<compile_context>
chip_gen: v7x
topology: tpu7x:2x2x1
jax: 0.10.0
libtpu: 0.0.40
codegen_flags: <defaults>
</compile_context>

<pallas_src>
import functools
import math

import jax
import jax.numpy as jnp
from jax.experimental import pallas as pl
from jax.experimental.pallas import tpu as pltpu


# ---------------------------------------------------------------------------
# Pallas kernel: one batch element per grid step
# ---------------------------------------------------------------------------
def _self_routing_kernel(a_ref, pose_ref, w_ref, b2_ref, o_ref, *,
                         A, B, C, D, k, pad, oh, ow, w_in, row_chunk, pose_out):
    """Refs:
      a_ref    (1, A,   L) f32  : vertically padded, spatially flattened activations
      pose_ref (1, A*C, L) f32  : idem for poses
      w_ref    (kk, R, A*C) f32 : per-tap block-diagonal weights;
                                  rows [0:A*B] -> W2 (logits),
                                  rows [A*B*(1+d) : A*B*(2+d)] -> W1 slice d
      b2_ref   (A*B, kk) f32    : routing bias per tap
      o_ref    (1, OUT_ROWS, l) f32 : rows [0:B]=a_out, rows [B+d*B:B+(d+1)*B]=pose d
    """
    AB = A * B
    kk = k * k

    for r0 in range(0, oh, row_chunk):                 # static chunking of output rows
        rows = min(row_chunk, oh - r0)
        m = rows * ow                                  # spatial positions in this chunk

        # output x coordinate per lane + horizontal-padding masks (hoisted; each mask
        # is shared by the k taps with the same horizontal offset dx).
        x_pos = jax.lax.broadcasted_iota(jnp.int32, (1, m), 1) % ow
        masks = {}
        for t in range(kk):
            dx = t % k - pad
            if dx != 0 and dx not in masks:
                valid = jnp.logical_and(x_pos + dx >= 0, x_pos + dx < w_in)
                masks[dx] = valid.astype(jnp.float32)

        ar_sum = jnp.zeros((B, m), jnp.float32)        # sum_{t,i} a_i * r_ij
        a_sum = jnp.zeros((1, m), jnp.float32)         # sum_{t,i} a_i
        pn = [jnp.zeros((B, m), jnp.float32) for _ in range(D)] if pose_out else []

        for t in range(kk):                            # static 3x3 tap loop (no im2col)
            kh, kw = t // k, t % k
            # flattened-spatial start of this tap's shifted window (static offset)
            start = (r0 + kh) * w_in + kw
            p_tap = pose_ref[0, :, start:start + m]                      # (A*C, m)
            a_tap = a_ref[0, :, start:start + m]                         # (A,   m)

            dx = kw - pad
            if dx != 0:
                # horizontal zero-padding: zeroing `a` kills the whole contribution
                a_tap = a_tap * masks[dx]

            # one fused MXU matmul per tap: logits + all D pose-vote slices
            res = jnp.dot(w_ref[t], p_tap, preferred_element_type=jnp.float32)  # (R, m)

            logit = (res[:AB] + b2_ref[:, t:t + 1]).reshape(A, B, m)
            logit = logit - jnp.max(logit, axis=1, keepdims=True)
            e = jnp.exp(logit)
            r = e * pl.reciprocal(jnp.sum(e, axis=1, keepdims=True), approx=True)

            ar = a_tap[:, None, :] * r                                   # (A, B, m)
            ar_sum = ar_sum + jnp.sum(ar, axis=0)
            a_sum = a_sum + jnp.sum(a_tap, axis=0, keepdims=True)

            if pose_out:
                for d in range(D):
                    vote = res[AB * (1 + d):AB * (2 + d)].reshape(A, B, m)
                    pn[d] = pn[d] + jnp.sum(ar * vote, axis=0)

        cols = slice(r0 * ow, r0 * ow + m)
        o_ref[0, 0:B, cols] = ar_sum / a_sum                             # a_out
        if pose_out:
            inv_ar = 1.0 / ar_sum
            for d in range(D):
                o_ref[0, B * (1 + d):B * (2 + d), cols] = pn[d] * inv_ar


# ---------------------------------------------------------------------------
# Wrapper
# ---------------------------------------------------------------------------
def self_routing2d(a, pose, W1, W2, b2, *, A, B, C, D,
                   kernel_size=3, stride=1, padding=1, row_chunk_positions=512):
    """Equivalent of SelfRouting2d.forward(a, pose) -> (a_out, pose_out)."""
    k = kernel_size
    kk = k * k
    # TODO(synk): stride > 1 and non-'same' padding need a different window layout.
    assert stride == 1, "only stride=1 implemented"
    assert 2 * padding == k - 1, "only 'same' convolutions implemented"

    bsz, A_in, h, w = a.shape
    assert A_in == A and pose.shape == (bsz, A * C, h, w)
    oh, ow = h, w
    l = oh * ow
    AC, AB = A * C, A * B
    pose_out = W1 is not None

    # ---- vertically padded + spatially flattened inputs (no 9x im2col in HBM) ----
    hp = h + 2 * padding
    guard_l = padding
    guard_r = max(padding, k - 1 - padding)
    L = hp * w + guard_l + guard_r

    def flat_pad(x):
        xp = jnp.pad(x, ((0, 0), (0, 0), (padding, padding), (0, 0)))
        xf = xp.reshape(bsz, x.shape[1], hp * w)
        return jnp.pad(xf, ((0, 0), (0, 0), (guard_l, guard_r)))

    a_flat = flat_pad(a.astype(jnp.float32))
    pose_flat = flat_pad(pose.astype(jnp.float32))

    # ---- fused, block-diagonal, transposed weights: one (R, A*C) matrix per tap ----
    eyeA = jnp.eye(A, dtype=jnp.float32)
    W2r = W2.reshape(kk, A, B, C)
    W2bdT = jnp.einsum('tijc,ki->tijkc', W2r, eyeA).reshape(kk, AB, AC)
    if pose_out:
        W1r = W1.reshape(kk, A, B, D, C)
        W1bdT = jnp.einsum('tijdc,ki->tdijkc', W1r, eyeA).reshape(kk, D * AB, AC)
        Wcat = jnp.concatenate([W2bdT, W1bdT], axis=1)       # (kk, (1+D)*A*B, A*C)
    else:
        Wcat = W2bdT
    R = Wcat.shape[1]
    Wcat = Wcat.astype(jnp.float32)
    b2T = jnp.transpose(b2.reshape(kk, A, B), (1, 2, 0)).reshape(AB, kk).astype(jnp.float32)

    out_rows = B * (1 + D) if pose_out else B
    row_chunk = oh if oh * ow <= row_chunk_positions else max(1, row_chunk_positions // ow)

    kernel = functools.partial(
        _self_routing_kernel, A=A, B=B, C=C, D=D, k=k, pad=padding,
        oh=oh, ow=ow, w_in=w, row_chunk=row_chunk, pose_out=pose_out)

    out = pl.pallas_call(
        kernel,
        out_shape=jax.ShapeDtypeStruct((bsz, out_rows, l), jnp.float32),
        grid=(bsz,),
        in_specs=[
            pl.BlockSpec((1, A, L), lambda bi: (bi, 0, 0)),
            pl.BlockSpec((1, AC, L), lambda bi: (bi, 0, 0)),
            pl.BlockSpec((kk, R, AC), lambda bi: (0, 0, 0)),
            pl.BlockSpec((AB, kk), lambda bi: (0, 0)),
        ],
        out_specs=pl.BlockSpec((1, out_rows, l), lambda bi: (bi, 0, 0)),
        compiler_params=pltpu.CompilerParams(dimension_semantics=("parallel",)),
    )(a_flat, pose_flat, Wcat, b2T)

    a_res = out[:, :B, :].reshape(bsz, B, oh, ow)
    if pose_out:
        p = out[:, B:, :].reshape(bsz, D, B, l)                 # rows are d-major
        p = jnp.transpose(p, (0, 2, 1, 3)).reshape(bsz, B * D, oh, ow)
    else:
        p = None
    return a_res, p


# ---------------------------------------------------------------------------
# Pure-JAX reference (mirrors the PyTorch forward exactly)
# ---------------------------------------------------------------------------
def self_routing2d_ref(a, pose, W1, W2, b2, *, A, B, C, D, k=3, pad=1):
    bsz, _, h, w = a.shape
    oh, ow = h + 2 * pad - k + 1, w + 2 * pad - k + 1
    l = oh * ow
    kk, kkA = k * k, k * k * A
    pose_p = jnp.pad(pose, ((0, 0), (0, 0), (pad, pad), (pad, pad)))
    a_p = jnp.pad(a, ((0, 0), (0, 0), (pad, pad), (pad, pad)))

    p_cols = jnp.stack([pose_p[:, :, kh:kh + oh, kw:kw + ow].reshape(bsz, A * C, l)
                        for kh in range(k) for kw in range(k)], axis=2)   # (b, A*C, kk, l)
    P = p_cols.reshape(bsz, A, C, kk, l)
    P = jnp.transpose(P, (0, 4, 3, 1, 2)).reshape(bsz, l, kkA, C)         # (b, l, kkA, C)

    logit = jnp.einsum('blnc,njc->blnj', P, W2) + b2.reshape(1, 1, kkA, B)
    r = jax.nn.softmax(logit, axis=3)

    a_cols = jnp.stack([a_p[:, :, kh:kh + oh, kw:kw + ow].reshape(bsz, A, l)
                        for kh in range(k) for kw in range(k)], axis=2)   # (b, A, kk, l)
    a_unf = jnp.transpose(a_cols, (0, 3, 2, 1)).reshape(bsz, l, kkA)       # (b, l, kkA)

    ar = a_unf[..., None] * r
    ar_sum = ar.sum(axis=2, keepdims=True)                                 # (b, l, 1, B)
    a_sum = a_unf.sum(axis=2, keepdims=True)[..., None]                    # (b, l, 1, 1)
    a_out = (ar_sum / a_sum).squeeze(2)                                    # (b, l, B)
    a_out = jnp.transpose(a_out, (0, 2, 1)).reshape(bsz, B, oh, ow)

    pose_out = None
    if W1 is not None:
        coeff = (ar / ar_sum)[..., None]                                   # (b, l, kkA, B, 1)
        vote = jnp.einsum('blnc,nmc->blnm', P, W1).reshape(bsz, l, kkA, B, D)
        po = (coeff * vote).sum(axis=2).reshape(bsz, l, B * D)
        pose_out = jnp.transpose(po, (0, 2, 1)).reshape(bsz, B * D, oh, ow)
    return a_out, pose_out


if __name__ == "__main__":
    A, B, C, D = 8, 8, 4, 4
    batch, h, w = 2, 8, 8
    kkA = 9 * A

    key = jax.random.PRNGKey(0)
    k1, k2, k3, k4, k5 = jax.random.split(key, 5)
    # `a` is a capsule activation map (a sigmoid output in the full network).
    a = jax.nn.sigmoid(jax.random.normal(k1, (batch, A, h, w), jnp.float32))
    pose = jax.random.normal(k2, (batch, A * C, h, w), jnp.float32)
    # PyTorch inits W2/b2 to zero; small random values make the check non-trivial.
    W1 = jax.random.normal(k3, (kkA, B * D, C), jnp.float32) * (1.0 / math.sqrt(C))
    W2 = jax.random.normal(k4, (kkA, B, C), jnp.float32) * 0.3
    b2 = jax.random.normal(k5, (1, 1, kkA, B), jnp.float32) * 0.1

    fwd = jax.jit(functools.partial(self_routing2d, A=A, B=B, C=C, D=D))
    a_out, pose_out = jax.block_until_ready(fwd(a, pose, W1, W2, b2))

    a_ref_o, pose_ref_o = self_routing2d_ref(a, pose, W1, W2, b2, A=A, B=B, C=C, D=D)

    assert a_out.shape == (batch, B, h, w), a_out.shape
    assert pose_out.shape == (batch, B * D, h, w), pose_out.shape
    err_a = float(jnp.max(jnp.abs(a_out - a_ref_o)))
    err_p = float(jnp.max(jnp.abs(pose_out - pose_ref_o)))
    # f32 matmuls; only approximation left is the EUP approx reciprocal in softmax
    assert err_a < 1e-2, f"a_out max err {err_a}"
    assert err_p < 1e-2, f"pose_out max err {err_p}"
    print("KERNEL_OK")
</pallas_src>

<mosaic_0001>
module attributes {stable_mosaic.version = 11 : i64} {
  func.func @_self_routing_kernel(%arg0: i32, %arg1: memref<1x8x82xf32, #tpu.memory_space<vmem>>, %arg2: memref<1x32x82xf32, #tpu.memory_space<vmem>>, %arg3: memref<9x320x32xf32, #tpu.memory_space<vmem>>, %arg4: memref<64x9xf32, #tpu.memory_space<vmem>>, %arg5: memref<1x40x64xf32, #tpu.memory_space<vmem>>) attributes {dimension_semantics = [#tpu.dimension_semantics<parallel>], iteration_bounds = array<i64: 2>, scalar_prefetch = 0 : i64, scratch_operands = 0 : i64, tpu.core_type = #tpu.core_type<tc>, window_params = [{transform_indices = @transform_0, window_bounds = array<i64: 1, 8, 82>}, {transform_indices = @transform_1, window_bounds = array<i64: 1, 32, 82>}, {pipeline_mode = #tpu.pipeline_mode<synchronous>, transform_indices = @transform_2, window_bounds = array<i64: 9, 320, 32>}, {pipeline_mode = #tpu.pipeline_mode<synchronous>, transform_indices = @transform_3, window_bounds = array<i64: 64, 9>}, {transform_indices = @transform_4, window_bounds = array<i64: 1, 40, 64>}]} {
    %0 = tpu.iota {dimensions = array<i32: 1>} : vector<1x64xi32>
    %c8_i32 = arith.constant 8 : i32
    %c0_i32 = arith.constant 0 : i32
    %1 = arith.cmpi eq, %c8_i32, %c0_i32 : i32
    %c1_i32 = arith.constant 1 : i32
    %2 = arith.select %1, %c1_i32, %c8_i32 : i32
    %3 = vector.broadcast %2 : i32 to vector<1x64xi32>
    %4 = arith.remsi %0, %3 : vector<1x64xi32>
    %c0_i32_0 = arith.constant 0 : i32
    %5 = vector.broadcast %c0_i32_0 : i32 to vector<1x64xi32>
    %6 = arith.cmpi ne, %4, %5 : vector<1x64xi32>
    %c0_i32_1 = arith.constant 0 : i32
    %7 = vector.broadcast %c0_i32_1 : i32 to vector<1x64xi32>
    %8 = arith.cmpi slt, %4, %7 : vector<1x64xi32>
    %c0_i32_2 = arith.constant 0 : i32
    %9 = arith.cmpi slt, %2, %c0_i32_2 : i32
    %10 = vector.broadcast %9 : i1 to vector<1x64xi1>
    %11 = vector.broadcast %10 : vector<1x64xi1> to vector<1x64xi1>
    %12 = arith.xori %8, %11 : vector<1x64xi1>
    %13 = arith.andi %12, %6 : vector<1x64xi1>
    %14 = vector.broadcast %2 : i32 to vector<1x64xi32>
    %15 = arith.addi %4, %14 : vector<1x64xi32>
    %16 = arith.select %13, %15, %4 : vector<1x64xi1>, vector<1x64xi32>
    %c-1_i32 = arith.constant -1 : i32
    %17 = vector.broadcast %c-1_i32 : i32 to vector<1x64xi32>
    %18 = arith.addi %16, %17 : vector<1x64xi32>
    %c0_i32_3 = arith.constant 0 : i32
    %19 = vector.broadcast %c0_i32_3 : i32 to vector<1x64xi32>
    %20 = arith.cmpi sge, %18, %19 : vector<1x64xi32>
    %c-1_i32_4 = arith.constant -1 : i32
    %21 = vector.broadcast %c-1_i32_4 : i32 to vector<1x64xi32>
    %22 = arith.addi %16, %21 : vector<1x64xi32>
    %c8_i32_5 = arith.constant 8 : i32
    %23 = vector.broadcast %c8_i32_5 : i32 to vector<1x64xi32>
    %24 = arith.cmpi slt, %22, %23 : vector<1x64xi32>
    %25 = arith.andi %20, %24 : vector<1x64xi1>
    %26 = arith.extui %25 : vector<1x64xi1> to vector<1x64xi32>
    %27 = arith.sitofp %26 : vector<1x64xi32> to vector<1x64xf32>
    %c1_i32_6 = arith.constant 1 : i32
    %28 = vector.broadcast %c1_i32_6 : i32 to vector<1x64xi32>
    %29 = arith.addi %16, %28 : vector<1x64xi32>
    %c0_i32_7 = arith.constant 0 : i32
    %30 = vector.broadcast %c0_i32_7 : i32 to vector<1x64xi32>
    %31 = arith.cmpi sge, %29, %30 : vector<1x64xi32>
    %c1_i32_8 = arith.constant 1 : i32
    %32 = vector.broadcast %c1_i32_8 : i32 to vector<1x64xi32>
    %33 = arith.addi %16, %32 : vector<1x64xi32>
    %c8_i32_9 = arith.constant 8 : i32
    %34 = vector.broadcast %c8_i32_9 : i32 to vector<1x64xi32>
    %35 = arith.cmpi slt, %33, %34 : vector<1x64xi32>
    %36 = arith.andi %31, %35 : vector<1x64xi1>
    %37 = arith.extui %36 : vector<1x64xi1> to vector<1x64xi32>
    %38 = arith.sitofp %37 : vector<1x64xi32> to vector<1x64xf32>
    %cst = arith.constant 0.000000e+00 : f32
    %39 = vector.broadcast %cst : f32 to vector<8x64xf32>
    %cst_10 = arith.constant 0.000000e+00 : f32
    %40 = vector.broadcast %cst_10 : f32 to vector<1x64xf32>
    %cst_11 = arith.constant 0.000000e+00 : f32
    %41 = vector.broadcast %cst_11 : f32 to vector<8x64xf32>
    %cst_12 = arith.constant 0.000000e+00 : f32
    %42 = vector.broadcast %cst_12 : f32 to vector<8x64xf32>
    %cst_13 = arith.constant 0.000000e+00 : f32
    %43 = vector.broadcast %cst_13 : f32 to vector<8x64xf32>
    %cst_14 = arith.constant 0.000000e+00 : f32
    %44 = vector.broadcast %cst_14 : f32 to vector<8x64xf32>
    %c0 = arith.constant 0 : index
    %c0_15 = arith.constant 0 : index
    %c0_16 = arith.constant 0 : index
    %45 = vector.load %arg2[%c0, %c0_15, %c0_16] : memref<1x32x82xf32, #tpu.memory_space<vmem>>, vector<1x32x64xf32>
    %46 = vector.shape_cast %45 : vector<1x32x64xf32> to vector<32x64xf32>
    %c0_17 = arith.constant 0 : index
    %c0_18 = arith.constant 0 : index
    %c0_19 = arith.constant 0 : index
    %47 = vector.load %arg1[%c0_17, %c0_18, %c0_19] : memref<1x8x82xf32, #tpu.memory_space<vmem>>, vector<1x8x64xf32>
    %48 = vector.shape_cast %47 : vector<1x8x64xf32> to vector<8x64xf32>
    %49 = vector.broadcast %27 : vector<1x64xf32> to vector<8x64xf32>
    %50 = arith.mulf %48, %49 : vector<8x64xf32>
    %c0_20 = arith.constant 0 : index
    %c0_21 = arith.constant 0 : index
    %c0_22 = arith.constant 0 : index
    %51 = vector.load %arg3[%c0_20, %c0_21, %c0_22] : memref<9x320x32xf32, #tpu.memory_space<vmem>>, vector<1x320x32xf32>
    %52 = vector.shape_cast %51 : vector<1x320x32xf32> to vector<320x32xf32>
    %cst_23 = arith.constant dense<0.000000e+00> : vector<320x64xf32>
    %53 = tpu.matmul %52, %46, %cst_23 {dimension_numbers = #tpu.dot_dimension_numbers<[1], [0], [0], [1], [0, 0, 1, 1], [], []>} : vector<320x32xf32>, vector<32x64xf32>, vector<320x64xf32> -> vector<320x64xf32>
    %54 = vector.extract_strided_slice %53 {offsets = [0, 0], sizes = [64, 64], strides = [1, 1]} : vector<320x64xf32> to vector<64x64xf32>
    %c0_24 = arith.constant 0 : index
    %c0_25 = arith.constant 0 : index
    %55 = vector.load %arg4[%c0_24, %c0_25] : memref<64x9xf32, #tpu.memory_space<vmem>>, vector<64x1xf32>
    %56 = vector.broadcast %55 : vector<64x1xf32> to vector<64x64xf32>
    %57 = arith.addf %54, %56 : vector<64x64xf32>
    %58 = vector.shape_cast %57 : vector<64x64xf32> to vector<8x8x64xf32>
    %cst_26 = arith.constant dense<0xFF800000> : vector<8x64xf32>
    %59 = vector.multi_reduction <maximumf>, %58, %cst_26 [1] : vector<8x8x64xf32> to vector<8x64xf32>
    %60 = vector.shape_cast %59 : vector<8x64xf32> to vector<8x1x64xf32>
    %61 = vector.broadcast %60 : vector<8x1x64xf32> to vector<8x8x64xf32>
    %62 = arith.subf %58, %61 : vector<8x8x64xf32>
    %63 = math.exp %62 : vector<8x8x64xf32>
    %cst_27 = arith.constant dense<0.000000e+00> : vector<8x64xf32>
    %64 = vector.multi_reduction <add>, %63, %cst_27 [1] : vector<8x8x64xf32> to vector<8x64xf32>
    %65 = vector.shape_cast %64 : vector<8x64xf32> to vector<8x1x64xf32>
    %66 = tpu.reciprocal %65 {approx = true} : vector<8x1x64xf32> -> vector<8x1x64xf32>
    %67 = vector.broadcast %66 : vector<8x1x64xf32> to vector<8x8x64xf32>
    %68 = arith.mulf %63, %67 : vector<8x8x64xf32>
    %69 = vector.shape_cast %50 : vector<8x64xf32> to vector<8x1x64xf32>
    %70 = vector.broadcast %69 : vector<8x1x64xf32> to vector<8x8x64xf32>
    %71 = arith.mulf %70, %68 : vector<8x8x64xf32>
    %cst_28 = arith.constant dense<0.000000e+00> : vector<8x64xf32>
    %72 = vector.multi_reduction <add>, %71, %cst_28 [0] : vector<8x8x64xf32> to vector<8x64xf32>
    %73 = arith.addf %39, %72 : vector<8x64xf32>
    %cst_29 = arith.constant dense<0.000000e+00> : vector<64xf32>
    %74 = vector.multi_reduction <add>, %50, %cst_29 [0] : vector<8x64xf32> to vector<64xf32>
    %75 = vector.shape_cast %74 : vector<64xf32> to vector<1x64xf32>
    %76 = arith.addf %40, %75 : vector<1x64xf32>
    %77 = vector.extract_strided_slice %53 {offsets = [64, 0], sizes = [64, 64], strides = [1, 1]} : vector<320x64xf32> to vector<64x64xf32>
    %78 = vector.shape_cast %77 : vector<64x64xf32> to vector<8x8x64xf32>
    %79 = arith.mulf %71, %78 : vector<8x8x64xf32>
    %cst_30 = arith.constant dense<0.000000e+00> : vector<8x64xf32>
    %80 = vector.multi_reduction <add>, %79, %cst_30 [0] : vector<8x8x64xf32> to vector<8x64xf32>
    %81 = arith.addf %41, %80 : vector<8x64xf32>
    %82 = vector.extract_strided_slice %53 {offsets = [128, 0], sizes = [64, 64], strides = [1, 1]} : vector<320x64xf32> to vector<64x64xf32>
    %83 = vector.shape_cast %82 : vector<64x64xf32> to vector<8x8x64xf32>
    %84 = arith.mulf %71, %83 : vector<8x8x64xf32>
    %cst_31 = arith.constant dense<0.000000e+00> : vector<8x64xf32>
    %85 = vector.multi_reduction <add>, %84, %cst_31 [0] : vector<8x8x64xf32> to vector<8x64xf32>
    %86 = arith.addf %42, %85 : vector<8x64xf32>
    %87 = vector.extract_strided_slice %53 {offsets = [192, 0], sizes = [64, 64], strides = [1, 1]} : vector<320x64xf32> to vector<64x64xf32>
    %88 = vector.shape_cast %87 : vector<64x64xf32> to vector<8x8x64xf32>
    %89 = arith.mulf %71, %88 : vector<8x8x64xf32>
    %cst_32 = arith.constant dense<0.000000e+00> : vector<8x64xf32>
    %90 = vector.multi_reduction <add>, %89, %cst_32 [0] : vector<8x8x64xf32> to vector<8x64xf32>
    %91 = arith.addf %43, %90 : vector<8x64xf32>
    %92 = vector.extract_strided_slice %53 {offsets = [256, 0], sizes = [64, 64], strides = [1, 1]} : vector<320x64xf32> to vector<64x64xf32>
    %93 = vector.shape_cast %92 : vector<64x64xf32> to vector<8x8x64xf32>
    %94 = arith.mulf %71, %93 : vector<8x8x64xf32>
    %cst_33 = arith.constant dense<0.000000e+00> : vector<8x64xf32>
    %95 = vector.multi_reduction <add>, %94, %cst_33 [0] : vector<8x8x64xf32> to vector<8x64xf32>
    %96 = arith.addf %44, %95 : vector<8x64xf32>
    %c0_34 = arith.constant 0 : index
    %c0_35 = arith.constant 0 : index
    %c1 = arith.constant 1 : index
    %97 = vector.load %arg2[%c0_34, %c0_35, %c1] : memref<1x32x82xf32, #tpu.memory_space<vmem>>, vector<1x32x64xf32>
    %98 = vector.shape_cast %97 : vector<1x32x64xf32> to vector<32x64xf32>
    %c0_36 = arith.constant 0 : index
    %c0_37 = arith.constant 0 : index
    %c1_38 = arith.constant 1 : index
    %99 = vector.load %arg1[%c0_36, %c0_37, %c1_38] : memref<1x8x82xf32, #tpu.memory_space<vmem>>, vector<1x8x64xf32>
    %100 = vector.shape_cast %99 : vector<1x8x64xf32> to vector<8x64xf32>
    %c1_39 = arith.constant 1 : index
    %c0_40 = arith.constant 0 : index
    %c0_41 = arith.constant 0 : index
    %101 = vector.load %arg3[%c1_39, %c0_40, %c0_41] : memref<9x320x32xf32, #tpu.memory_space<vmem>>, vector<1x320x32xf32>
    %102 = vector.shape_cast %101 : vector<1x320x32xf32> to vector<320x32xf32>
    %cst_42 = arith.constant dense<0.000000e+00> : vector<320x64xf32>
    %103 = tpu.matmul %102, %98, %cst_42 {dimension_numbers = #tpu.dot_dimension_numbers<[1], [0], [0], [1], [0, 0, 1, 1], [], []>} : vector<320x32xf32>, vector<32x64xf32>, vector<320x64xf32> -> vector<320x64xf32>
    %104 = vector.extract_strided_slice %103 {offsets = [0, 0], sizes = [64, 64], strides = [1, 1]} : vector<320x64xf32> to vector<64x64xf32>
    %c0_43 = arith.constant 0 : index
    %c1_44 = arith.constant 1 : index
    %105 = vector.load %arg4[%c0_43, %c1_44] : memref<64x9xf32, #tpu.memory_space<vmem>>, vector<64x1xf32>
    %106 = vector.broadcast %105 : vector<64x1xf32> to vector<64x64xf32>
    %107 = arith.addf %104, %106 : vector<64x64xf32>
    %108 = vector.shape_cast %107 : vector<64x64xf32> to vector<8x8x64xf32>
    %cst_45 = arith.constant dense<0xFF800000> : vector<8x64xf32>
    %109 = vector.multi_reduction <maximumf>, %108, %cst_45 [1] : vector<8x8x64xf32> to vector<8x64xf32>
    %110 = vector.shape_cast %109 : vector<8x64xf32> to vector<8x1x64xf32>
    %111 = vector.broadcast %110 : vector<8x1x64xf32> to vector<8x8x64xf32>
    %112 = arith.subf %108, %111 : vector<8x8x64xf32>
    %113 = math.exp %112 : vector<8x8x64xf32>
    %cst_46 = arith.constant dense<0.000000e+00> : vector<8x64xf32>
    %114 = vector.multi_reduction <add>, %113, %cst_46 [1] : vector<8x8x64xf32> to vector<8x64xf32>
    %115 = vector.shape_cast %114 : vector<8x64xf32> to vector<8x1x64xf32>
    %116 = tpu.reciprocal %115 {approx = true} : vector<8x1x64xf32> -> vector<8x1x64xf32>
    %117 = vector.broadcast %116 : vector<8x1x64xf32> to vector<8x8x64xf32>
    %118 = arith.mulf %113, %117 : vector<8x8x64xf32>
    %119 = vector.shape_cast %100 : vector<8x64xf32> to vector<8x1x64xf32>
    %120 = vector.broadcast %119 : vector<8x1x64xf32> to vector<8x8x64xf32>
    %121 = arith.mulf %120, %118 : vector<8x8x64xf32>
    %cst_47 = arith.constant dense<0.000000e+00> : vector<8x64xf32>
    %122 = vector.multi_reduction <add>, %121, %cst_47 [0] : vector<8x8x64xf32> to vector<8x64xf32>
    %123 = arith.addf %73, %122 : vector<8x64xf32>
    %cst_48 = arith.constant dense<0.000000e+00> : vector<64xf32>
    %124 = vector.multi_reduction <add>, %100, %cst_48 [0] : vector<8x64xf32> to vector<64xf32>
    %125 = vector.shape_cast %124 : vector<64xf32> to vector<1x64xf32>
    %126 = arith.addf %76, %125 : vector<1x64xf32>
    %127 = vector.extract_strided_slice %103 {offsets = [64, 0], sizes = [64, 64], strides = [1, 1]} : vector<320x64xf32> to vector<64x64xf32>
    %128 = vector.shape_cast %127 : vector<64x64xf32> to vector<8x8x64xf32>
    %129 = arith.mulf %121, %128 : vector<8x8x64xf32>
    %cst_49 = arith.constant dense<0.000000e+00> : vector<8x64xf32>
    %130 = vector.multi_reduction <add>, %129, %cst_49 [0] : vector<8x8x64xf32> to vector<8x64xf32>
    %131 = arith.addf %81, %130 : vector<8x64xf32>
    %132 = vector.extract_strided_slice %103 {offsets = [128, 0], sizes = [64, 64], strides = [1, 1]} : vector<320x64xf32> to vector<64x64xf32>
    %133 = vector.shape_cast %132 : vector<64x64xf32> to vector<8x8x64xf32>
    %134 = arith.mulf %121, %133 : vector<8x8x64xf32>
    %cst_50 = arith.constant dense<0.000000e+00> : vector<8x64xf32>
    %135 = vector.multi_reduction <add>, %134, %cst_50 [0] : vector<8x8x64xf32> to vector<8x64xf32>
    %136 = arith.addf %86, %135 : vector<8x64xf32>
    %137 = vector.extract_strided_slice %103 {offsets = [192, 0], sizes = [64, 64], strides = [1, 1]} : vector<320x64xf32> to vector<64x64xf32>
    %138 = vector.shape_cast %137 : vector<64x64xf32> to vector<8x8x64xf32>
    %139 = arith.mulf %121, %138 : vector<8x8x64xf32>
    %cst_51 = arith.constant dense<0.000000e+00> : vector<8x64xf32>
    %140 = vector.multi_reduction <add>, %139, %cst_51 [0] : vector<8x8x64xf32> to vector<8x64xf32>
    %141 = arith.addf %91, %140 : vector<8x64xf32>
    %142 = vector.extract_strided_slice %103 {offsets = [256, 0], sizes = [64, 64], strides = [1, 1]} : vector<320x64xf32> to vector<64x64xf32>
    %143 = vector.shape_cast %142 : vector<64x64xf32> to vector<8x8x64xf32>
    %144 = arith.mulf %121, %143 : vector<8x8x64xf32>
    %cst_52 = arith.constant dense<0.000000e+00> : vector<8x64xf32>
    %145 = vector.multi_reduction <add>, %144, %cst_52 [0] : vector<8x8x64xf32> to vector<8x64xf32>
    %146 = arith.addf %96, %145 : vector<8x64xf32>
    %c0_53 = arith.constant 0 : index
    %c0_54 = arith.constant 0 : index
    %c2 = arith.constant 2 : index
    %147 = vector.load %arg2[%c0_53, %c0_54, %c2] : memref<1x32x82xf32, #tpu.memory_space<vmem>>, vector<1x32x64xf32>
    %148 = vector.shape_cast %147 : vector<1x32x64xf32> to vector<32x64xf32>
    %c0_55 = arith.constant 0 : index
    %c0_56 = arith.constant 0 : index
    %c2_57 = arith.constant 2 : index
    %149 = vector.load %arg1[%c0_55, %c0_56, %c2_57] : memref<1x8x82xf32, #tpu.memory_space<vmem>>, vector<1x8x64xf32>
    %150 = vector.shape_cast %149 : vector<1x8x64xf32> to vector<8x64xf32>
    %151 = vector.broadcast %38 : vector<1x64xf32> to vector<8x64xf32>
    %152 = arith.mulf %150, %151 : vector<8x64xf32>
    %c2_58 = arith.constant 2 : index
    %c0_59 = arith.constant 0 : index
    %c0_60 = arith.constant 0 : index
    %153 = vector.load %arg3[%c2_58, %c0_59, %c0_60] : memref<9x320x32xf32, #tpu.memory_space<vmem>>, vector<1x320x32xf32>
    %154 = vector.shape_cast %153 : vector<1x320x32xf32> to vector<320x32xf32>
    %cst_61 = arith.constant dense<0.000000e+00> : vector<320x64xf32>
    %155 = tpu.matmul %154, %148, %cst_61 {dimension_numbers = #tpu.dot_dimension_numbers<[1], [0], [0], [1], [0, 0, 1, 1], [], []>} : vector<320x32xf32>, vector<32x64xf32>, vector<320x64xf32> -> vector<320x64xf32>
    %156 = vector.extract_strided_slice %155 {offsets = [0, 0], sizes = [64, 64], strides = [1, 1]} : vector<320x64xf32> to vector<64x64xf32>
    %c0_62 = arith.constant 0 : index
    %c2_63 = arith.constant 2 : index
    %157 = vector.load %arg4[%c0_62, %c2_63] : memref<64x9xf32, #tpu.memory_space<vmem>>, vector<64x1xf32>
    %158 = vector.broadcast %157 : vector<64x1xf32> to vector<64x64xf32>
    %159 = arith.addf %156, %158 : vector<64x64xf32>
    %160 = vector.shape_cast %159 : vector<64x64xf32> to vector<8x8x64xf32>
    %cst_64 = arith.constant dense<0xFF800000> : vector<8x64xf32>
    %161 = vector.multi_reduction <maximumf>, %160, %cst_64 [1] : vector<8x8x64xf32> to vector<8x64xf32>
    %162 = vector.shape_cast %161 : vector<8x64xf32> to vector<8x1x64xf32>
    %163 = vector.broadcast %162 : vector<8x1x64xf32> to vector<8x8x64xf32>
    %164 = arith.subf %160, %163 : vector<8x8x64xf32>
    %165 = math.exp %164 : vector<8x8x64xf32>
    %cst_65 = arith.constant dense<0.000000e+00> : vector<8x64xf32>
    %166 = vector.multi_reduction <add>, %165, %cst_65 [1] : vector<8x8x64xf32> to vector<8x64xf32>
    %167 = vector.shape_cast %166 : vector<8x64xf32> to vector<8x1x64xf32>
    %168 = tpu.reciprocal %167 {approx = true} : vector<8x1x64xf32> -> vector<8x1x64xf32>
    %169 = vector.broadcast %168 : vector<8x1x64xf32> to vector<8x8x64xf32>
    %170 = arith.mulf %165, %169 : vector<8x8x64xf32>
    %171 = vector.shape_cast %152 : vector<8x64xf32> to vector<8x1x64xf32>
    %172 = vector.broadcast %171 : vector<8x1x64xf32> to vector<8x8x64xf32>
    %173 = arith.mulf %172, %170 : vector<8x8x64xf32>
    %cst_66 = arith.constant dense<0.000000e+00> : vector<8x64xf32>
    %174 = vector.multi_reduction <add>, %173, %cst_66 [0] : vector<8x8x64xf32> to vector<8x64xf32>
    %175 = arith.addf %123, %174 : vector<8x64xf32>
    %cst_67 = arith.constant dense<0.000000e+00> : vector<64xf32>
    %176 = vector.multi_reduction <add>, %152, %cst_67 [0] : vector<8x64xf32> to vector<64xf32>
    %177 = vector.shape_cast %176 : vector<64xf32> to vector<1x64xf32>
    %178 = arith.addf %126, %177 : vector<1x64xf32>
    %179 = vector.extract_strided_slice %155 {offsets = [64, 0], sizes = [64, 64], strides = [1, 1]} : vector<320x64xf32> to vector<64x64xf32>
    %180 = vector.shape_cast %179 : vector<64x64xf32> to vector<8x8x64xf32>
    %181 = arith.mulf %173, %180 : vector<8x8x64xf32>
    %cst_68 = arith.constant dense<0.000000e+00> : vector<8x64xf32>
    %182 = vector.multi_reduction <add>, %181, %cst_68 [0] : vector<8x8x64xf32> to vector<8x64xf32>
    %183 = arith.addf %131, %182 : vector<8x64xf32>
    %184 = vector.extract_strided_slice %155 {offsets = [128, 0], sizes = [64, 64], strides = [1, 1]} : vector<320x64xf32> to vector<64x64xf32>
    %185 = vector.shape_cast %184 : vector<64x64xf32> to vector<8x8x64xf32>
    %186 = arith.mulf %173, %185 : vector<8x8x64xf32>
    %cst_69 = arith.constant dense<0.000000e+00> : vector<8x64xf32>
    %187 = vector.multi_reduction <add>, %186, %cst_69 [0] : vector<8x8x64xf32> to vector<8x64xf32>
    %188 = arith.addf %136, %187 : vector<8x64xf32>
    %189 = vector.extract_strided_slice %155 {offsets = [192, 0], sizes = [64, 64], strides = [1, 1]} : vector<320x64xf32> to vector<64x64xf32>
    %190 = vector.shape_cast %189 : vector<64x64xf32> to vector<8x8x64xf32>
    %191 = arith.mulf %173, %190 : vector<8x8x64xf32>
    %cst_70 = arith.constant dense<0.000000e+00> : vector<8x64xf32>
    %192 = vector.multi_reduction <add>, %191, %cst_70 [0] : vector<8x8x64xf32> to vector<8x64xf32>
    %193 = arith.addf %141, %192 : vector<8x64xf32>
    %194 = vector.extract_strided_slice %155 {offsets = [256, 0], sizes = [64, 64], strides = [1, 1]} : vector<320x64xf32> to vector<64x64xf32>
    %195 = vector.shape_cast %194 : vector<64x64xf32> to vector<8x8x64xf32>
    %196 = arith.mulf %173, %195 : vector<8x8x64xf32>
    %cst_71 = arith.constant dense<0.000000e+00> : vector<8x64xf32>
    %197 = vector.multi_reduction <add>, %196, %cst_71 [0] : vector<8x8x64xf32> to vector<8x64xf32>
    %198 = arith.addf %146, %197 : vector<8x64xf32>
    %c0_72 = arith.constant 0 : index
    %c0_73 = arith.constant 0 : index
    %c8 = arith.constant 8 : index
    %199 = vector.load %arg2[%c0_72, %c0_73, %c8] : memref<1x32x82xf32, #tpu.memory_space<vmem>>, vector<1x32x64xf32>
    %200 = vector.shape_cast %199 : vector<1x32x64xf32> to vector<32x64xf32>
    %c0_74 = arith.constant 0 : index
    %c0_75 = arith.constant 0 : index
    %c8_76 = arith.constant 8 : index
    %201 = vector.load %arg1[%c0_74, %c0_75, %c8_76] : memref<1x8x82xf32, #tpu.memory_space<vmem>>, vector<1x8x64xf32>
    %202 = vector.shape_cast %201 : vector<1x8x64xf32> to vector<8x64xf32>
    %203 = vector.broadcast %27 : vector<1x64xf32> to vector<8x64xf32>
    %204 = arith.mulf %202, %203 : vector<8x64xf32>
    %c3 = arith.constant 3 : index
    %c0_77 = arith.constant 0 : index
    %c0_78 = arith.constant 0 : index
    %205 = vector.load %arg3[%c3, %c0_77, %c0_78] : memref<9x320x32xf32, #tpu.memory_space<vmem>>, vector<1x320x32xf32>
    %206 = vector.shape_cast %205 : vector<1x320x32xf32> to vector<320x32xf32>
    %cst_79 = arith.constant dense<0.000000e+00> : vector<320x64xf32>
    %207 = tpu.matmul %206, %200, %cst_79 {dimension_numbers = #tpu.dot_dimension_numbers<[1], [0], [0], [1], [0, 0, 1, 1], [], []>} : vector<320x32xf32>, vector<32x64xf32>, vector<320x64xf32> -> vector<320x64xf32>
    %208 = vector.extract_strided_slice %207 {offsets = [0, 0], sizes = [64, 64], strides = [1, 1]} : vector<320x64xf32> to vector<64x64xf32>
    %c0_80 = arith.constant 0 : index
    %c3_81 = arith.constant 3 : index
    %209 = vector.load %arg4[%c0_80, %c3_81] : memref<64x9xf32, #tpu.memory_space<vmem>>, vector<64x1xf32>
    %210 = vector.broadcast %209 : vector<64x1xf32> to vector<64x64xf32>
    %211 = arith.addf %208, %210 : vector<64x64xf32>
    %212 = vector.shape_cast %211 : vector<64x64xf32> to vector<8x8x64xf32>
    %cst_82 = arith.constant dense<0xFF800000> : vector<8x64xf32>
    %213 = vector.multi_reduction <maximumf>, %212, %cst_82 [1] : vector<8x8x64xf32> to vector<8x64xf32>
    %214 = vector.shape_cast %213 : vector<8x64xf32> to vector<8x1x64xf32>
    %215 = vector.broadcast %214 : vector<8x1x64xf32> to vector<8x8x64xf32>
    %216 = arith.subf %212, %215 : vector<8x8x64xf32>
    %217 = math.exp %216 : vector<8x8x64xf32>
    %cst_83 = arith.constant dense<0.000000e+00> : vector<8x64xf32>
    %218 = vector.multi_reduction <add>, %217, %cst_83 [1] : vector<8x8x64xf32> to vector<8x64xf32>
    %219 = vector.shape_cast %218 : vector<8x64xf32> to vector<8x1x64xf32>
    %220 = tpu.reciprocal %219 {approx = true} : vector<8x1x64xf32> -> vector<8x1x64xf32>
    %221 = vector.broadcast %220 : vector<8x1x64xf32> to vector<8x8x64xf32>
    %222 = arith.mulf %217, %221 : vector<8x8x64xf32>
    %223 = vector.shape_cast %204 : vector<8x64xf32> to vector<8x1x64xf32>
    %224 = vector.broadcast %223 : vector<8x1x64xf32> to vector<8x8x64xf32>
    %225 = arith.mulf %224, %222 : vector<8x8x64xf32>
    %cst_84 = arith.constant dense<0.000000e+00> : vector<8x64xf32>
    %226 = vector.multi_reduction <add>, %225, %cst_84 [0] : vector<8x8x64xf32> to vector<8x64xf32>
    %227 = arith.addf %175, %226 : vector<8x64xf32>
    %cst_85 = arith.constant dense<0.000000e+00> : vector<64xf32>
    %228 = vector.multi_reduction <add>, %204, %cst_85 [0] : vector<8x64xf32> to vector<64xf32>
    %229 = vector.shape_cast %228 : vector<64xf32> to vector<1x64xf32>
    %230 = arith.addf %178, %229 : vector<1x64xf32>
    %231 = vector.extract_strided_slice %207 {offsets = [64, 0], sizes = [64, 64], strides = [1, 1]} : vector<320x64xf32> to vector<64x64xf32>
    %232 = vector.shape_cast %231 : vector<64x64xf32> to vector<8x8x64xf32>
    %233 = arith.mulf %225, %232 : vector<8x8x64xf32>
    %cst_86 = arith.constant dense<0.000000e+00> : vector<8x64xf32>
    %234 = vector.multi_reduction <add>, %233, %cst_86 [0] : vector<8x8x64xf32> to vector<8x64xf32>
    %235 = arith.addf %183, %234 : vector<8x64xf32>
    %236 = vector.extract_strided_slice %207 {offsets = [128, 0], sizes = [64, 64], strides = [1, 1]} : vector<320x64xf32> to vector<64x64xf32>
    %237 = vector.shape_cast %236 : vector<64x64xf32> to vector<8x8x64xf32>
    %238 = arith.mulf %225, %237 : vector<8x8x64xf32>
    %cst_87 = arith.constant dense<0.000000e+00> : vector<8x64xf32>
    %239 = vector.multi_reduction <add>, %238, %cst_87 [0] : vector<8x8x64xf32> to vector<8x64xf32>
    %240 = arith.addf %188, %239 : vector<8x64xf32>
    %241 = vector.extract_strided_slice %207 {offsets = [192, 0], sizes = [64, 64], strides = [1, 1]} : vector<320x64xf32> to vector<64x64xf32>
    %242 = vector.shape_cast %241 : vector<64x64xf32> to vector<8x8x64xf32>
    %243 = arith.mulf %225, %242 : vector<8x8x64xf32>
    %cst_88 = arith.constant dense<0.000000e+00> : vector<8x64xf32>
    %244 = vector.multi_reduction <add>, %243, %cst_88 [0] : vector<8x8x64xf32> to vector<8x64xf32>
    %245 = arith.addf %193, %244 : vector<8x64xf32>
    %246 = vector.extract_strided_slice %207 {offsets = [256, 0], sizes = [64, 64], strides = [1, 1]} : vector<320x64xf32> to vector<64x64xf32>
    %247 = vector.shape_cast %246 : vector<64x64xf32> to vector<8x8x64xf32>
    %248 = arith.mulf %225, %247 : vector<8x8x64xf32>
    %cst_89 = arith.constant dense<0.000000e+00> : vector<8x64xf32>
    %249 = vector.multi_reduction <add>, %248, %cst_89 [0] : vector<8x8x64xf32> to vector<8x64xf32>
    %250 = arith.addf %198, %249 : vector<8x64xf32>
    %c0_90 = arith.constant 0 : index
    %c0_91 = arith.constant 0 : index
    %c9 = arith.constant 9 : index
    %251 = vector.load %arg2[%c0_90, %c0_91, %c9] : memref<1x32x82xf32, #tpu.memory_space<vmem>>, vector<1x32x64xf32>
    %252 = vector.shape_cast %251 : vector<1x32x64xf32> to vector<32x64xf32>
    %c0_92 = arith.constant 0 : index
    %c0_93 = arith.constant 0 : index
    %c9_94 = arith.constant 9 : index
    %253 = vector.load %arg1[%c0_92, %c0_93, %c9_94] : memref<1x8x82xf32, #tpu.memory_space<vmem>>, vector<1x8x64xf32>
    %254 = vector.shape_cast %253 : vector<1x8x64xf32> to vector<8x64xf32>
    %c4 = arith.constant 4 : index
    %c0_95 = arith.constant 0 : index
    %c0_96 = arith.constant 0 : index
    %255 = vector.load %arg3[%c4, %c0_95, %c0_96] : memref<9x320x32xf32, #tpu.memory_space<vmem>>, vector<1x320x32xf32>
    %256 = vector.shape_cast %255 : vector<1x320x32xf32> to vector<320x32xf32>
    %cst_97 = arith.constant dense<0.000000e+00> : vector<320x64xf32>
    %257 = tpu.matmul %256, %252, %cst_97 {dimension_numbers = #tpu.dot_dimension_numbers<[1], [0], [0], [1], [0, 0, 1, 1], [], []>} : vector<320x32xf32>, vector<32x64xf32>, vector<320x64xf32> -> vector<320x64xf32>
    %258 = vector.extract_strided_slice %257 {offsets = [0, 0], sizes = [64, 64], strides = [1, 1]} : vector<320x64xf32> to vector<64x64xf32>
    %c0_98 = arith.constant 0 : index
    %c4_99 = arith.constant 4 : index
    %259 = vector.load %arg4[%c0_98, %c4_99] : memref<64x9xf32, #tpu.memory_space<vmem>>, vector<64x1xf32>
    %260 = vector.broadcast %259 : vector<64x1xf32> to vector<64x64xf32>
    %261 = arith.addf %258, %260 : vector<64x64xf32>
    %262 = vector.shape_cast %261 : vector<64x64xf32> to vector<8x8x64xf32>
    %cst_100 = arith.constant dense<0xFF800000> : vector<8x64xf32>
    %263 = vector.multi_reduction <maximumf>, %262, %cst_100 [1] : vector<8x8x64xf32> to vector<8x64xf32>
    %264 = vector.shape_cast %263 : vector<8x64xf32> to vector<8x1x64xf32>
    %265 = vector.broadcast %264 : vector<8x1x64xf32> to vector<8x8x64xf32>
    %266 = arith.subf %262, %265 : vector<8x8x64xf32>
    %267 = math.exp %266 : vector<8x8x64xf32>
    %cst_101 = arith.constant dense<0.000000e+00> : vector<8x64xf32>
    %268 = vector.multi_reduction <add>, %267, %cst_101 [1] : vector<8x8x64xf32> to vector<8x64xf32>
    %269 = vector.shape_cast %268 : vector<8x64xf32> to vector<8x1x64xf32>
    %270 = tpu.reciprocal %269 {approx = true} : vector<8x1x64xf32> -> vector<8x1x64xf32>
    %271 = vector.broadcast %270 : vector<8x1x64xf32> to vector<8x8x64xf32>
    %272 = arith.mulf %267, %271 : vector<8x8x64xf32>
    %273 = vector.shape_cast %254 : vector<8x64xf32> to vector<8x1x64xf32>
    %274 = vector.broadcast %273 : vector<8x1x64xf32> to vector<8x8x64xf32>
    %275 = arith.mulf %274, %272 : vector<8x8x64xf32>
    %cst_102 = arith.constant dense<0.000000e+00> : vector<8x64xf32>
    %276 = vector.multi_reduction <add>, %275, %cst_102 [0] : vector<8x8x64xf32> to vector<8x64xf32>
    %277 = arith.addf %227, %276 : vector<8x64xf32>
    %cst_103 = arith.constant dense<0.000000e+00> : vector<64xf32>
    %278 = vector.multi_reduction <add>, %254, %cst_103 [0] : vector<8x64xf32> to vector<64xf32>
    %279 = vector.shape_cast %278 : vector<64xf32> to vector<1x64xf32>
    %280 = arith.addf %230, %279 : vector<1x64xf32>
    %281 = vector.extract_strided_slice %257 {offsets = [64, 0], sizes = [64, 64], strides = [1, 1]} : vector<320x64xf32> to vector<64x64xf32>
    %282 = vector.shape_cast %281 : vector<64x64xf32> to vector<8x8x64xf32>
    %283 = arith.mulf %275, %282 : vector<8x8x64xf32>
    %cst_104 = arith.constant dense<0.000000e+00> : vector<8x64xf32>
    %284 = vector.multi_reduction <add>, %283, %cst_104 [0] : vector<8x8x64xf32> to vector<8x64xf32>
    %285 = arith.addf %235, %284 : vector<8x64xf32>
    %286 = vector.extract_strided_slice %257 {offsets = [128, 0], sizes = [64, 64], strides = [1, 1]} : vector<320x64xf32> to vector<64x64xf32>
    %287 = vector.shape_cast %286 : vector<64x64xf32> to vector<8x8x64xf32>
    %288 = arith.mulf %275, %287 : vector<8x8x64xf32>
    %cst_105 = arith.constant dense<0.000000e+00> : vector<8x64xf32>
    %289 = vector.multi_reduction <add>, %288, %cst_105 [0] : vector<8x8x64xf32> to vector<8x64xf32>
    %290 = arith.addf %240, %289 : vector<8x64xf32>
    %291 = vector.extract_strided_slice %257 {offsets = [192, 0], sizes = [64, 64], strides = [1, 1]} : vector<320x64xf32> to vector<64x64xf32>
    %292 = vector.shape_cast %291 : vector<64x64xf32> to vector<8x8x64xf32>
    %293 = arith.mulf %275, %292 : vector<8x8x64xf32>
    %cst_106 = arith.constant dense<0.000000e+00> : vector<8x64xf32>
    %294 = vector.multi_reduction <add>, %293, %cst_106 [0] : vector<8x8x64xf32> to vector<8x64xf32>
    %295 = arith.addf %245, %294 : vector<8x64xf32>
    %296 = vector.extract_strided_slice %257 {offsets = [256, 0], sizes = [64, 64], strides = [1, 1]} : vector<320x64xf32> to vector<64x64xf32>
    %297 = vector.shape_cast %296 : vector<64x64xf32> to vector<8x8x64xf32>
    %298 = arith.mulf %275, %297 : vector<8x8x64xf32>
    %cst_107 = arith.constant dense<0.000000e+00> : vector<8x64xf32>
    %299 = vector.multi_reduction <add>, %298, %cst_107 [0] : vector<8x8x64xf32> to vector<8x64xf32>
    %300 = arith.addf %250, %299 : vector<8x64xf32>
    %c0_108 = arith.constant 0 : index
    %c0_109 = arith.constant 0 : index
    %c10 = arith.constant 10 : index
    %301 = vector.load %arg2[%c0_108, %c0_109, %c10] : memref<1x32x82xf32, #tpu.memory_space<vmem>>, vector<1x32x64xf32>
    %302 = vector.shape_cast %301 : vector<1x32x64xf32> to vector<32x64xf32>
    %c0_110 = arith.constant 0 : index
    %c0_111 = arith.constant 0 : index
    %c10_112 = arith.constant 10 : index
    %303 = vector.load %arg1[%c0_110, %c0_111, %c10_112] : memref<1x8x82xf32, #tpu.memory_space<vmem>>, vector<1x8x64xf32>
    %304 = vector.shape_cast %303 : vector<1x8x64xf32> to vector<8x64xf32>
    %305 = vector.broadcast %38 : vector<1x64xf32> to vector<8x64xf32>
    %306 = arith.mulf %304, %305 : vector<8x64xf32>
    %c5 = arith.constant 5 : index
    %c0_113 = arith.constant 0 : index
    %c0_114 = arith.constant 0 : index
    %307 = vector.load %arg3[%c5, %c0_113, %c0_114] : memref<9x320x32xf32, #tpu.memory_space<vmem>>, vector<1x320x32xf32>
    %308 = vector.shape_cast %307 : vector<1x320x32xf32> to vector<320x32xf32>
    %cst_115 = arith.constant dense<0.000000e+00> : vector<320x64xf32>
    %309 = tpu.matmul %308, %302, %cst_115 {dimension_numbers = #tpu.dot_dimension_numbers<[1], [0], [0], [1], [0, 0, 1, 1], [], []>} : vector<320x32xf32>, vector<32x64xf32>, vector<320x64xf32> -> vector<320x64xf32>
    %310 = vector.extract_strided_slice %309 {offsets = [0, 0], sizes = [64, 64], strides = [1, 1]} : vector<320x64xf32> to vector<64x64xf32>
    %c0_116 = arith.constant 0 : index
    %c5_117 = arith.constant 5 : index
    %311 = vector.load %arg4[%c0_116, %c5_117] : memref<64x9xf32, #tpu.memory_space<vmem>>, vector<64x1xf32>
    %312 = vector.broadcast %311 : vector<64x1xf32> to vector<64x64xf32>
    %313 = arith.addf %310, %312 : vector<64x64xf32>
    %314 = vector.shape_cast %313 : vector<64x64xf32> to vector<8x8x64xf32>
    %cst_118 = arith.constant dense<0xFF800000> : vector<8x64xf32>
    %315 = vector.multi_reduction <maximumf>, %314, %cst_118 [1] : vector<8x8x64xf32> to vector<8x64xf32>
    %316 = vector.shape_cast %315 : vector<8x64xf32> to vector<8x1x64xf32>
    %317 = vector.broadcast %316 : vector<8x1x64xf32> to vector<8x8x64xf32>
    %318 = arith.subf %314, %317 : vector<8x8x64xf32>
    %319 = math.exp %318 : vector<8x8x64xf32>
    %cst_119 = arith.constant dense<0.000000e+00> : vector<8x64xf32>
    %320 = vector.multi_reduction <add>, %319, %cst_119 [1] : vector<8x8x64xf32> to vector<8x64xf32>
    %321 = vector.shape_cast %320 : vector<8x64xf32> to vector<8x1x64xf32>
    %322 = tpu.reciprocal %321 {approx = true} : vector<8x1x64xf32> -> vector<8x1x64xf32>
    %323 = vector.broadcast %322 : vector<8x1x64xf32> to vector<8x8x64xf32>
    %324 = arith.mulf %319, %323 : vector<8x8x64xf32>
    %325 = vector.shape_cast %306 : vector<8x64xf32> to vector<8x1x64xf32>
    %326 = vector.broadcast %325 : vector<8x1x64xf32> to vector<8x8x64xf32>
    %327 = arith.mulf %326, %324 : vector<8x8x64xf32>
    %cst_120 = arith.constant dense<0.000000e+00> : vector<8x64xf32>
    %328 = vector.multi_reduction <add>, %327, %cst_120 [0] : vector<8x8x64xf32> to vector<8x64xf32>
    %329 = arith.addf %277, %328 : vector<8x64xf32>
    %cst_121 = arith.constant dense<0.000000e+00> : vector<64xf32>
    %330 = vector.multi_reduction <add>, %306, %cst_121 [0] : vector<8x64xf32> to vector<64xf32>
    %331 = vector.shape_cast %330 : vector<64xf32> to vector<1x64xf32>
    %332 = arith.addf %280, %331 : vector<1x64xf32>
    %333 = vector.extract_strided_slice %309 {offsets = [64, 0], sizes = [64, 64], strides = [1, 1]} : vector<320x64xf32> to vector<64x64xf32>
    %334 = vector.shape_cast %333 : vector<64x64xf32> to vector<8x8x64xf32>
    %335 = arith.mulf %327, %334 : vector<8x8x64xf32>
    %cst_122 = arith.constant dense<0.000000e+00> : vector<8x64xf32>
    %336 = vector.multi_reduction <add>, %335, %cst_122 [0] : vector<8x8x64xf32> to vector<8x64xf32>
    %337 = arith.addf %285, %336 : vector<8x64xf32>
    %338 = vector.extract_strided_slice %309 {offsets = [128, 0], sizes = [64, 64], strides = [1, 1]} : vector<320x64xf32> to vector<64x64xf32>
    %339 = vector.shape_cast %338 : vector<64x64xf32> to vector<8x8x64xf32>
    %340 = arith.mulf %327, %339 : vector<8x8x64xf32>
    %cst_123 = arith.constant dense<0.000000e+00> : vector<8x64xf32>
    %341 = vector.multi_reduction <add>, %340, %cst_123 [0] : vector<8x8x64xf32> to vector<8x64xf32>
    %342 = arith.addf %290, %341 : vector<8x64xf32>
    %343 = vector.extract_strided_slice %309 {offsets = [192, 0], sizes = [64, 64], strides = [1, 1]} : vector<320x64xf32> to vector<64x64xf32>
    %344 = vector.shape_cast %343 : vector<64x64xf32> to vector<8x8x64xf32>
    %345 = arith.mulf %327, %344 : vector<8x8x64xf32>
    %cst_124 = arith.constant dense<0.000000e+00> : vector<8x64xf32>
    %346 = vector.multi_reduction <add>, %345, %cst_124 [0] : vector<8x8x64xf32> to vector<8x64xf32>
    %347 = arith.addf %295, %346 : vector<8x64xf32>
    %348 = vector.extract_strided_slice %309 {offsets = [256, 0], sizes = [64, 64], strides = [1, 1]} : vector<320x64xf32> to vector<64x64xf32>
    %349 = vector.shape_cast %348 : vector<64x64xf32> to vector<8x8x64xf32>
    %350 = arith.mulf %327, %349 : vector<8x8x64xf32>
    %cst_125 = arith.constant dense<0.000000e+00> : vector<8x64xf32>
    %351 = vector.multi_reduction <add>, %350, %cst_125 [0] : vector<8x8x64xf32> to vector<8x64xf32>
    %352 = arith.addf %300, %351 : vector<8x64xf32>
    %c0_126 = arith.constant 0 : index
    %c0_127 = arith.constant 0 : index
    %c16 = arith.constant 16 : index
    %353 = vector.load %arg2[%c0_126, %c0_127, %c16] : memref<1x32x82xf32, #tpu.memory_space<vmem>>, vector<1x32x64xf32>
    %354 = vector.shape_cast %353 : vector<1x32x64xf32> to vector<32x64xf32>
    %c0_128 = arith.constant 0 : index
    %c0_129 = arith.constant 0 : index
    %c16_130 = arith.constant 16 : index
    %355 = vector.load %arg1[%c0_128, %c0_129, %c16_130] : memref<1x8x82xf32, #tpu.memory_space<vmem>>, vector<1x8x64xf32>
    %356 = vector.shape_cast %355 : vector<1x8x64xf32> to vector<8x64xf32>
    %357 = vector.broadcast %27 : vector<1x64xf32> to vector<8x64xf32>
    %358 = arith.mulf %356, %357 : vector<8x64xf32>
    %c6 = arith.constant 6 : index
    %c0_131 = arith.constant 0 : index
    %c0_132 = arith.constant 0 : index
    %359 = vector.load %arg3[%c6, %c0_131, %c0_132] : memref<9x320x32xf32, #tpu.memory_space<vmem>>, vector<1x320x32xf32>
    %360 = vector.shape_cast %359 : vector<1x320x32xf32> to vector<320x32xf32>
    %cst_133 = arith.constant dense<0.000000e+00> : vector<320x64xf32>
    %361 = tpu.matmul %360, %354, %cst_133 {dimension_numbers = #tpu.dot_dimension_numbers<[1], [0], [0], [1], [0, 0, 1, 1], [], []>} : vector<320x32xf32>, vector<32x64xf32>, vector<320x64xf32> -> vector<320x64xf32>
    %362 = vector.extract_strided_slice %361 {offsets = [0, 0], sizes = [64, 64], strides = [1, 1]} : vector<320x64xf32> to vector<64x64xf32>
    %c0_134 = arith.constant 0 : index
    %c6_135 = arith.constant 6 : index
    %363 = vector.load %arg4[%c0_134, %c6_135] : memref<64x9xf32, #tpu.memory_space<vmem>>, vector<64x1xf32>
    %364 = vector.broadcast %363 : vector<64x1xf32> to vector<64x64xf32>
    %365 = arith.addf %362, %364 : vector<64x64xf32>
    %366 = vector.shape_cast %365 : vector<64x64xf32> to vector<8x8x64xf32>
    %cst_136 = arith.constant dense<0xFF800000> : vector<8x64xf32>
    %367 = vector.multi_reduction <maximumf>, %366, %cst_136 [1] : vector<8x8x64xf32> to vector<8x64xf32>
    %368 = vector.shape_cast %367 : vector<8x64xf32> to vector<8x1x64xf32>
    %369 = vector.broadcast %368 : vector<8x1x64xf32> to vector<8x8x64xf32>
    %370 = arith.subf %366, %369 : vector<8x8x64xf32>
    %371 = math.exp %370 : vector<8x8x64xf32>
    %cst_137 = arith.constant dense<0.000000e+00> : vector<8x64xf32>
    %372 = vector.multi_reduction <add>, %371, %cst_137 [1] : vector<8x8x64xf32> to vector<8x64xf32>
    %373 = vector.shape_cast %372 : vector<8x64xf32> to vector<8x1x64xf32>
    %374 = tpu.reciprocal %373 {approx = true} : vector<8x1x64xf32> -> vector<8x1x64xf32>
    %375 = vector.broadcast %374 : vector<8x1x64xf32> to vector<8x8x64xf32>
    %376 = arith.mulf %371, %375 : vector<8x8x64xf32>
    %377 = vector.shape_cast %358 : vector<8x64xf32> to vector<8x1x64xf32>
    %378 = vector.broadcast %377 : vector<8x1x64xf32> to vector<8x8x64xf32>
    %379 = arith.mulf %378, %376 : vector<8x8x64xf32>
    %cst_138 = arith.constant dense<0.000000e+00> : vector<8x64xf32>
    %380 = vector.multi_reduction <add>, %379, %cst_138 [0] : vector<8x8x64xf32> to vector<8x64xf32>
    %381 = arith.addf %329, %380 : vector<8x64xf32>
    %cst_139 = arith.constant dense<0.000000e+00> : vector<64xf32>
    %382 = vector.multi_reduction <add>, %358, %cst_139 [0] : vector<8x64xf32> to vector<64xf32>
    %383 = vector.shape_cast %382 : vector<64xf32> to vector<1x64xf32>
    %384 = arith.addf %332, %383 : vector<1x64xf32>
    %385 = vector.extract_strided_slice %361 {offsets = [64, 0], sizes = [64, 64], strides = [1, 1]} : vector<320x64xf32> to vector<64x64xf32>
    %386 = vector.shape_cast %385 : vector<64x64xf32> to vector<8x8x64xf32>
    %387 = arith.mulf %379, %386 : vector<8x8x64xf32>
    %cst_140 = arith.constant dense<0.000000e+00> : vector<8x64xf32>
    %388 = vector.multi_reduction <add>, %387, %cst_140 [0] : vector<8x8x64xf32> to vector<8x64xf32>
    %389 = arith.addf %337, %388 : vector<8x64xf32>
    %390 = vector.extract_strided_slice %361 {offsets = [128, 0], sizes = [64, 64], strides = [1, 1]} : vector<320x64xf32> to vector<64x64xf32>
    %391 = vector.shape_cast %390 : vector<64x64xf32> to vector<8x8x64xf32>
    %392 = arith.mulf %379, %391 : vector<8x8x64xf32>
    %cst_141 = arith.constant dense<0.000000e+00> : vector<8x64xf32>
    %393 = vector.multi_reduction <add>, %392, %cst_141 [0] : vector<8x8x64xf32> to vector<8x64xf32>
    %394 = arith.addf %342, %393 : vector<8x64xf32>
    %395 = vector.extract_strided_slice %361 {offsets = [192, 0], sizes = [64, 64], strides = [1, 1]} : vector<320x64xf32> to vector<64x64xf32>
    %396 = vector.shape_cast %395 : vector<64x64xf32> to vector<8x8x64xf32>
    %397 = arith.mulf %379, %396 : vector<8x8x64xf32>
    %cst_142 = arith.constant dense<0.000000e+00> : vector<8x64xf32>
    %398 = vector.multi_reduction <add>, %397, %cst_142 [0] : vector<8x8x64xf32> to vector<8x64xf32>
    %399 = arith.addf %347, %398 : vector<8x64xf32>
    %400 = vector.extract_strided_slice %361 {offsets = [256, 0], sizes = [64, 64], strides = [1, 1]} : vector<320x64xf32> to vector<64x64xf32>
    %401 = vector.shape_cast %400 : vector<64x64xf32> to vector<8x8x64xf32>
    %402 = arith.mulf %379, %401 : vector<8x8x64xf32>
    %cst_143 = arith.constant dense<0.000000e+00> : vector<8x64xf32>
    %403 = vector.multi_reduction <add>, %402, %cst_143 [0] : vector<8x8x64xf32> to vector<8x64xf32>
    %404 = arith.addf %352, %403 : vector<8x64xf32>
    %c0_144 = arith.constant 0 : index
    %c0_145 = arith.constant 0 : index
    %c17 = arith.constant 17 : index
    %405 = vector.load %arg2[%c0_144, %c0_145, %c17] : memref<1x32x82xf32, #tpu.memory_space<vmem>>, vector<1x32x64xf32>
    %406 = vector.shape_cast %405 : vector<1x32x64xf32> to vector<32x64xf32>
    %c0_146 = arith.constant 0 : index
    %c0_147 = arith.constant 0 : index
    %c17_148 = arith.constant 17 : index
    %407 = vector.load %arg1[%c0_146, %c0_147, %c17_148] : memref<1x8x82xf32, #tpu.memory_space<vmem>>, vector<1x8x64xf32>
    %408 = vector.shape_cast %407 : vector<1x8x64xf32> to vector<8x64xf32>
    %c7 = arith.constant 7 : index
    %c0_149 = arith.constant 0 : index
    %c0_150 = arith.constant 0 : index
    %409 = vector.load %arg3[%c7, %c0_149, %c0_150] : memref<9x320x32xf32, #tpu.memory_space<vmem>>, vector<1x320x32xf32>
    %410 = vector.shape_cast %409 : vector<1x320x32xf32> to vector<320x32xf32>
    %cst_151 = arith.constant dense<0.000000e+00> : vector<320x64xf32>
    %411 = tpu.matmul %410, %406, %cst_151 {dimension_numbers = #tpu.dot_dimension_numbers<[1], [0], [0], [1], [0, 0, 1, 1], [], []>} : vector<320x32xf32>, vector<32x64xf32>, vector<320x64xf32> -> vector<320x64xf32>
    %412 = vector.extract_strided_slice %411 {offsets = [0, 0], sizes = [64, 64], strides = [1, 1]} : vector<320x64xf32> to vector<64x64xf32>
    %c0_152 = arith.constant 0 : index
    %c7_153 = arith.constant 7 : index
    %413 = vector.load %arg4[%c0_152, %c7_153] : memref<64x9xf32, #tpu.memory_space<vmem>>, vector<64x1xf32>
    %414 = vector.broadcast %413 : vector<64x1xf32> to vector<64x64xf32>
    %415 = arith.addf %412, %414 : vector<64x64xf32>
    %416 = vector.shape_cast %415 : vector<64x64xf32> to vector<8x8x64xf32>
    %cst_154 = arith.constant dense<0xFF800000> : vector<8x64xf32>
    %417 = vector.multi_reduction <maximumf>, %416, %cst_154 [1] : vector<8x8x64xf32> to vector<8x64xf32>
    %418 = vector.shape_cast %417 : vector<8x64xf32> to vector<8x1x64xf32>
    %419 = vector.broadcast %418 : vector<8x1x64xf32> to vector<8x8x64xf32>
    %420 = arith.subf %416, %419 : vector<8x8x64xf32>
    %421 = math.exp %420 : vector<8x8x64xf32>
    %cst_155 = arith.constant dense<0.000000e+00> : vector<8x64xf32>
    %422 = vector.multi_reduction <add>, %421, %cst_155 [1] : vector<8x8x64xf32> to vector<8x64xf32>
    %423 = vector.shape_cast %422 : vector<8x64xf32> to vector<8x1x64xf32>
    %424 = tpu.reciprocal %423 {approx = true} : vector<8x1x64xf32> -> vector<8x1x64xf32>
    %425 = vector.broadcast %424 : vector<8x1x64xf32> to vector<8x8x64xf32>
    %426 = arith.mulf %421, %425 : vector<8x8x64xf32>
    %427 = vector.shape_cast %408 : vector<8x64xf32> to vector<8x1x64xf32>
    %428 = vector.broadcast %427 : vector<8x1x64xf32> to vector<8x8x64xf32>
    %429 = arith.mulf %428, %426 : vector<8x8x64xf32>
    %cst_156 = arith.constant dense<0.000000e+00> : vector<8x64xf32>
    %430 = vector.multi_reduction <add>, %429, %cst_156 [0] : vector<8x8x64xf32> to vector<8x64xf32>
    %431 = arith.addf %381, %430 : vector<8x64xf32>
    %cst_157 = arith.constant dense<0.000000e+00> : vector<64xf32>
    %432 = vector.multi_reduction <add>, %408, %cst_157 [0] : vector<8x64xf32> to vector<64xf32>
    %433 = vector.shape_cast %432 : vector<64xf32> to vector<1x64xf32>
    %434 = arith.addf %384, %433 : vector<1x64xf32>
    %435 = vector.extract_strided_slice %411 {offsets = [64, 0], sizes = [64, 64], strides = [1, 1]} : vector<320x64xf32> to vector<64x64xf32>
    %436 = vector.shape_cast %435 : vector<64x64xf32> to vector<8x8x64xf32>
    %437 = arith.mulf %429, %436 : vector<8x8x64xf32>
    %cst_158 = arith.constant dense<0.000000e+00> : vector<8x64xf32>
    %438 = vector.multi_reduction <add>, %437, %cst_158 [0] : vector<8x8x64xf32> to vector<8x64xf32>
    %439 = arith.addf %389, %438 : vector<8x64xf32>
    %440 = vector.extract_strided_slice %411 {offsets = [128, 0], sizes = [64, 64], strides = [1, 1]} : vector<320x64xf32> to vector<64x64xf32>
    %441 = vector.shape_cast %440 : vector<64x64xf32> to vector<8x8x64xf32>
    %442 = arith.mulf %429, %441 : vector<8x8x64xf32>
    %cst_159 = arith.constant dense<0.000000e+00> : vector<8x64xf32>
    %443 = vector.multi_reduction <add>, %442, %cst_159 [0] : vector<8x8x64xf32> to vector<8x64xf32>
    %444 = arith.addf %394, %443 : vector<8x64xf32>
    %445 = vector.extract_strided_slice %411 {offsets = [192, 0], sizes = [64, 64], strides = [1, 1]} : vector<320x64xf32> to vector<64x64xf32>
    %446 = vector.shape_cast %445 : vector<64x64xf32> to vector<8x8x64xf32>
    %447 = arith.mulf %429, %446 : vector<8x8x64xf32>
    %cst_160 = arith.constant dense<0.000000e+00> : vector<8x64xf32>
    %448 = vector.multi_reduction <add>, %447, %cst_160 [0] : vector<8x8x64xf32> to vector<8x64xf32>
    %449 = arith.addf %399, %448 : vector<8x64xf32>
    %450 = vector.extract_strided_slice %411 {offsets = [256, 0], sizes = [64, 64], strides = [1, 1]} : vector<320x64xf32> to vector<64x64xf32>
    %451 = vector.shape_cast %450 : vector<64x64xf32> to vector<8x8x64xf32>
    %452 = arith.mulf %429, %451 : vector<8x8x64xf32>
    %cst_161 = arith.constant dense<0.000000e+00> : vector<8x64xf32>
    %453 = vector.multi_reduction <add>, %452, %cst_161 [0] : vector<8x8x64xf32> to vector<8x64xf32>
    %454 = arith.addf %404, %453 : vector<8x64xf32>
    %c0_162 = arith.constant 0 : index
    %c0_163 = arith.constant 0 : index
    %c18 = arith.constant 18 : index
    %455 = vector.load %arg2[%c0_162, %c0_163, %c18] : memref<1x32x82xf32, #tpu.memory_space<vmem>>, vector<1x32x64xf32>
    %456 = vector.shape_cast %455 : vector<1x32x64xf32> to vector<32x64xf32>
    %c0_164 = arith.constant 0 : index
    %c0_165 = arith.constant 0 : index
    %c18_166 = arith.constant 18 : index
    %457 = vector.load %arg1[%c0_164, %c0_165, %c18_166] : memref<1x8x82xf32, #tpu.memory_space<vmem>>, vector<1x8x64xf32>
    %458 = vector.shape_cast %457 : vector<1x8x64xf32> to vector<8x64xf32>
    %459 = vector.broadcast %38 : vector<1x64xf32> to vector<8x64xf32>
    %460 = arith.mulf %458, %459 : vector<8x64xf32>
    %c8_167 = arith.constant 8 : index
    %c0_168 = arith.constant 0 : index
    %c0_169 = arith.constant 0 : index
    %461 = vector.load %arg3[%c8_167, %c0_168, %c0_169] : memref<9x320x32xf32, #tpu.memory_space<vmem>>, vector<1x320x32xf32>
    %462 = vector.shape_cast %461 : vector<1x320x32xf32> to vector<320x32xf32>
    %cst_170 = arith.constant dense<0.000000e+00> : vector<320x64xf32>
    %463 = tpu.matmul %462, %456, %cst_170 {dimension_numbers = #tpu.dot_dimension_numbers<[1], [0], [0], [1], [0, 0, 1, 1], [], []>} : vector<320x32xf32>, vector<32x64xf32>, vector<320x64xf32> -> vector<320x64xf32>
    %464 = vector.extract_strided_slice %463 {offsets = [0, 0], sizes = [64, 64], strides = [1, 1]} : vector<320x64xf32> to vector<64x64xf32>
    %c0_171 = arith.constant 0 : index
    %c8_172 = arith.constant 8 : index
    %465 = vector.load %arg4[%c0_171, %c8_172] : memref<64x9xf32, #tpu.memory_space<vmem>>, vector<64x1xf32>
    %466 = vector.broadcast %465 : vector<64x1xf32> to vector<64x64xf32>
    %467 = arith.addf %464, %466 : vector<64x64xf32>
    %468 = vector.shape_cast %467 : vector<64x64xf32> to vector<8x8x64xf32>
    %cst_173 = arith.constant dense<0xFF800000> : vector<8x64xf32>
    %469 = vector.multi_reduction <maximumf>, %468, %cst_173 [1] : vector<8x8x64xf32> to vector<8x64xf32>
    %470 = vector.shape_cast %469 : vector<8x64xf32> to vector<8x1x64xf32>
    %471 = vector.broadcast %470 : vector<8x1x64xf32> to vector<8x8x64xf32>
    %472 = arith.subf %468, %471 : vector<8x8x64xf32>
    %473 = math.exp %472 : vector<8x8x64xf32>
    %cst_174 = arith.constant dense<0.000000e+00> : vector<8x64xf32>
    %474 = vector.multi_reduction <add>, %473, %cst_174 [1] : vector<8x8x64xf32> to vector<8x64xf32>
    %475 = vector.shape_cast %474 : vector<8x64xf32> to vector<8x1x64xf32>
    %476 = tpu.reciprocal %475 {approx = true} : vector<8x1x64xf32> -> vector<8x1x64xf32>
    %477 = vector.broadcast %476 : vector<8x1x64xf32> to vector<8x8x64xf32>
    %478 = arith.mulf %473, %477 : vector<8x8x64xf32>
    %479 = vector.shape_cast %460 : vector<8x64xf32> to vector<8x1x64xf32>
    %480 = vector.broadcast %479 : vector<8x1x64xf32> to vector<8x8x64xf32>
    %481 = arith.mulf %480, %478 : vector<8x8x64xf32>
    %cst_175 = arith.constant dense<0.000000e+00> : vector<8x64xf32>
    %482 = vector.multi_reduction <add>, %481, %cst_175 [0] : vector<8x8x64xf32> to vector<8x64xf32>
    %483 = arith.addf %431, %482 : vector<8x64xf32>
    %cst_176 = arith.constant dense<0.000000e+00> : vector<64xf32>
    %484 = vector.multi_reduction <add>, %460, %cst_176 [0] : vector<8x64xf32> to vector<64xf32>
    %485 = vector.shape_cast %484 : vector<64xf32> to vector<1x64xf32>
    %486 = arith.addf %434, %485 : vector<1x64xf32>
    %487 = vector.extract_strided_slice %463 {offsets = [64, 0], sizes = [64, 64], strides = [1, 1]} : vector<320x64xf32> to vector<64x64xf32>
    %488 = vector.shape_cast %487 : vector<64x64xf32> to vector<8x8x64xf32>
    %489 = arith.mulf %481, %488 : vector<8x8x64xf32>
    %cst_177 = arith.constant dense<0.000000e+00> : vector<8x64xf32>
    %490 = vector.multi_reduction <add>, %489, %cst_177 [0] : vector<8x8x64xf32> to vector<8x64xf32>
    %491 = arith.addf %439, %490 : vector<8x64xf32>
    %492 = vector.extract_strided_slice %463 {offsets = [128, 0], sizes = [64, 64], strides = [1, 1]} : vector<320x64xf32> to vector<64x64xf32>
    %493 = vector.shape_cast %492 : vector<64x64xf32> to vector<8x8x64xf32>
    %494 = arith.mulf %481, %493 : vector<8x8x64xf32>
    %cst_178 = arith.constant dense<0.000000e+00> : vector<8x64xf32>
    %495 = vector.multi_reduction <add>, %494, %cst_178 [0] : vector<8x8x64xf32> to vector<8x64xf32>
    %496 = arith.addf %444, %495 : vector<8x64xf32>
    %497 = vector.extract_strided_slice %463 {offsets = [192, 0], sizes = [64, 64], strides = [1, 1]} : vector<320x64xf32> to vector<64x64xf32>
    %498 = vector.shape_cast %497 : vector<64x64xf32> to vector<8x8x64xf32>
    %499 = arith.mulf %481, %498 : vector<8x8x64xf32>
    %cst_179 = arith.constant dense<0.000000e+00> : vector<8x64xf32>
    %500 = vector.multi_reduction <add>, %499, %cst_179 [0] : vector<8x8x64xf32> to vector<8x64xf32>
    %501 = arith.addf %449, %500 : vector<8x64xf32>
    %502 = vector.extract_strided_slice %463 {offsets = [256, 0], sizes = [64, 64], strides = [1, 1]} : vector<320x64xf32> to vector<64x64xf32>
    %503 = vector.shape_cast %502 : vector<64x64xf32> to vector<8x8x64xf32>
    %504 = arith.mulf %481, %503 : vector<8x8x64xf32>
    %cst_180 = arith.constant dense<0.000000e+00> : vector<8x64xf32>
    %505 = vector.multi_reduction <add>, %504, %cst_180 [0] : vector<8x8x64xf32> to vector<8x64xf32>
    %506 = arith.addf %454, %505 : vector<8x64xf32>
    %507 = vector.broadcast %486 : vector<1x64xf32> to vector<8x64xf32>
    %508 = arith.divf %483, %507 : vector<8x64xf32>
    %c0_181 = arith.constant 0 : index
    %c0_182 = arith.constant 0 : index
    %c0_183 = arith.constant 0 : index
    %509 = vector.load %arg5[%c0_181, %c0_182, %c0_183] : memref<1x40x64xf32, #tpu.memory_space<vmem>>, vector<1x8x64xf32>
    %510 = vector.shape_cast %509 : vector<1x8x64xf32> to vector<8x64xf32>
    %511 = vector.shape_cast %508 : vector<8x64xf32> to vector<1x8x64xf32>
    tpu.vector_store %arg5[%c0_181, %c0_182, %c0_183], %511 {strides = array<i32>} : memref<1x40x64xf32, #tpu.memory_space<vmem>>, vector<1x8x64xf32>,
    %cst_184 = arith.constant 1.000000e+00 : f32
    %512 = vector.broadcast %cst_184 : f32 to vector<8x64xf32>
    %513 = arith.divf %512, %483 : vector<8x64xf32>
    %514 = arith.mulf %491, %513 : vector<8x64xf32>
    %c0_185 = arith.constant 0 : index
    %c8_186 = arith.constant 8 : index
    %c0_187 = arith.constant 0 : index
    %515 = vector.load %arg5[%c0_185, %c8_186, %c0_187] : memref<1x40x64xf32, #tpu.memory_space<vmem>>, vector<1x8x64xf32>
    %516 = vector.shape_cast %515 : vector<1x8x64xf32> to vector<8x64xf32>
    %517 = vector.shape_cast %514 : vector<8x64xf32> to vector<1x8x64xf32>
    tpu.vector_store %arg5[%c0_185, %c8_186, %c0_187], %517 {strides = array<i32>} : memref<1x40x64xf32, #tpu.memory_space<vmem>>, vector<1x8x64xf32>,
    %518 = arith.mulf %496, %513 : vector<8x64xf32>
    %c0_188 = arith.constant 0 : index
    %c16_189 = arith.constant 16 : index
    %c0_190 = arith.constant 0 : index
    %519 = vector.load %arg5[%c0_188, %c16_189, %c0_190] : memref<1x40x64xf32, #tpu.memory_space<vmem>>, vector<1x8x64xf32>
    %520 = vector.shape_cast %519 : vector<1x8x64xf32> to vector<8x64xf32>
    %521 = vector.shape_cast %518 : vector<8x64xf32> to vector<1x8x64xf32>
    tpu.vector_store %arg5[%c0_188, %c16_189, %c0_190], %521 {strides = array<i32>} : memref<1x40x64xf32, #tpu.memory_space<vmem>>, vector<1x8x64xf32>,
    %522 = arith.mulf %501, %513 : vector<8x64xf32>
    %c0_191 = arith.constant 0 : index
    %c24 = arith.constant 24 : index
    %c0_192 = arith.constant 0 : index
    %523 = vector.load %arg5[%c0_191, %c24, %c0_192] : memref<1x40x64xf32, #tpu.memory_space<vmem>>, vector<1x8x64xf32>
    %524 = vector.shape_cast %523 : vector<1x8x64xf32> to vector<8x64xf32>
    %525 = vector.shape_cast %522 : vector<8x64xf32> to vector<1x8x64xf32>
    tpu.vector_store %arg5[%c0_191, %c24, %c0_192], %525 {strides = array<i32>} : memref<1x40x64xf32, #tpu.memory_space<vmem>>, vector<1x8x64xf32>,
    %526 = arith.mulf %506, %513 : vector<8x64xf32>
    %c0_193 = arith.constant 0 : index
    %c32 = arith.constant 32 : index
    %c0_194 = arith.constant 0 : index
    %527 = vector.load %arg5[%c0_193, %c32, %c0_194] : memref<1x40x64xf32, #tpu.memory_space<vmem>>, vector<1x8x64xf32>
    %528 = vector.shape_cast %527 : vector<1x8x64xf32> to vector<8x64xf32>
    %529 = vector.shape_cast %526 : vector<8x64xf32> to vector<1x8x64xf32>
    tpu.vector_store %arg5[%c0_193, %c32, %c0_194], %529 {strides = array<i32>} : memref<1x40x64xf32, #tpu.memory_space<vmem>>, vector<1x8x64xf32>,
    return
  }
  func.func @transform_0(%arg0: i32) -> (i32, i32, i32) {
    %c0_i32 = arith.constant 0 : i32
    %c0_i32_0 = arith.constant 0 : i32
    %c0_i32_1 = arith.constant 0 : i32
    return %arg0, %c0_i32, %c0_i32_0 : i32, i32, i32
  }
  func.func @transform_1(%arg0: i32) -> (i32, i32, i32) {
    %c0_i32 = arith.constant 0 : i32
    %c0_i32_0 = arith.constant 0 : i32
    %c0_i32_1 = arith.constant 0 : i32
    return %arg0, %c0_i32, %c0_i32_0 : i32, i32, i32
  }
  func.func @transform_2(%arg0: i32) -> (i32, i32, i32) {
    %c0_i32 = arith.constant 0 : i32
    %c0_i32_0 = arith.constant 0 : i32
    %c0_i32_1 = arith.constant 0 : i32
    %c0_i32_2 = arith.constant 0 : i32
    return %c0_i32, %c0_i32_0, %c0_i32_1 : i32, i32, i32
  }
  func.func @transform_3(%arg0: i32) -> (i32, i32) {
    %c0_i32 = arith.constant 0 : i32
    %c0_i32_0 = arith.constant 0 : i32
    %c0_i32_1 = arith.constant 0 : i32
    return %c0_i32, %c0_i32_0 : i32, i32
  }
  func.func @transform_4(%arg0: i32) -> (i32, i32, i32) {
    %c0_i32 = arith.constant 0 : i32
    %c0_i32_0 = arith.constant 0 : i32
    %c0_i32_1 = arith.constant 0 : i32
    return %arg0, %c0_i32, %c0_i32_0 : i32, i32, i32
  }
}

</mosaic_0001>

<bundles_post_ra>
// kernel: self_routing2d.1
= control target key start
LH: loop header
LB: loop body
LE: loop exit
PB: predicated region body
PF: predicated region fallthrough
CT: control target
= control target key end

     0   :  { %s11942_s15 = smov 0   ;;  %s18116_s0 = inlined_call_operand.vmem [shape: f32[2,8,82], index: 0, kind: input, shape index: {}]   ;;  %s18117_s1 = inlined_call_operand.vmem [shape: f32[2,32,82], index: 1, kind: input, shape index: {}]   ;;  %s18118_s2 = inlined_call_operand.vmem [shape: f32[9,320,32], index: 2, kind: input, shape index: {}]   ;;  %s18119_s3 = inlined_call_operand.vmem [shape: f32[64,9], index: 3, kind: input, shape index: {}]   ;;  %s18120_s4 = inlined_call_operand.vmem [shape: f32[2,40,64], index: 4, kind: output, shape index: {}]  }
   0x1 LB: > { %s9670_s16 = sadd.s32 4294967295, %s11888_s15   ;;  %p9674_p0 = scmp.ge.s32.totalorder %s11888_s15, 1  ;;  %s11888_s15 = sphi %s11942_s15, %s14_s15  }
   0x2   : > { %p171_p1 = scmp.lt.s32.totalorder %s11888_s15, 3 }
   0x4   : > { %p172_p2 = pnand %p9674_p0, %p171_p1 }
   0x6   : > { %175 = sbr.rel (%p172_p2) target bundleno = 1939 (0x793), region = 36 }
   0xd   : > { %v11953_v0 = vld [vmem:[%s18119_s3 + $0x10] sm:$0xff]  ;;  %v11958_v1 = vld [vmem:[%s18119_s3] sm:$0xff]  ;;  %p201_p3 = scmp.lt.s32.totalorder %s9670_s16, 1  ;;  %vm287_vm0 = vcmask 261120   ;;  %v11890_v2 = vmov 0   ;;  %v11970_v4 = vld [vmem:[%s18119_s3 + $0x18] sm:$0xff]  ;;  %v18121_v24 = vlaneseq }
   0xe   : > { %11485 = vset.pattern.permute.xlu1 %v11890_v2  ;;  %11484 = vset.pattern.permute.xlu0 %v11890_v2  ;;  %v247_v3 = vld [vmem:[%s18118_s2] sm:$0xff]  ;;  %v11975_v5 = vld [vmem:[%s18119_s3 + $0x8] sm:$0xff]  ;;  %vm1885_vm1 = vcmask 531464   ;;  %v12018_v16 = vld [vmem:[%s18119_s3 + $0x38] sm:$0xff]  ;;  %s11891_s25 = smov 127   ;;  %v11892_v28 = vmov 1  }
   0xf   : > { %693 = vperm.xlu1 %11485, %v11953_v0   ;;  %683 = vperm.xlu0 %11484, %v11958_v1   ;;  %s19032_s16 = smov (!%p201_p3, %s9670_s16), 1  ;;  %v267_v6 = vld [vmem:[%s18118_s2 + $0xa0] sm:$0xff]  ;;  %v12001_v11 = vld [vmem:[%s18119_s3 + $0x28] sm:$0xff]  ;;  %v12023_v17 = vld [vmem:[%s18119_s3 + $0x30] sm:$0xff]  ;;  %v12055_v30 = vand.u32 127, %v18121_v24  ;;  %v11893_v50 = vmov 0.0  }
  0x10   : > { %10768 = vmatprep.mubr.msk.f32.mxu0 %vm287_vm0, %v247_v3  ;;  %s10363_s27 = sshll.u32 %s19032_s16, 5  ;;  %s9675_s5 = sshll.u32 %s19032_s16, 3  ;;  %v12006_v12 = vld [vmem:[%s18119_s3 + $0x20] sm:$0xff]  ;;  %10798 = vmatprep.mubr.msk.f32.mxu1 %vm287_vm0, %v267_v6  ;;  %v248_v20 = vld [vmem:[%s18118_s2 + $0x8] sm:$0xff]  ;;  %v249_v23 = vld [vmem:[%s18118_s2 + $0x10] sm:$0xff]  ;;  %v11895_v56 = vmov 2  }
  0x11   : > { %s11982_s30 = scalar_lea.vmem %s18117_s1, %s10363_s27  ;;  %s11996_s10 = scalar_lea.vmem %s18116_s0, %s9675_s5  ;;  %v268_v25 = vld [vmem:[%s18118_s2 + $0xa8] sm:$0xff]  ;;  %v250_v26 = vld [vmem:[%s18118_s2 + $0x18] sm:$0xff]  ;;  %v251_v29 = vld [vmem:[%s18118_s2 + $0x20] sm:$0xff]  ;;  %v221_v36 = vand.u32 7, %v12055_v30  ;;  %vm5069_vm4 = vcmask 597064   ;;  %vm2948_vm5 = vcmask 539664  }
  0x12   : > { %v241_v7 = vld [vmem:[%s11982_s30] sm:$0xff]  ;;  %v242_v8 = vld [vmem:[%s11982_s30 + $0x8] sm:$0xff]  ;;  %v243_v9 = vld [vmem:[%s11982_s30 + $0x10] sm:$0xff]  ;;  %s11894_s21 = smov 2   ;;  %s11896_s6 = smov 126   ;;  %vm4011_vm6 = vcmask 588864  }
  0x13   : > { %698 = vperm.xlu1 %11485, %v11970_v4   ;;  %688 = vperm.xlu0 %11484, %v11975_v5   ;;  %v11372_v10 = vpack.c.bf16 %v242_v8, %v241_v7  ;;  %v244_v13 = vld [vmem:[%s11982_s30 + $0x18] sm:$0xff]  ;;  %v12011_v15 = vld [vmem:[%s11996_s10] sm:$0xff]  ;;  %v12034_v21 = vpack.i.bf16 %v242_v8, %v241_v7  ;;  %v269_v31 = vld [vmem:[%s18118_s2 + $0xb0] sm:$0xff]  ;;  %v235_v41 = vadd.s32 1, %v221_v36  ;;  %s11897_s22 = smov 8   ;;  %s11898_s23 = smov 120  }
  0x14   : > { %v11376_v14 = vpack.c.bf16 %v244_v13, %v243_v9  ;;  %v1906_v18 = vsel %vm1885_vm1, %v12011_v15, 0.0  ;;  %v12029_v19 = vpack.i.bf16 %v244_v13, %v243_v9  ;;  %v270_v32 = vld [vmem:[%s18118_s2 + $0xb8] sm:$0xff]  ;;  %v252_v33 = vld [vmem:[%s18118_s2 + $0x28] sm:$0xff]  ;;  %v253_v35 = vld [vmem:[%s18118_s2 + $0x30] sm:$0xff]  ;;  %s11900_s24 = smov 119   ;;  %s11902_s26 = smov 112  }
  0x15   : > { %11373 = vmatprep.subr.bf16.mxu0 %v11372_v10  ;;  %11444 = vmatprep.subr.bf16.mxu1 %v11372_v10  ;;  %v1907_v22 = vrot.slane %v1906_v18, 4  ;;  %v271_v37 = vld [vmem:[%s18118_s2 + $0xc0] sm:$0xff]  ;;  %v272_v38 = vld [vmem:[%s18118_s2 + $0xc8] sm:$0xff]  ;;  %v254_v39 = vld [vmem:[%s18118_s2 + $0x38] sm:$0xff]  ;;  %vm237_vm2 = vcmp.lt.s32.totalorder %v235_v41, 8  ;;  %s11904_s27 = smov 10  }
  0x16   : > { %11375 = vmatpush3.bf16.msra.mxu0 %v11372_v10  ;;  %11446 = vmatpush3.bf16.msra.mxu1 %v11372_v10  ;;  %v255_v42 = vld [vmem:[%s18118_s2 + $0x40] sm:$0xff]  ;;  %v273_v43 = vld [vmem:[%s18118_s2 + $0xd0] sm:$0xff]  ;;  %v274_v44 = vld [vmem:[%s18118_s2 + $0xd8] sm:$0xff]  ;;  %v12125_v51 = vsel %vm237_vm2, 1.0, %v11893_v50  ;;  %v229_v10 = vadd.s32 4294967295, %v221_v36  ;;  %s11905_s28 = smov 118  }
  0x17   : > { %708 = vperm.xlu1 %11485, %v12001_v11   ;;  %703 = vperm.xlu0 %11484, %v12006_v12   ;;  %v1908_v27 = vadd.f32 %v1907_v22, %v1906_v18  ;;  %v256_v46 = vld [vmem:[%s18118_s2 + $0x48] sm:$0xff]  ;;  %v257_v47 = vld [vmem:[%s18118_s2 + $0x50] sm:$0xff]  ;;  %v275_v48 = vld [vmem:[%s18118_s2 + $0xe0] sm:$0xff]  ;;  %18165 = vst [vmem:[#allocation2_spill] sm:$0xff] %v12125_v51  ;;  %s11906_s29 = smov 111   ;;  %vm729_vm7 = vcmask 523264  }
  0x18   : > { %11377 = vmatprep.subr.bf16.mxu0 %v11376_v14  ;;  %11445 = vmatprep.subr.bf16.mxu1 %v11376_v14  ;;  %v276_v49 = vld [vmem:[%s18118_s2 + $0xe8] sm:$0xff]  ;;  %v258_v53 = vld [vmem:[%s18118_s2 + $0x58] sm:$0xff]  ;;  %v259_v54 = vld [vmem:[%s18118_s2 + $0x60] sm:$0xff]  ;;  %vm230_vm3 = vcmp.ge.s32.totalorder %v229_v10, 0  ;;  %vm6131_vm8 = vcmask 605264   ;;  %s11908_s5 = smov 110  }
  0x19   : > { %v1909_v34 = vrot.slane %v1908_v27, 2  ;;  %v277_v55 = vld [vmem:[%s18118_s2 + $0xf0] sm:$0xff]  ;;  %v260_v57 = vld [vmem:[%s18118_s2 + $0x68] sm:$0xff]  ;;  %v278_v59 = vld [vmem:[%s18118_s2 + $0xf8] sm:$0xff]  ;;  %s11910_s13 = smov 16   ;;  %vm7193_vm9 = vcmask 654464  }
  0x1a   : > { %11379 = vmatpush3.bf16.msra.mxu0 %v11376_v14  ;;  %11447 = vmatpush3.bf16.msra.mxu1 %v11376_v14  ;;  %v261_v58 = vld [vmem:[%s18118_s2 + $0x70] sm:$0xff]  ;;  %v279_v60 = vld [vmem:[%s18118_s2 + $0x100] sm:$0xff]  ;;  %v262_v61 = vld [vmem:[%s18118_s2 + $0x78] sm:$0xff]  ;;  %vm8251_vm10 = vcmask 662664   ;;  %vm9313_vm11 = vcmask 670864  }
  0x1b   : > { %718 = vperm.xlu1 %11485, %v12018_v16   ;;  %713 = vperm.xlu0 %11484, %v12023_v17   ;;  %v1910_v40 = vadd.f32 %v1909_v34, %v1908_v27  ;;  %v263_v62 = vld [vmem:[%s18118_s2 + $0x80] sm:$0xff]  ;;  %v280_v63 = vld [vmem:[%s18118_s2 + $0x108] sm:$0xff]  ;;  %v281_v2 = vld [vmem:[%s18118_s2 + $0x110] sm:$0xff]  ;;  %v11901_v27 = vmov 4  }
  0x1c   : > { %v264_v3 = vld [vmem:[%s18118_s2 + $0x88] sm:$0xff]  ;;  %v265_v6 = vld [vmem:[%s18118_s2 + $0x90] sm:$0xff]  ;;  %v282_v7 = vld [vmem:[%s18118_s2 + $0x118] sm:$0xff] }
  0x1d   : > { %10769 = vmatmul.mubr.msk.f32.vlgmr.msra.gmra.mrb[0].mxu0 %vm287_vm0, %v248_v20  ;;  %10799 = vmatmul.mubr.msk.f32.vlgmr.msra.gmra.mrb[0].mxu1 %vm287_vm0, %v268_v25  ;;  %v1911_v45 = vrot.slane %v1910_v40, 1  ;;  %v283_v8 = vld [vmem:[%s18118_s2 + $0x120] sm:$0xff]  ;;  %v266_v9 = vld [vmem:[%s18118_s2 + $0x98] sm:$0xff]  ;;  %v284_v13 = vld [vmem:[%s18118_s2 + $0x128] sm:$0xff]  ;;  %v11899_v25 = vmov 3  }
  0x1e   : > { %10771 = vmatprep.mubr.msk.f32.mxu0 %vm287_vm0, %v249_v23  ;;  %10801 = vmatprep.mubr.msk.f32.mxu1 %vm287_vm0, %v269_v31  ;;  %v9801_v14 = vld [vmem:[%s18118_s2 + $0x280] sm:$0xff]  ;;  %v285_v18 = vld [vmem:[%s18118_s2 + $0x130] sm:$0xff]  ;;  %v286_v20 = vld [vmem:[%s18118_s2 + $0x138] sm:$0xff]  ;;  %v12230_v23 = vsel %vm230_vm3, 1.0, %v11893_v50 }
  0x1f   : > { %11492 = vrot.lane.b32.xlu1 %v12029_v19, %s11891_s25  ;;  %11487 = vrot.lane.b32.xlu0 %v12034_v21, %s11891_s25  ;;  %v1912_v52 = vadd.f32 %v1911_v45, %v1910_v40  ;;  %v9721_v22 = vld [vmem:[%s18118_s2 + $0x140] sm:$0xff]  ;;  %v7469_v36 = vld [vmem:[%s11982_s30 + $0x18] sm:$0xff] }
  0x20   : > { %11497 = vset.pattern.permute.xlu1 %v11892_v28  ;;  %11496 = vset.pattern.permute.xlu0 %v11892_v28  ;;  %v9723_v50 = vld [vmem:[%s18118_s2 + $0x150] sm:$0xff] }
  0x21   : > { %10772 = vmatmul.mubr.msk.f32.gmra.mrb[2].mxu0 %vm287_vm0, %v250_v26  ;;  %10802 = vmatmul.mubr.msk.f32.gmra.mrb[2].mxu1 %vm287_vm0, %v270_v32  ;;  %v5090_v26 = vsel %vm5069_vm4, %v12011_v15, 0.0  ;;  %v11903_v32 = vmov 5  }
  0x22   : > { %10774 = vmatprep.mubr.msk.f32.mxu0 %vm287_vm0, %v251_v29  ;;  %10804 = vmatprep.mubr.msk.f32.mxu1 %vm287_vm0, %v271_v37  ;;  %v5091_v28 = vrot.slane %v5090_v26, 4 }
  0x23   : > { %1562 = vperm.xlu1 %11497, %v11975_v5   ;;  %1557 = vperm.xlu0 %11496, %v11958_v1  }
  0x24   : > { %v5092_v29 = vadd.f32 %v5091_v28, %v5090_v26 }
  0x25   : > { %10775 = vmatmul.mubr.msk.f32.gmra.mrb[4].mxu0 %vm287_vm0, %v252_v33  ;;  %10805 = vmatmul.mubr.msk.f32.gmra.mrb[4].mxu1 %vm287_vm0, %v272_v38 }
  0x26   : > { %10777 = vmatprep.mubr.msk.f32.mxu0 %vm287_vm0, %v253_v35  ;;  %10807 = vmatprep.mubr.msk.f32.mxu1 %vm287_vm0, %v273_v43  ;;  %v5093_v30 = vrot.slane %v5092_v29, 2 }
  0x27   : > { %1567 = vperm.xlu1 %11497, %v11953_v0   ;;  %1572 = vperm.xlu0 %11496, %v11970_v4  }
  0x28   : > { %v5094_v31 = vadd.f32 %v5093_v30, %v5092_v29  ;;  %v9732_v30 = vld [vmem:[%s18118_s2 + $0x198] sm:$0xff] }
  0x29   : > { %10778 = vmatmul.mubr.msk.f32.gmra.mrb[6].mxu0 %vm287_vm0, %v254_v39  ;;  %10808 = vmatmul.mubr.msk.f32.gmra.mrb[6].mxu1 %vm287_vm0, %v274_v44 }
  0x2a   : > { %10780 = vmatprep.mubr.msk.f32.mxu0 %vm287_vm0, %v255_v42  ;;  %10810 = vmatprep.mubr.msk.f32.mxu1 %vm287_vm0, %v275_v48  ;;  %v5095_v33 = vrot.slane %v5094_v31, 1 }
  0x2b   : > { %1577 = vperm.xlu1 %11497, %v12006_v12   ;;  %1582 = vperm.xlu0 %11496, %v12001_v11  }
  0x2c   : > { %v5096_v34 = vadd.f32 %v5095_v33, %v5094_v31 }
  0x2d   : > { %10781 = vmatmul.mubr.msk.f32.gmra.mrb[8].mxu0 %vm287_vm0, %v256_v46  ;;  %10811 = vmatmul.mubr.msk.f32.gmra.mrb[8].mxu1 %vm287_vm0, %v276_v49  ;;  %v9722_v49 = vld [vmem:[%s18118_s2 + $0x148] sm:$0xff] }
  0x2e   : > { %10783 = vmatprep.mubr.msk.f32.mxu0 %vm287_vm0, %v257_v47  ;;  %10813 = vmatprep.mubr.msk.f32.mxu1 %vm287_vm0, %v277_v55  ;;  %v9725_v55 = vld [vmem:[%s18118_s2 + $0x160] sm:$0xff] }
  0x2f   : > { %1587 = vperm.xlu1 %11497, %v12023_v17   ;;  %1592 = vperm.xlu0 %11496, %v12018_v16  }
  0x31   : > { %10784 = vmatmul.mubr.msk.f32.gmra.mrb[10].mxu0 %vm287_vm0, %v258_v53  ;;  %10814 = vmatmul.mubr.msk.f32.gmra.mrb[10].mxu1 %vm287_vm0, %v278_v59  ;;  %v9727_v59 = vld [vmem:[%s18118_s2 + $0x170] sm:$0xff] }
  0x32   : > { %10786 = vmatprep.mubr.msk.f32.mxu0 %vm287_vm0, %v259_v54  ;;  %10816 = vmatprep.mubr.msk.f32.mxu1 %vm287_vm0, %v279_v60  ;;  %v9724_v54 = vld [vmem:[%s18118_s2 + $0x158] sm:$0xff] }
  0x33   : > { %2164 = vrot.lane.b32.xlu1 %v12125_v51, %s11894_s21  ;;  %1914 = vrot.lane.b32.xlu0 %v1912_v52, %s11891_s25 }
  0x34   : > { %11509 = vset.pattern.permute.xlu1 %v11895_v56  ;;  %11508 = vset.pattern.permute.xlu0 %v11895_v56 }
  0x35   : > { %10787 = vmatmul.mubr.msk.f32.gmra.mrb[12].mxu0 %vm287_vm0, %v260_v57  ;;  %10817 = vmatmul.mubr.msk.f32.gmra.mrb[12].mxu1 %vm287_vm0, %v280_v63  ;;  %v9728_v63 = vld [vmem:[%s18118_s2 + $0x178] sm:$0xff] }
  0x36   : > { %10789 = vmatprep.mubr.msk.f32.mxu0 %vm287_vm0, %v261_v58  ;;  %10819 = vmatprep.mubr.msk.f32.mxu1 %vm287_vm0, %v281_v2  ;;  %v9726_v58 = vld [vmem:[%s18118_s2 + $0x168] sm:$0xff] }
  0x37   : > { %11504 = vrot.lane.b32.xlu1 %v12029_v19, %s11896_s6  ;;  %11499 = vrot.lane.b32.xlu0 %v12034_v21, %s11896_s6 }
  0x39   : > { %10790 = vmatmul.mubr.msk.f32.gmra.mrb[14].mxu0 %vm287_vm0, %v262_v61  ;;  %10820 = vmatmul.mubr.msk.f32.gmra.mrb[14].mxu1 %vm287_vm0, %v282_v7 }
  0x3a   : > { %10792 = vmatprep.mubr.msk.f32.mxu0 %vm287_vm0, %v263_v62  ;;  %10822 = vmatprep.mubr.msk.f32.mxu1 %vm287_vm0, %v283_v8 }
  0x3b   : > { %2625 = vperm.xlu1 %11509, %v11975_v5   ;;  %2620 = vperm.xlu0 %11508, %v11958_v1  }
  0x3d   : > { %10793 = vmatmul.mubr.msk.f32.gmra.mrb[16].mxu0 %vm287_vm0, %v264_v3  ;;  %10823 = vmatmul.mubr.msk.f32.gmra.mrb[16].mxu1 %vm287_vm0, %v284_v13  ;;  %v9729_v3 = vld [vmem:[%s18118_s2 + $0x180] sm:$0xff] }
  0x3e   : > { %10795 = vmatprep.mubr.msk.f32.mxu0 %vm287_vm0, %v265_v6  ;;  %10825 = vmatprep.mubr.msk.f32.mxu1 %vm287_vm0, %v285_v18 }
  0x3f   : > { %2630 = vperm.xlu1 %11509, %v11953_v0   ;;  %2635 = vperm.xlu0 %11508, %v11970_v4  }
  0x41   : > { %10796 = vmatmul.mubr.msk.f32.gmra.mrb[18].mxu0 %vm287_vm0, %v266_v9  ;;  %10826 = vmatmul.mubr.msk.f32.gmra.mrb[18].mxu1 %vm287_vm0, %v286_v20  ;;  %v9730_v20 = vld [vmem:[%s18118_s2 + $0x188] sm:$0xff] }
  0x42   : > { %10904 = vmatprep.mubr.msk.f32.mxu0 %vm287_vm0, %v9801_v14  ;;  %10836 = vmatprep.mubr.msk.f32.mxu1 %vm287_vm0, %v9721_v22  ;;  %v9731_v22 = vld [vmem:[%s18118_s2 + $0x190] sm:$0xff] }
  0x43   : > { %2640 = vperm.xlu1 %11509, %v12006_v12   ;;  %2645 = vperm.xlu0 %11508, %v12001_v11  }
  0x47   : > { %2650 = vperm.xlu1 %11509, %v12023_v17   ;;  %2655 = vperm.xlu0 %11508, %v12018_v16  }
  0x4b   : > { %3227 = vrot.lane.b32.xlu1 %v12230_v23, %s11897_s22  ;;  %11511 = vrot.lane.b32.xlu0 %v12034_v21, %s11898_s23 }
  0x4c   : > { %11521 = vset.pattern.permute.xlu1 %v11899_v25  ;;  %11520 = vset.pattern.permute.xlu0 %v11899_v25 }
  0x4f   : > { %11516 = vrot.lane.b32.xlu1 %v12029_v19, %s11898_s23  ;;  %3683 = vperm.xlu0 %11520, %v11958_v1  }
  0x53   : > { %3688 = vperm.xlu1 %11521, %v11975_v5   ;;  %3698 = vperm.xlu0 %11520, %v11970_v4  }
  0x57   : > { %3693 = vperm.xlu1 %11521, %v11953_v0   ;;  %3708 = vperm.xlu0 %11520, %v12001_v11  }
  0x5b   : > { %3703 = vperm.xlu1 %11521, %v12006_v12   ;;  %3718 = vperm.xlu0 %11520, %v12018_v16  }
  0x5f   : > { %3713 = vperm.xlu1 %11521, %v12023_v17   ;;  %11528 = vrot.lane.b32.xlu0 %v12029_v19, %s11900_s24 }
  0x60   : > { %11533 = vset.pattern.permute.xlu0 %v11901_v27 }
  0x63   : > { %11523 = vrot.lane.b32.xlu1 %v12034_v21, %s11900_s24  ;;  %4746 = vperm.xlu0 %11533, %v11975_v5  }
  0x64   : > { %11532 = vset.pattern.permute.xlu1 %v11901_v27 }
  0x67   : > { %4741 = vperm.xlu1 %11532, %v11958_v1   ;;  %4761 = vperm.xlu0 %11533, %v12006_v12  }
  0x6b   : > { %4751 = vperm.xlu1 %11532, %v11953_v0   ;;  %4771 = vperm.xlu0 %11533, %v12023_v17  }
  0x6f   : > { %4756 = vperm.xlu1 %11532, %v11970_v4   ;;  %11540 = vrot.lane.b32.xlu0 %v12034_v21, %s11902_s26 }
  0x70   : > { %11555 = vset.pattern.permute.xlu0 %v11903_v32 }
  0x73   : > { %4766 = vperm.xlu1 %11532, %v12001_v11   ;;  %11550 = vrot.lane.b32.xlu0 %v12029_v19, %s11902_s26 }
  0x77   : > { %4776 = vperm.xlu1 %11532, %v12018_v16   ;;  %5347 = vrot.lane.b32.xlu0 %v12125_v51, %s11904_s27 }
  0x7b   : > { %5098 = vrot.lane.b32.xlu1 %v5096_v34, %s11900_s24  ;;  %5808 = vperm.xlu0 %11555, %v11975_v5  }
  0x7c   : > { %11554 = vset.pattern.permute.xlu1 %v11903_v32  ;;  %v9733_v32 = vld [vmem:[%s18118_s2 + $0x1a0] sm:$0xff] }
  0x7f   : > { %11535 = vrot.lane.b32.xlu1 %v12034_v21, %s11905_s28  ;;  %5823 = vperm.xlu0 %11555, %v12006_v12   ;;  %v7468_v12 = vld [vmem:[%s11982_s30 + $0x10] sm:$0xff] }
  0x83   : > { %11545 = vrot.lane.b32.xlu1 %v12029_v19, %s11905_s28 }
  0x87   : > { %5803 = vperm.xlu1 %11554, %v11958_v1  }
  0x8b   : > { %5813 = vperm.xlu1 %11554, %v11953_v0   ;;  %v11566_v0 = vpack.i.bf16 %v7469_v36, %v7468_v12 }
  0x8e   : > { %v12277_v16 = vpop.permute.xlu1 %693  ;;  %v12279_v17 = vpop.permute.xlu0 %683 }
  0x8f   : > { %5818 = vperm.xlu1 %11554, %v11970_v4  }
  0x92   : > { %v12282_v5 = vpop.permute.xlu1 %698  ;;  %v12284_v35 = vpop.permute.xlu0 %688 }
  0x93   : > { %5828 = vperm.xlu1 %11554, %v12001_v11   ;;  %v5800_v11 = vld [vmem:[%s18119_s3 + $0x38] sm:$0xff] }
  0x96   : > { %v12289_v37 = vpop.permute.xlu1 %708  ;;  %v12291_v19 = vpop.permute.xlu0 %703 }
  0x97   : > { %11557 = vrot.lane.b32.xlu1 %v12034_v21, %s11906_s29 }
  0x9a   : > { %v12295_v1 = vpop.permute.xlu1 %718  ;;  %v12297_v4 = vpop.permute.xlu0 %713 }
  0x9b   : > { %11567 = vrot.lane.b32.xlu1 %v11566_v0, %s11906_s29  ;;  %v9734_v0 = vld [vmem:[%s18118_s2 + $0x1a8] sm:$0xff] }
  0x9e   : > { %v11493_v38 = vpop.permute.xlu1 %11492  ;;  %v11488_v39 = vpop.permute.xlu0 %11487 }
  0x9f   : > { %v11495_v40 = vunpack.i.h.bf16 %v11493_v38  ;;  %v11494_v41 = vunpack.i.l.bf16 %v11493_v38  ;;  %v11490_v42 = vunpack.i.h.bf16 %v11488_v39  ;;  %v11489_v43 = vunpack.i.l.bf16 %v11488_v39  ;;  %5838 = vperm.xlu1 %11554, %v5800_v11   ;;  %v9802_v11 = vld [vmem:[%s18118_s2 + $0x288] sm:$0xff]  ;;  %v9735_v38 = vld [vmem:[%s18118_s2 + $0x1b0] sm:$0xff] }
  0xa1   : > { %v11380_v44 = vpack.c.bf16 %v11490_v42, %v11489_v43  ;;  %v11384_v46 = vpack.c.bf16 %v11495_v40, %v11494_v41  ;;  %v9803_v40 = vld [vmem:[%s18118_s2 + $0x290] sm:$0xff]  ;;  %v9736_v42 = vld [vmem:[%s18118_s2 + $0x1b8] sm:$0xff] }
  0xa2   : > { %v12303_v21 = vpop.permute.xlu1 %1562  ;;  %v12305_v45 = vpop.permute.xlu0 %1557  ;;  %v9804_v43 = vld [vmem:[%s18118_s2 + $0x298] sm:$0xff] }
  0xa3   : > { %18166 = vst [vmem:[#allocation3_spill] sm:$0xff] %v12303_v21  ;;  %18167 = vst [vmem:[#allocation4_spill] sm:$0xff] %v12305_v45  ;;  %11381 = vmatprep.subr.bf16.mxu1 %v11380_v44 }
  0xa4   : > { %11383 = vmatpush3.bf16.msra.mxu1 %v11380_v44  ;;  %v9737_v44 = vld [vmem:[%s18118_s2 + $0x1c0] sm:$0xff] }
  0xa5   : > { %11385 = vmatprep.subr.bf16.mxu1 %v11384_v46 }
  0xa6   : > { %v12307_v47 = vpop.permute.xlu1 %1567  ;;  %v12309_v48 = vpop.permute.xlu0 %1572 }
  0xa7   : > { %18168 = vst [vmem:[#allocation5_spill] sm:$0xff] %v12307_v47  ;;  %18169 = vst [vmem:[#allocation6_spill] sm:$0xff] %v12309_v48 }
  0xa8   : > { %11387 = vmatpush3.bf16.msra.mxu1 %v11384_v46 }
  0xaa   : > { %v12317_v52 = vpop.permute.xlu1 %1577  ;;  %v12319_v53 = vpop.permute.xlu0 %1582 }
  0xab   : > { %18170 = vst [vmem:[#allocation7_spill] sm:$0xff] %v12317_v52  ;;  %18171 = vst [vmem:[#allocation8_spill] sm:$0xff] %v12319_v53  ;;  %10837 = vmatmul.mubr.msk.f32.vlgmr.msra.gmra.mrb[20].mxu1 %vm287_vm0, %v9722_v49  ;;  %v9805_v49 = vld [vmem:[%s18118_s2 + $0x2a0] sm:$0xff]  ;;  %v8526_v52 = vld [vmem:[%s11982_s30 + $0x10] sm:$0xff] }
  0xac   : > { %10839 = vmatprep.mubr.msk.f32.mxu1 %vm287_vm0, %v9723_v50 }
  0xae   : > { %v12329_v56 = vpop.permute.xlu1 %1587  ;;  %v12331_v57 = vpop.permute.xlu0 %1592 }
  0xaf   : > { %18172 = vst [vmem:[#allocation9_spill] sm:$0xff] %v12329_v56  ;;  %18173 = vst [vmem:[#allocation10_spill] sm:$0xff] %v12331_v57  ;;  %10840 = vmatmul.mubr.msk.f32.gmra.mrb[22].mxu1 %vm287_vm0, %v9724_v54  ;;  %v9738_v54 = vld [vmem:[%s18118_s2 + $0x1c8] sm:$0xff] }
  0xb0   : > { %10842 = vmatprep.mubr.msk.f32.mxu1 %vm287_vm0, %v9725_v55  ;;  %v9806_v55 = vld [vmem:[%s18118_s2 + $0x2a8] sm:$0xff] }
  0xb2   : > { %v2165_v60 = vpop.permute.xlu1 %2164  ;;  %v12344_v62 = vpop.permute.xlu0 %1914 }
  0xb3   : > { %v12342_v61 = vmul.f32 %v2165_v60, %v12011_v15  ;;  %18175 = vst [vmem:[#allocation12_spill] sm:$0xff] %v12344_v62  ;;  %10843 = vmatmul.mubr.msk.f32.gmra.mrb[24].mxu1 %vm287_vm0, %v9726_v58  ;;  %v9739_v58 = vld [vmem:[%s18118_s2 + $0x1d0] sm:$0xff]  ;;  %v18202_v62 = vlaneseq }
  0xb4   : > { %10845 = vmatprep.mubr.msk.f32.mxu1 %vm287_vm0, %v9727_v59  ;;  %v9807_v60 = vld [vmem:[%s18118_s2 + $0x2b0] sm:$0xff] }
  0xb5   : > { %18174 = vst [vmem:[#allocation11_spill] sm:$0xff] %v12342_v61  ;;  %v2969_v2 = vsel %vm2948_vm5, %v12342_v61, 0.0  ;;  %v12684_v51 = vshrl.u32 %v18202_v62, 7 }
  0xb6   : > { %v2970_v6 = vrot.slane %v2969_v2, 4  ;;  %v11505_v7 = vpop.permute.xlu1 %11504  ;;  %v11500_v10 = vpop.permute.xlu0 %11499 }
  0xb7   : > { %v11507_v8 = vunpack.i.h.bf16 %v11505_v7  ;;  %v11506_v9 = vunpack.i.l.bf16 %v11505_v7  ;;  %10846 = vmatmul.mubr.msk.f32.gmra.mrb[26].mxu1 %vm287_vm0, %v9728_v63  ;;  %v11502_v14 = vunpack.i.h.bf16 %v11500_v10  ;;  %v11501_v18 = vunpack.i.l.bf16 %v11500_v10  ;;  %v9740_v7 = vld [vmem:[%s18118_s2 + $0x1d8] sm:$0xff] }
  0xb8   : > { %v2971_v13 = vadd.f32 %v2970_v6, %v2969_v2  ;;  %10848 = vmatprep.mubr.msk.f32.mxu1 %vm287_vm0, %v9729_v3 }
  0xb9   : > { %v11388_v26 = vpack.c.bf16 %v11502_v14, %v11501_v18  ;;  %v11392_v27 = vpack.c.bf16 %v11507_v8, %v11506_v9  ;;  %v9741_v9 = vld [vmem:[%s18118_s2 + $0x1e0] sm:$0xff] }
  0xba   : > { %v12364_v25 = vpop.permute.xlu1 %2625  ;;  %v2972_v28 = vrot.slane %v2971_v13, 2  ;;  %v12366_v29 = vpop.permute.xlu0 %2620 }
  0xbb   : > { %18176 = vst [vmem:[#allocation13_spill] sm:$0xff] %v12364_v25  ;;  %18177 = vst [vmem:[#allocation14_spill] sm:$0xff] %v12366_v29  ;;  %10849 = vmatmul.mubr.msk.f32.gmra.mrb[28].mxu1 %vm287_vm0, %v9730_v20  ;;  %11389 = vmatprep.subr.bf16.mxu0 %v11388_v26 }
  0xbc   : > { %10851 = vmatprep.mubr.msk.f32.mxu1 %vm287_vm0, %v9731_v22  ;;  %v2973_v31 = vadd.f32 %v2972_v28, %v2971_v13  ;;  %11391 = vmatpush3.bf16.msra.mxu0 %v11388_v26  ;;  %v9809_v13 = vld [vmem:[%s18118_s2 + $0x2c0] sm:$0xff]  ;;  %v9742_v28 = vld [vmem:[%s18118_s2 + $0x1e8] sm:$0xff] }
  0xbd   : > { %11393 = vmatprep.subr.bf16.mxu0 %v11392_v27 }
  0xbe   : > { %v12376_v33 = vpop.permute.xlu1 %2630  ;;  %v2974_v34 = vrot.slane %v2973_v31, 1  ;;  %v12378_v12 = vpop.permute.xlu0 %2635 }
  0xbf   : > { %18178 = vst [vmem:[#allocation15_spill] sm:$0xff] %v12376_v33  ;;  %18179 = vst [vmem:[#allocation16_spill] sm:$0xff] %v12378_v12  ;;  %10852 = vmatmul.mubr.msk.f32.gmra.mrb[30].mxu1 %vm287_vm0, %v9732_v30  ;;  %v9810_v30 = vld [vmem:[%s18118_s2 + $0x2c8] sm:$0xff] }
  0xc0   : > { %10854 = vmatprep.mubr.msk.f32.mxu1 %vm287_vm0, %v9733_v32  ;;  %v2975_v36 = vadd.f32 %v2974_v34, %v2973_v31  ;;  %11395 = vmatpush3.bf16.msra.mxu0 %v11392_v27  ;;  %v9743_v31 = vld [vmem:[%s18118_s2 + $0x1f0] sm:$0xff] }
  0xc1   : > { %v9811_v34 = vld [vmem:[%s18118_s2 + $0x2d0] sm:$0xff] }
  0xc2   : > { %v12391_v39 = vpop.permute.xlu1 %2640  ;;  %2977 = vrot.lane.b32.xlu0 %v2975_v36, %s11896_s6  ;;  %v12397_v41 = vpop.permute.xlu0 %2645 }
  0xc3   : > { %18180 = vst [vmem:[#allocation17_spill] sm:$0xff] %v12391_v39  ;;  %18181 = vst [vmem:[#allocation18_spill] sm:$0xff] %v12397_v41  ;;  %10855 = vmatmul.mubr.msk.f32.gmra.mrb[32].mxu1 %vm287_vm0, %v9734_v0  ;;  %10905 = vmatmul.mubr.msk.f32.vlgmr.msra.gmra.mrb[20].mxu0 %vm287_vm0, %v9802_v11  ;;  %v8527_v41 = vld [vmem:[%s11982_s30 + $0x18] sm:$0xff] }
  0xc4   : > { %10857 = vmatprep.mubr.msk.f32.mxu1 %vm287_vm0, %v9735_v38  ;;  %10907 = vmatprep.mubr.msk.f32.mxu0 %vm287_vm0, %v9803_v40  ;;  %v9744_v38 = vld [vmem:[%s18118_s2 + $0x1f8] sm:$0xff] }
  0xc6   : > { %v12412_v46 = vpop.permute.xlu1 %2650  ;;  %v12417_v50 = vpop.permute.xlu0 %2655 }
  0xc7   : > { %18182 = vst [vmem:[#allocation19_spill] sm:$0xff] %v12412_v46  ;;  %18183 = vst [vmem:[#allocation20_spill] sm:$0xff] %v12417_v50  ;;  %10858 = vmatmul.mubr.msk.f32.gmra.mrb[34].mxu1 %vm287_vm0, %v9736_v42  ;;  %10908 = vmatmul.mubr.msk.f32.gmra.mrb[22].mxu0 %vm287_vm0, %v9804_v43  ;;  %v9812_v42 = vld [vmem:[%s18118_s2 + $0x2d8] sm:$0xff]  ;;  %v9745_v43 = vld [vmem:[%s18118_s2 + $0x200] sm:$0xff] }
  0xc8   : > { %10860 = vmatprep.mubr.msk.f32.mxu1 %vm287_vm0, %v9737_v44  ;;  %10910 = vmatprep.mubr.msk.f32.mxu0 %vm287_vm0, %v9805_v49  ;;  %v9813_v49 = vld [vmem:[%s18118_s2 + $0x2e0] sm:$0xff] }
  0xc9   : > { %v11879_v46 = vld [vmem:[%s11996_s10] sm:$0xff] }
  0xca   : > { %v3228_v59 = vpop.permute.xlu1 %3227  ;;  %v11512_v2 = vpop.permute.xlu0 %11511  ;;  %v12902_v56 = vmul.f32 %v11879_v46, %v12230_v23  ;;  %v9896_v46 = vld [vmem:[%s18118_s2 + $0x438] sm:$0xff] }
  0xcb   : > { %v12436_v63 = vmul.f32 %v3228_v59, %v12011_v15  ;;  %10861 = vmatmul.mubr.msk.f32.gmra.mrb[36].mxu1 %vm287_vm0, %v9738_v54  ;;  %v11514_v3 = vunpack.i.h.bf16 %v11512_v2  ;;  %v11513_v6 = vunpack.i.l.bf16 %v11512_v2  ;;  %10911 = vmatmul.mubr.msk.f32.gmra.mrb[24].mxu0 %vm287_vm0, %v9806_v55  ;;  %v9808_v15 = vld [vmem:[%s18118_s2 + $0x2b8] sm:$0xff]  ;;  %v9746_v59 = vld [vmem:[%s18118_s2 + $0x208] sm:$0xff]  ;;  %v9747_v2 = vld [vmem:[%s18118_s2 + $0x210] sm:$0xff] }
  0xcc   : > { %10863 = vmatprep.mubr.msk.f32.mxu1 %vm287_vm0, %v9739_v58  ;;  %10913 = vmatprep.mubr.msk.f32.mxu0 %vm287_vm0, %v9807_v60  ;;  %v9814_v60 = vld [vmem:[%s18118_s2 + $0x2e8] sm:$0xff]  ;;  %18206 = vst [vmem:[#allocation41_spill] sm:$0xff] %v12902_v56 }
  0xcd   : > { %18184 = vst [vmem:[#allocation21_spill] sm:$0xff] %v12436_v63  ;;  %v4032_v8 = vsel %vm4011_vm6, %v12436_v63, 0.0  ;;  %v11396_v18 = vpack.c.bf16 %v11514_v3, %v11513_v6  ;;  %v9815_v3 = vld [vmem:[%s18118_s2 + $0x2f0] sm:$0xff] }
  0xce   : > { %v4033_v10 = vrot.slane %v4032_v8, 4  ;;  %v11517_v14 = vpop.permute.xlu1 %11516  ;;  %v12456_v20 = vpop.permute.xlu0 %3683 }
  0xcf   : > { %18185 = vst [vmem:[#allocation22_spill] sm:$0xff] %v12456_v20  ;;  %10864 = vmatmul.mubr.msk.f32.gmra.mrb[38].mxu1 %vm287_vm0, %v9740_v7  ;;  %v11519_v22 = vunpack.i.h.bf16 %v11517_v14  ;;  %v11518_v26 = vunpack.i.l.bf16 %v11517_v14  ;;  %10914 = vmatmul.mubr.msk.f32.gmra.mrb[26].mxu0 %vm287_vm0, %v9808_v15  ;;  %v9816_v15 = vld [vmem:[%s18118_s2 + $0x2f8] sm:$0xff] }
  0xd0   : > { %v4034_v27 = vadd.f32 %v4033_v10, %v4032_v8  ;;  %10866 = vmatprep.mubr.msk.f32.mxu1 %vm287_vm0, %v9741_v9  ;;  %10916 = vmatprep.mubr.msk.f32.mxu0 %vm287_vm0, %v9809_v13  ;;  %v9748_v8 = vld [vmem:[%s18118_s2 + $0x218] sm:$0xff]  ;;  %v9749_v9 = vld [vmem:[%s18118_s2 + $0x220] sm:$0xff] }
  0xd1   : > { %11397 = vmatprep.subr.bf16.mxu1 %v11396_v18  ;;  %v11400_v32 = vpack.c.bf16 %v11519_v22, %v11518_v26  ;;  %v9817_v10 = vld [vmem:[%s18118_s2 + $0x300] sm:$0xff]  ;;  %v9818_v22 = vld [vmem:[%s18118_s2 + $0x308] sm:$0xff]  ;;  %v9751_v26 = vld [vmem:[%s18118_s2 + $0x230] sm:$0xff] }
  0xd2   : > { %v4035_v36 = vrot.slane %v4034_v27, 2  ;;  %11399 = vmatpush3.bf16.msra.mxu1 %v11396_v18  ;;  %v12474_v0 = vpop.permute.xlu1 %3688  ;;  %v12476_v11 = vpop.permute.xlu0 %3698  ;;  %v9750_v18 = vld [vmem:[%s18118_s2 + $0x228] sm:$0xff] }
  0xd3   : > { %18186 = vst [vmem:[#allocation23_spill] sm:$0xff] %v12474_v0  ;;  %18187 = vst [vmem:[#allocation24_spill] sm:$0xff] %v12476_v11  ;;  %10867 = vmatmul.mubr.msk.f32.gmra.mrb[40].mxu1 %vm287_vm0, %v9742_v28  ;;  %11401 = vmatprep.subr.bf16.mxu1 %v11400_v32 }
  0xd4   : > { %10917 = vmatmul.mubr.msk.f32.gmra.mrb[28].mxu0 %vm287_vm0, %v9810_v30  ;;  %10869 = vmatprep.mubr.msk.f32.mxu1 %vm287_vm0, %v9743_v31  ;;  %v4036_v40 = vadd.f32 %v4035_v36, %v4034_v27  ;;  %v9819_v30 = vld [vmem:[%s18118_s2 + $0x310] sm:$0xff] }
  0xd5   : > { %10919 = vmatprep.mubr.msk.f32.mxu0 %vm287_vm0, %v9811_v34 }
  0xd6   : > { %v4037_v44 = vrot.slane %v4036_v40, 1  ;;  %11403 = vmatpush3.bf16.msra.mxu1 %v11400_v32  ;;  %v12494_v54 = vpop.permute.xlu1 %3693  ;;  %v12496_v55 = vpop.permute.xlu0 %3708 }
  0xd7   : > { %18188 = vst [vmem:[#allocation25_spill] sm:$0xff] %v12494_v54  ;;  %18189 = vst [vmem:[#allocation26_spill] sm:$0xff] %v12496_v55  ;;  %10870 = vmatmul.mubr.msk.f32.gmra.mrb[42].mxu1 %vm287_vm0, %v9744_v38  ;;  %v9752_v38 = vld [vmem:[%s18118_s2 + $0x238] sm:$0xff] }
  0xd8   : > { %10920 = vmatmul.mubr.msk.f32.gmra.mrb[30].mxu0 %vm287_vm0, %v9812_v42  ;;  %10872 = vmatprep.mubr.msk.f32.mxu1 %vm287_vm0, %v9745_v43  ;;  %v4038_v58 = vadd.f32 %v4037_v44, %v4036_v40  ;;  %v9820_v40 = vld [vmem:[%s18118_s2 + $0x318] sm:$0xff]  ;;  %v9753_v42 = vld [vmem:[%s18118_s2 + $0x240] sm:$0xff] }
  0xd9   : > { %10922 = vmatprep.mubr.msk.f32.mxu0 %vm287_vm0, %v9813_v49  ;;  %v9821_v44 = vld [vmem:[%s18118_s2 + $0x320] sm:$0xff] }
  0xda   : > { %4040 = vrot.lane.b32.xlu0 %v4038_v58, %s11898_s23  ;;  %v12515_v6 = vpop.permute.xlu1 %3703  ;;  %v12517_v7 = vpop.permute.xlu0 %3718 }
  0xdb   : > { %18190 = vst [vmem:[#allocation27_spill] sm:$0xff] %v12515_v6  ;;  %18191 = vst [vmem:[#allocation28_spill] sm:$0xff] %v12517_v7  ;;  %10873 = vmatmul.mubr.msk.f32.gmra.mrb[44].mxu1 %vm287_vm0, %v9746_v59 }
  0xdc   : > { %10923 = vmatmul.mubr.msk.f32.gmra.mrb[32].mxu0 %vm287_vm0, %v9814_v60  ;;  %10875 = vmatprep.mubr.msk.f32.mxu1 %vm287_vm0, %v9747_v2  ;;  %v9754_v60 = vld [vmem:[%s18118_s2 + $0x248] sm:$0xff] }
  0xdd   : > { %10925 = vmatprep.mubr.msk.f32.mxu0 %vm287_vm0, %v9815_v3  ;;  %v9822_v2 = vld [vmem:[%s18118_s2 + $0x328] sm:$0xff]  ;;  %v9755_v3 = vld [vmem:[%s18118_s2 + $0x250] sm:$0xff] }
  0xde   : > { %v12535_v13 = vpop.permute.xlu1 %3713  ;;  %v11529_v14 = vpop.permute.xlu0 %11528 }
  0xdf   : > { %18192 = vst [vmem:[#allocation29_spill] sm:$0xff] %v12535_v13  ;;  %10876 = vmatmul.mubr.msk.f32.gmra.mrb[46].mxu1 %vm287_vm0, %v9748_v8  ;;  %v11531_v27 = vunpack.i.h.bf16 %v11529_v14  ;;  %v11530_v28 = vunpack.i.l.bf16 %v11529_v14  ;;  %v9823_v8 = vld [vmem:[%s18118_s2 + $0x330] sm:$0xff]  ;;  %v9824_v14 = vld [vmem:[%s18118_s2 + $0x338] sm:$0xff] }
  0xe0   : > { %10926 = vmatmul.mubr.msk.f32.gmra.mrb[34].mxu0 %vm287_vm0, %v9816_v15  ;;  %10878 = vmatprep.mubr.msk.f32.mxu1 %vm287_vm0, %v9749_v9 }
  0xe1   : > { %10928 = vmatprep.mubr.msk.f32.mxu0 %vm287_vm0, %v9817_v10  ;;  %v11408_v49 = vpack.c.bf16 %v11531_v27, %v11530_v28  ;;  %v9756_v10 = vld [vmem:[%s18118_s2 + $0x258] sm:$0xff] }
  0xe2   : > { %v11524_v31 = vpop.permute.xlu1 %11523  ;;  %v12553_v32 = vpop.permute.xlu0 %4746 }
  0xe3   : > { %18193 = vst [vmem:[#allocation30_spill] sm:$0xff] %v12553_v32  ;;  %10879 = vmatmul.mubr.msk.f32.gmra.mrb[48].mxu1 %vm287_vm0, %v9750_v18  ;;  %v11526_v34 = vunpack.i.h.bf16 %v11524_v31  ;;  %v11525_v36 = vunpack.i.l.bf16 %v11524_v31  ;;  %v9757_v18 = vld [vmem:[%s18118_s2 + $0x260] sm:$0xff]  ;;  %v9758_v31 = vld [vmem:[%s18118_s2 + $0x268] sm:$0xff] }
  0xe4   : > { %10929 = vmatmul.mubr.msk.f32.gmra.mrb[36].mxu0 %vm287_vm0, %v9818_v22  ;;  %10881 = vmatprep.mubr.msk.f32.mxu1 %vm287_vm0, %v9751_v26  ;;  %v9825_v22 = vld [vmem:[%s18118_s2 + $0x340] sm:$0xff] }
  0xe5   : > { %10931 = vmatprep.mubr.msk.f32.mxu0 %vm287_vm0, %v9819_v30  ;;  %v11404_v43 = vpack.c.bf16 %v11526_v34, %v11525_v36  ;;  %v9826_v34 = vld [vmem:[%s18118_s2 + $0x348] sm:$0xff]  ;;  %v9759_v36 = vld [vmem:[%s18118_s2 + $0x270] sm:$0xff] }
  0xe6   : > { %v12571_v58 = vpop.permute.xlu1 %4741  ;;  %v12573_v59 = vpop.permute.xlu0 %4761 }
  0xe7   : > { %18194 = vst [vmem:[#allocation31_spill] sm:$0xff] %v12571_v58  ;;  %18195 = vst [vmem:[#allocation32_spill] sm:$0xff] %v12573_v59  ;;  %10882 = vmatmul.mubr.msk.f32.gmra.mrb[50].mxu1 %vm287_vm0, %v9752_v38  ;;  %11405 = vmatprep.subr.bf16.mxu0 %v11404_v43 }
  0xe8   : > { %10932 = vmatmul.mubr.msk.f32.gmra.mrb[38].mxu0 %vm287_vm0, %v9820_v40  ;;  %10884 = vmatprep.mubr.msk.f32.mxu1 %vm287_vm0, %v9753_v42  ;;  %v9827_v40 = vld [vmem:[%s18118_s2 + $0x350] sm:$0xff] }
  0xe9   : > { %10934 = vmatprep.mubr.msk.f32.mxu0 %vm287_vm0, %v9821_v44  ;;  %11407 = vmatpush3.bf16.msra.mxu0 %v11404_v43 }
  0xea   : > { %11409 = vmatprep.subr.bf16.mxu0 %v11408_v49  ;;  %v12591_v15 = vpop.permute.xlu1 %4751  ;;  %v12593_v9 = vpop.permute.xlu0 %4771 }
  0xeb   : > { %18196 = vst [vmem:[#allocation33_spill] sm:$0xff] %v12591_v15  ;;  %18197 = vst [vmem:[#allocation34_spill] sm:$0xff] %v12593_v9  ;;  %10885 = vmatmul.mubr.msk.f32.gmra.mrb[52].mxu1 %vm287_vm0, %v9754_v60  ;;  %v9886_v15 = vld [vmem:[%s18118_s2 + $0x3e8] sm:$0xff] }
  0xec   : > { %10935 = vmatmul.mubr.msk.f32.gmra.mrb[40].mxu0 %vm287_vm0, %v9822_v2  ;;  %10887 = vmatprep.mubr.msk.f32.mxu1 %vm287_vm0, %v9755_v3  ;;  %v9760_v3 = vld [vmem:[%s18118_s2 + $0x278] sm:$0xff] }
  0xed   : > { %10937 = vmatprep.mubr.msk.f32.mxu0 %vm287_vm0, %v9823_v8  ;;  %11411 = vmatpush3.bf16.msra.mxu0 %v11408_v49  ;;  %v5346_v8 = vld [vmem:[%s11996_s10] sm:$0xff] }
  0xee   : > { %v12611_v26 = vpop.permute.xlu1 %4756  ;;  %v11541_v27 = vpop.permute.xlu0 %11540 }
  0xef   : > { %18198 = vst [vmem:[#allocation35_spill] sm:$0xff] %v12611_v26  ;;  %10888 = vmatmul.mubr.msk.f32.gmra.mrb[54].mxu1 %vm287_vm0, %v9756_v10  ;;  %v11543_v28 = vunpack.i.h.bf16 %v11541_v27  ;;  %v11542_v30 = vunpack.i.l.bf16 %v11541_v27  ;;  %v9828_v10 = vld [vmem:[%s18118_s2 + $0x358] sm:$0xff] }
  0xf0   : > { %10938 = vmatmul.mubr.msk.f32.gmra.mrb[42].mxu0 %vm287_vm0, %v9824_v14  ;;  %10890 = vmatprep.mubr.msk.f32.mxu1 %vm287_vm0, %v9757_v18  ;;  %v10770_v38 = vpop.f32.mrb[0].mxu0  ;;  %v12657_v14 = vpop.f32.mrb[0].mxu1 }
  0xf1   : > { %10940 = vmatprep.mubr.msk.f32.mxu0 %vm287_vm0, %v9825_v22  ;;  %v12631_v43 = vpack.c.bf16 %v11543_v28, %v11542_v30  ;;  %v12634_v44 = vadd.f32 %v10770_v38, %v12284_v35  ;;  %v474_v49 = vpop.f32.mrb[1].mxu0  ;;  %v9829_v28 = vld [vmem:[%s18118_s2 + $0x360] sm:$0xff]  ;;  %v12665_v30 = vpop.f32.mrb[1].mxu1 }
  0xf2   : > { %v12629_v42 = vpop.permute.xlu1 %4766  ;;  %v12636_v60 = vpop.permute.xlu0 %11550  ;;  %v12640_v2 = vadd.f32 %v12279_v17, %v474_v49  ;;  %v9881_v17 = vld [vmem:[%s18118_s2 + $0x3c0] sm:$0xff] }
  0xf3   : > { %18199 = vst [vmem:[#allocation36_spill] sm:$0xff] %v12629_v42  ;;  %10891 = vmatmul.mubr.msk.f32.gmra.mrb[56].mxu1 %vm287_vm0, %v9758_v31  ;;  %v737_v35 = vsel %vm729_vm7, %v12634_v44, -inf  ;;  %11421 = vmatprep.subr.bf16.mxu0 %v12631_v43 }
  0xf4   : > { %10941 = vmatmul.mubr.msk.f32.gmra.mrb[44].mxu0 %vm287_vm0, %v9826_v34  ;;  %10893 = vmatprep.mubr.msk.f32.mxu1 %vm287_vm0, %v9759_v36  ;;  %v738_v18 = vrot.slane %v737_v35, 4  ;;  %v730_v22 = vsel %vm729_vm7, %v12640_v2, -inf  ;;  %v10773_v27 = vpop.f32.mrb[2].mxu0 }
  0xf5   : > { %10943 = vmatprep.mubr.msk.f32.mxu0 %vm287_vm0, %v9827_v40  ;;  %v731_v31 = vrot.slane %v730_v22, 4  ;;  %v12668_v34 = vadd.f32 %v10773_v27, %v12282_v5  ;;  %v484_v36 = vpop.f32.mrb[3].mxu0  ;;  %v9882_v5 = vld [vmem:[%s18118_s2 + $0x3c8] sm:$0xff] }
  0xf6   : > { %v5348_v38 = vpop.permute.xlu0 %5347  ;;  %v739_v40 = vmax.f32 %v737_v35, %v738_v18  ;;  %v12672_v49 = vadd.f32 %v12277_v16, %v484_v36  ;;  %v12681_v27 = vpop.permute.xlu1 %4776  ;;  %v9830_v35 = vld [vmem:[%s18118_s2 + $0x368] sm:$0xff]  ;;  %v11907_v36 = vmov 1966171168  }
  0xf7   : > { %10894 = vmatmul.mubr.msk.f32.gmra.mrb[58].mxu1 %vm287_vm0, %v9760_v3  ;;  %v12674_v24 = vmul.f32 %v5348_v38, %v5346_v8  ;;  %18201 = vst [vmem:[#allocation38_spill] sm:$0xff] %v12681_v27  ;;  %v732_v3 = vmax.f32 %v730_v22, %v731_v31  ;;  %v751_v16 = vsel %vm729_vm7, %v12668_v34, -inf  ;;  %v9883_v8 = vld [vmem:[%s18118_s2 + $0x3d0] sm:$0xff]  ;;  %v12704_v38 = vunpack.c.l.s4 %v11907_v36  ;;  %v9884_v36 = vld [vmem:[%s18118_s2 + $0x3d8] sm:$0xff] }
  0xf8   : > { %10944 = vmatmul.mubr.msk.f32.gmra.mrb[46].mxu0 %vm287_vm0, %v9828_v10  ;;  %10972 = vmatprep.mubr.msk.f32.mxu1 %vm287_vm0, %v9881_v17  ;;  %v12695_v10 = vpop.f32.mrb[2].mxu1  ;;  %v740_v17 = vrot.slane %v739_v40, 2  ;;  %v752_v18 = vrot.slane %v751_v16, 4  ;;  %v744_v62 = vsel %vm729_vm7, %v12672_v49, -inf  ;;  %v10776_v22 = vpop.f32.mrb[4].mxu0 }
  0xf9   : > { %18200 = vst [vmem:[#allocation37_spill] sm:$0xff] %v12674_v24  ;;  %10946 = vmatprep.mubr.msk.f32.mxu0 %vm287_vm0, %v9829_v28  ;;  %v9831_v28 = vld [vmem:[%s18118_s2 + $0x370] sm:$0xff]  ;;  %v12702_v31 = vpop.f32.mrb[3].mxu1  ;;  %v733_v63 = vrot.slane %v732_v3, 2  ;;  %v745_v61 = vrot.slane %v744_v62, 4  ;;  %v6152_v9 = vsel %vm6131_vm8, %v12674_v24, 0.0  ;;  %v12710_v6 = vadd.f32 %v10776_v22, %v12289_v37 }
  0xfa   : > { %v494_v27 = vpop.f32.mrb[5].mxu0  ;;  %v741_v13 = vmax.f32 %v739_v40, %v740_v17  ;;  %v753_v7 = vmax.f32 %v751_v16, %v752_v18  ;;  %v6153_v59 = vrot.slane %v6152_v9, 4  ;;  %v9832_v37 = vld [vmem:[%s18118_s2 + $0x378] sm:$0xff]  ;;  %v9885_v40 = vld [vmem:[%s18118_s2 + $0x3e0] sm:$0xff]  ;;  %v12728_v16 = vpop.f32.mrb[4].mxu1 }
  0xfb   : > { %10973 = vmatmul.mubr.msk.f32.vlgmr.msra.gmra.mrb[60].mxu1 %vm287_vm0, %v9882_v5  ;;  %v734_v42 = vmax.f32 %v732_v3, %v733_v63  ;;  %v746_v55 = vmax.f32 %v744_v62, %v745_v61  ;;  %v12719_v5 = vadd.f32 %v12291_v19, %v494_v27  ;;  %v765_v19 = vsel %vm729_vm7, %v12710_v6, -inf  ;;  %v12739_v17 = vpop.f32.mrb[5].mxu1 }
  0xfc   : > { %10947 = vmatmul.mubr.msk.f32.gmra.mrb[48].mxu0 %vm287_vm0, %v9830_v35  ;;  %10975 = vmatprep.mubr.msk.f32.mxu1 %vm287_vm0, %v9883_v8  ;;  %v12730_v35 = vpop.permute.xlu1 %5098  ;;  %v742_v63 = vrot.slane %v741_v13, 1  ;;  %v754_v3 = vrot.slane %v753_v7, 2  ;;  %v12732_v61 = vadd.f32 %v6153_v59, %v6152_v9  ;;  %v10779_v27 = vpop.f32.mrb[6].mxu0  ;;  %v9833_v8 = vld [vmem:[%s18118_s2 + $0x380] sm:$0xff]  ;;  %v766_v22 = vrot.slane %v765_v19, 4 }
  0xfd   : > { %10949 = vmatprep.mubr.msk.f32.mxu0 %vm287_vm0, %v9831_v28  ;;  %18203 = vst [vmem:[#allocation39_spill] sm:$0xff] %v12730_v35  ;;  %v735_v18 = vrot.slane %v734_v42, 1  ;;  %v747_v62 = vrot.slane %v746_v55, 2  ;;  %v758_v28 = vsel %vm729_vm7, %v12719_v5, -inf  ;;  %v504_v24 = vpop.f32.mrb[7].mxu0  ;;  %v12745_v54 = vadd.f32 %v10779_v27, %v12295_v1  ;;  %v9834_v1 = vld [vmem:[%s18118_s2 + $0x388] sm:$0xff] }
  0xfe   : > { %v743_v59 = vmax.f32 %v741_v13, %v742_v63  ;;  %v755_v9 = vmax.f32 %v753_v7, %v754_v3  ;;  %v759_v35 = vrot.slane %v758_v28, 4  ;;  %v767_v20 = vmax.f32 %v765_v19, %v766_v22  ;;  %v9887_v7 = vld [vmem:[%s18118_s2 + $0x3f0] sm:$0xff]  ;;  %v12762_v13 = vpop.f32.mrb[6].mxu1 }
  0xff   : > { %10976 = vmatmul.mubr.msk.f32.gmra.mrb[62].mxu1 %vm287_vm0, %v9884_v36  ;;  %v736_v26 = vmax.f32 %v734_v42, %v735_v18  ;;  %v748_v11 = vmax.f32 %v746_v55, %v747_v62  ;;  %v12753_v58 = vadd.f32 %v12297_v4, %v504_v24  ;;  %v779_v24 = vsel %vm729_vm7, %v12745_v54, -inf  ;;  %v9835_v4 = vld [vmem:[%s18118_s2 + $0x390] sm:$0xff] }
 0x100   : > { %10950 = vmatmul.mubr.msk.f32.gmra.mrb[50].mxu0 %vm287_vm0, %v9832_v37  ;;  %10978 = vmatprep.mubr.msk.f32.mxu1 %vm287_vm0, %v9885_v40  ;;  %v787_v36 = vsub.f32 %v12634_v44, %v743_v59  ;;  %v756_v42 = vrot.slane %v755_v9, 1  ;;  %v760_v55 = vmax.f32 %v758_v28, %v759_v35  ;;  %v12770_v37 = vpop.f32.mrb[8].mxu0  ;;  %v12772_v40 = vpop.f32.mrb[7].mxu1  ;;  %v768_v19 = vrot.slane %v767_v20, 2 }
 0x101   : > { %10952 = vmatprep.mubr.msk.f32.mxu0 %vm287_vm0, %v9833_v8  ;;  %v786_v63 = vsub.f32 %v12640_v2, %v736_v26  ;;  %v749_v3 = vrot.slane %v748_v11, 1  ;;  %v780_v27 = vrot.slane %v779_v24, 4  ;;  %v12776_v44 = vpop.f32.mrb[9].mxu0  ;;  %v12778_v35 = vpop.permute.xlu1 %11535  ;;  %v772_v22 = vsel %vm729_vm7, %v12753_v58, -inf  ;;  %v9888_v26 = vld [vmem:[%s18118_s2 + $0x3f8] sm:$0xff] }
 0x102   : > { %v796_v8 = vmul.f32 1.442695, %v787_v36  ;;  %v757_v18 = vmax.f32 %v755_v9, %v756_v42  ;;  %v761_v62 = vrot.slane %v760_v55, 2  ;;  %v769_v28 = vmax.f32 %v767_v20, %v768_v19  ;;  %v9836_v9 = vld [vmem:[%s18118_s2 + $0x398] sm:$0xff]  ;;  %v12794_v36 = vpop.f32.mrb[8].mxu1  ;;  %v9837_v20 = vld [vmem:[%s18118_s2 + $0x3a0] sm:$0xff] }
 0x103   : > { %10979 = vmatmul.mubr.msk.f32.gmra.mrb[64].mxu1 %vm287_vm0, %v9886_v15  ;;  %v794_v2 = vmul.f32 1.442695, %v786_v63  ;;  %v750_v15 = vmax.f32 %v748_v11, %v749_v3  ;;  %v781_v59 = vmax.f32 %v779_v24, %v780_v27  ;;  %v773_v63 = vrot.slane %v772_v22, 4  ;;  %v12802_v24 = vpop.f32.mrb[9].mxu1 }
 0x104   : > { %10953 = vmatmul.mubr.msk.f32.gmra.mrb[52].mxu0 %vm287_vm0, %v9834_v1  ;;  %10981 = vmatprep.mubr.msk.f32.mxu1 %vm287_vm0, %v9887_v7  ;;  %v9889_v1 = vld [vmem:[%s18118_s2 + $0x400] sm:$0xff]  ;;  %11587 = vpow2.f32 %v796_v8  ;;  %v789_v7 = vsub.f32 %v12668_v34, %v757_v18  ;;  %v762_v42 = vmax.f32 %v760_v55, %v761_v62  ;;  %v12800_v11 = vpop.f32.mrb[10].mxu0  ;;  %v770_v3 = vrot.slane %v769_v28, 1  ;;  %v9890_v62 = vld [vmem:[%s18118_s2 + $0x408] sm:$0xff] }
 0x105   : > { %10955 = vmatprep.mubr.msk.f32.mxu0 %vm287_vm0, %v9835_v4  ;;  %11589 = vpow2.f32 %v794_v2  ;;  %v788_v4 = vsub.f32 %v12672_v49, %v750_v15  ;;  %v782_v19 = vrot.slane %v781_v59, 2  ;;  %v12806_v27 = vpop.f32.mrb[11].mxu0  ;;  %v774_v8 = vmax.f32 %v772_v22, %v773_v63  ;;  %v9891_v22 = vld [vmem:[%s18118_s2 + $0x410] sm:$0xff] }
 0x106   : > { %v800_v34 = vmul.f32 1.442695, %v789_v7  ;;  %v763_v55 = vrot.slane %v762_v42, 1  ;;  %v6155_v18 = vrot.slane %v12732_v61, 2  ;;  %v771_v2 = vmax.f32 %v769_v28, %v770_v3  ;;  %v9839_v28 = vld [vmem:[%s18118_s2 + $0x3b0] sm:$0xff] }
 0x107   : > { %10982 = vmatmul.mubr.msk.f32.gmra.mrb[66].mxu1 %vm287_vm0, %v9888_v26  ;;  %v798_v49 = vmul.f32 1.442695, %v788_v4  ;;  %v783_v15 = vmax.f32 %v781_v59, %v782_v19  ;;  %v9838_v26 = vld [vmem:[%s18118_s2 + $0x3a8] sm:$0xff]  ;;  %v775_v63 = vrot.slane %v774_v8, 2 }
 0x108   : > { %10956 = vmatmul.mubr.msk.f32.gmra.mrb[54].mxu0 %vm287_vm0, %v9836_v9  ;;  %10984 = vmatprep.mubr.msk.f32.mxu1 %vm287_vm0, %v9889_v1  ;;  %v11538_v9 = vunpack.i.h.bf16 %v12778_v35  ;;  %v11546_v1 = vpop.permute.xlu1 %11545  ;;  %11591 = vpow2.f32 %v800_v34  ;;  %v764_v7 = vmax.f32 %v762_v42, %v763_v55  ;;  %v6156_v4 = vadd.f32 %v6155_v18, %v12732_v61  ;;  %v12826_v59 = vpop.f32.mrb[12].mxu0  ;;  %v9892_v18 = vld [vmem:[%s18118_s2 + $0x418] sm:$0xff] }
 0x109   : > { %10958 = vmatprep.mubr.msk.f32.mxu0 %vm287_vm0, %v9837_v20  ;;  %11593 = vpow2.f32 %v798_v49  ;;  %v791_v20 = vsub.f32 %v12710_v6, %v771_v2  ;;  %v784_v3 = vrot.slane %v783_v15, 1  ;;  %v12830_v19 = vpop.f32.mrb[13].mxu0  ;;  %v11537_v34 = vunpack.i.l.bf16 %v12778_v35  ;;  %v12839_v6 = vpop.f32.mrb[10].mxu1 }
 0x10a   : > { %v790_v42 = vsub.f32 %v12719_v5, %v764_v7  ;;  %v776_v55 = vmax.f32 %v774_v8, %v775_v63  ;;  %v6157_v61 = vrot.slane %v6156_v4, 1  ;;  %v11548_v49 = vunpack.i.h.bf16 %v11546_v1  ;;  %v9840_v5 = vld [vmem:[%s18118_s2 + $0x3b8] sm:$0xff]  ;;  %v12845_v35 = vpop.f32.mrb[11].mxu1 }
 0x10b   : > { %10985 = vmatmul.mubr.msk.f32.gmra.mrb[68].mxu1 %vm287_vm0, %v9890_v62  ;;  %v804_v62 = vmul.f32 1.442695, %v791_v20  ;;  %v785_v2 = vmax.f32 %v783_v15, %v784_v3  ;;  %v11547_v8 = vunpack.i.l.bf16 %v11546_v1  ;;  %v9893_v20 = vld [vmem:[%s18118_s2 + $0x420] sm:$0xff]  ;;  %v886_v3 = vunpack.c.0.s8 %v12704_v38  ;;  %v9894_v38 = vld [vmem:[%s18118_s2 + $0x428] sm:$0xff] }
 0x10c   : > { %10959 = vmatmul.mubr.msk.f32.gmra.mrb[56].mxu0 %vm287_vm0, %v9838_v26  ;;  %10987 = vmatprep.mubr.msk.f32.mxu1 %vm287_vm0, %v9891_v22  ;;  %v11412_v26 = vpack.c.bf16 %v11538_v9, %v11537_v34  ;;  %v11552_v22 = vunpack.i.l.bf16 %v12636_v60  ;;  %v802_v7 = vmul.f32 1.442695, %v790_v42  ;;  %v777_v63 = vrot.slane %v776_v55, 1  ;;  %v9961_v15 = vld [vmem:[%s18118_s2 + $0x500] sm:$0xff] }
 0x10d   : > { %10961 = vmatprep.mubr.msk.f32.mxu0 %vm287_vm0, %v9839_v28  ;;  %v6158_v32 = vadd.f32 %v6157_v61, %v6156_v4  ;;  %v12854_v28 = vpop.f32.mrb[14].mxu0  ;;  %11595 = vpow2.f32 %v804_v62  ;;  %v793_v9 = vsub.f32 %v12745_v54, %v785_v2  ;;  %v11416_v4 = vpack.c.bf16 %v11548_v49, %v11547_v8  ;;  %v9962_v54 = vld [vmem:[%s18118_s2 + $0x508] sm:$0xff]  ;;  %v12871_v61 = vpop.f32.mrb[12].mxu1  ;;  %v5799_v2 = vld [vmem:[%s18119_s3 + $0x30] sm:$0xff] }
 0x10e   : > { %v12859_v1 = vpop.f32.mrb[15].mxu0  ;;  %11413 = vmatprep.subr.bf16.mxu1 %v11412_v26  ;;  %v12861_v34 = vpop.eup %11587  ;;  %11597 = vpow2.f32 %v802_v7  ;;  %v778_v42 = vmax.f32 %v776_v55, %v777_v63  ;;  %v9963_v63 = vld [vmem:[%s18118_s2 + $0x510] sm:$0xff]  ;;  %5833 = vperm.xlu0 %11555, %v5799_v2   ;;  %v12898_v0 = vsub.s32 %v886_v3, %v12684_v51 }
 0x10f   : > { %10988 = vmatmul.mubr.msk.f32.gmra.mrb[70].mxu1 %vm287_vm0, %v9892_v18  ;;  %6160 = vrot.lane.b32.xlu1 %v6158_v32, %s11905_s28  ;;  %v12873_v18 = vpop.eup %11589  ;;  %v817_v49 = vsel %vm729_vm7, %v12861_v34, 0.0  ;;  %v808_v55 = vmul.f32 1.442695, %v793_v9  ;;  %v9895_v32 = vld [vmem:[%s18118_s2 + $0x430] sm:$0xff]  ;;  %v12882_v62 = vpop.f32.mrb[13].mxu1 }
 0x110   : > { %10962 = vmatmul.mubr.msk.f32.gmra.mrb[58].mxu0 %vm287_vm0, %v9840_v5  ;;  %10990 = vmatprep.mubr.msk.f32.mxu1 %vm287_vm0, %v9893_v20  ;;  %v818_v5 = vrot.slane %v817_v49, 4  ;;  %v810_v8 = vsel %vm729_vm7, %v12873_v18, 0.0  ;;  %v792_v7 = vsub.f32 %v12753_v58, %v778_v42  ;;  %v12893_v20 = vpop.f32.mrb[16].mxu0  ;;  %18205 = vst [vmem:[#allocation40_spill] sm:$0xff] %v12898_v0  ;;  %v8524_v42 = vld [vmem:[%s11982_s30] sm:$0xff]  ;;  %v12916_v3 = vpop.f32.mrb[14].mxu1 }
 0x111   : > { %11040 = vmatprep.mubr.msk.f32.mxu0 %vm287_vm0, %v9961_v15  ;;  %11415 = vmatpush3.bf16.msra.mxu1 %v11412_v26  ;;  %v18204_v15 = vunpack.i.h.bf16 %v12636_v60  ;;  %v811_v50 = vrot.slane %v810_v8, 4  ;;  %11599 = vpow2.f32 %v808_v55  ;;  %v12905_v58 = vpop.f32.mrb[17].mxu0  ;;  %v8525_v26 = vld [vmem:[%s11982_s30 + $0x8] sm:$0xff]  ;;  %s11911_s30 = smov 1  }
 0x112   : > { %11417 = vmatprep.subr.bf16.mxu1 %v11416_v4  ;;  %v12909_v39 = vpop.eup %11591  ;;  %v819_v60 = vadd.f32 %v818_v5, %v817_v49  ;;  %v9897_v49 = vld [vmem:[%s18118_s2 + $0x440] sm:$0xff]  ;;  %v12933_v5 = vrot.slane %v12902_v56, %v12898_v0 }
 0x113   : > { %v11424_v9 = vpack.c.bf16 %v18204_v15, %v11552_v22  ;;  %10991 = vmatmul.mubr.msk.f32.gmra.mrb[72].mxu1 %vm287_vm0, %v9894_v38  ;;  %v806_v22 = vmul.f32 1.442695, %v792_v7  ;;  %v11561_v38 = vpack.i.bf16 %v8525_v26, %v8524_v42  ;;  %v12918_v55 = vpop.eup %11593  ;;  %v812_v2 = vadd.f32 %v811_v50, %v810_v8  ;;  %v12935_v50 = vpop.f32.mrb[15].mxu1  ;;  %v9965_v42 = vld [vmem:[%s18118_s2 + $0x520] sm:$0xff] }
 0x114   : > { %11041 = vmatmul.mubr.msk.f32.vlgmr.msra.gmra.mrb[60].mxu0 %vm287_vm0, %v9962_v54  ;;  %10993 = vmatprep.mubr.msk.f32.mxu1 %vm287_vm0, %v9895_v32  ;;  %v831_v15 = vsel %vm729_vm7, %v12909_v39, 0.0  ;;  %v9964_v54 = vld [vmem:[%s18118_s2 + $0x518] sm:$0xff]  ;;  %v883_v32 = vcombine.high %v12902_v56, %v12902_v56  ;;  %v820_v8 = vrot.slane %v819_v60, 2  ;;  %v12943_v26 = vpop.f32.mrb[18].mxu0  ;;  %v12956_v33 = vpop.f32.mrb[16].mxu1 }
 0x115   : > { %11043 = vmatprep.mubr.msk.f32.mxu0 %vm287_vm0, %v9963_v63  ;;  %11423 = vmatpush3.bf16.msra.mxu0 %v12631_v43  ;;  %v832_v7 = vrot.slane %v831_v15, 4  ;;  %v824_v63 = vsel %vm729_vm7, %v12918_v55, 0.0  ;;  %11601 = vpow2.f32 %v806_v22  ;;  %v813_v56 = vrot.slane %v812_v2, 2  ;;  %v12946_v43 = vpop.f32.mrb[19].mxu0 }
 0x116   : > { %11419 = vmatpush3.bf16.msra.mxu1 %v11416_v4  ;;  %11425 = vmatprep.subr.bf16.mxu0 %v11424_v9  ;;  %v825_v57 = vrot.slane %v824_v63, 4  ;;  %v821_v22 = vadd.f32 %v820_v8, %v819_v60  ;;  %v9898_v4 = vld [vmem:[%s18118_s2 + $0x448] sm:$0xff] }
 0x117   : > { %10994 = vmatmul.mubr.msk.f32.gmra.mrb[74].mxu1 %vm287_vm0, %v9896_v46  ;;  %11562 = vrot.lane.b32.xlu0 %v11561_v38, %s11908_s5  ;;  %v833_v53 = vadd.f32 %v832_v7, %v831_v15  ;;  %v11571_v46 = vpack.i.bf16 %v8527_v41, %v8526_v52  ;;  %v12958_v12 = vpop.eup %11595  ;;  %v814_v47 = vadd.f32 %v813_v56, %v812_v2  ;;  %v9966_v60 = vld [vmem:[%s18118_s2 + $0x528] sm:$0xff]  ;;  %v9899_v38 = vld [vmem:[%s18118_s2 + $0x450] sm:$0xff] }
 0x118   : > { %11044 = vmatmul.mubr.msk.f32.gmra.mrb[62].mxu0 %vm287_vm0, %v9964_v54  ;;  %10996 = vmatprep.mubr.msk.f32.mxu1 %vm287_vm0, %v9897_v49  ;;  %v826_v48 = vadd.f32 %v825_v57, %v824_v63  ;;  %v12969_v54 = vpop.f32.mrb[17].mxu1  ;;  %v12971_v52 = vpop.eup %11597  ;;  %v822_v56 = vrot.slane %v821_v22, 1  ;;  %v845_v41 = vsel %vm729_vm7, %v12958_v12, 0.0  ;;  %v9967_v2 = vld [vmem:[%s18118_s2 + $0x530] sm:$0xff]  ;;  %v12979_v49 = vrot.slane %v883_v32, %v12898_v0  ;;  %v9900_v32 = vld [vmem:[%s18118_s2 + $0x458] sm:$0xff] }
 0x119   : > { %11046 = vmatprep.mubr.msk.f32.mxu0 %vm287_vm0, %v9965_v42  ;;  %18207 = vst [vmem:[#allocation42_spill] sm:$0xff] %v12969_v54  ;;  %11427 = vmatpush3.bf16.msra.mxu0 %v11424_v9  ;;  %v834_v57 = vrot.slane %v833_v53, 2  ;;  %v815_v8 = vrot.slane %v814_v47, 1  ;;  %v846_v63 = vrot.slane %v845_v41, 4  ;;  %v838_v9 = vsel %vm729_vm7, %v12971_v52, 0.0  ;;  %v12990_v25 = vpop.f32.mrb[18].mxu1 }
 0x11a   : > { %v827_v7 = vrot.slane %v826_v48, 2  ;;  %v823_v42 = vadd.f32 %v822_v56, %v821_v22  ;;  %v839_v29 = vrot.slane %v838_v9, 4  ;;  %v9901_v22 = vld [vmem:[%s18118_s2 + $0x460] sm:$0xff] }
 0x11b   : > { %10997 = vmatmul.mubr.msk.f32.gmra.mrb[76].mxu1 %vm287_vm0, %v9898_v4  ;;  %11572 = vrot.lane.b32.xlu0 %v11571_v46, %s11908_s5  ;;  %v835_v15 = vadd.f32 %v834_v57, %v833_v53  ;;  %v12992_v45 = vpop.eup %11599  ;;  %v816_v21 = vadd.f32 %v815_v8, %v814_v47  ;;  %v847_v4 = vadd.f32 %v846_v63, %v845_v41  ;;  %v9968_v53 = vld [vmem:[%s18118_s2 + $0x538] sm:$0xff]  ;;  %v13001_v46 = vpop.f32.mrb[19].mxu1  ;;  %v6855_v47 = vld [vmem:[%s18119_s3] sm:$0xff] }
 0x11c   : > { %11047 = vmatmul.mubr.msk.f32.gmra.mrb[64].mxu0 %vm287_vm0, %v9966_v60  ;;  %10999 = vmatprep.mubr.msk.f32.mxu1 %vm287_vm0, %v9899_v38  ;;  %v828_v54 = vadd.f32 %v827_v7, %v826_v48  ;;  %v11909_v60 = vmov 6   ;;  %11603 = vrcp.f32 %v823_v42  ;;  %v840_v38 = vadd.f32 %v839_v29, %v838_v9  ;;  %v9969_v57 = vld [vmem:[%s18118_s2 + $0x540] sm:$0xff]  ;;  %v9970_v9 = vld [vmem:[%s18118_s2 + $0x548] sm:$0xff] }
 0x11d   : > { %11049 = vmatprep.mubr.msk.f32.mxu0 %vm287_vm0, %v9967_v2  ;;  %11576 = vset.pattern.permute.xlu1 %v11909_v60  ;;  %v836_v48 = vrot.slane %v835_v15, 1  ;;  %v859_v56 = vsel %vm729_vm7, %v12992_v45, 0.0  ;;  %11605 = vrcp.f32 %v816_v21  ;;  %v848_v2 = vrot.slane %v847_v4, 2  ;;  %v9902_v21 = vld [vmem:[%s18118_s2 + $0x468] sm:$0xff] }
 0x11e   : > { %6865 = vperm.xlu1 %11576, %v6855_v47   ;;  %11577 = vset.pattern.permute.xlu0 %v11909_v60  ;;  %v829_v41 = vrot.slane %v828_v54, 1  ;;  %v860_v8 = vrot.slane %v859_v56, 4  ;;  %v841_v63 = vrot.slane %v840_v38, 2  ;;  %v18208_v47 = vcombine.high %v12933_v5, %v12933_v5 }
 0x11f   : > { %11000 = vmatmul.mubr.msk.f32.gmra.mrb[78].mxu1 %vm287_vm0, %v9900_v32  ;;  %6409 = vrot.lane.b32.xlu0 %v12230_v23, %s11910_s13  ;;  %v13014_v29 = vpop.eup %11601  ;;  %v837_v7 = vadd.f32 %v836_v48, %v835_v15  ;;  %v849_v32 = vadd.f32 %v848_v2, %v847_v4  ;;  %v9903_v15 = vld [vmem:[%s18118_s2 + $0x470] sm:$0xff]  ;;  %v899_v2 = vcombine.high %v12979_v49, %v12979_v49 }
 0x120   : > { %11050 = vmatmul.mubr.msk.f32.gmra.mrb[66].mxu0 %vm287_vm0, %v9968_v53  ;;  %11002 = vmatprep.mubr.msk.f32.mxu1 %vm287_vm0, %v9901_v22  ;;  %v830_v42 = vadd.f32 %v829_v41, %v828_v54  ;;  %v861_v60 = vadd.f32 %v860_v8, %v859_v56  ;;  %v852_v23 = vsel %vm729_vm7, %v13014_v29, 0.0  ;;  %v6856_v53 = vld [vmem:[%s18119_s3 + $0x8] sm:$0xff]  ;;  %v6857_v22 = vld [vmem:[%s18119_s3 + $0x10] sm:$0xff]  ;;  %v842_v54 = vadd.f32 %v841_v63, %v840_v38  ;;  %v9904_v63 = vld [vmem:[%s18118_s2 + $0x478] sm:$0xff] }
 0x121   : > { %11052 = vmatprep.mubr.msk.f32.mxu0 %vm287_vm0, %v9969_v57  ;;  %11607 = vrcp.f32 %v837_v7  ;;  %v853_v4 = vrot.slane %v852_v23, 4  ;;  %v920_v48 = vrot.slane %v18208_v47, %v12898_v0  ;;  %v9971_v56 = vld [vmem:[%s18118_s2 + $0x550] sm:$0xff]  ;;  %v850_v57 = vrot.slane %v849_v32, 1 }
 0x122   : > { %6875 = vperm.xlu1 %11576, %v6857_v22   ;;  %11609 = vrcp.f32 %v830_v42  ;;  %v862_v41 = vrot.slane %v861_v60, 2  ;;  %v843_v38 = vrot.slane %v842_v54, 1  ;;  %v906_v7 = vrot.slane %v12933_v5, %v12898_v0  ;;  %v9905_v5 = vld [vmem:[%s18118_s2 + $0x480] sm:$0xff] }
 0x123   : > { %11003 = vmatmul.mubr.msk.f32.gmra.mrb[80].mxu1 %vm287_vm0, %v9902_v21  ;;  %6870 = vperm.xlu0 %11577, %v6856_v53   ;;  %v854_v8 = vadd.f32 %v853_v4, %v852_v23  ;;  %v13054_v42 = vsub.s32 0, %v12684_v51  ;;  %v851_v22 = vadd.f32 %v850_v57, %v849_v32  ;;  %v9972_v21 = vld [vmem:[%s18118_s2 + $0x558] sm:$0xff]  ;;  %v9973_v51 = vld [vmem:[%s18118_s2 + $0x560] sm:$0xff] }
 0x124   : > { %11053 = vmatmul.mubr.msk.f32.gmra.mrb[68].mxu0 %vm287_vm0, %v9970_v9  ;;  %11005 = vmatprep.mubr.msk.f32.mxu1 %vm287_vm0, %v9903_v15  ;;  %v863_v47 = vadd.f32 %v862_v41, %v861_v60  ;;  %v844_v9 = vadd.f32 %v843_v38, %v842_v54  ;;  %v930_v15 = vcombine.high %v920_v48, %v920_v48 }
 0x125   : > { %18209 = vst [vmem:[#allocation43_spill] sm:$0xff] %v13054_v42  ;;  %11055 = vmatprep.mubr.msk.f32.mxu0 %vm287_vm0, %v9971_v56  ;;  %v855_v23 = vrot.slane %v854_v8, 2  ;;  %v928_v53 = vcombine.high %v906_v7, %v906_v7  ;;  %11611 = vrcp.f32 %v851_v22  ;;  %v13067_v60 = vrot.slane %v899_v2, %v12898_v0  ;;  %v9906_v2 = vld [vmem:[%s18118_s2 + $0x488] sm:$0xff] }
 0x126   : > { %v864_v32 = vrot.slane %v863_v47, 1  ;;  %v939_v4 = vrot.slane %v920_v48, %v13054_v42  ;;  %v11604_v56 = vpop.eup %11603  ;;  %11613 = vrcp.f32 %v844_v9  ;;  %v13073_v54 = vrot.slane %v12979_v49, %v12898_v0  ;;  %v9974_v49 = vld [vmem:[%s18118_s2 + $0x568] sm:$0xff] }
 0x127   : > { %11006 = vmatmul.mubr.msk.f32.gmra.mrb[82].mxu1 %vm287_vm0, %v9904_v63  ;;  %v856_v57 = vadd.f32 %v855_v23, %v854_v8  ;;  %v935_v41 = vrot.slane %v906_v7, %v13054_v42  ;;  %v11606_v48 = vpop.eup %11605  ;;  %v875_v38 = vmul.f32 %v11604_v56, %v12861_v34  ;;  %v9907_v8 = vld [vmem:[%s18118_s2 + $0x490] sm:$0xff]  ;;  %v931_v9 = vcombine.high %v13067_v60, %v13067_v60 }
 0x128   : > { %11056 = vmatmul.mubr.msk.f32.gmra.mrb[70].mxu0 %vm287_vm0, %v9972_v21  ;;  %11008 = vmatprep.mubr.msk.f32.mxu1 %vm287_vm0, %v9905_v5  ;;  %v865_v63 = vadd.f32 %v864_v32, %v863_v47  ;;  %v874_v7 = vmul.f32 %v11606_v48, %v12873_v18  ;;  %v947_v21 = vrot.slane %v930_v15, %v13054_v42  ;;  %v9975_v34 = vld [vmem:[%s18118_s2 + $0x570] sm:$0xff]  ;;  %v9908_v32 = vld [vmem:[%s18118_s2 + $0x498] sm:$0xff]  ;;  %v9909_v48 = vld [vmem:[%s18118_s2 + $0x4a0] sm:$0xff] }
 0x129   : > { %11058 = vmatprep.mubr.msk.f32.mxu0 %vm287_vm0, %v9973_v51  ;;  %v857_v22 = vrot.slane %v856_v57, 1  ;;  %v943_v5 = vrot.slane %v928_v53, %v13054_v42  ;;  %v955_v47 = vrot.slane %v13067_v60, %v13054_v42  ;;  %v13099_v23 = vmul.f32 %v939_v4, %v875_v38 }
 0x12a   : > { %11615 = vrcp.f32 %v865_v63  ;;  %v951_v15 = vrot.slane %v13073_v54, %v13054_v42  ;;  %v13104_v53 = vmul.f32 %v935_v41, %v874_v7  ;;  %v929_v38 = vcombine.high %v13073_v54, %v13073_v54  ;;  %v9910_v54 = vld [vmem:[%s18118_s2 + $0x4a8] sm:$0xff] }
 0x12b   : > { %11009 = vmatmul.mubr.msk.f32.gmra.mrb[84].mxu1 %vm287_vm0, %v9906_v2  ;;  %v11608_v18 = vpop.eup %11607  ;;  %v858_v51 = vadd.f32 %v857_v22, %v856_v57  ;;  %v1005_v56 = vmul.f32 %v12770_v37, %v13099_v23  ;;  %v1053_v57 = vmul.f32 %v12728_v16, %v13099_v23  ;;  %v1029_v41 = vmul.f32 %v12893_v20, %v13099_v23  ;;  %v9976_v2 = vld [vmem:[%s18118_s2 + $0x578] sm:$0xff]  ;;  %v9977_v20 = vld [vmem:[%s18118_s2 + $0x580] sm:$0xff] }
 0x12c   : > { %11059 = vmatmul.mubr.msk.f32.gmra.mrb[72].mxu0 %vm287_vm0, %v9974_v49  ;;  %11011 = vmatprep.mubr.msk.f32.mxu1 %vm287_vm0, %v9907_v8  ;;  %v11610_v60 = vpop.eup %11609  ;;  %v877_v4 = vmul.f32 %v11608_v18, %v12909_v39  ;;  %v1004_v37 = vmul.f32 %v13104_v53, %v12776_v44  ;;  %v1052_v16 = vmul.f32 %v13104_v53, %v12739_v17 }
 0x12d   : > { %11061 = vmatprep.mubr.msk.f32.mxu0 %vm287_vm0, %v9975_v34  ;;  %v876_v39 = vmul.f32 %v11610_v60, %v12918_v55  ;;  %11617 = vrcp.f32 %v858_v51  ;;  %v1013_v63 = vsel %vm729_vm7, %v1005_v56, 0.0  ;;  %v1061_v49 = vsel %vm729_vm7, %v1053_v57, 0.0  ;;  %v9911_v51 = vld [vmem:[%s18118_s2 + $0x4b0] sm:$0xff] }
 0x12e   : > { %v13137_v8 = vmul.f32 %v947_v21, %v877_v4  ;;  %v1012_v44 = vsel %vm729_vm7, %v1004_v37, 0.0  ;;  %v1060_v55 = vsel %vm729_vm7, %v1052_v16, 0.0  ;;  %v1077_v7 = vmul.f32 %v12871_v61, %v13099_v23  ;;  %v9978_v61 = vld [vmem:[%s18118_s2 + $0x588] sm:$0xff]  ;;  %v9979_v56 = vld [vmem:[%s18118_s2 + $0x590] sm:$0xff] }
 0x12f   : > { %11012 = vmatmul.mubr.msk.f32.gmra.mrb[86].mxu1 %vm287_vm0, %v9908_v32  ;;  %v13142_v17 = vmul.f32 %v943_v5, %v876_v39  ;;  %v11612_v22 = vpop.eup %11611  ;;  %v1014_v21 = vadd.f32 %v1013_v63, %v1012_v44  ;;  %v1062_v34 = vadd.f32 %v1061_v49, %v1060_v55  ;;  %v963_v4 = vrot.slane %v931_v9, %v13054_v42  ;;  %v9981_v44 = vld [vmem:[%s18118_s2 + $0x5a0] sm:$0xff] }
 0x130   : > { %11062 = vmatmul.mubr.msk.f32.gmra.mrb[74].mxu0 %vm287_vm0, %v9976_v2  ;;  %11014 = vmatprep.mubr.msk.f32.mxu1 %vm287_vm0, %v9909_v48  ;;  %v1007_v18 = vmul.f32 %v12800_v11, %v13137_v8  ;;  %v1055_v5 = vmul.f32 %v12762_v13, %v13137_v8  ;;  %v11614_v32 = vpop.eup %11613  ;;  %v879_v60 = vmul.f32 %v11612_v22, %v12958_v12  ;;  %v1037_v48 = vsel %vm729_vm7, %v1029_v41, 0.0 }
 0x131   : > { %11064 = vmatprep.mubr.msk.f32.mxu0 %vm287_vm0, %v9977_v20  ;;  %v1006_v11 = vmul.f32 %v13142_v17, %v12806_v27  ;;  %v1054_v13 = vmul.f32 %v13142_v17, %v12772_v40  ;;  %v878_v57 = vmul.f32 %v11614_v32, %v12971_v52  ;;  %v959_v2 = vrot.slane %v929_v38, %v13054_v42  ;;  %v9912_v52 = vld [vmem:[%s18118_s2 + $0x4b8] sm:$0xff]  ;;  %v9913_v20 = vld [vmem:[%s18118_s2 + $0x4c0] sm:$0xff] }
 0x132   : > { %v1028_v12 = vmul.f32 %v13104_v53, %v12905_v58  ;;  %v13177_v9 = vmul.f32 %v955_v47, %v879_v60  ;;  %v1076_v39 = vmul.f32 %v13104_v53, %v12882_v62  ;;  %v1017_v47 = vsel %vm729_vm7, %v1007_v18, 0.0  ;;  %v9980_v62 = vld [vmem:[%s18118_s2 + $0x598] sm:$0xff] }
 0x133   : > { %11015 = vmatmul.mubr.msk.f32.gmra.mrb[88].mxu1 %vm287_vm0, %v9910_v54  ;;  %v1015_v27 = vsel %vm729_vm7, %v1006_v11, 0.0  ;;  %v1063_v40 = vsel %vm729_vm7, %v1054_v13, 0.0  ;;  %v13188_v41 = vmul.f32 %v951_v15, %v878_v57 }
 0x134   : > { %11065 = vmatmul.mubr.msk.f32.gmra.mrb[76].mxu0 %vm287_vm0, %v9978_v61  ;;  %11017 = vmatprep.mubr.msk.f32.mxu1 %vm287_vm0, %v9911_v51  ;;  %v11616_v58 = vpop.eup %11615  ;;  %v1016_v37 = vadd.f32 %v1015_v27, %v1014_v21  ;;  %v1064_v16 = vadd.f32 %v1063_v40, %v1062_v34  ;;  %v13201_v15 = vmul.f32 %v12657_v14, %v13177_v9  ;;  %v1085_v21 = vsel %vm729_vm7, %v1077_v7, 0.0  ;;  %v9982_v7 = vld [vmem:[%s18118_s2 + $0x5a8] sm:$0xff]  ;;  %v9984_v40 = vld [vmem:[%s18118_s2 + $0x5b8] sm:$0xff] }
 0x135   : > { %11067 = vmatprep.mubr.msk.f32.mxu0 %vm287_vm0, %v9979_v56  ;;  %v881_v38 = vmul.f32 %v11616_v58, %v12992_v45  ;;  %v1009_v63 = vmul.f32 %v12826_v59, %v13177_v9  ;;  %v1057_v49 = vmul.f32 %v12794_v36, %v13177_v9  ;;  %v13212_v55 = vmul.f32 %v13188_v41, %v12665_v30  ;;  %v9914_v30 = vld [vmem:[%s18118_s2 + $0x4c8] sm:$0xff] }
 0x136   : > { %v1008_v45 = vmul.f32 %v13188_v41, %v12830_v19  ;;  %v1018_v54 = vadd.f32 %v1017_v47, %v1016_v37  ;;  %v1056_v14 = vmul.f32 %v13188_v41, %v12802_v24  ;;  %v1065_v36 = vsel %vm729_vm7, %v1055_v5, 0.0  ;;  %v9915_v5 = vld [vmem:[%s18118_s2 + $0x4d0] sm:$0xff] }
 0x137   : > { %11018 = vmatmul.mubr.msk.f32.gmra.mrb[90].mxu1 %vm287_vm0, %v9912_v52  ;;  %v11618_v59 = vpop.eup %11617  ;;  %v13219_v22 = vmul.f32 %v963_v4, %v881_v38  ;;  %v1036_v34 = vsel %vm729_vm7, %v1028_v12, 0.0  ;;  %v1021_v19 = vsel %vm729_vm7, %v1009_v63, 0.0  ;;  %v1066_v61 = vadd.f32 %v1065_v36, %v1064_v16  ;;  %v9983_v4 = vld [vmem:[%s18118_s2 + $0x5b0] sm:$0xff]  ;;  %v18210_v63 = vld [vmem:[#allocation42_spill] sm:$0xff] }
 0x138   : > { %11068 = vmatmul.mubr.msk.f32.gmra.mrb[78].mxu0 %vm287_vm0, %v9980_v62  ;;  %11020 = vmatprep.mubr.msk.f32.mxu1 %vm287_vm0, %v9913_v20  ;;  %v880_v24 = vmul.f32 %v11618_v59, %v13014_v29  ;;  %v1019_v18 = vsel %vm729_vm7, %v1008_v45, 0.0  ;;  %v1067_v32 = vsel %vm729_vm7, %v1056_v14, 0.0  ;;  %v1038_v57 = vadd.f32 %v1037_v48, %v1036_v34  ;;  %v9919_v45 = vld [vmem:[%s18118_s2 + $0x4f0] sm:$0xff] }
 0x139   : > { %11070 = vmatprep.mubr.msk.f32.mxu0 %vm287_vm0, %v9981_v44  ;;  %v13241_v51 = vmul.f32 %v12695_v10, %v13219_v22  ;;  %v1020_v29 = vadd.f32 %v1019_v18, %v1018_v54  ;;  %v1011_v60 = vmul.f32 %v12854_v28, %v13219_v22  ;;  %v1068_v13 = vadd.f32 %v1067_v32, %v1066_v61  ;;  %v9916_v28 = vld [vmem:[%s18118_s2 + $0x4d8] sm:$0xff]  ;;  %v9986_v44 = vld [vmem:[%s18118_s2 + $0x5c8] sm:$0xff]  ;;  %v9987_v14 = vld [vmem:[%s18118_s2 + $0x5d0] sm:$0xff] }
 0x13a   : > { %v13249_v11 = vmul.f32 %v959_v2, %v880_v24  ;;  %v1059_v56 = vmul.f32 %v12839_v6, %v13219_v22  ;;  %v1084_v12 = vsel %vm729_vm7, %v1076_v39, 0.0  ;;  %v1069_v27 = vsel %vm729_vm7, %v1057_v49, 0.0  ;;  %v9917_v39 = vld [vmem:[%s18118_s2 + $0x4e0] sm:$0xff] }
 0x13b   : > { %11021 = vmatmul.mubr.msk.f32.gmra.mrb[92].mxu1 %vm287_vm0, %v9914_v30  ;;  %v1022_v10 = vadd.f32 %v1021_v19, %v1020_v29  ;;  %v1070_v52 = vadd.f32 %v1069_v27, %v1068_v13  ;;  %v1031_v58 = vmul.f32 %v12943_v26, %v13137_v8  ;;  %v1030_v16 = vmul.f32 %v13142_v17, %v12946_v43  ;;  %v10041_v18 = vld [vmem:[%s18118_s2 + $0x640] sm:$0xff]  ;;  %v9990_v27 = vld [vmem:[%s18118_s2 + $0x5e8] sm:$0xff] }
 0x13c   : > { %11071 = vmatmul.mubr.msk.f32.gmra.mrb[80].mxu0 %vm287_vm0, %v9982_v7  ;;  %11023 = vmatprep.mubr.msk.f32.mxu1 %vm287_vm0, %v9915_v5  ;;  %v1034_v2 = vmul.f32 %v13249_v11, %v12702_v31  ;;  %v1010_v6 = vmul.f32 %v13249_v11, %v12859_v1  ;;  %v1058_v48 = vmul.f32 %v13249_v11, %v12845_v35  ;;  %v9985_v35 = vld [vmem:[%s18118_s2 + $0x5c0] sm:$0xff]  ;;  %v1043_v59 = vsel %vm729_vm7, %v13212_v55, 0.0  ;;  %v9920_v55 = vld [vmem:[%s18118_s2 + $0x4f8] sm:$0xff] }
 0x13d   : > { %11073 = vmatprep.mubr.msk.f32.mxu0 %vm287_vm0, %v9983_v4  ;;  %v1086_v31 = vadd.f32 %v1085_v21, %v1084_v12  ;;  %v1079_v1 = vmul.f32 %v12916_v3, %v13137_v8  ;;  %v9918_v3 = vld [vmem:[%s18118_s2 + $0x4e8] sm:$0xff]  ;;  %v1039_v26 = vsel %vm729_vm7, %v1030_v16, 0.0  ;;  %v1078_v38 = vmul.f32 %v13142_v17, %v12935_v50  ;;  %v10045_v16 = vld [vmem:[%s18118_s2 + $0x660] sm:$0xff] }
 0x13e   : > { %v1023_v47 = vsel %vm729_vm7, %v1010_v6, 0.0  ;;  %v1071_v37 = vsel %vm729_vm7, %v1058_v48, 0.0  ;;  %v1081_v43 = vmul.f32 %v12956_v33, %v13177_v9  ;;  %v1080_v49 = vmul.f32 %v13188_v41, %v18210_v63  ;;  %v10043_v6 = vld [vmem:[%s18118_s2 + $0x650] sm:$0xff] }
 0x13f   : > { %11024 = vmatmul.mubr.msk.f32.gmra.mrb[94].mxu1 %vm287_vm0, %v9916_v28  ;;  %v1024_v62 = vadd.f32 %v1023_v47, %v1022_v10  ;;  %v1072_v20 = vadd.f32 %v1071_v37, %v1070_v52  ;;  %v1040_v54 = vadd.f32 %v1039_v26, %v1038_v57  ;;  %v1083_v50 = vmul.f32 %v12990_v25, %v13219_v22  ;;  %v9991_v52 = vld [vmem:[%s18118_s2 + $0x5f0] sm:$0xff] }
 0x140   : > { %11074 = vmatmul.mubr.msk.f32.gmra.mrb[82].mxu0 %vm287_vm0, %v9984_v40  ;;  %11026 = vmatprep.mubr.msk.f32.mxu1 %vm287_vm0, %v9917_v39  ;;  %v1082_v33 = vmul.f32 %v13249_v11, %v13001_v46  ;;  %v1041_v36 = vsel %vm729_vm7, %v1031_v58, 0.0  ;;  %v1087_v21 = vsel %vm729_vm7, %v1078_v38, 0.0  ;;  %v980_v34 = vsel %vm729_vm7, %v13104_v53, 0.0  ;;  %v9988_v53 = vld [vmem:[%s18118_s2 + $0x5d8] sm:$0xff]  ;;  %v10047_v63 = vld [vmem:[%s18118_s2 + $0x670] sm:$0xff] }
 0x141   : > { %11076 = vmatprep.mubr.msk.f32.mxu0 %vm287_vm0, %v9985_v35  ;;  %v1025_v25 = vsel %vm729_vm7, %v1011_v60, 0.0  ;;  %v1042_v30 = vadd.f32 %v1041_v36, %v1040_v54  ;;  %v1088_v46 = vadd.f32 %v1087_v21, %v1086_v31  ;;  %v1089_v24 = vsel %vm729_vm7, %v1079_v1, 0.0  ;;  %v9989_v60 = vld [vmem:[%s18118_s2 + $0x5e0] sm:$0xff]  ;;  %v10048_v54 = vld [vmem:[%s18118_s2 + $0x678] sm:$0xff]  ;;  %v10122_v21 = vld [vmem:[%s18118_s2 + $0x788] sm:$0xff] }
 0x142   : > { %v1091_v19 = vsel %vm729_vm7, %v1080_v49, 0.0  ;;  %v981_v61 = vsel %vm729_vm7, %v13099_v23, 0.0  ;;  %v983_v7 = vsel %vm729_vm7, %v13142_v17, 0.0  ;;  %v1073_v5 = vsel %vm729_vm7, %v1059_v56, 0.0  ;;  %v10042_v56 = vld [vmem:[%s18118_s2 + $0x648] sm:$0xff]  ;;  %v10121_v36 = vld [vmem:[%s18118_s2 + $0x780] sm:$0xff] }
 0x143   : > { %11027 = vmatmul.mubr.msk.f32.gmra.mrb[96].mxu1 %vm287_vm0, %v9918_v3  ;;  %v1044_v29 = vadd.f32 %v1043_v59, %v1042_v30  ;;  %v1090_v32 = vadd.f32 %v1089_v24, %v1088_v46  ;;  %v982_v4 = vadd.f32 %v981_v61, %v980_v34  ;;  %v1045_v13 = vsel %vm729_vm7, %v13201_v15, 0.0  ;;  %v9993_v3 = vld [vmem:[%s18118_s2 + $0x600] sm:$0xff]  ;;  %v10000_v59 = vld [vmem:[%s18118_s2 + $0x638] sm:$0xff]  ;;  %v10123_v34 = vld [vmem:[%s18118_s2 + $0x790] sm:$0xff] }
 0x144   : > { %11077 = vmatmul.mubr.msk.f32.gmra.mrb[84].mxu0 %vm287_vm0, %v9986_v44  ;;  %11029 = vmatprep.mubr.msk.f32.mxu1 %vm287_vm0, %v9919_v45  ;;  %v1047_v57 = vsel %vm729_vm7, %v1034_v2, 0.0  ;;  %v13346_v23 = vadd.f32 %v1025_v25, %v1024_v62  ;;  %v13348_v10 = vadd.f32 %v1073_v5, %v1072_v20  ;;  %v1093_v15 = vsel %vm729_vm7, %v1081_v43, 0.0  ;;  %v9995_v44 = vld [vmem:[%s18118_s2 + $0x610] sm:$0xff]  ;;  %v10124_v25 = vld [vmem:[%s18118_s2 + $0x798] sm:$0xff] }
 0x145   : > { %11079 = vmatprep.mubr.msk.f32.mxu0 %vm287_vm0, %v9987_v14  ;;  %v1092_v17 = vadd.f32 %v1091_v19, %v1090_v32  ;;  %v984_v12 = vadd.f32 %v983_v7, %v982_v4  ;;  %v1046_v28 = vadd.f32 %v1045_v13, %v1044_v29  ;;  %v1095_v2 = vsel %vm729_vm7, %v1082_v33, 0.0  ;;  %v9998_v33 = vld [vmem:[%s18118_s2 + $0x628] sm:$0xff]  ;;  %v9999_v14 = vld [vmem:[%s18118_s2 + $0x630] sm:$0xff] }
 0x146   : > { %18211 = vst [vmem:[#allocation42_spill] sm:$0xff] %v13346_v23  ;;  %18212 = vst [vmem:[#allocation44_spill] sm:$0xff] %v13348_v10  ;;  %v985_v48 = vsel %vm729_vm7, %v13137_v8, 0.0  ;;  %v987_v40 = vsel %vm729_vm7, %v13188_v41, 0.0  ;;  %v1049_v1 = vsel %vm729_vm7, %v13241_v51, 0.0  ;;  %v10044_v8 = vld [vmem:[%s18118_s2 + $0x658] sm:$0xff] }
 0x147   : > { %11030 = vmatmul.mubr.msk.f32.gmra.mrb[98].mxu1 %vm287_vm0, %v9920_v55  ;;  %v1094_v39 = vadd.f32 %v1093_v15, %v1092_v17  ;;  %v986_v31 = vadd.f32 %v985_v48, %v984_v12  ;;  %v1048_v58 = vadd.f32 %v1047_v57, %v1046_v28  ;;  %v1097_v37 = vsel %vm729_vm7, %v1083_v50, 0.0  ;;  %v9992_v51 = vld [vmem:[%s18118_s2 + $0x5f8] sm:$0xff]  ;;  %v9997_v50 = vld [vmem:[%s18118_s2 + $0x620] sm:$0xff]  ;;  %v18217_v57 = vld [vmem:[#allocation4_spill] sm:$0xff] }
 0x148   : > { %11080 = vmatmul.mubr.msk.f32.gmra.mrb[86].mxu0 %vm287_vm0, %v9988_v53  ;;  %11108 = vmatprep.mubr.msk.f32.mxu1 %vm287_vm0, %v10041_v18  ;;  %v989_v62 = vsel %vm729_vm7, %v13177_v9, 0.0  ;;  %v991_v20 = vsel %vm729_vm7, %v13249_v11, 0.0  ;;  %v10046_v9 = vld [vmem:[%s18118_s2 + $0x668] sm:$0xff]  ;;  %v993_v49 = vsel %vm729_vm7, %v13219_v22, 0.0  ;;  %v9996_v22 = vld [vmem:[%s18118_s2 + $0x618] sm:$0xff] }
 0x149   : > { %11082 = vmatprep.mubr.msk.f32.mxu0 %vm287_vm0, %v9989_v60  ;;  %v1096_v35 = vadd.f32 %v1095_v2, %v1094_v39  ;;  %v988_v41 = vadd.f32 %v987_v40, %v986_v31  ;;  %v13379_v47 = vadd.f32 %v1049_v1, %v1048_v58  ;;  %v9994_v11 = vld [vmem:[%s18118_s2 + $0x608] sm:$0xff]  ;;  %v18218_v31 = vld [vmem:[#allocation13_spill] sm:$0xff] }
 0x14a   : > { %v18216_v60 = vld [vmem:[#allocation3_spill] sm:$0xff] }
 0x14b   : > { %11109 = vmatmul.mubr.msk.f32.vlgmr.msra.gmra.mrb[100].mxu1 %vm287_vm0, %v10042_v56  ;;  %18213 = vst [vmem:[#allocation45_spill] sm:$0xff] %v13379_v47  ;;  %v990_v26 = vadd.f32 %v989_v62, %v988_v41  ;;  %v13396_v38 = vadd.f32 %v1097_v37, %v1096_v35  ;;  %v18219_v35 = vld [vmem:[#allocation14_spill] sm:$0xff] }
 0x14c   : > { %11083 = vmatmul.mubr.msk.f32.gmra.mrb[88].mxu0 %vm287_vm0, %v9990_v27  ;;  %11111 = vmatprep.mubr.msk.f32.mxu1 %vm287_vm0, %v10043_v6 }
 0x14d   : > { %11085 = vmatprep.mubr.msk.f32.mxu0 %vm287_vm0, %v9991_v52  ;;  %18214 = vst [vmem:[#allocation46_spill] sm:$0xff] %v13396_v38  ;;  %v992_v43 = vadd.f32 %v991_v20, %v990_v26  ;;  %v18220_v20 = vld [vmem:[#allocation6_spill] sm:$0xff] }
 0x14f   : > { %11112 = vmatmul.mubr.msk.f32.gmra.mrb[102].mxu1 %vm287_vm0, %v10044_v8  ;;  %v13416_v45 = vadd.f32 %v993_v49, %v992_v43 }
 0x150   : > { %11086 = vmatmul.mubr.msk.f32.gmra.mrb[90].mxu0 %vm287_vm0, %v9992_v51  ;;  %11114 = vmatprep.mubr.msk.f32.mxu1 %vm287_vm0, %v10045_v16 }
 0x151   : > { %11088 = vmatprep.mubr.msk.f32.mxu0 %vm287_vm0, %v9993_v3  ;;  %18215 = vst [vmem:[#allocation47_spill] sm:$0xff] %v13416_v45  ;;  %v18228_v45 = vld [vmem:[#allocation18_spill] sm:$0xff] }
 0x153   : > { %11115 = vmatmul.mubr.msk.f32.gmra.mrb[104].mxu1 %vm287_vm0, %v10046_v9 }
 0x154   : > { %11089 = vmatmul.mubr.msk.f32.gmra.mrb[92].mxu0 %vm287_vm0, %v9994_v11  ;;  %11117 = vmatprep.mubr.msk.f32.mxu1 %vm287_vm0, %v10047_v63 }
 0x155   : > { %11091 = vmatprep.mubr.msk.f32.mxu0 %vm287_vm0, %v9995_v44  ;;  %v18221_v44 = vld [vmem:[#allocation5_spill] sm:$0xff] }
 0x157   : > { %11118 = vmatmul.mubr.msk.f32.gmra.mrb[106].mxu1 %vm287_vm0, %v10048_v54 }
 0x158   : > { %11092 = vmatmul.mubr.msk.f32.gmra.mrb[94].mxu0 %vm287_vm0, %v9996_v22 }
 0x159   : > { %11094 = vmatprep.mubr.msk.f32.mxu0 %vm287_vm0, %v9997_v50 }
 0x15c   : > { %11095 = vmatmul.mubr.msk.f32.gmra.mrb[96].mxu0 %vm287_vm0, %v9998_v33 }
 0x15d   : > { %11097 = vmatprep.mubr.msk.f32.mxu0 %vm287_vm0, %v9999_v14 }
 0x160   : > { %11098 = vmatmul.mubr.msk.f32.gmra.mrb[98].mxu0 %vm287_vm0, %v10000_v59 }
 0x161   : > { %11176 = vmatprep.mubr.msk.f32.mxu0 %vm287_vm0, %v10121_v36 }
 0x164   : > { %11177 = vmatmul.mubr.msk.f32.vlgmr.msra.gmra.mrb[100].mxu0 %vm287_vm0, %v10122_v21 }
 0x165   : > { %11179 = vmatprep.mubr.msk.f32.mxu0 %vm287_vm0, %v10123_v34 }
 0x168   : > { %11180 = vmatmul.mubr.msk.f32.gmra.mrb[102].mxu0 %vm287_vm0, %v10124_v25 }
 0x17e   : > { %v10838_v30 = vpop.f32.mrb[20].mxu1 }
 0x17f   : > { %v1348_v46 = vpop.f32.mrb[21].mxu1  ;;  %v13473_v4 = vadd.f32 %v10838_v30, %v18216_v60 }
 0x180   : > { %v13478_v17 = vadd.f32 %v18217_v57, %v1348_v46 }
 0x181   : > { %v1610_v15 = vsel %vm729_vm7, %v13473_v4, -inf }
 0x182   : > { %v10841_v55 = vpop.f32.mrb[22].mxu1  ;;  %v1603_v27 = vsel %vm729_vm7, %v13478_v17, -inf  ;;  %v1611_v40 = vrot.slane %v1610_v15, 4 }
 0x183   : > { %v1358_v24 = vpop.f32.mrb[23].mxu1  ;;  %v1604_v52 = vrot.slane %v1603_v27, 4  ;;  %v13505_v3 = vadd.f32 %v10841_v55, %v18220_v20 }
 0x184   : > { %v1612_v37 = vmax.f32 %v1610_v15, %v1611_v40  ;;  %v13518_v54 = vadd.f32 %v18221_v44, %v1358_v24  ;;  %v10049_v15 = vld [vmem:[%s18118_s2 + $0x680] sm:$0xff]  ;;  %v10052_v44 = vld [vmem:[%s18118_s2 + $0x698] sm:$0xff] }
 0x185   : > { %v1605_v62 = vmax.f32 %v1603_v27, %v1604_v52  ;;  %v1624_v14 = vsel %vm729_vm7, %v13505_v3, -inf  ;;  %v13539_v27 = vpop.permute.xlu1 %5803  ;;  %11120 = vmatprep.mubr.msk.f32.mxu1 %vm287_vm0, %v10049_v15 }
 0x186   : > { %v13462_v19 = vpop.f32.mrb[24].mxu1  ;;  %v1613_v49 = vrot.slane %v1612_v37, 2  ;;  %v1617_v30 = vsel %vm729_vm7, %v13518_v54, -inf  ;;  %v1625_v55 = vrot.slane %v1624_v14, 4  ;;  %18222 = vst [vmem:[#allocation3_spill] sm:$0xff] %v13539_v27 }
 0x187   : > { %v13464_v53 = vpop.f32.mrb[25].mxu1  ;;  %v1606_v33 = vrot.slane %v1605_v62, 2  ;;  %v1618_v57 = vrot.slane %v1617_v30, 4 }
 0x188   : > { %v1614_v25 = vmax.f32 %v1612_v37, %v1613_v49  ;;  %v1626_v37 = vmax.f32 %v1624_v14, %v1625_v55 }
 0x18a   : > { %v13466_v18 = vpop.f32.mrb[26].mxu1  ;;  %v1615_v40 = vrot.slane %v1614_v25, 1  ;;  %v1627_v55 = vrot.slane %v1626_v37, 2 }
 0x18b   : > { %v13468_v61 = vpop.f32.mrb[27].mxu1 }
 0x18e   : > { %v10850_v7 = vpop.f32.mrb[28].mxu1 }
 0x18f   : > { %v1388_v5 = vpop.f32.mrb[29].mxu1  ;;  %1928 = vrot.lane.b32.xlu0 %v10850_v7, %s11911_s30  ;;  %v1607_v7 = vmax.f32 %v1605_v62, %v1606_v33  ;;  %v18224_v33 = vld [vmem:[#allocation15_spill] sm:$0xff] }
 0x190   : > { %1926 = vrot.lane.b32.xlu1 %v1388_v5, %s11911_s30 }
 0x191   : > { %v1608_v20 = vrot.slane %v1607_v7, 1 }
 0x192   : > { %v10853_v29 = vpop.f32.mrb[30].mxu1 }
 0x193   : > { %v1398_v32 = vpop.f32.mrb[31].mxu1 }
 0x196   : > { %v13475_v13 = vpop.f32.mrb[32].mxu1  ;;  %v10906_v56 = vpop.f32.mrb[20].mxu0 }
 0x197   : > { %v13480_v12 = vpop.f32.mrb[33].mxu1  ;;  %v2411_v28 = vpop.f32.mrb[21].mxu0  ;;  %v13491_v58 = vadd.f32 %v10906_v56, %v18218_v31  ;;  %v10050_v31 = vld [vmem:[%s18118_s2 + $0x688] sm:$0xff] }
 0x198   : > { %v13496_v8 = vadd.f32 %v18219_v35, %v2411_v28  ;;  %v10051_v35 = vld [vmem:[%s18118_s2 + $0x690] sm:$0xff]  ;;  %11121 = vmatmul.mubr.msk.f32.gmra.mrb[108].mxu1 %vm287_vm0, %v10050_v31 }
 0x199   : > { %v2673_v26 = vsel %vm729_vm7, %v13491_v58, -inf  ;;  %11123 = vmatprep.mubr.msk.f32.mxu1 %vm287_vm0, %v10051_v35 }
 0x19a   : > { %v13484_v2 = vpop.f32.mrb[34].mxu1  ;;  %v10909_v6 = vpop.f32.mrb[22].mxu0  ;;  %v2666_v43 = vsel %vm729_vm7, %v13496_v8, -inf  ;;  %v2674_v50 = vrot.slane %v2673_v26, 4 }
 0x19b   : > { %v13488_v48 = vpop.f32.mrb[35].mxu1  ;;  %v2421_v39 = vpop.f32.mrb[23].mxu0  ;;  %v2667_v59 = vrot.slane %v2666_v43, 4 }
 0x19c   : > { %v2675_v24 = vmax.f32 %v2673_v26, %v2674_v50  ;;  %v1619_v50 = vmax.f32 %v1617_v30, %v1618_v57  ;;  %v13561_v14 = vadd.f32 %v18224_v33, %v2421_v39  ;;  %11124 = vmatmul.mubr.msk.f32.gmra.mrb[110].mxu1 %vm287_vm0, %v10052_v44  ;;  %v13571_v30 = vpop.permute.xlu1 %5813  ;;  %v1609_v39 = vmax.f32 %v1607_v7, %v1608_v20  ;;  %v10055_v7 = vld [vmem:[%s18118_s2 + $0x6b0] sm:$0xff] }
 0x19d   : > { %v2668_v5 = vmax.f32 %v2666_v43, %v2667_v59  ;;  %18225 = vst [vmem:[#allocation4_spill] sm:$0xff] %v13571_v30  ;;  %v1628_v20 = vmax.f32 %v1626_v37, %v1627_v55 }
 0x19e   : > { %v13493_v1 = vpop.f32.mrb[36].mxu1  ;;  %v13498_v41 = vpop.f32.mrb[24].mxu0  ;;  %v2676_v62 = vrot.slane %v2675_v24, 2 }
 0x19f   : > { %v13500_v51 = vpop.f32.mrb[25].mxu0  ;;  %v13502_v16 = vpop.f32.mrb[37].mxu1  ;;  %v2669_v26 = vrot.slane %v2668_v5, 2 }
 0x1a0   : > { %v2677_v15 = vmax.f32 %v2675_v24, %v2676_v62  ;;  %v1620_v24 = vrot.slane %v1619_v50, 2 }
 0x1a1   : > { %v2670_v57 = vmax.f32 %v2668_v5, %v2669_v26  ;;  %v18226_v26 = vld [vmem:[#allocation8_spill] sm:$0xff] }
 0x1a2   : > { %v13509_v9 = vpop.f32.mrb[38].mxu1  ;;  %v13513_v11 = vpop.f32.mrb[26].mxu0  ;;  %v2678_v44 = vrot.slane %v2677_v15, 1 }
 0x1a3   : > { %v13515_v63 = vpop.f32.mrb[39].mxu1  ;;  %v13520_v22 = vpop.f32.mrb[27].mxu0  ;;  %v2671_v47 = vrot.slane %v2670_v57, 1 }
 0x1a6   : > { %v13524_v36 = vpop.f32.mrb[40].mxu1 }
 0x1a7   : > { %v10918_v21 = vpop.f32.mrb[28].mxu0  ;;  %v13526_v34 = vpop.f32.mrb[41].mxu1 }
 0x1a8   : > { %2991 = vrot.lane.b32.xlu0 %v10918_v21, %s11894_s21  ;;  %v2451_v46 = vpop.f32.mrb[29].mxu0  ;;  %v1616_v21 = vmax.f32 %v1614_v25, %v1615_v40  ;;  %v10054_v25 = vld [vmem:[%s18118_s2 + $0x6a8] sm:$0xff] }
 0x1a9   : > { %2989 = vrot.lane.b32.xlu1 %v2451_v46, %s11894_s21 }
 0x1aa   : > { %v13532_v60 = vpop.f32.mrb[42].mxu1  ;;  %v1660_v5 = vsub.f32 %v13473_v4, %v1616_v21 }
 0x1ab   : > { %v10921_v56 = vpop.f32.mrb[30].mxu0  ;;  %v13534_v28 = vpop.f32.mrb[43].mxu1 }
 0x1ac   : > { %1932 = vrot.lane.b32.xlu0 %v10853_v29, %s11911_s30  ;;  %v2461_v52 = vpop.f32.mrb[31].mxu0  ;;  %v18223_v29 = vld [vmem:[#allocation16_spill] sm:$0xff] }
 0x1ad   : > { %1930 = vrot.lane.b32.xlu1 %v1398_v32, %s11911_s30  ;;  %v13552_v43 = vadd.f32 %v10909_v6, %v18223_v29  ;;  %v10053_v6 = vld [vmem:[%s18118_s2 + $0x6a0] sm:$0xff]  ;;  %v13593_v29 = vadd.f32 %v13462_v19, %v18226_v26  ;;  %v10056_v19 = vld [vmem:[%s18118_s2 + $0x6b8] sm:$0xff]  ;;  %v2679_v26 = vmax.f32 %v2677_v15, %v2678_v44 }
 0x1ae   : > { %v13554_v49 = vpop.f32.mrb[44].mxu1  ;;  %11126 = vmatprep.mubr.msk.f32.mxu1 %vm287_vm0, %v10053_v6  ;;  %v1659_v6 = vsub.f32 %v13478_v17, %v1609_v39  ;;  %v1629_v39 = vrot.slane %v1628_v20, 1 }
 0x1af   : > { %v10924_v32 = vpop.f32.mrb[32].mxu0  ;;  %v13563_v59 = vpop.f32.mrb[45].mxu1  ;;  %v2687_v31 = vsel %vm729_vm7, %v13552_v43, -inf  ;;  %11127 = vmatmul.mubr.msk.f32.gmra.mrb[112].mxu1 %vm287_vm0, %v10054_v25  ;;  %v1669_v25 = vmul.f32 1.442695, %v1660_v5  ;;  %v13620_v5 = vadd.f32 %v13498_v41, %v18228_v45  ;;  %v2723_v41 = vsub.f32 %v13491_v58, %v2679_v26 }
 0x1b0   : > { %2995 = vrot.lane.b32.xlu0 %v10921_v56, %s11894_s21  ;;  %v2471_v46 = vpop.f32.mrb[33].mxu0  ;;  %v2680_v56 = vsel %vm729_vm7, %v13561_v14, -inf  ;;  %v2688_v33 = vrot.slane %v2687_v31, 4  ;;  %11129 = vmatprep.mubr.msk.f32.mxu1 %vm287_vm0, %v10055_v7  ;;  %v1638_v7 = vsel %vm729_vm7, %v13593_v29, -inf  ;;  %v1630_v45 = vmax.f32 %v1628_v20, %v1629_v39 }
 0x1b1   : > { %2993 = vrot.lane.b32.xlu1 %v2461_v52, %s11894_s21  ;;  %v2681_v4 = vrot.slane %v2680_v56, 4  ;;  %11619 = vpow2.f32 %v1669_v25  ;;  %v1639_v15 = vrot.slane %v1638_v7, 4 }
 0x1b2   : > { %v13575_v35 = vpop.f32.mrb[46].mxu1  ;;  %v2689_v10 = vmax.f32 %v2687_v31, %v2688_v33  ;;  %v1662_v26 = vsub.f32 %v13505_v3, %v1630_v45 }
 0x1b3   : > { %v10927_v40 = vpop.f32.mrb[34].mxu0  ;;  %v13583_v52 = vpop.f32.mrb[47].mxu1  ;;  %11130 = vmatmul.mubr.msk.f32.gmra.mrb[114].mxu1 %vm287_vm0, %v10056_v19  ;;  %v2682_v23 = vmax.f32 %v2680_v56, %v2681_v4  ;;  %v1640_v58 = vmax.f32 %v1638_v7, %v1639_v15 }
 0x1b4   : > { %1936 = vrot.lane.b32.xlu0 %v13475_v13, %s11911_s30  ;;  %v2481_v62 = vpop.f32.mrb[35].mxu0  ;;  %v1621_v13 = vmax.f32 %v1619_v50, %v1620_v24  ;;  %v1667_v50 = vmul.f32 1.442695, %v1659_v6  ;;  %v2672_v24 = vmax.f32 %v2670_v57, %v2671_v47  ;;  %v2690_v57 = vrot.slane %v2689_v10, 2 }
 0x1b5   : > { %1934 = vrot.lane.b32.xlu1 %v13480_v12, %s11911_s30  ;;  %v13609_v12 = vpop.permute.xlu1 %5818  ;;  %v2683_v33 = vrot.slane %v2682_v23, 2  ;;  %v1641_v45 = vrot.slane %v1640_v58, 2 }
 0x1b6   : > { %v13599_v21 = vpop.f32.mrb[48].mxu1  ;;  %18227 = vst [vmem:[#allocation13_spill] sm:$0xff] %v13609_v12  ;;  %v1622_v38 = vrot.slane %v1621_v13, 1  ;;  %11621 = vpow2.f32 %v1667_v50  ;;  %v2722_v44 = vsub.f32 %v13496_v8, %v2672_v24  ;;  %v2732_v8 = vmul.f32 1.442695, %v2723_v41 }
 0x1b7   : > { %v13605_v37 = vpop.f32.mrb[49].mxu1  ;;  %v13607_v55 = vpop.f32.mrb[36].mxu0  ;;  %v2691_v25 = vmax.f32 %v2689_v10, %v2690_v57  ;;  %v2684_v7 = vmax.f32 %v2682_v23, %v2683_v33 }
 0x1b8   : > { %2999 = vrot.lane.b32.xlu0 %v10924_v32, %s11894_s21  ;;  %v13612_v17 = vpop.f32.mrb[37].mxu0  ;;  %v2730_v50 = vmul.f32 1.442695, %v2722_v44  ;;  %11623 = vpow2.f32 %v2732_v8  ;;  %v1673_v44 = vmul.f32 1.442695, %v1662_v26 }
 0x1b9   : > { %2997 = vrot.lane.b32.xlu1 %v2471_v46, %s11894_s21  ;;  %v18229_v46 = vld [vmem:[#allocation7_spill] sm:$0xff]  ;;  %v13639_v56 = vpop.permute.xlu1 %5828  ;;  %v2692_v57 = vrot.slane %v2691_v25, 1 }
 0x1ba   : > { %v13622_v32 = vpop.f32.mrb[50].mxu1  ;;  %v13630_v31 = vadd.f32 %v18229_v46, %v13464_v53  ;;  %18230 = vst [vmem:[#allocation14_spill] sm:$0xff] %v13639_v56  ;;  %v2701_v53 = vsel %vm729_vm7, %v13620_v5, -inf  ;;  %v18235_v46 = vld [vmem:[#allocation17_spill] sm:$0xff]  ;;  %11625 = vpow2.f32 %v2730_v50  ;;  %v1642_v56 = vmax.f32 %v1640_v58, %v1641_v45  ;;  %v18239_v45 = vld [vmem:[#allocation20_spill] sm:$0xff] }
 0x1bb   : > { %v13624_v12 = vpop.f32.mrb[51].mxu1  ;;  %v13626_v42 = vpop.f32.mrb[38].mxu0  ;;  %v2702_v39 = vrot.slane %v2701_v53, 4  ;;  %v13666_v41 = vadd.f32 %v18235_v46, %v13500_v51  ;;  %11627 = vpow2.f32 %v1673_v44 }
 0x1bc   : > { %1940 = vrot.lane.b32.xlu0 %v13484_v2, %s11911_s30  ;;  %v13634_v47 = vpop.f32.mrb[39].mxu0  ;;  %v1623_v2 = vmax.f32 %v1621_v13, %v1622_v38  ;;  %v18233_v38 = vld [vmem:[#allocation10_spill] sm:$0xff]  ;;  %v13678_v51 = vpop.eup %11619  ;;  %v1643_v44 = vrot.slane %v1642_v56, 1 }
 0x1bd   : > { %1938 = vrot.lane.b32.xlu1 %v13488_v48, %s11911_s30  ;;  %v1631_v48 = vsel %vm729_vm7, %v13630_v31, -inf  ;;  %v13659_v13 = vadd.f32 %v13466_v18, %v18233_v38  ;;  %v11558_v3 = vpop.permute.xlu1 %11557 }
 0x1be   : > { %v13644_v6 = vpop.f32.mrb[52].mxu1  ;;  %v1661_v15 = vsub.f32 %v13518_v54, %v1623_v2  ;;  %v11560_v23 = vunpack.i.h.bf16 %v11558_v3  ;;  %v2703_v54 = vmax.f32 %v2701_v53, %v2702_v39  ;;  %v2685_v2 = vrot.slane %v2684_v7, 1 }
 0x1bf   : > { %18231 = vst [vmem:[#allocation6_spill] sm:$0xff] %v13644_v6  ;;  %v13646_v4 = vpop.f32.mrb[53].mxu1  ;;  %v13648_v20 = vpop.f32.mrb[40].mxu0  ;;  %v1652_v33 = vsel %vm729_vm7, %v13659_v13, -inf  ;;  %v11559_v8 = vunpack.i.l.bf16 %v11558_v3  ;;  %v2693_v3 = vmax.f32 %v2691_v25, %v2692_v57 }
 0x1c0   : > { %18232 = vst [vmem:[#allocation5_spill] sm:$0xff] %v13646_v4  ;;  %3003 = vrot.lane.b32.xlu0 %v10927_v40, %s11894_s21  ;;  %v13653_v19 = vpop.f32.mrb[41].mxu0  ;;  %v1632_v40 = vrot.slane %v1631_v48, 4  ;;  %v1671_v46 = vmul.f32 1.442695, %v1661_v15  ;;  %v13694_v50 = vpop.eup %11621  ;;  %v1690_v15 = vsel %vm729_vm7, %v13678_v51, 0.0  ;;  %v2686_v58 = vmax.f32 %v2684_v7, %v2685_v2 }
 0x1c1   : > { %3001 = vrot.lane.b32.xlu1 %v2481_v62, %s11894_s21  ;;  %v2704_v0 = vrot.slane %v2703_v54, 2  ;;  %v18242_v7 = vld [vmem:[#allocation9_spill] sm:$0xff] }
 0x1c2   : > { %v13661_v24 = vpop.f32.mrb[54].mxu1  ;;  %v1633_v53 = vmax.f32 %v1631_v48, %v1632_v40  ;;  %v10058_v48 = vld [vmem:[%s18118_s2 + $0x6c8] sm:$0xff]  ;;  %v1653_v40 = vrot.slane %v1652_v33, 4  ;;  %11629 = vpow2.f32 %v1671_v46  ;;  %v13722_v2 = vadd.f32 %v18242_v7, %v13468_v61 }
 0x1c3   : > { %18234 = vst [vmem:[#allocation16_spill] sm:$0xff] %v13661_v24  ;;  %v13668_v10 = vpop.f32.mrb[55].mxu1  ;;  %v13670_v62 = vpop.f32.mrb[42].mxu0  ;;  %v2705_v46 = vmax.f32 %v2703_v54, %v2704_v0 }
 0x1c4   : > { %18236 = vst [vmem:[#allocation15_spill] sm:$0xff] %v13668_v10  ;;  %1986 = vrot.lane.b32.xlu0 %v13502_v16, %s11911_s30  ;;  %v13674_v18 = vpop.f32.mrb[43].mxu0  ;;  %v10057_v16 = vld [vmem:[%s18118_s2 + $0x6c0] sm:$0xff]  ;;  %v1634_v25 = vrot.slane %v1633_v53, 2  ;;  %v1654_v10 = vmax.f32 %v1652_v33, %v1653_v40 }
 0x1c5   : > { %1988 = vrot.lane.b32.xlu1 %v13493_v1, %s11911_s30  ;;  %v2694_v1 = vsel %vm729_vm7, %v13666_v41, -inf  ;;  %11132 = vmatprep.mubr.msk.f32.mxu1 %vm287_vm0, %v10057_v16  ;;  %v13710_v16 = vadd.f32 %v13513_v11, %v18239_v45  ;;  %v2725_v45 = vsub.f32 %v13552_v43, %v2693_v3  ;;  %v1644_v3 = vmax.f32 %v1642_v56, %v1643_v44 }
 0x1c6   : > { %v13682_v38 = vpop.f32.mrb[56].mxu1  ;;  %11133 = vmatmul.mubr.msk.f32.gmra.mrb[116].mxu1 %vm287_vm0, %v10058_v48  ;;  %v1691_v48 = vrot.slane %v1690_v15, 4 }
 0x1c7   : > { %18237 = vst [vmem:[#allocation8_spill] sm:$0xff] %v13682_v38  ;;  %v13689_v39 = vpop.f32.mrb[57].mxu1  ;;  %v13691_v26 = vpop.f32.mrb[44].mxu0  ;;  %v1683_v38 = vsel %vm729_vm7, %v13694_v50, 0.0  ;;  %v2715_v61 = vsel %vm729_vm7, %v13710_v16, -inf }
 0x1c8   : > { %18238 = vst [vmem:[#allocation18_spill] sm:$0xff] %v13689_v39  ;;  %3049 = vrot.lane.b32.xlu0 %v13612_v17, %s11894_s21  ;;  %v13698_v30 = vpop.f32.mrb[45].mxu0  ;;  %v2695_v17 = vrot.slane %v2694_v1, 4  ;;  %v1692_v54 = vadd.f32 %v1691_v48, %v1690_v15  ;;  %v1655_v48 = vrot.slane %v1654_v10, 2 }
 0x1c9   : > { %3051 = vrot.lane.b32.xlu1 %v13607_v55, %s11894_s21  ;;  %v11428_v55 = vpack.c.bf16 %v11560_v23, %v11559_v8  ;;  %v2724_v23 = vsub.f32 %v13561_v14, %v2686_v58  ;;  %v1645_v14 = vsel %vm729_vm7, %v13722_v2, -inf  ;;  %v2736_v58 = vmul.f32 1.442695, %v2725_v45 }
 0x1ca   : > { %v13712_v27 = vpop.f32.mrb[58].mxu1  ;;  %v2696_v8 = vmax.f32 %v2694_v1, %v2695_v17  ;;  %v2706_v17 = vrot.slane %v2705_v46, 1  ;;  %v1646_v44 = vrot.slane %v1645_v14, 4 }
 0x1cb   : > { %18240 = vst [vmem:[#allocation7_spill] sm:$0xff] %v13712_v27  ;;  %v13716_v57 = vpop.f32.mrb[59].mxu1  ;;  %v13718_v39 = vpop.f32.mrb[46].mxu0  ;;  %11429 = vmatprep.subr.bf16.mxu1 %v11428_v55  ;;  %v1684_v27 = vrot.slane %v1683_v38, 4  ;;  %v2734_v15 = vmul.f32 1.442695, %v2724_v23  ;;  %11631 = vpow2.f32 %v2736_v58  ;;  %v1656_v58 = vmax.f32 %v1654_v10, %v1655_v48 }
 0x1cc   : > { %18241 = vst [vmem:[#allocation10_spill] sm:$0xff] %v13716_v57  ;;  %1990 = vrot.lane.b32.xlu0 %v13515_v63, %s11911_s30  ;;  %v13726_v11 = vpop.f32.mrb[47].mxu0  ;;  %11431 = vmatpush3.bf16.msra.mxu1 %v11428_v55  ;;  %v13736_v63 = vpop.eup %11623  ;;  %v1635_v57 = vmax.f32 %v1633_v53, %v1634_v25  ;;  %v2716_v53 = vrot.slane %v2715_v61, 4  ;;  %v2697_v56 = vrot.slane %v2696_v8, 2  ;;  %v2707_v24 = vmax.f32 %v2705_v46, %v2706_v17  ;;  %v10060_v46 = vld [vmem:[%s18118_s2 + $0x6d8] sm:$0xff] }
 0x1cd   : > { %1992 = vrot.lane.b32.xlu1 %v13509_v9, %s11911_s30  ;;  %v13742_v9 = vpop.eup %11625  ;;  %v1685_v33 = vadd.f32 %v1684_v27, %v1683_v38  ;;  %v2753_v40 = vsel %vm729_vm7, %v13736_v63, 0.0  ;;  %v1664_v27 = vsub.f32 %v13593_v29, %v1644_v3  ;;  %11633 = vpow2.f32 %v2734_v15 }
 0x1ce   : > { %v13734_v7 = vpop.f32.mrb[60].mxu1  ;;  %v1636_v55 = vrot.slane %v1635_v57, 1  ;;  %v2717_v4 = vmax.f32 %v2715_v61, %v2716_v53  ;;  %v2698_v3 = vmax.f32 %v2696_v8, %v2697_v56  ;;  %v1647_v17 = vmax.f32 %v1645_v14, %v1646_v44 }
 0x1cf   : > { %18243 = vst [vmem:[#allocation17_spill] sm:$0xff] %v13734_v7  ;;  %v13738_v43 = vpop.f32.mrb[61].mxu1  ;;  %v13740_v0 = vpop.f32.mrb[48].mxu0  ;;  %v1686_v6 = vrot.slane %v1685_v33, 2  ;;  %v1677_v56 = vmul.f32 1.442695, %v1664_v27  ;;  %v2727_v48 = vsub.f32 %v13620_v5, %v2707_v24 }
 0x1d0   : > { %18244 = vst [vmem:[#allocation20_spill] sm:$0xff] %v13738_v43  ;;  %3053 = vrot.lane.b32.xlu0 %v13634_v47, %s11894_s21  ;;  %v13748_v1 = vpop.f32.mrb[49].mxu0  ;;  %v2746_v47 = vsel %vm729_vm7, %v13742_v9, 0.0  ;;  %v13762_v7 = vpop.eup %11627  ;;  %v1637_v61 = vmax.f32 %v1635_v57, %v1636_v55  ;;  %v10062_v57 = vld [vmem:[%s18118_s2 + $0x6e8] sm:$0xff]  ;;  %v2718_v44 = vrot.slane %v2717_v4, 2 }
 0x1d1   : > { %3055 = vrot.lane.b32.xlu1 %v13626_v42, %s11894_s21  ;;  %v1693_v42 = vrot.slane %v1692_v54, 2  ;;  %v13769_v23 = vpop.eup %11629  ;;  %v2747_v29 = vrot.slane %v2746_v47, 4  ;;  %v1704_v8 = vsel %vm729_vm7, %v13762_v7, 0.0  ;;  %11635 = vpow2.f32 %v1677_v56 }
 0x1d2   : > { %v13754_v25 = vpop.f32.mrb[62].mxu1  ;;  %v1697_v15 = vsel %vm729_vm7, %v13769_v23, 0.0  ;;  %v1705_v5 = vrot.slane %v1704_v8, 4 }
 0x1d3   : > { %18245 = vst [vmem:[#allocation9_spill] sm:$0xff] %v13754_v25  ;;  %v13758_v45 = vpop.f32.mrb[63].mxu1  ;;  %v13760_v43 = vpop.f32.mrb[50].mxu0  ;;  %v2754_v25 = vrot.slane %v2753_v40, 4  ;;  %v1694_v14 = vadd.f32 %v1693_v42, %v1692_v54  ;;  %v2748_v27 = vadd.f32 %v2747_v29, %v2746_v47  ;;  %v1698_v24 = vrot.slane %v1697_v15, 4 }
 0x1d4   : > { %18246 = vst [vmem:[#allocation48_spill] sm:$0xff] %v13758_v45  ;;  %1994 = vrot.lane.b32.xlu0 %v13526_v34, %s11911_s30  ;;  %v13767_v38 = vpop.f32.mrb[51].mxu0  ;;  %v10059_v45 = vld [vmem:[%s18118_s2 + $0x6d0] sm:$0xff] }
 0x1d5   : > { %18247 = vst [vmem:[#allocation49_spill] sm:$0xff] %v13767_v38  ;;  %1996 = vrot.lane.b32.xlu1 %v13524_v36, %s11911_s30  ;;  %11135 = vmatprep.mubr.msk.f32.mxu1 %vm287_vm0, %v10059_v45  ;;  %v10061_v36 = vld [vmem:[%s18118_s2 + $0x6e0] sm:$0xff]  ;;  %v18251_v45 = vld [vmem:[#allocation19_spill] sm:$0xff]  ;;  %v2755_v55 = vadd.f32 %v2754_v25, %v2753_v40  ;;  %v2719_v40 = vmax.f32 %v2717_v4, %v2718_v44  ;;  %v2749_v47 = vrot.slane %v2748_v27, 2 }
 0x1d6   : > { %v13776_v34 = vpop.f32.mrb[64].mxu1  ;;  %11136 = vmatmul.mubr.msk.f32.gmra.mrb[118].mxu1 %vm287_vm0, %v10060_v46  ;;  %v2699_v46 = vrot.slane %v2698_v3, 1  ;;  %v1699_v4 = vadd.f32 %v1698_v24, %v1697_v15 }
 0x1d7   : > { %18248 = vst [vmem:[#allocation50_spill] sm:$0xff] %v13776_v34  ;;  %v13785_v53 = vpop.f32.mrb[65].mxu1  ;;  %v13787_v38 = vpop.f32.mrb[52].mxu0  ;;  %v13796_v34 = vadd.f32 %v18251_v45, %v13520_v22  ;;  %11138 = vmatprep.mubr.msk.f32.mxu1 %vm287_vm0, %v10061_v36  ;;  %v1687_v22 = vadd.f32 %v1686_v6, %v1685_v33  ;;  %v1663_v45 = vsub.f32 %v13630_v31, %v1637_v61  ;;  %v1657_v36 = vrot.slane %v1656_v58, 1 }
 0x1d8   : > { %18249 = vst [vmem:[#allocation51_spill] sm:$0xff] %v13785_v53  ;;  %18250 = vst [vmem:[#allocation52_spill] sm:$0xff] %v13787_v38  ;;  %3057 = vrot.lane.b32.xlu0 %v13653_v19, %s11894_s21  ;;  %v13800_v10 = vpop.f32.mrb[53].mxu0  ;;  %v1648_v53 = vrot.slane %v1647_v17, 2  ;;  %v1695_v31 = vrot.slane %v1694_v14, 1  ;;  %v2756_v54 = vrot.slane %v2755_v55, 2  ;;  %v2700_v42 = vmax.f32 %v2698_v3, %v2699_v46  ;;  %v13827_v61 = vpop.eup %11631 }
 0x1d9   : > { %18252 = vst [vmem:[#allocation19_spill] sm:$0xff] %v13800_v10  ;;  %3059 = vrot.lane.b32.xlu1 %v13648_v20, %s11894_s21  ;;  %v2708_v6 = vsel %vm729_vm7, %v13796_v34, -inf  ;;  %v2740_v33 = vmul.f32 1.442695, %v2727_v48  ;;  %v1688_v25 = vrot.slane %v1687_v22, 1  ;;  %v1706_v48 = vadd.f32 %v1705_v5, %v1704_v8 }
 0x1da   : > { %v13809_v19 = vpop.f32.mrb[66].mxu1  ;;  %11139 = vmatmul.mubr.msk.f32.gmra.mrb[120].mxu1 %vm287_vm0, %v10062_v57  ;;  %v1649_v56 = vmax.f32 %v1647_v17, %v1648_v53  ;;  %v2709_v57 = vrot.slane %v2708_v6, 4  ;;  %v1675_v44 = vmul.f32 1.442695, %v1663_v45  ;;  %v2757_v3 = vadd.f32 %v2756_v54, %v2755_v55  ;;  %v13841_v53 = vpop.permute.xlu0 %5808 }
 0x1db   : > { %18253 = vst [vmem:[#allocation53_spill] sm:$0xff] %v13809_v19  ;;  %v13812_v10 = vpop.f32.mrb[67].mxu1  ;;  %v13814_v38 = vpop.f32.mrb[54].mxu0  ;;  %11637 = vpow2.f32 %v2740_v33  ;;  %v2720_v46 = vrot.slane %v2719_v40, 1  ;;  %v1696_v17 = vadd.f32 %v1695_v31, %v1694_v14  ;;  %18257 = vst [vmem:[#allocation57_spill] sm:$0xff] %v13841_v53  ;;  %v2767_v8 = vsel %vm729_vm7, %v13827_v61, 0.0 }
 0x1dc   : > { %18254 = vst [vmem:[#allocation54_spill] sm:$0xff] %v13812_v10  ;;  %1998 = vrot.lane.b32.xlu0 %v13534_v28, %s11911_s30  ;;  %v13821_v20 = vpop.f32.mrb[55].mxu0  ;;  %v13833_v19 = vpop.eup %11633  ;;  %v1689_v15 = vadd.f32 %v1688_v25, %v1687_v22  ;;  %v1707_v14 = vrot.slane %v1706_v48, 2  ;;  %v1700_v24 = vrot.slane %v1699_v4, 2  ;;  %11639 = vpow2.f32 %v1675_v44  ;;  %v10063_v22 = vld [vmem:[%s18118_s2 + $0x6f0] sm:$0xff] }
 0x1dd   : > { %18255 = vst [vmem:[#allocation55_spill] sm:$0xff] %v13821_v20  ;;  %2000 = vrot.lane.b32.xlu1 %v13532_v60, %s11911_s30  ;;  %v1658_v20 = vmax.f32 %v1656_v58, %v1657_v36  ;;  %v2726_v58 = vsub.f32 %v13666_v41, %v2700_v42  ;;  %v2760_v55 = vsel %vm729_vm7, %v13833_v19, 0.0  ;;  %v2710_v36 = vmax.f32 %v2708_v6, %v2709_v57  ;;  %v10064_v6 = vld [vmem:[%s18118_s2 + $0x6f8] sm:$0xff] }
 0x1de   : > { %v13825_v29 = vpop.f32.mrb[68].mxu1  ;;  %v2758_v31 = vrot.slane %v2757_v3, 1  ;;  %v2768_v54 = vrot.slane %v2767_v8, 4  ;;  %v2721_v33 = vmax.f32 %v2719_v40, %v2720_v46  ;;  %11641 = vrcp.f32 %v1696_v17  ;;  %11141 = vmatprep.mubr.msk.f32.mxu1 %vm287_vm0, %v10063_v22  ;;  %v13877_v44 = vpop.permute.xlu0 %5823 }
 0x1df   : > { %v13829_v10 = vpop.f32.mrb[56].mxu0  ;;  %v13831_v28 = vpop.f32.mrb[69].mxu1  ;;  %v2738_v25 = vmul.f32 1.442695, %v2726_v58  ;;  %11643 = vrcp.f32 %v1689_v15  ;;  %11142 = vmatmul.mubr.msk.f32.gmra.mrb[122].mxu1 %vm287_vm0, %v10064_v6  ;;  %v2711_v42 = vrot.slane %v2710_v36, 2  ;;  %18260 = vst [vmem:[#allocation60_spill] sm:$0xff] %v13877_v44 }
 0x1e0   : > { %18256 = vst [vmem:[#allocation56_spill] sm:$0xff] %v13831_v28  ;;  %3061 = vrot.lane.b32.xlu0 %v13674_v18, %s11894_s21  ;;  %v13837_v60 = vpop.f32.mrb[57].mxu0  ;;  %v2750_v28 = vadd.f32 %v2749_v47, %v2748_v27  ;;  %v1650_v18 = vrot.slane %v1649_v56, 1  ;;  %v1666_v27 = vsub.f32 %v13659_v13, %v1658_v20  ;;  %v2761_v20 = vrot.slane %v2760_v55, 4  ;;  %v10065_v58 = vld [vmem:[%s18118_s2 + $0x700] sm:$0xff]  ;;  %v10066_v15 = vld [vmem:[%s18118_s2 + $0x708] sm:$0xff] }
 0x1e1   : > { %3063 = vrot.lane.b32.xlu1 %v13670_v62, %s11894_s21  ;;  %v10067_v6 = vld [vmem:[%s18118_s2 + $0x710] sm:$0xff]  ;;  %11144 = vmatprep.mubr.msk.f32.mxu1 %vm287_vm0, %v10065_v58  ;;  %11645 = vpow2.f32 %v2738_v25 }
 0x1e2   : > { %v13846_v45 = vpop.f32.mrb[70].mxu1  ;;  %v2751_v13 = vrot.slane %v2750_v28, 1  ;;  %v1681_v46 = vmul.f32 1.442695, %v1666_v27  ;;  %v1651_v17 = vmax.f32 %v1649_v56, %v1650_v18  ;;  %v2759_v18 = vadd.f32 %v2758_v31, %v2757_v3 }
 0x1e3   : > { %v13850_v5 = vpop.f32.mrb[58].mxu0  ;;  %v13852_v62 = vpop.f32.mrb[71].mxu1  ;;  %v2762_v27 = vadd.f32 %v2761_v20, %v2760_v55  ;;  %11145 = vmatmul.mubr.msk.f32.gmra.mrb[124].mxu1 %vm287_vm0, %v10066_v15  ;;  %v10069_v55 = vld [vmem:[%s18118_s2 + $0x720] sm:$0xff] }
 0x1e4   : > { %18258 = vst [vmem:[#allocation58_spill] sm:$0xff] %v13852_v62  ;;  %2048 = vrot.lane.b32.xlu0 %v13554_v49, %s11911_s30  ;;  %v13857_v41 = vpop.f32.mrb[59].mxu0  ;;  %v13868_v49 = vpop.eup %11635  ;;  %v2752_v44 = vadd.f32 %v2751_v13, %v2750_v28  ;;  %v2712_v62 = vmax.f32 %v2710_v36, %v2711_v42  ;;  %11147 = vmatprep.mubr.msk.f32.mxu1 %vm287_vm0, %v10067_v6  ;;  %11647 = vpow2.f32 %v1681_v46 }
 0x1e5   : > { %2046 = vrot.lane.b32.xlu1 %v13563_v59, %s11911_s30  ;;  %v1708_v59 = vadd.f32 %v1707_v14, %v1706_v48  ;;  %v1718_v56 = vsel %vm729_vm7, %v13868_v49, 0.0  ;;  %v2769_v48 = vadd.f32 %v2768_v54, %v2767_v8  ;;  %v1701_v14 = vadd.f32 %v1700_v24, %v1699_v4 }
 0x1e6   : > { %v13870_v47 = vpop.f32.mrb[72].mxu1  ;;  %v1719_v4 = vrot.slane %v1718_v56, 4  ;;  %v1665_v28 = vsub.f32 %v13722_v2, %v1651_v17  ;;  %11649 = vrcp.f32 %v2759_v18  ;;  %v2763_v13 = vrot.slane %v2762_v27, 2  ;;  %v10070_v17 = vld [vmem:[%s18118_s2 + $0x728] sm:$0xff] }
 0x1e7   : > { %v13873_v57 = vpop.f32.mrb[60].mxu0  ;;  %v13875_v40 = vpop.f32.mrb[73].mxu1  ;;  %v1709_v36 = vrot.slane %v1708_v59, 1  ;;  %v2770_v24 = vrot.slane %v2769_v48, 2  ;;  %v1702_v2 = vrot.slane %v1701_v14, 1  ;;  %11651 = vrcp.f32 %v2752_v44 }
 0x1e8   : > { %18259 = vst [vmem:[#allocation59_spill] sm:$0xff] %v13875_v40  ;;  %3111 = vrot.lane.b32.xlu0 %v13691_v26, %s11894_s21  ;;  %v13881_v22 = vpop.f32.mrb[61].mxu0  ;;  %v2729_v26 = vsub.f32 %v13710_v16, %v2721_v33  ;;  %v13901_v40 = vpop.eup %11637  ;;  %v2713_v42 = vrot.slane %v2712_v62, 1  ;;  %v1720_v15 = vadd.f32 %v1719_v4, %v1718_v56  ;;  %v1679_v6 = vmul.f32 1.442695, %v1665_v28 }
 0x1e9   : > { %3109 = vrot.lane.b32.xlu1 %v13698_v30, %s11894_s21  ;;  %v10068_v30 = vld [vmem:[%s18118_s2 + $0x718] sm:$0xff]  ;;  %v13921_v54 = vpop.eup %11639  ;;  %v13923_v33 = vpop.permute.xlu0 %2977  ;;  %v2771_v18 = vadd.f32 %v2770_v24, %v2769_v48  ;;  %v2764_v56 = vadd.f32 %v2763_v13, %v2762_v27  ;;  %v1703_v28 = vadd.f32 %v1702_v2, %v1701_v14 }
 0x1ea   : > { %v13898_v53 = vpop.f32.mrb[74].mxu1  ;;  %v2744_v31 = vmul.f32 1.442695, %v2729_v26  ;;  %18261 = vst [vmem:[#allocation61_spill] sm:$0xff] %v13923_v33  ;;  %11148 = vmatmul.mubr.msk.f32.gmra.mrb[126].mxu1 %vm287_vm0, %v10068_v30  ;;  %v11642_v25 = vpop.eup %11641  ;;  %v10071_v26 = vld [vmem:[%s18118_s2 + $0x730] sm:$0xff]  ;;  %v2714_v48 = vmax.f32 %v2712_v62, %v2713_v42  ;;  %v1721_v27 = vrot.slane %v1720_v15, 2 }
 0x1eb   : > { %v13903_v8 = vpop.f32.mrb[62].mxu0  ;;  %v13905_v16 = vpop.f32.mrb[75].mxu1  ;;  %11150 = vmatprep.mubr.msk.f32.mxu1 %vm287_vm0, %v10069_v55  ;;  %v1710_v55 = vadd.f32 %v1709_v36, %v1708_v59  ;;  %v1748_v4 = vmul.f32 %v11642_v25, %v13678_v51  ;;  %v10072_v51 = vld [vmem:[%s18118_s2 + $0x738] sm:$0xff]  ;;  %v2772_v36 = vrot.slane %v2771_v18, 1  ;;  %v2765_v42 = vrot.slane %v2764_v56, 1 }
 0x1ec   : > { %2052 = vrot.lane.b32.xlu0 %v13575_v35, %s11911_s30  ;;  %v13914_v3 = vpop.f32.mrb[63].mxu0  ;;  %v2781_v35 = vsel %vm729_vm7, %v13901_v40, 0.0  ;;  %v11644_v58 = vpop.eup %11643  ;;  %11653 = vpow2.f32 %v2744_v31 }
 0x1ed   : > { %2050 = vrot.lane.b32.xlu1 %v13583_v52, %s11911_s30  ;;  %v2782_v30 = vrot.slane %v2781_v35, 4  ;;  %v13947_v33 = vpop.permute.xlu0 %4040  ;;  %v1747_v31 = vmul.f32 %v11644_v58, %v13694_v50  ;;  %v13964_v59 = vpop.eup %11645  ;;  %11655 = vpow2.f32 %v1679_v6  ;;  %v10073_v50 = vld [vmem:[%s18118_s2 + $0x740] sm:$0xff] }
 0x1ee   : > { %v13927_v20 = vpop.f32.mrb[76].mxu1  ;;  %18263 = vst [vmem:[#allocation63_spill] sm:$0xff] %v13947_v33  ;;  %11151 = vmatmul.mubr.msk.f32.gmra.mrb[128].mxu1 %vm287_vm0, %v10070_v17  ;;  %v13966_v14 = vpop.permute.xlu1 %11567  ;;  %11657 = vrcp.f32 %v1710_v55 }
 0x1ef   : > { %18262 = vst [vmem:[#allocation62_spill] sm:$0xff] %v13927_v20  ;;  %v13930_v46 = vpop.f32.mrb[64].mxu0  ;;  %v13932_v52 = vpop.f32.mrb[77].mxu1  ;;  %v1711_v20 = vsel %vm729_vm7, %v13921_v54, 0.0  ;;  %11153 = vmatprep.mubr.msk.f32.mxu1 %vm287_vm0, %v10071_v26  ;;  %v2783_v2 = vadd.f32 %v2782_v30, %v2781_v35  ;;  %11659 = vrcp.f32 %v1703_v28  ;;  %v2774_v26 = vsel %vm729_vm7, %v13964_v59, 0.0 }
 0x1f0   : > { %3115 = vrot.lane.b32.xlu0 %v13718_v39, %s11894_s21  ;;  %v13940_v44 = vpop.f32.mrb[65].mxu0  ;;  %v13975_v13 = vpop.eup %11647  ;;  %v1712_v25 = vrot.slane %v1711_v20, 4  ;;  %v2728_v35 = vsub.f32 %v13796_v34, %v2714_v48  ;;  %v10075_v34 = vld [vmem:[%s18118_s2 + $0x750] sm:$0xff]  ;;  %v1722_v48 = vadd.f32 %v1721_v27, %v1720_v15 }
 0x1f1   : > { %3113 = vrot.lane.b32.xlu1 %v13726_v11, %s11894_s21  ;;  %v13977_v17 = vpop.permute.xlu0 %5833  ;;  %v11650_v6 = vpop.eup %11649  ;;  %v2784_v33 = vrot.slane %v2783_v2, 2 }
 0x1f2   : > { %v13950_v39 = vpop.f32.mrb[78].mxu1  ;;  %18268 = vst [vmem:[#allocation68_spill] sm:$0xff] %v13977_v17  ;;  %11154 = vmatmul.mubr.msk.f32.gmra.mrb[130].mxu1 %vm287_vm0, %v10072_v51  ;;  %v11652_v28 = vpop.eup %11651  ;;  %v1732_v51 = vsel %vm729_vm7, %v13975_v13, 0.0  ;;  %v2742_v27 = vmul.f32 1.442695, %v2728_v35 }
 0x1f3   : > { %18264 = vst [vmem:[#allocation64_spill] sm:$0xff] %v13950_v39  ;;  %v13955_v24 = vpop.f32.mrb[66].mxu0  ;;  %v13958_v11 = vpop.f32.mrb[79].mxu1  ;;  %11156 = vmatprep.mubr.msk.f32.mxu1 %vm287_vm0, %v10073_v50  ;;  %v2773_v50 = vadd.f32 %v2772_v36, %v2771_v18  ;;  %v1723_v36 = vrot.slane %v1722_v48, 1 }
 0x1f4   : > { %18265 = vst [vmem:[#allocation65_spill] sm:$0xff] %v13955_v24  ;;  %18266 = vst [vmem:[#allocation66_spill] sm:$0xff] %v13958_v11  ;;  %1855 = vrot.lane.b32.xlu0 %v1748_v4, %s11911_s30  ;;  %v13969_v62 = vpop.f32.mrb[67].mxu0  ;;  %v10074_v4 = vld [vmem:[%s18118_s2 + $0x748] sm:$0xff]  ;;  %v14004_v17 = vpop.permute.xlu1 %5838  ;;  %v2766_v11 = vadd.f32 %v2765_v42, %v2764_v56 }
 0x1f5   : > { %18267 = vst [vmem:[#allocation67_spill] sm:$0xff] %v13969_v62  ;;  %1853 = vrot.lane.b32.xlu1 %v1747_v31, %s11911_s30  ;;  %18271 = vst [vmem:[#allocation71_spill] sm:$0xff] %v14004_v17  ;;  %v2810_v62 = vmul.f32 %v11652_v28, %v13742_v9  ;;  %v14022_v18 = vpop.permute.xlu0 %11562  ;;  %v10077_v9 = vld [vmem:[%s18118_s2 + $0x760] sm:$0xff]  ;;  %11661 = vrcp.f32 %v2773_v50 }
 0x1f6   : > { %v13979_v58 = vpop.f32.mrb[80].mxu1  ;;  %11157 = vmatmul.mubr.msk.f32.gmra.mrb[132].mxu1 %vm287_vm0, %v10074_v4  ;;  %v14010_v15 = vpop.eup %11653  ;;  %11663 = vrcp.f32 %v2766_v11 }
 0x1f7   : > { %18269 = vst [vmem:[#allocation69_spill] sm:$0xff] %v13979_v58  ;;  %v13985_v30 = vpop.f32.mrb[81].mxu1  ;;  %v13987_v55 = vpop.f32.mrb[68].mxu0  ;;  %v1713_v58 = vadd.f32 %v1712_v25, %v1711_v20  ;;  %11159 = vmatprep.mubr.msk.f32.mxu1 %vm287_vm0, %v10075_v34  ;;  %v1733_v20 = vrot.slane %v1732_v51, 4  ;;  %v2785_v25 = vadd.f32 %v2784_v33, %v2783_v2  ;;  %v2795_v4 = vsel %vm729_vm7, %v14010_v15, 0.0 }
 0x1f8   : > { %18270 = vst [vmem:[#allocation70_spill] sm:$0xff] %v13985_v30  ;;  %2056 = vrot.lane.b32.xlu0 %v13599_v21, %s11911_s30  ;;  %v13995_v31 = vpop.f32.mrb[69].mxu0  ;;  %v2775_v30 = vrot.slane %v2774_v26, 4  ;;  %v2811_v21 = vmul.f32 %v11650_v6, %v13736_v63  ;;  %v10076_v63 = vld [vmem:[%s18118_s2 + $0x758] sm:$0xff]  ;;  %v14030_v42 = vpop.eup %11655  ;;  %11665 = vpow2.f32 %v2742_v27 }
 0x1f9   : > { %2054 = vrot.lane.b32.xlu1 %v13605_v37, %s11911_s30  ;;  %v1714_v6 = vrot.slane %v1713_v58, 2  ;;  %v11658_v34 = vpop.eup %11657  ;;  %v14052_v50 = vpop.permute.xlu1 %6160  ;;  %v1725_v27 = vsel %vm729_vm7, %v14030_v42, 0.0 }
 0x1fa   : > { %v14007_v39 = vpop.f32.mrb[82].mxu1  ;;  %v2776_v35 = vadd.f32 %v2775_v30, %v2774_v26  ;;  %11160 = vmatmul.mubr.msk.f32.gmra.mrb[134].mxu1 %vm287_vm0, %v10076_v63  ;;  %v11660_v2 = vpop.eup %11659  ;;  %v1734_v26 = vadd.f32 %v1733_v20, %v1732_v51  ;;  %v10079_v30 = vld [vmem:[%s18118_s2 + $0x770] sm:$0xff]  ;;  %18276 = vst [vmem:[#allocation76_spill] sm:$0xff] %v14052_v50  ;;  %v2786_v63 = vrot.slane %v2785_v25, 1  ;;  %v1724_v51 = vadd.f32 %v1723_v36, %v1722_v48 }
 0x1fb   : > { %18272 = vst [vmem:[#allocation72_spill] sm:$0xff] %v14007_v39  ;;  %v14013_v24 = vpop.f32.mrb[83].mxu1  ;;  %v14015_v37 = vpop.f32.mrb[70].mxu0  ;;  %11162 = vmatprep.mubr.msk.f32.mxu1 %vm287_vm0, %v10077_v9  ;;  %v2796_v9 = vrot.slane %v2795_v4, 4  ;;  %v1715_v20 = vadd.f32 %v1714_v6, %v1713_v58  ;;  %v1749_v50 = vmul.f32 %v11660_v2, %v13769_v23  ;;  %v1726_v58 = vrot.slane %v1725_v27, 4 }
 0x1fc   : > { %18273 = vst [vmem:[#allocation73_spill] sm:$0xff] %v14013_v24  ;;  %2918 = vrot.lane.b32.xlu0 %v2811_v21, %s11894_s21  ;;  %v14024_v56 = vpop.f32.mrb[71].mxu0  ;;  %v2777_v17 = vrot.slane %v2776_v35, 2  ;;  %v1735_v48 = vrot.slane %v1734_v26, 2  ;;  %11667 = vrcp.f32 %v1724_v51  ;;  %v2787_v23 = vadd.f32 %v2786_v63, %v2785_v25 }
 0x1fd   : > { %2916 = vrot.lane.b32.xlu1 %v2810_v62, %s11894_s21  ;;  %v10078_v62 = vld [vmem:[%s18118_s2 + $0x768] sm:$0xff]  ;;  %v2797_v36 = vadd.f32 %v2796_v9, %v2795_v4  ;;  %v1716_v6 = vrot.slane %v1715_v20, 1 }
 0x1fe   : > { %v14034_v28 = vpop.f32.mrb[84].mxu1  ;;  %11163 = vmatmul.mubr.msk.f32.gmra.mrb[136].mxu1 %vm287_vm0, %v10078_v62  ;;  %v14077_v62 = vpop.permute.xlu1 %6865  ;;  %11669 = vrcp.f32 %v2787_v23 }
 0x1ff   : > { %18274 = vst [vmem:[#allocation74_spill] sm:$0xff] %v14034_v28  ;;  %v14037_v21 = vpop.f32.mrb[85].mxu1  ;;  %v14039_v33 = vpop.f32.mrb[72].mxu0  ;;  %11165 = vmatprep.mubr.msk.f32.mxu1 %vm287_vm0, %v10079_v30  ;;  %18279 = vst [vmem:[#allocation79_spill] sm:$0xff] %v14077_v62  ;;  %v2798_v63 = vrot.slane %v2797_v36, 2  ;;  %v1717_v62 = vadd.f32 %v1716_v6, %v1715_v20 }
 0x200   : > { %18275 = vst [vmem:[#allocation75_spill] sm:$0xff] %v14037_v21  ;;  %3119 = vrot.lane.b32.xlu0 %v13740_v0, %s11894_s21  ;;  %v14047_v11 = vpop.f32.mrb[73].mxu0  ;;  %v1750_v0 = vmul.f32 %v11658_v34, %v13762_v7  ;;  %v14059_v21 = vpop.permute.xlu0 %11572  ;;  %v2778_v34 = vadd.f32 %v2777_v17, %v2776_v35  ;;  %v1736_v35 = vadd.f32 %v1735_v48, %v1734_v26  ;;  %v11570_v26 = vunpack.i.h.bf16 %v13966_v14 }
 0x201   : > { %3117 = vrot.lane.b32.xlu1 %v13748_v1, %s11894_s21  ;;  %v10080_v1 = vld [vmem:[%s18118_s2 + $0x778] sm:$0xff]  ;;  %v11662_v30 = vpop.eup %11661  ;;  %v2799_v20 = vadd.f32 %v2798_v63, %v2797_v36  ;;  %11671 = vrcp.f32 %v1717_v62  ;;  %v11564_v36 = vunpack.i.l.bf16 %v14022_v18 }
 0x202   : > { %v14061_v28 = vpop.f32.mrb[86].mxu1  ;;  %11166 = vmatmul.mubr.msk.f32.gmra.mrb[138].mxu1 %vm287_vm0, %v10080_v1  ;;  %v2779_v9 = vrot.slane %v2778_v34, 1  ;;  %v2813_v51 = vmul.f32 %v11662_v30, %v13827_v61  ;;  %v1737_v61 = vrot.slane %v1736_v35, 1 }
 0x203   : > { %18277 = vst [vmem:[#allocation77_spill] sm:$0xff] %v14061_v28  ;;  %v14065_v39 = vpop.f32.mrb[87].mxu1  ;;  %v14067_v24 = vpop.f32.mrb[74].mxu0 }
 0x204   : > { %18278 = vst [vmem:[#allocation78_spill] sm:$0xff] %v14065_v39  ;;  %1859 = vrot.lane.b32.xlu0 %v1750_v0, %s11911_s30  ;;  %v14074_v7 = vpop.f32.mrb[75].mxu0  ;;  %v11664_v28 = vpop.eup %11663  ;;  %v1738_v62 = vadd.f32 %v1737_v61, %v1736_v35 }
 0x205   : > { %1857 = vrot.lane.b32.xlu1 %v1749_v50, %s11911_s30  ;;  %v14088_v4 = vpop.permute.xlu0 %6409  ;;  %v14092_v17 = vpop.eup %11665  ;;  %v1727_v50 = vadd.f32 %v1726_v58, %v1725_v27  ;;  %v11569_v27 = vunpack.i.l.bf16 %v13966_v14  ;;  %v2780_v14 = vadd.f32 %v2779_v9, %v2778_v34  ;;  %v18290_v34 = vld [vmem:[#allocation49_spill] sm:$0xff]  ;;  %v11575_v9 = vunpack.i.h.bf16 %v14059_v21 }
 0x206   : > { %v14079_v2 = vpop.f32.mrb[88].mxu1  ;;  %18282 = vst [vmem:[#allocation82_spill] sm:$0xff] %v14088_v4  ;;  %v11668_v6 = vpop.eup %11667 }
 0x207   : > { %18280 = vst [vmem:[#allocation80_spill] sm:$0xff] %v14079_v2  ;;  %v14082_v39 = vpop.f32.mrb[89].mxu1  ;;  %v14084_v0 = vpop.f32.mrb[76].mxu0  ;;  %v1728_v48 = vrot.slane %v1727_v50, 2  ;;  %11673 = vrcp.f32 %v2780_v14 }
 0x208   : > { %18281 = vst [vmem:[#allocation81_spill] sm:$0xff] %v14082_v39  ;;  %2060 = vrot.lane.b32.xlu0 %v13622_v32, %s11911_s30  ;;  %v14090_v25 = vpop.f32.mrb[77].mxu0  ;;  %v2812_v32 = vmul.f32 %v11664_v28, %v13833_v19  ;;  %v14112_v19 = vpop.permute.xlu1 %6875  ;;  %11675 = vrcp.f32 %v1738_v62 }
 0x209   : > { %2058 = vrot.lane.b32.xlu1 %v13624_v12, %s11911_s30  ;;  %v2788_v12 = vsel %vm729_vm7, %v14092_v17, 0.0  ;;  %18285 = vst [vmem:[#allocation85_spill] sm:$0xff] %v14112_v19  ;;  %v14114_v28 = vpop.permute.xlu0 %6870  ;;  %v2800_v19 = vrot.slane %v2799_v20, 1 }
 0x20a   : > { %v14097_v1 = vpop.f32.mrb[90].mxu1  ;;  %18286 = vst [vmem:[#allocation86_spill] sm:$0xff] %v14114_v28  ;;  %v2789_v30 = vrot.slane %v2788_v12, 4  ;;  %v1729_v28 = vadd.f32 %v1728_v48, %v1727_v50 }
 0x20b   : > { %18283 = vst [vmem:[#allocation83_spill] sm:$0xff] %v14097_v1  ;;  %v14100_v4 = vpop.f32.mrb[91].mxu1  ;;  %v14102_v39 = vpop.f32.mrb[78].mxu0  ;;  %v11565_v1 = vunpack.i.h.bf16 %v14022_v18  ;;  %v2801_v61 = vadd.f32 %v2800_v19, %v2799_v20  ;;  %v18298_v20 = vld [vmem:[#allocation52_spill] sm:$0xff] }
 0x20c   : > { %18284 = vst [vmem:[#allocation84_spill] sm:$0xff] %v14100_v4  ;;  %2922 = vrot.lane.b32.xlu0 %v2813_v51, %s11894_s21  ;;  %v14109_v58 = vpop.f32.mrb[79].mxu0  ;;  %v2790_v18 = vadd.f32 %v2789_v30, %v2788_v12  ;;  %v1730_v12 = vrot.slane %v1729_v28, 1 }
 0x20d   : > { %2920 = vrot.lane.b32.xlu1 %v2812_v32, %s11894_s21  ;;  %v11432_v32 = vpack.c.bf16 %v11570_v26, %v11569_v27  ;;  %v14138_v50 = vpop.permute.xlu0 %1928  ;;  %v11436_v26 = vpack.c.bf16 %v11565_v1, %v11564_v36  ;;  %11677 = vrcp.f32 %v2801_v61 }
 0x20e   : > { %v14116_v23 = vpop.f32.mrb[92].mxu1  ;;  %18293 = vst [vmem:[#allocation91_spill] sm:$0xff] %v14138_v50 }
 0x20f   : > { %18287 = vst [vmem:[#allocation87_spill] sm:$0xff] %v14116_v23  ;;  %v14118_v4 = vpop.f32.mrb[93].mxu1  ;;  %v14120_v51 = vpop.f32.mrb[80].mxu0  ;;  %v1752_v23 = vmul.f32 %v11668_v6, %v13868_v49  ;;  %11433 = vmatprep.subr.bf16.mxu1 %v11432_v32  ;;  %11437 = vmatprep.subr.bf16.mxu0 %v11436_v26  ;;  %v2791_v6 = vrot.slane %v2790_v18, 2 }
 0x210   : > { %18288 = vst [vmem:[#allocation88_spill] sm:$0xff] %v14118_v4  ;;  %3123 = vrot.lane.b32.xlu0 %v13760_v43, %s11894_s21  ;;  %v14126_v63 = vpop.f32.mrb[81].mxu0  ;;  %v11574_v4 = vunpack.i.l.bf16 %v14059_v21  ;;  %v11670_v43 = vpop.eup %11669  ;;  %11435 = vmatpush3.bf16.msra.mxu1 %v11432_v32  ;;  %v18294_v21 = vld [vmem:[#allocation6_spill] sm:$0xff] }
 0x211   : > { %18289 = vst [vmem:[#allocation89_spill] sm:$0xff] %v14126_v63  ;;  %3121 = vrot.lane.b32.xlu1 %v18290_v34, %s11894_s21  ;;  %v14144_v49 = vpop.permute.xlu1 %1926  ;;  %v2815_v48 = vmul.f32 %v11670_v43, %v13901_v40  ;;  %11439 = vmatpush3.bf16.msra.mxu0 %v11436_v26  ;;  %v11672_v36 = vpop.eup %11671  ;;  %v2792_v34 = vadd.f32 %v2791_v6, %v2790_v18 }
 0x212   : > { %v14133_v2 = vpop.f32.mrb[94].mxu1  ;;  %18295 = vst [vmem:[#allocation6_spill] sm:$0xff] %v14144_v49  ;;  %v11674_v26 = vpop.eup %11673 }
 0x213   : > { %18291 = vst [vmem:[#allocation49_spill] sm:$0xff] %v14133_v2  ;;  %v14135_v63 = vpop.f32.mrb[95].mxu1  ;;  %v14140_v35 = vpop.f32.mrb[82].mxu0  ;;  %v2814_v6 = vmul.f32 %v11674_v26, %v13964_v59 }
 0x214   : > { %18292 = vst [vmem:[#allocation90_spill] sm:$0xff] %v14135_v63  ;;  %1863 = vrot.lane.b32.xlu0 %v1752_v23, %s11911_s30  ;;  %v14146_v27 = vpop.f32.mrb[83].mxu0  ;;  %v11440_v23 = vpack.c.bf16 %v11575_v9, %v11574_v4  ;;  %v1731_v4 = vadd.f32 %v1730_v12, %v1729_v28  ;;  %v1751_v9 = vmul.f32 %v11672_v36, %v13921_v54  ;;  %v11676_v18 = vpop.eup %11675  ;;  %v2793_v54 = vrot.slane %v2792_v34, 1  ;;  %v18306_v36 = vld [vmem:[#allocation19_spill] sm:$0xff] }
 0x215   : > { %2108 = vrot.lane.b32.xlu1 %v18294_v21, %s11911_s30  ;;  %v18303_v21 = vld [vmem:[#allocation5_spill] sm:$0xff] }
 0x216   : > { %v14149_v14 = vpop.f32.mrb[96].mxu1  ;;  %11441 = vmatprep.subr.bf16.mxu0 %v11440_v23  ;;  %11679 = vrcp.f32 %v1731_v4  ;;  %v2794_v59 = vadd.f32 %v2793_v54, %v2792_v34 }
 0x217   : > { %18296 = vst [vmem:[#allocation92_spill] sm:$0xff] %v14149_v14  ;;  %v14151_v30 = vpop.f32.mrb[97].mxu1  ;;  %v14153_v1 = vpop.f32.mrb[84].mxu0  ;;  %11443 = vmatpush3.bf16.msra.mxu0 %v11440_v23 }
 0x218   : > { %18297 = vst [vmem:[#allocation93_spill] sm:$0xff] %v14151_v30  ;;  %2926 = vrot.lane.b32.xlu0 %v2815_v48, %s11894_s21  ;;  %v14156_v32 = vpop.f32.mrb[85].mxu0  ;;  %v11678_v14 = vpop.eup %11677  ;;  %11681 = vrcp.f32 %v2794_v59 }
 0x219   : > { %3171 = vrot.lane.b32.xlu1 %v18298_v20, %s11894_s21 }
 0x21a   : > { %v14160_v40 = vpop.permute.xlu0 %2991  ;;  %v14162_v19 = vpop.f32.mrb[98].mxu1 }
 0x21b   : > { %18299 = vst [vmem:[#allocation52_spill] sm:$0xff] %v14160_v40  ;;  %18300 = vst [vmem:[#allocation94_spill] sm:$0xff] %v14162_v19  ;;  %v14164_v62 = vpop.permute.xlu1 %2989  ;;  %v14167_v43 = vpop.f32.mrb[99].mxu1 }
 0x21c   : > { %18301 = vst [vmem:[#allocation95_spill] sm:$0xff] %v14164_v62  ;;  %18302 = vst [vmem:[#allocation96_spill] sm:$0xff] %v14167_v43  ;;  %2106 = vrot.lane.b32.xlu0 %v18303_v21, %s11911_s30  ;;  %v14171_v48 = vpop.f32.mrb[86].mxu0  ;;  %v1754_v43 = vmul.f32 %v11676_v18, %v13975_v13  ;;  %v2817_v13 = vmul.f32 %v11678_v14, %v14010_v15 }
 0x21d   : > { %1861 = vrot.lane.b32.xlu1 %v1751_v9, %s11911_s30  ;;  %v14174_v61 = vpop.f32.mrb[87].mxu0 }
 0x21e   : > { %v14176_v20 = vpop.permute.xlu0 %1932  ;;  %v14178_v28 = vpop.f32.mrb[100].mxu1 }
 0x21f   : > { %18304 = vst [vmem:[#allocation5_spill] sm:$0xff] %v14176_v20  ;;  %v14180_v12 = vpop.permute.xlu1 %1930  ;;  %v14182_v23 = vpop.f32.mrb[101].mxu1 }
 0x220   : > { %18305 = vst [vmem:[#allocation97_spill] sm:$0xff] %v14180_v12  ;;  %3169 = vrot.lane.b32.xlu0 %v18306_v36, %s11894_s21  ;;  %v14187_v21 = vpop.f32.mrb[88].mxu0  ;;  %v11680_v34 = vpop.eup %11679 }
 0x221   : > { %2924 = vrot.lane.b32.xlu1 %v2814_v6, %s11894_s21  ;;  %v14190_v9 = vpop.f32.mrb[89].mxu0  ;;  %v18310_v6 = vld [vmem:[#allocation16_spill] sm:$0xff]  ;;  %v1753_v59 = vmul.f32 %v11680_v34, %v14030_v42 }
 0x222   : > { %v14192_v19 = vpop.permute.xlu0 %2995  ;;  %v14194_v4 = vpop.f32.mrb[102].mxu1 }
 0x223   : > { %18307 = vst [vmem:[#allocation19_spill] sm:$0xff] %v14192_v19  ;;  %v14197_v30 = vpop.permute.xlu1 %2993  ;;  %v14199_v20 = vpop.f32.mrb[103].mxu1 }
 0x224   : > { %18308 = vst [vmem:[#allocation98_spill] sm:$0xff] %v14197_v30  ;;  %1867 = vrot.lane.b32.xlu0 %v1754_v43, %s11911_s30  ;;  %v14202_v26 = vpop.f32.mrb[90].mxu0  ;;  %v11682_v42 = vpop.eup %11681 }
 0x225   : > { %18309 = vst [vmem:[#allocation99_spill] sm:$0xff] %v14202_v26  ;;  %2112 = vrot.lane.b32.xlu1 %v18310_v6, %s11911_s30  ;;  %v14206_v36 = vpop.f32.mrb[91].mxu0 }
 0x226   : > { %18311 = vst [vmem:[#allocation16_spill] sm:$0xff] %v14206_v36  ;;  %v14208_v19 = vpop.permute.xlu0 %1936  ;;  %v14210_v12 = vpop.f32.mrb[104].mxu1 }
 0x227   : > { %18312 = vst [vmem:[#allocation100_spill] sm:$0xff] %v14208_v19  ;;  %v14213_v18 = vpop.permute.xlu1 %1934  ;;  %v14215_v30 = vpop.f32.mrb[105].mxu1 }
 0x228   : > { %18313 = vst [vmem:[#allocation101_spill] sm:$0xff] %v14213_v18  ;;  %2930 = vrot.lane.b32.xlu0 %v2817_v13, %s11894_s21  ;;  %v14218_v43 = vpop.f32.mrb[92].mxu0  ;;  %v18319_v18 = vld [vmem:[#allocation15_spill] sm:$0xff] }
 0x229   : > { %18314 = vst [vmem:[#allocation102_spill] sm:$0xff] %v14218_v43  ;;  %3175 = vrot.lane.b32.xlu1 %v13814_v38, %s11894_s21  ;;  %v14222_v54 = vpop.f32.mrb[93].mxu0 }
 0x22a   : > { %18315 = vst [vmem:[#allocation103_spill] sm:$0xff] %v14222_v54  ;;  %v14224_v6 = vpop.permute.xlu0 %2999  ;;  %v14226_v19 = vpop.f32.mrb[106].mxu1 }
 0x22b   : > { %18316 = vst [vmem:[#allocation104_spill] sm:$0xff] %v14224_v6  ;;  %v14228_v15 = vpop.permute.xlu1 %2997  ;;  %v14230_v14 = vpop.f32.mrb[107].mxu1 }
 0x22c   : > { %18317 = vst [vmem:[#allocation105_spill] sm:$0xff] %v14228_v15  ;;  %18318 = vst [vmem:[#allocation106_spill] sm:$0xff] %v14230_v14  ;;  %2110 = vrot.lane.b32.xlu0 %v18319_v18, %s11911_s30  ;;  %v14235_v13 = vpop.f32.mrb[94].mxu0  ;;  %v18325_v15 = vld [vmem:[#allocation55_spill] sm:$0xff] }
 0x22d   : > { %18320 = vst [vmem:[#allocation15_spill] sm:$0xff] %v14235_v13  ;;  %1865 = vrot.lane.b32.xlu1 %v1753_v59, %s11911_s30  ;;  %v14238_v38 = vpop.f32.mrb[95].mxu0  ;;  %v2816_v59 = vmul.f32 %v11682_v42, %v14092_v17  ;;  %v18338_v42 = vld [vmem:[#allocation8_spill] sm:$0xff] }
 0x22e   : > { %18321 = vst [vmem:[#allocation107_spill] sm:$0xff] %v14238_v38  ;;  %v14240_v62 = vpop.permute.xlu0 %1940  ;;  %v18332_v38 = vld [vmem:[#allocation23_spill] sm:$0xff] }
 0x22f   : > { %18322 = vst [vmem:[#allocation108_spill] sm:$0xff] %v14240_v62  ;;  %v14242_v6 = vpop.permute.xlu1 %1938  ;;  %v14244_v40 = vpop.f32.mrb[96].mxu0  ;;  %v18330_v62 = vld [vmem:[#allocation18_spill] sm:$0xff] }
 0x230   : > { %18323 = vst [vmem:[#allocation109_spill] sm:$0xff] %v14242_v6  ;;  %18324 = vst [vmem:[#allocation110_spill] sm:$0xff] %v14244_v40  ;;  %3173 = vrot.lane.b32.xlu0 %v18325_v15, %s11894_s21  ;;  %v14248_v63 = vpop.f32.mrb[97].mxu0  ;;  %v18333_v40 = vld [vmem:[#allocation17_spill] sm:$0xff] }
 0x231   : > { %18326 = vst [vmem:[#allocation55_spill] sm:$0xff] %v14248_v63  ;;  %v14263_v50 = vadd.f32 %v18333_v40, %v18332_v38  ;;  %2928 = vrot.lane.b32.xlu1 %v2816_v59, %s11894_s21 }
 0x232   : > { %v14250_v34 = vpop.permute.xlu0 %3003 }
 0x233   : > { %18327 = vst [vmem:[#allocation111_spill] sm:$0xff] %v14250_v34  ;;  %v14252_v18 = vpop.permute.xlu1 %3001  ;;  %v14254_v49 = vpop.f32.mrb[98].mxu0 }
 0x234   : > { %18328 = vst [vmem:[#allocation112_spill] sm:$0xff] %v14252_v18  ;;  %18329 = vst [vmem:[#allocation113_spill] sm:$0xff] %v14254_v49  ;;  %2114 = vrot.lane.b32.xlu0 %v18330_v62, %s11911_s30  ;;  %v14259_v6 = vpop.f32.mrb[99].mxu0  ;;  %v3736_v62 = vsel %vm729_vm7, %v14263_v50, -inf }
 0x235   : > { %18331 = vst [vmem:[#allocation18_spill] sm:$0xff] %v14259_v6  ;;  %2116 = vrot.lane.b32.xlu1 %v18338_v42, %s11911_s30  ;;  %v18342_v6 = vld [vmem:[#allocation30_spill] sm:$0xff] }
 0x236   : > { %v14266_v15 = vpop.permute.xlu0 %1986  ;;  %v14288_v63 = vadd.f32 %v13873_v57, %v18342_v6 }
 0x237   : > { %18334 = vst [vmem:[#allocation23_spill] sm:$0xff] %v14266_v15  ;;  %v14268_v34 = vpop.permute.xlu1 %1988  ;;  %v14270_v18 = vpop.f32.mrb[100].mxu0  ;;  %v3737_v15 = vrot.slane %v3736_v62, 4 }
 0x238   : > { %18335 = vst [vmem:[#allocation17_spill] sm:$0xff] %v14268_v34  ;;  %18336 = vst [vmem:[#allocation114_spill] sm:$0xff] %v14270_v18  ;;  %3177 = vrot.lane.b32.xlu0 %v13837_v60, %s11894_s21  ;;  %v14274_v17 = vpop.f32.mrb[101].mxu0  ;;  %v18343_v60 = vld [vmem:[#allocation10_spill] sm:$0xff]  ;;  %v18345_v34 = vld [vmem:[#allocation31_spill] sm:$0xff]  ;;  %v4794_v57 = vsel %vm729_vm7, %v14288_v63, -inf }
 0x239   : > { %18337 = vst [vmem:[#allocation115_spill] sm:$0xff] %v14274_v17  ;;  %v14296_v2 = vadd.f32 %v18345_v34, %v13881_v22  ;;  %3179 = vrot.lane.b32.xlu1 %v13829_v10, %s11894_s21  ;;  %v3738_v6 = vmax.f32 %v3736_v62, %v3737_v15  ;;  %v18348_v22 = vld [vmem:[#allocation7_spill] sm:$0xff]  ;;  %v4795_v10 = vrot.slane %v4794_v57, 4  ;;  %v18353_v15 = vld [vmem:[#allocation24_spill] sm:$0xff]  ;;  %v18354_v62 = vld [vmem:[#allocation9_spill] sm:$0xff] }
 0x23a   : > { %v14280_v40 = vpop.permute.xlu0 %3049  ;;  %v14324_v13 = vadd.f32 %v18354_v62, %v18353_v15 }
 0x23b   : > { %18339 = vst [vmem:[#allocation8_spill] sm:$0xff] %v14280_v40  ;;  %v14282_v38 = vpop.permute.xlu1 %3051  ;;  %v14284_v59 = vpop.f32.mrb[102].mxu0 }
 0x23c   : > { %18340 = vst [vmem:[#allocation116_spill] sm:$0xff] %v14282_v38  ;;  %18341 = vst [vmem:[#allocation117_spill] sm:$0xff] %v14284_v59  ;;  %2118 = vrot.lane.b32.xlu0 %v18343_v60, %s11911_s30  ;;  %v14292_v49 = vpop.f32.mrb[103].mxu0  ;;  %v4787_v60 = vsel %vm729_vm7, %v14296_v2, -inf }
 0x23d   : > { %18344 = vst [vmem:[#allocation30_spill] sm:$0xff] %v14292_v49  ;;  %2120 = vrot.lane.b32.xlu1 %v18348_v22, %s11911_s30  ;;  %v4788_v54 = vrot.slane %v4787_v60, 4  ;;  %s11912_s30 = smov 9  }
 0x23e   : > { %v14300_v42 = vpop.permute.xlu0 %1990 }
 0x23f   : > { %18346 = vst [vmem:[#allocation10_spill] sm:$0xff] %v14300_v42  ;;  %v14302_v59 = vpop.permute.xlu1 %1992  ;;  %v18351_v42 = vld [vmem:[#allocation20_spill] sm:$0xff]  ;;  %v4789_v15 = vmax.f32 %v4787_v60, %v4788_v54  ;;  %v18360_v54 = vld [vmem:[#allocation33_spill] sm:$0xff] }
 0x240   : > { %18347 = vst [vmem:[#allocation31_spill] sm:$0xff] %v14302_v59  ;;  %3181 = vrot.lane.b32.xlu0 %v13857_v41, %s11894_s21  ;;  %v18352_v59 = vld [vmem:[#allocation22_spill] sm:$0xff]  ;;  %v3739_v41 = vrot.slane %v3738_v6, 2  ;;  %v14352_v60 = vadd.f32 %v18360_v54, %v13914_v3  ;;  %v18364_v3 = vld [vmem:[#allocation48_spill] sm:$0xff]  ;;  %v18365_v54 = vld [vmem:[#allocation25_spill] sm:$0xff] }
 0x241   : > { %v14318_v38 = vadd.f32 %v18352_v59, %v18351_v42  ;;  %3183 = vrot.lane.b32.xlu1 %v13850_v5, %s11894_s21  ;;  %v3750_v42 = vsel %vm729_vm7, %v14324_v13, -inf  ;;  %v14366_v17 = vadd.f32 %v18365_v54, %v18364_v3  ;;  %v18370_v54 = vld [vmem:[#allocation58_spill] sm:$0xff] }
 0x242   : > { %v14312_v34 = vpop.permute.xlu0 %3053 }
 0x243   : > { %18349 = vst [vmem:[#allocation7_spill] sm:$0xff] %v14312_v34  ;;  %v14314_v40 = vpop.permute.xlu1 %3055  ;;  %v4796_v34 = vmax.f32 %v4794_v57, %v4795_v10  ;;  %v3729_v59 = vsel %vm729_vm7, %v14318_v38, -inf }
 0x244   : > { %18350 = vst [vmem:[#allocation118_spill] sm:$0xff] %v14314_v40  ;;  %4054 = vrot.lane.b32.xlu0 %v13825_v29, %s11897_s22  ;;  %v3740_v29 = vmax.f32 %v3738_v6, %v3739_v41  ;;  %v3730_v57 = vrot.slane %v3729_v59, 4  ;;  %v4790_v6 = vrot.slane %v4789_v15, 2 }
 0x245   : > { %5112 = vrot.lane.b32.xlu1 %v13987_v55, %s11912_s30  ;;  %v4797_v10 = vrot.slane %v4796_v34, 2  ;;  %v18361_v55 = vld [vmem:[#allocation56_spill] sm:$0xff] }
 0x246   : > { %v14328_v22 = vpop.permute.xlu0 %1994  ;;  %v4791_v43 = vmax.f32 %v4789_v15, %v4790_v6 }
 0x247   : > { %18355 = vst [vmem:[#allocation20_spill] sm:$0xff] %v14328_v22  ;;  %v14330_v40 = vpop.permute.xlu1 %1996  ;;  %v3751_v22 = vrot.slane %v3750_v42, 4 }
 0x248   : > { %18356 = vst [vmem:[#allocation22_spill] sm:$0xff] %v14330_v40  ;;  %5110 = vrot.lane.b32.xlu0 %v13995_v31, %s11912_s30  ;;  %v18359_v40 = vld [vmem:[#allocation35_spill] sm:$0xff]  ;;  %v3741_v31 = vrot.slane %v3740_v29, 1  ;;  %v4792_v6 = vrot.slane %v4791_v43, 1 }
 0x249   : > { %v14346_v18 = vadd.f32 %v13903_v8, %v18359_v40  ;;  %4052 = vrot.lane.b32.xlu1 %v18361_v55, %s11897_s22  ;;  %v3752_v8 = vmax.f32 %v3750_v42, %v3751_v22  ;;  %v4801_v55 = vsel %vm729_vm7, %v14352_v60, -inf  ;;  %v18368_v42 = vld [vmem:[#allocation50_spill] sm:$0xff] }
 0x24a   : > { %v14340_v5 = vpop.permute.xlu0 %3057  ;;  %v4802_v3 = vrot.slane %v4801_v55, 4  ;;  %v4793_v36 = vmax.f32 %v4791_v43, %v4792_v6 }
 0x24b   : > { %18357 = vst [vmem:[#allocation24_spill] sm:$0xff] %v14340_v5  ;;  %v14342_v62 = vpop.permute.xlu1 %3059  ;;  %v4798_v5 = vmax.f32 %v4796_v34, %v4797_v10  ;;  %v4808_v40 = vsel %vm729_vm7, %v14346_v18, -inf  ;;  %v3753_v10 = vrot.slane %v3752_v8, 2 }
 0x24c   : > { %18358 = vst [vmem:[#allocation9_spill] sm:$0xff] %v14342_v62  ;;  %4058 = vrot.lane.b32.xlu0 %v13846_v45, %s11897_s22  ;;  %v3731_v62 = vmax.f32 %v3729_v59, %v3730_v57  ;;  %v3742_v45 = vmax.f32 %v3740_v29, %v3741_v31  ;;  %v18367_v59 = vld [vmem:[#allocation26_spill] sm:$0xff]  ;;  %v4809_v29 = vrot.slane %v4808_v40, 4  ;;  %v4803_v26 = vmax.f32 %v4801_v55, %v4802_v3 }
 0x24d   : > { %5116 = vrot.lane.b32.xlu1 %v14015_v37, %s11912_s30  ;;  %v14376_v57 = vadd.f32 %v18368_v42, %v18367_v59  ;;  %v3743_v37 = vsel %vm729_vm7, %v14366_v17, -inf  ;;  %v4843_v43 = vsub.f32 %v14296_v2, %v4793_v36  ;;  %v18379_v36 = vld [vmem:[#allocation51_spill] sm:$0xff] }
 0x24e   : > { %v14356_v41 = vpop.permute.xlu0 %1998  ;;  %v3732_v22 = vrot.slane %v3731_v62, 2  ;;  %v3786_v31 = vsub.f32 %v14263_v50, %v3742_v45  ;;  %v3744_v45 = vrot.slane %v3743_v37, 4  ;;  %v4804_v55 = vrot.slane %v4803_v26, 2 }
 0x24f   : > { %18362 = vst [vmem:[#allocation35_spill] sm:$0xff] %v14356_v41  ;;  %v14358_v49 = vpop.permute.xlu1 %2000 }
 0x250   : > { %18363 = vst [vmem:[#allocation33_spill] sm:$0xff] %v14358_v49  ;;  %5114 = vrot.lane.b32.xlu0 %v14024_v56, %s11912_s30  ;;  %v4799_v56 = vrot.slane %v4798_v5, 1  ;;  %v3733_v42 = vmax.f32 %v3731_v62, %v3732_v22  ;;  %v3795_v50 = vmul.f32 1.442695, %v3786_v31 }
 0x251   : > { %4056 = vrot.lane.b32.xlu1 %v18370_v54, %s11897_s22  ;;  %v18378_v54 = vld [vmem:[#allocation36_spill] sm:$0xff] }
 0x252   : > { %v14372_v34 = vpop.permute.xlu0 %3061  ;;  %v4800_v49 = vmax.f32 %v4798_v5, %v4799_v56  ;;  %v3734_v22 = vrot.slane %v3733_v42, 1  ;;  %11683 = vpow2.f32 %v3795_v50  ;;  %v4805_v50 = vmax.f32 %v4803_v26, %v4804_v55 }
 0x253   : > { %18366 = vst [vmem:[#allocation56_spill] sm:$0xff] %v14372_v34  ;;  %v14378_v15 = vpop.permute.xlu1 %3063  ;;  %v4810_v34 = vmax.f32 %v4808_v40, %v4809_v29 }
 0x254   : > { %18369 = vst [vmem:[#allocation48_spill] sm:$0xff] %v14378_v15  ;;  %4062 = vrot.lane.b32.xlu0 %v13870_v47, %s11897_s22  ;;  %v3764_v15 = vsel %vm729_vm7, %v14376_v57, -inf  ;;  %v3754_v47 = vmax.f32 %v3752_v8, %v3753_v10  ;;  %v4844_v5 = vsub.f32 %v14288_v63, %v4800_v49  ;;  %v3735_v31 = vmax.f32 %v3733_v42, %v3734_v22  ;;  %v18384_v22 = vld [vmem:[#allocation53_spill] sm:$0xff] }
 0x255   : > { %v3765_v14 = vrot.slane %v3764_v15, 4  ;;  %5120 = vrot.lane.b32.xlu1 %v14039_v33, %s11912_s30  ;;  %v4811_v40 = vrot.slane %v4810_v34, 2  ;;  %v18375_v33 = vld [vmem:[#allocation59_spill] sm:$0xff] }
 0x256   : > { %v14387_v59 = vpop.permute.xlu0 %2048  ;;  %v3755_v8 = vrot.slane %v3754_v47, 1  ;;  %v4853_v63 = vmul.f32 1.442695, %v4844_v5 }
 0x257   : > { %18371 = vst [vmem:[#allocation25_spill] sm:$0xff] %v14387_v59  ;;  %v14391_v41 = vpop.permute.xlu1 %2046  ;;  %v3766_v29 = vmax.f32 %v3764_v15, %v3765_v14  ;;  %v4812_v49 = vmax.f32 %v4810_v34, %v4811_v40  ;;  %v18380_v14 = vld [vmem:[#allocation27_spill] sm:$0xff]  ;;  %v18381_v34 = vld [vmem:[#allocation32_spill] sm:$0xff] }
 0x258   : > { %18372 = vst [vmem:[#allocation26_spill] sm:$0xff] %v14391_v41  ;;  %5118 = vrot.lane.b32.xlu0 %v14047_v11, %s11912_s30  ;;  %v3745_v11 = vmax.f32 %v3743_v37, %v3744_v45  ;;  %v3756_v3 = vmax.f32 %v3754_v47, %v3755_v8  ;;  %v14419_v15 = vadd.f32 %v18380_v14, %v18379_v36  ;;  %v4851_v37 = vmul.f32 1.442695, %v4843_v43  ;;  %v18386_v36 = vld [vmem:[#allocation54_spill] sm:$0xff]  ;;  %v18387_v14 = vld [vmem:[#allocation29_spill] sm:$0xff] }
 0x259   : > { %4060 = vrot.lane.b32.xlu1 %v18375_v33, %s11897_s22  ;;  %v3767_v42 = vrot.slane %v3766_v29, 2  ;;  %v14423_v45 = vadd.f32 %v18381_v34, %v13940_v44  ;;  %v3785_v47 = vsub.f32 %v14318_v38, %v3735_v31  ;;  %11685 = vpow2.f32 %v4853_v63 }
 0x25a   : > { %v14397_v62 = vpop.permute.xlu0 %3111  ;;  %v3746_v2 = vrot.slane %v3745_v11, 2  ;;  %v4813_v40 = vrot.slane %v4812_v49, 1  ;;  %v3788_v26 = vsub.f32 %v14324_v13, %v3756_v3  ;;  %v3757_v38 = vsel %vm729_vm7, %v14419_v15, -inf }
 0x25b   : > { %18373 = vst [vmem:[#allocation50_spill] sm:$0xff] %v14397_v62  ;;  %v14400_v56 = vpop.permute.xlu1 %3109  ;;  %11687 = vpow2.f32 %v4851_v37  ;;  %v4806_v43 = vrot.slane %v4805_v50, 1  ;;  %v3768_v55 = vmax.f32 %v3766_v29, %v3767_v42  ;;  %v4815_v33 = vsel %vm729_vm7, %v14423_v45, -inf }
 0x25c   : > { %18374 = vst [vmem:[#allocation58_spill] sm:$0xff] %v14400_v56  ;;  %4066 = vrot.lane.b32.xlu0 %v13898_v53, %s11897_s22  ;;  %v14413_v53 = vadd.f32 %v13930_v46, %v18378_v54  ;;  %v14449_v31 = vpop.eup %11683  ;;  %v3793_v63 = vmul.f32 1.442695, %v3785_v47  ;;  %v3758_v29 = vrot.slane %v3757_v38, 4  ;;  %v14457_v37 = vadd.f32 %v18387_v14, %v18386_v36  ;;  %v18390_v14 = vld [vmem:[#allocation38_spill] sm:$0xff] }
 0x25d   : > { %5124 = vrot.lane.b32.xlu1 %v14067_v24, %s11912_s30  ;;  %v3747_v24 = vmax.f32 %v3745_v11, %v3746_v2  ;;  %v4814_v11 = vmax.f32 %v4812_v49, %v4813_v40  ;;  %v3799_v2 = vmul.f32 1.442695, %v3788_v26  ;;  %v4807_v42 = vmax.f32 %v4805_v50, %v4806_v43 }
 0x25e   : > { %v14407_v10 = vpop.permute.xlu0 %2052  ;;  %v4822_v44 = vsel %vm729_vm7, %v14413_v53, -inf  ;;  %v4816_v34 = vrot.slane %v4815_v33, 4  ;;  %v3816_v47 = vsel %vm729_vm7, %v14449_v31, 0.0  ;;  %11689 = vpow2.f32 %v3793_v63 }
 0x25f   : > { %18376 = vst [vmem:[#allocation59_spill] sm:$0xff] %v14407_v10  ;;  %v14409_v6 = vpop.permute.xlu1 %2050  ;;  %v4823_v3 = vrot.slane %v4822_v44, 4  ;;  %v4846_v26 = vsub.f32 %v14346_v18, %v4814_v11  ;;  %11691 = vpow2.f32 %v3799_v2  ;;  %v3759_v43 = vmax.f32 %v3757_v38, %v3758_v29  ;;  %v18397_v10 = vld [vmem:[#allocation64_spill] sm:$0xff] }
 0x260   : > { %18377 = vst [vmem:[#allocation119_spill] sm:$0xff] %v14409_v6  ;;  %5122 = vrot.lane.b32.xlu0 %v14074_v7, %s11912_s30  ;;  %v18383_v7 = vld [vmem:[#allocation28_spill] sm:$0xff]  ;;  %v3817_v63 = vrot.slane %v3816_v47, 4  ;;  %v4845_v18 = vsub.f32 %v14352_v60, %v4807_v42 }
 0x261   : > { %v14432_v5 = vadd.f32 %v18384_v22, %v18383_v7  ;;  %4064 = vrot.lane.b32.xlu1 %v13905_v16, %s11897_s22  ;;  %v3748_v16 = vrot.slane %v3747_v24, 1  ;;  %v3769_v7 = vrot.slane %v3768_v55, 1  ;;  %v18388_v22 = vld [vmem:[#allocation62_spill] sm:$0xff]  ;;  %v4824_v36 = vmax.f32 %v4822_v44, %v4823_v3 }
 0x262   : > { %v14427_v46 = vpop.permute.xlu0 %3115  ;;  %v4817_v44 = vmax.f32 %v4815_v33, %v4816_v34  ;;  %v4857_v2 = vmul.f32 1.442695, %v4846_v26  ;;  %v4855_v34 = vmul.f32 1.442695, %v4845_v18 }
 0x263   : > { %18382 = vst [vmem:[#allocation36_spill] sm:$0xff] %v14427_v46  ;;  %v14434_v8 = vpop.permute.xlu1 %3113  ;;  %v18391_v46 = vld [vmem:[#allocation65_spill] sm:$0xff]  ;;  %v3770_v11 = vmax.f32 %v3768_v55, %v3769_v7  ;;  %v4825_v29 = vrot.slane %v4824_v36, 2  ;;  %v3760_v55 = vrot.slane %v3759_v43, 2 }
 0x264   : > { %18385 = vst [vmem:[#allocation51_spill] sm:$0xff] %v14434_v8  ;;  %5172 = vrot.lane.b32.xlu0 %v14084_v0, %s11912_s30  ;;  %v3778_v0 = vsel %vm729_vm7, %v14432_v5, -inf  ;;  %v3771_v8 = vsel %vm729_vm7, %v14457_v37, -inf  ;;  %v4818_v7 = vrot.slane %v4817_v44, 2  ;;  %11693 = vpow2.f32 %v4857_v2 }
 0x265   : > { %v3779_v49 = vrot.slane %v3778_v0, 4  ;;  %4114 = vrot.lane.b32.xlu1 %v18388_v22, %s11897_s22  ;;  %v14478_v22 = vpop.eup %11685  ;;  %v3772_v33 = vrot.slane %v3771_v8, 4  ;;  %11695 = vpow2.f32 %v4855_v34  ;;  %v18402_v34 = vld [vmem:[#allocation70_spill] sm:$0xff] }
 0x266   : > { %v14447_v13 = vpop.permute.xlu0 %1855  ;;  %v14485_v38 = vpop.eup %11687 }
 0x267   : > { %v14453_v54 = vpop.permute.xlu1 %1853 }
 0x268   : > { %4112 = vrot.lane.b32.xlu0 %v13932_v52, %s11897_s22  ;;  %v14470_v52 = vadd.f32 %v18391_v46, %v18390_v14  ;;  %v3780_v46 = vmax.f32 %v3778_v0, %v3779_v49  ;;  %v18393_v14 = vld [vmem:[#allocation67_spill] sm:$0xff]  ;;  %v18396_v0 = vld [vmem:[#allocation66_spill] sm:$0xff]  ;;  %v3790_v49 = vsub.f32 %v14376_v57, %v3770_v11  ;;  %v4826_v57 = vmax.f32 %v4824_v36, %v4825_v29 }
 0x269   : > { %5170 = vrot.lane.b32.xlu1 %v14090_v25, %s11912_s30  ;;  %v4874_v25 = vsel %vm729_vm7, %v14478_v22, 0.0  ;;  %v3773_v11 = vmax.f32 %v3771_v8, %v3772_v33  ;;  %v4819_v36 = vmax.f32 %v4817_v44, %v4818_v7 }
 0x26a   : > { %v14465_v40 = vpop.permute.xlu0 %2056  ;;  %v3781_v26 = vrot.slane %v3780_v46, 2  ;;  %v3803_v44 = vmul.f32 1.442695, %v3790_v49  ;;  %v4827_v33 = vrot.slane %v4826_v57, 1 }
 0x26b   : > { %18389 = vst [vmem:[#allocation27_spill] sm:$0xff] %v14465_v40  ;;  %v14472_v50 = vpop.permute.xlu1 %2054  ;;  %v3749_v40 = vmax.f32 %v3747_v24, %v3748_v16  ;;  %v3818_v16 = vadd.f32 %v3817_v63, %v3816_v47  ;;  %v10125_v47 = vld [vmem:[%s18118_s2 + $0x7a0] sm:$0xff] }
 0x26c   : > { %18392 = vst [vmem:[#allocation32_spill] sm:$0xff] %v14472_v50  ;;  %5176 = vrot.lane.b32.xlu0 %v14102_v39, %s11912_s30  ;;  %v4836_v39 = vsel %vm729_vm7, %v14470_v52, -inf  ;;  %v18394_v50 = vld [vmem:[#allocation34_spill] sm:$0xff]  ;;  %11182 = vmatprep.mubr.msk.f32.mxu0 %vm287_vm0, %v10125_v47  ;;  %v3782_v62 = vmax.f32 %v3780_v46, %v3781_v26  ;;  %v4820_v26 = vrot.slane %v4819_v36, 1 }
 0x26d   : > { %v14491_v24 = vadd.f32 %v18394_v50, %v18393_v14  ;;  %v3787_v42 = vsub.f32 %v14366_v17, %v3749_v40  ;;  %v4867_v50 = vsel %vm729_vm7, %v14485_v38, 0.0  ;;  %v4837_v14 = vrot.slane %v4836_v39, 4  ;;  %4118 = vrot.lane.b32.xlu1 %v18397_v10, %s11897_s22  ;;  %v10126_v17 = vld [vmem:[%s18118_s2 + $0x7a8] sm:$0xff] }
 0x26e   : > { %v14483_v3 = vpop.permute.xlu0 %2918  ;;  %v4875_v40 = vrot.slane %v4874_v25, 4  ;;  %v3761_v10 = vmax.f32 %v3759_v43, %v3760_v55  ;;  %11183 = vmatmul.mubr.msk.f32.gmra.mrb[104].mxu0 %vm287_vm0, %v10126_v17  ;;  %v4868_v56 = vrot.slane %v4867_v50, 4  ;;  %v10128_v43 = vld [vmem:[%s18118_s2 + $0x7b8] sm:$0xff] }
 0x26f   : > { %v14493_v60 = vpop.permute.xlu1 %2916  ;;  %v4829_v63 = vsel %vm729_vm7, %v14491_v24, -inf  ;;  %v3797_v29 = vmul.f32 1.442695, %v3787_v42 }
 0x270   : > { %18395 = vst [vmem:[#allocation28_spill] sm:$0xff] %v14493_v60  ;;  %4116 = vrot.lane.b32.xlu0 %v18396_v0, %s11897_s22  ;;  %v14521_v0 = vpop.eup %11689  ;;  %v4830_v41 = vrot.slane %v4829_v63, 4  ;;  %v4876_v55 = vadd.f32 %v4875_v40, %v4874_v25  ;;  %v3762_v46 = vrot.slane %v3761_v10, 1  ;;  %v4869_v25 = vadd.f32 %v4868_v56, %v4867_v50  ;;  %v18403_v40 = vld [vmem:[#allocation69_spill] sm:$0xff] }
 0x271   : > { %v14523_v2 = vpop.eup %11691  ;;  %5174 = vrot.lane.b32.xlu1 %v14109_v58, %s11912_s30  ;;  %v3809_v58 = vsel %vm729_vm7, %v14521_v0, 0.0  ;;  %11697 = vpow2.f32 %v3797_v29  ;;  %v4821_v29 = vmax.f32 %v4819_v36, %v4820_v26  ;;  %v14569_v36 = vpop.f32.mrb[108].mxu1 }
 0x272   : > { %v14505_v6 = vpop.permute.xlu0 %3119  ;;  %v3830_v49 = vsel %vm729_vm7, %v14523_v2, 0.0  ;;  %v4831_v17 = vmax.f32 %v4829_v63, %v4830_v41  ;;  %11699 = vpow2.f32 %v3803_v44  ;;  %v14553_v56 = vpop.eup %11693  ;;  %v4870_v63 = vrot.slane %v4869_v25, 2  ;;  %v18406_v44 = vld [vmem:[#allocation89_spill] sm:$0xff]  ;;  %18410 = vst [vmem:[#allocation66_spill] sm:$0xff] %v14569_v36 }
 0x273   : > { %18398 = vst [vmem:[#allocation53_spill] sm:$0xff] %v14505_v6  ;;  %v14515_v18 = vpop.permute.xlu1 %3117  ;;  %v3819_v6 = vrot.slane %v3818_v16, 2 }
 0x274   : > { %18399 = vst [vmem:[#allocation54_spill] sm:$0xff] %v14515_v18  ;;  %5180 = vrot.lane.b32.xlu0 %v14120_v51, %s11912_s30  ;;  %v4838_v18 = vmax.f32 %v4836_v39, %v4837_v14  ;;  %v10127_v51 = vld [vmem:[%s18118_s2 + $0x7b0] sm:$0xff]  ;;  %v3774_v39 = vrot.slane %v3773_v11, 2  ;;  %v3783_v14 = vrot.slane %v3782_v62, 1  ;;  %v4871_v26 = vadd.f32 %v4870_v63, %v4869_v25  ;;  %v18415_v63 = vld [vmem:[#allocation74_spill] sm:$0xff] }
 0x275   : > { %11185 = vmatprep.mubr.msk.f32.mxu0 %vm287_vm0, %v10127_v51  ;;  %v3820_v7 = vadd.f32 %v3819_v6, %v3818_v16  ;;  %4122 = vrot.lane.b32.xlu1 %v18403_v40, %s11897_s22  ;;  %v3831_v6 = vrot.slane %v3830_v49, 4  ;;  %v3763_v16 = vmax.f32 %v3761_v10, %v3762_v46 }
 0x276   : > { %v14527_v8 = vpop.permute.xlu0 %1859  ;;  %11186 = vmatmul.mubr.msk.f32.gmra.mrb[106].mxu0 %vm287_vm0, %v10128_v43  ;;  %v4839_v47 = vrot.slane %v4838_v18, 2  ;;  %v3775_v41 = vmax.f32 %v3773_v11, %v3774_v39  ;;  %v3784_v40 = vmax.f32 %v3782_v62, %v3783_v14  ;;  %v4888_v62 = vsel %vm729_vm7, %v14553_v56, 0.0  ;;  %v18412_v14 = vld [vmem:[#allocation72_spill] sm:$0xff] }
 0x277   : > { %18400 = vst [vmem:[#allocation29_spill] sm:$0xff] %v14527_v8  ;;  %v14535_v42 = vpop.permute.xlu1 %1857  ;;  %v3810_v8 = vrot.slane %v3809_v58, 4  ;;  %v3821_v50 = vrot.slane %v3820_v7, 1  ;;  %v3832_v60 = vadd.f32 %v3831_v6, %v3830_v49  ;;  %v3789_v11 = vsub.f32 %v14419_v15, %v3763_v16 }
 0x278   : > { %18401 = vst [vmem:[#allocation62_spill] sm:$0xff] %v14535_v42  ;;  %4120 = vrot.lane.b32.xlu0 %v18402_v34, %s11897_s22  ;;  %v4877_v34 = vrot.slane %v4876_v55, 2  ;;  %v4828_v42 = vmax.f32 %v4826_v57, %v4827_v33  ;;  %v4840_v59 = vmax.f32 %v4838_v18, %v4839_v47  ;;  %v14559_v33 = vpop.eup %11695  ;;  %v18409_v18 = vld [vmem:[#allocation73_spill] sm:$0xff]  ;;  %v3776_v39 = vrot.slane %v3775_v41, 1 }
 0x279   : > { %5178 = vrot.lane.b32.xlu1 %v18406_v44, %s11912_s30  ;;  %v3811_v10 = vadd.f32 %v3810_v8, %v3809_v58  ;;  %v4847_v8 = vsub.f32 %v14423_v45, %v4821_v29  ;;  %v14572_v58 = vpop.f32.mrb[109].mxu1  ;;  %v4881_v15 = vsel %vm729_vm7, %v14559_v33, 0.0  ;;  %v4889_v25 = vrot.slane %v4888_v62, 4 }
 0x27a   : > { %v14547_v51 = vpop.permute.xlu0 %2060  ;;  %v4878_v46 = vadd.f32 %v4877_v34, %v4876_v55  ;;  %v3822_v55 = vadd.f32 %v3821_v50, %v3820_v7  ;;  %18411 = vst [vmem:[#allocation64_spill] sm:$0xff] %v14572_v58  ;;  %v3833_v50 = vrot.slane %v3832_v60, 2  ;;  %v14587_v29 = vpop.f32.mrb[110].mxu1 }
 0x27b   : > { %18404 = vst [vmem:[#allocation38_spill] sm:$0xff] %v14547_v51  ;;  %v14549_v43 = vpop.permute.xlu1 %2058  ;;  %v4832_v51 = vrot.slane %v4831_v17, 2  ;;  %v3812_v34 = vrot.slane %v3811_v10, 2  ;;  %v14583_v7 = vpop.eup %11697  ;;  %18416 = vst [vmem:[#allocation89_spill] sm:$0xff] %v14587_v29  ;;  %v4859_v44 = vmul.f32 1.442695, %v4847_v8  ;;  %v4890_v36 = vadd.f32 %v4889_v25, %v4888_v62 }
 0x27c   : > { %18405 = vst [vmem:[#allocation65_spill] sm:$0xff] %v14549_v43  ;;  %5184 = vrot.lane.b32.xlu0 %v14140_v35, %s11912_s30  ;;  %v4848_v35 = vsub.f32 %v14413_v53, %v4828_v42  ;;  %v3792_v53 = vsub.f32 %v14432_v5, %v3784_v40  ;;  %v4841_v42 = vrot.slane %v4840_v59, 1  ;;  %v4879_v6 = vrot.slane %v4878_v46, 1 }
 0x27d   : > { %v4833_v49 = vmax.f32 %v4831_v17, %v4832_v51  ;;  %4126 = vrot.lane.b32.xlu1 %v18412_v14, %s11897_s22  ;;  %v3801_v5 = vmul.f32 1.442695, %v3789_v11  ;;  %v14589_v17 = vpop.eup %11699  ;;  %v4872_v51 = vrot.slane %v4871_v26, 1  ;;  %v4882_v40 = vrot.slane %v4881_v15, 4 }
 0x27e   : > { %v14557_v57 = vpop.permute.xlu0 %2922  ;;  %v4861_v16 = vmul.f32 1.442695, %v4848_v35  ;;  %11701 = vrcp.f32 %v3822_v55  ;;  %v3807_v35 = vmul.f32 1.442695, %v3792_v53  ;;  %v3777_v14 = vmax.f32 %v3775_v41, %v3776_v39 }
 0x27f   : > { %18407 = vst [vmem:[#allocation67_spill] sm:$0xff] %v14557_v57  ;;  %v14562_v43 = vpop.permute.xlu1 %2920  ;;  %v4880_v58 = vadd.f32 %v4879_v6, %v4878_v46  ;;  %v3834_v57 = vadd.f32 %v3833_v50, %v3832_v60  ;;  %v3823_v8 = vsel %vm729_vm7, %v14583_v7, 0.0  ;;  %v3844_v41 = vsel %vm729_vm7, %v14589_v17, 0.0  ;;  %v18426_v6 = vld [vmem:[#allocation40_spill] sm:$0xff] }
 0x280   : > { %18408 = vst [vmem:[#allocation34_spill] sm:$0xff] %v14562_v43  ;;  %4124 = vrot.lane.b32.xlu0 %v18409_v18, %s11897_s22  ;;  %v14591_v18 = vpop.f32.mrb[111].mxu1  ;;  %11703 = vpow2.f32 %v4861_v16  ;;  %v4873_v46 = vadd.f32 %v4872_v51, %v4871_v26  ;;  %v3845_v16 = vrot.slane %v3844_v41, 4 }
 0x281   : > { %18417 = vst [vmem:[#allocation73_spill] sm:$0xff] %v14591_v18  ;;  %5182 = vrot.lane.b32.xlu1 %v14146_v27, %s11912_s30  ;;  %11705 = vpow2.f32 %v3801_v5 }
 0x282   : > { %v14579_v47 = vpop.permute.xlu0 %3123  ;;  %v14605_v27 = vpop.f32.mrb[112].mxu1  ;;  %11707 = vpow2.f32 %v4859_v44 }
 0x283   : > { %18413 = vst [vmem:[#allocation70_spill] sm:$0xff] %v14579_v47  ;;  %v14581_v45 = vpop.permute.xlu1 %3121  ;;  %v4842_v47 = vmax.f32 %v4840_v59, %v4841_v42  ;;  %18420 = vst [vmem:[#allocation120_spill] sm:$0xff] %v14605_v27  ;;  %v4883_v59 = vadd.f32 %v4882_v40, %v4881_v15  ;;  %v14611_v60 = vpop.f32.mrb[113].mxu1  ;;  %11709 = vpow2.f32 %v3807_v35  ;;  %v3824_v42 = vrot.slane %v3823_v8, 4  ;;  %v18430_v40 = vld [vmem:[#allocation75_spill] sm:$0xff] }
 0x284   : > { %18414 = vst [vmem:[#allocation69_spill] sm:$0xff] %v14581_v45  ;;  %4174 = vrot.lane.b32.xlu0 %v18415_v63, %s11897_s22  ;;  %v4834_v45 = vrot.slane %v4833_v49, 1  ;;  %v3813_v63 = vadd.f32 %v3812_v34, %v3811_v10  ;;  %v18421_v10 = vld [vmem:[#allocation3_spill] sm:$0xff]  ;;  %v4891_v15 = vrot.slane %v4890_v36, 2  ;;  %11711 = vrcp.f32 %v4880_v58 }
 0x285   : > { %v14609_v62 = vadd.f32 %v18421_v10, %v14182_v23  ;;  %18422 = vst [vmem:[#allocation3_spill] sm:$0xff] %v14611_v60  ;;  %v4850_v39 = vsub.f32 %v14470_v52, %v4842_v47  ;;  %5232 = vrot.lane.b32.xlu1 %v14153_v1, %s11912_s30  ;;  %v18425_v23 = vld [vmem:[#allocation11_spill] sm:$0xff]  ;;  %v3791_v52 = vsub.f32 %v14457_v37, %v3777_v14  ;;  %v3835_v47 = vrot.slane %v3834_v57, 1 }
 0x286   : > { %v14595_v11 = vpop.permute.xlu0 %1863  ;;  %v4835_v55 = vmax.f32 %v4833_v49, %v4834_v45  ;;  %v2819_v26 = vcombine.high %v18425_v23, %v18425_v23  ;;  %v2826_v25 = vrot.slane %v18425_v23, %v18426_v6  ;;  %v18427_v49 = vld [vmem:[#allocation77_spill] sm:$0xff]  ;;  %v14627_v1 = vpop.f32.mrb[114].mxu1  ;;  %v4884_v45 = vrot.slane %v4883_v59, 2 }
 0x287   : > { %18418 = vst [vmem:[#allocation72_spill] sm:$0xff] %v14595_v11  ;;  %v14597_v29 = vpop.permute.xlu1 %2108  ;;  %18428 = vst [vmem:[#allocation11_spill] sm:$0xff] %v14627_v1  ;;  %v5849_v50 = vsel %vm729_vm7, %v14609_v62, -inf  ;;  %11713 = vrcp.f32 %v4873_v46  ;;  %v14631_v58 = vpop.f32.mrb[115].mxu1  ;;  %v4865_v5 = vmul.f32 1.442695, %v4850_v39  ;;  %v3825_v35 = vadd.f32 %v3824_v42, %v3823_v8 }
 0x288   : > { %18419 = vst [vmem:[#allocation74_spill] sm:$0xff] %v14597_v29  ;;  %5230 = vrot.lane.b32.xlu0 %v14156_v32, %s11912_s30  ;;  %v3814_v32 = vrot.slane %v3813_v63, 1  ;;  %18429 = vst [vmem:[#allocation77_spill] sm:$0xff] %v14631_v58  ;;  %v4849_v51 = vsub.f32 %v14491_v24, %v4835_v55  ;;  %v11702_v44 = vpop.eup %11701  ;;  %v4892_v14 = vadd.f32 %v4891_v15, %v4890_v36  ;;  %v3805_v1 = vmul.f32 1.442695, %v3791_v52  ;;  %v18455_v29 = vld [vmem:[#allocation83_spill] sm:$0xff] }
 0x289   : > { %4172 = vrot.lane.b32.xlu1 %v18430_v40, %s11897_s22  ;;  %v5850_v27 = vrot.slane %v5849_v50, 4  ;;  %v14645_v24 = vrot.slane %v2819_v26, %v18426_v6  ;;  %v4885_v39 = vadd.f32 %v4884_v45, %v4883_v59  ;;  %v2834_v55 = vcombine.high %v2826_v25, %v2826_v25 }
 0x28a   : > { %v14616_v53 = vpop.permute.xlu0 %2926  ;;  %v3815_v23 = vadd.f32 %v3814_v32, %v3813_v63  ;;  %v14642_v46 = vpop.eup %11703  ;;  %v3836_v40 = vadd.f32 %v3835_v47, %v3834_v57  ;;  %11715 = vpow2.f32 %v4865_v5  ;;  %v4863_v36 = vmul.f32 1.442695, %v4849_v51  ;;  %v18433_v63 = vld [vmem:[#allocation4_spill] sm:$0xff]  ;;  %v18436_v47 = vld [vmem:[#allocation57_spill] sm:$0xff] }
 0x28b   : > { %18423 = vst [vmem:[#allocation121_spill] sm:$0xff] %v14616_v53  ;;  %v14618_v34 = vpop.permute.xlu1 %3171  ;;  %v14647_v58 = vpop.eup %11705  ;;  %v14651_v8 = vadd.f32 %v18433_v63, %v14199_v20  ;;  %v3826_v59 = vrot.slane %v3825_v35, 2  ;;  %v4893_v42 = vrot.slane %v4892_v14, 1  ;;  %v14661_v57 = vrot.slane %v2826_v25, %v18426_v6 }
 0x28c   : > { %18424 = vst [vmem:[#allocation122_spill] sm:$0xff] %v14618_v34  ;;  %4178 = vrot.lane.b32.xlu0 %v18427_v49, %s11897_s22  ;;  %v3846_v49 = vadd.f32 %v3845_v16, %v3844_v41  ;;  %v3874_v41 = vmul.f32 %v11702_v44, %v14449_v31  ;;  %v14658_v32 = vpop.eup %11707  ;;  %11717 = vrcp.f32 %v3815_v23  ;;  %v5851_v16 = vmax.f32 %v5849_v50, %v5850_v27  ;;  %v18437_v50 = vld [vmem:[#allocation78_spill] sm:$0xff] }
 0x28d   : > { %5236 = vrot.lane.b32.xlu1 %v14171_v48, %s11912_s30  ;;  %v14665_v26 = vpop.eup %11709  ;;  %11719 = vpow2.f32 %v3805_v1  ;;  %v4902_v48 = vsel %vm729_vm7, %v14642_v46, 0.0  ;;  %v4886_v52 = vrot.slane %v4885_v39, 1  ;;  %v14672_v45 = vadd.f32 %v14178_v28, %v18436_v47 }
 0x28e   : > { %v14636_v37 = vpop.permute.xlu0 %2106  ;;  %v3847_v20 = vrot.slane %v3846_v49, 2  ;;  %v11712_v31 = vpop.eup %11711  ;;  %v14675_v25 = vrot.slane %v2834_v55, %v18426_v6  ;;  %11721 = vrcp.f32 %v3836_v40  ;;  %v3837_v5 = vsel %vm729_vm7, %v14647_v58, 0.0 }
 0x28f   : > { %18431 = vst [vmem:[#allocation75_spill] sm:$0xff] %v14636_v37  ;;  %v14638_v10 = vpop.permute.xlu1 %1861  ;;  %v4895_v1 = vsel %vm729_vm7, %v14658_v32, 0.0  ;;  %11723 = vpow2.f32 %v4863_v36  ;;  %v5863_v27 = vsel %vm729_vm7, %v14651_v8, -inf  ;;  %v3827_v44 = vadd.f32 %v3826_v59, %v3825_v35 }
 0x290   : > { %18432 = vst [vmem:[#allocation123_spill] sm:$0xff] %v14638_v10  ;;  %5234 = vrot.lane.b32.xlu0 %v14174_v61, %s11912_s30  ;;  %v3858_v23 = vsel %vm729_vm7, %v14665_v26, 0.0  ;;  %v4903_v55 = vrot.slane %v4902_v48, 4  ;;  %v4894_v63 = vadd.f32 %v4893_v42, %v4892_v14  ;;  %v5852_v47 = vrot.slane %v5851_v16, 2 }
 0x291   : > { %4176 = vrot.lane.b32.xlu1 %v18437_v50, %s11897_s22  ;;  %v11714_v28 = vpop.eup %11713  ;;  %v2864_v36 = vcombine.high %v14661_v57, %v14661_v57  ;;  %v4932_v60 = vmul.f32 %v11712_v31, %v14478_v22  ;;  %v18440_v50 = vld [vmem:[#allocation80_spill] sm:$0xff]  ;;  %v5856_v35 = vsel %vm729_vm7, %v14672_v45, -inf  ;;  %v5864_v59 = vrot.slane %v5863_v27, 4 }
 0x292   : > { %v14655_v61 = vpop.permute.xlu0 %3169  ;;  %v4887_v18 = vadd.f32 %v4886_v52, %v4885_v39  ;;  %v3838_v34 = vrot.slane %v3837_v5, 4  ;;  %v4931_v22 = vmul.f32 %v11714_v28, %v14485_v38  ;;  %v3828_v42 = vrot.slane %v3827_v44, 1 }
 0x293   : > { %18434 = vst [vmem:[#allocation4_spill] sm:$0xff] %v14655_v61  ;;  %v14663_v15 = vpop.permute.xlu1 %2924  ;;  %v3859_v61 = vrot.slane %v3858_v23, 4  ;;  %v2866_v31 = vcombine.high %v14675_v25, %v14675_v25  ;;  %11725 = vrcp.f32 %v4894_v63  ;;  %v5857_v39 = vrot.slane %v5856_v35, 4 }
 0x294   : > { %18435 = vst [vmem:[#allocation124_spill] sm:$0xff] %v14663_v15  ;;  %3981 = vrot.lane.b32.xlu0 %v3874_v41, %s11897_s22  ;;  %v3848_v41 = vadd.f32 %v3847_v20, %v3846_v49  ;;  %v4904_v20 = vadd.f32 %v4903_v55, %v4902_v48  ;;  %v5853_v52 = vmax.f32 %v5851_v16, %v5852_v47  ;;  %11727 = vrcp.f32 %v4887_v18 }
 0x295   : > { %5039 = vrot.lane.b32.xlu1 %v4932_v60, %s11912_s30  ;;  %v5865_v63 = vmax.f32 %v5863_v27, %v5864_v59  ;;  %v3839_v47 = vadd.f32 %v3838_v34, %v3837_v5  ;;  %v3860_v53 = vadd.f32 %v3859_v61, %v3858_v23  ;;  %v3829_v61 = vadd.f32 %v3828_v42, %v3827_v44 }
 0x296   : > { %v14685_v51 = vpop.permute.xlu0 %1867  ;;  %v3849_v28 = vrot.slane %v3848_v41, 1  ;;  %v4905_v18 = vrot.slane %v4904_v20, 2  ;;  %v5854_v23 = vrot.slane %v5853_v52, 1 }
 0x297   : > { %18438 = vst [vmem:[#allocation57_spill] sm:$0xff] %v14685_v51  ;;  %v14689_v40 = vpop.permute.xlu1 %2112  ;;  %v4896_v51 = vrot.slane %v4895_v1, 4  ;;  %v3840_v42 = vrot.slane %v3839_v47, 2  ;;  %v3861_v15 = vrot.slane %v3860_v53, 2  ;;  %11729 = vrcp.f32 %v3829_v61  ;;  %v18453_v61 = vld [vmem:[#allocation81_spill] sm:$0xff] }
 0x298   : > { %18439 = vst [vmem:[#allocation78_spill] sm:$0xff] %v14689_v40  ;;  %4182 = vrot.lane.b32.xlu0 %v18440_v50, %s11897_s22  ;;  %v18441_v40 = vld [vmem:[#allocation43_spill] sm:$0xff]  ;;  %v14706_v50 = vpop.eup %11715  ;;  %v3850_v44 = vadd.f32 %v3849_v28, %v3848_v41 }
 0x299   : > { %v14711_v14 = vrot.slane %v2864_v36, %v18441_v40  ;;  %v14716_v38 = vpop.f32.mrb[116].mxu1  ;;  %v11718_v48 = vpop.eup %11717  ;;  %v4897_v55 = vadd.f32 %v4896_v51, %v4895_v1  ;;  %v2835_v36 = vcombine.high %v14645_v24, %v14645_v24  ;;  %5240 = vrot.lane.b32.xlu1 %v14187_v21, %s11912_s30  ;;  %v4916_v27 = vsel %vm729_vm7, %v14706_v50, 0.0 }
 0x29a   : > { %v14701_v49 = vpop.permute.xlu0 %2930  ;;  %18444 = vst [vmem:[#allocation126_spill] sm:$0xff] %v14716_v38  ;;  %v14720_v16 = vpop.eup %11719  ;;  %v14735_v34 = vrot.slane %v2866_v31, %v18441_v40  ;;  %v5858_v51 = vmax.f32 %v5856_v35, %v5857_v39  ;;  %v3873_v21 = vmul.f32 %v11718_v48, %v14521_v0  ;;  %v5866_v38 = vrot.slane %v5865_v63, 2 }
 0x29b   : > { %18442 = vst [vmem:[#allocation80_spill] sm:$0xff] %v14701_v49  ;;  %v14713_v60 = vpop.permute.xlu1 %3175  ;;  %v14718_v49 = vpop.f32.mrb[117].mxu1  ;;  %v3851_v35 = vsel %vm729_vm7, %v14720_v16, 0.0  ;;  %v4906_v39 = vadd.f32 %v4905_v18, %v4904_v20  ;;  %v4917_v28 = vrot.slane %v4916_v27, 4  ;;  %11731 = vrcp.f32 %v3850_v44 }
 0x29c   : > { %18443 = vst [vmem:[#allocation125_spill] sm:$0xff] %v14713_v60  ;;  %5037 = vrot.lane.b32.xlu0 %v4931_v22, %s11912_s30  ;;  %18445 = vst [vmem:[#allocation127_spill] sm:$0xff] %v14718_v49  ;;  %v14726_v60 = vrot.slane %v14645_v24, %v18426_v6  ;;  %v11722_v1 = vpop.eup %11721  ;;  %v18448_v24 = vld [vmem:[#allocation13_spill] sm:$0xff]  ;;  %v4898_v49 = vrot.slane %v4897_v55, 2 }
 0x29d   : > { %18447 = vst [vmem:[#allocation129_spill] sm:$0xff] %v14735_v34  ;;  %v14737_v5 = vpop.eup %11723  ;;  %v14741_v59 = vadd.f32 %v14194_v4, %v18448_v24  ;;  %3979 = vrot.lane.b32.xlu1 %v3873_v21, %s11897_s22  ;;  %v5855_v24 = vmax.f32 %v5853_v52, %v5854_v23  ;;  %v4918_v10 = vadd.f32 %v4917_v28, %v4916_v27  ;;  %v18456_v34 = vld [vmem:[#allocation71_spill] sm:$0xff] }
 0x29e   : > { %v14730_v22 = vpop.permute.xlu0 %2110  ;;  %v4909_v48 = vsel %vm729_vm7, %v14737_v5, 0.0  ;;  %v14788_v43 = vadd.f32 %v14226_v19, %v18456_v34 }
 0x29f   : > { %18446 = vst [vmem:[#allocation128_spill] sm:$0xff] %v14730_v22  ;;  %v18449_v22 = vld [vmem:[#allocation14_spill] sm:$0xff]  ;;  %v14753_v4 = vpop.permute.xlu1 %1865  ;;  %v5870_v21 = vsel %vm729_vm7, %v14741_v59, -inf  ;;  %v4910_v18 = vrot.slane %v4909_v48, 4 }
 0x2a0   : > { %5238 = vrot.lane.b32.xlu0 %v14190_v9, %s11912_s30  ;;  %v14748_v31 = vadd.f32 %v14210_v12, %v18449_v22  ;;  %18450 = vst [vmem:[#allocation13_spill] sm:$0xff] %v14753_v4  ;;  %v3876_v9 = vmul.f32 %v11722_v1, %v14523_v2  ;;  %v18452_v12 = vld [vmem:[#allocation60_spill] sm:$0xff]  ;;  %v5859_v22 = vrot.slane %v5858_v51, 2  ;;  %v4899_v4 = vadd.f32 %v4898_v49, %v4897_v55 }
 0x2a1   : > { %v14762_v41 = vadd.f32 %v18452_v12, %v14215_v30  ;;  %v5867_v2 = vmax.f32 %v5865_v63, %v5866_v38  ;;  %v3852_v1 = vrot.slane %v3851_v35, 4  ;;  %v14770_v30 = vrot.slane %v2835_v36, %v18426_v6  ;;  %4180 = vrot.lane.b32.xlu1 %v18453_v61, %s11897_s22 }
 0x2a2   : > { %v14755_v0 = vpop.permute.xlu0 %3173  ;;  %v5884_v20 = vsel %vm729_vm7, %v14748_v31, -inf  ;;  %v3841_v49 = vadd.f32 %v3840_v42, %v3839_v47  ;;  %v4907_v38 = vrot.slane %v4906_v39, 1  ;;  %v5871_v55 = vrot.slane %v5870_v21, 4 }
 0x2a3   : > { %18451 = vst [vmem:[#allocation14_spill] sm:$0xff] %v14755_v0  ;;  %v11726_v0 = vpop.eup %11725  ;;  %v5877_v63 = vsel %vm729_vm7, %v14762_v41, -inf  ;;  %v5860_v44 = vmax.f32 %v5858_v51, %v5859_v22  ;;  %v5905_v12 = vsub.f32 %v14609_v62, %v5855_v24  ;;  %v5885_v36 = vrot.slane %v5884_v20, 4  ;;  %v14781_v37 = vpop.permute.xlu1 %2928 }
 0x2a4   : > { %3985 = vrot.lane.b32.xlu0 %v3876_v9, %s11897_s22  ;;  %v11728_v9 = vpop.eup %11727  ;;  %v4934_v52 = vmul.f32 %v11726_v0, %v14553_v56  ;;  %v3862_v61 = vadd.f32 %v3861_v15, %v3860_v53  ;;  %v5868_v47 = vrot.slane %v5867_v2, 1  ;;  %v4911_v42 = vadd.f32 %v4910_v18, %v4909_v48  ;;  %v18458_v53 = vld [vmem:[#allocation106_spill] sm:$0xff]  ;;  %v18459_v15 = vld [vmem:[#allocation68_spill] sm:$0xff] }
 0x2a5   : > { %v5878_v11 = vrot.slane %v5877_v63, 4  ;;  %v4933_v51 = vmul.f32 %v11728_v9, %v14559_v33  ;;  %v3842_v0 = vrot.slane %v3841_v49, 1  ;;  %v14798_v27 = vadd.f32 %v18459_v15, %v18458_v53  ;;  %v11730_v33 = vpop.eup %11729 }
 0x2a6   : > { %v14776_v23 = vpop.permute.xlu0 %2114  ;;  %5043 = vrot.lane.b32.xlu1 %v4934_v52, %s11912_s30  ;;  %v4908_v48 = vadd.f32 %v4907_v38, %v4906_v39  ;;  %v5861_v22 = vrot.slane %v5860_v44, 1  ;;  %v5913_v19 = vmul.f32 1.442695, %v5905_v12  ;;  %v5886_v34 = vmax.f32 %v5884_v20, %v5885_v36  ;;  %v18461_v20 = vld [vmem:[#allocation99_spill] sm:$0xff]  ;;  %v11732_v24 = vpop.eup %11731 }
 0x2a7   : > { %18454 = vst [vmem:[#allocation60_spill] sm:$0xff] %v14776_v23  ;;  %v4900_v23 = vrot.slane %v4899_v4, 1  ;;  %v14804_v18 = vpop.permute.xlu1 %2116  ;;  %v3863_v52 = vrot.slane %v3862_v61, 1  ;;  %v5869_v9 = vmax.f32 %v5867_v2, %v5868_v47  ;;  %v4919_v53 = vrot.slane %v4918_v10, 2  ;;  %v18466_v47 = vld [vmem:[#allocation16_spill] sm:$0xff] }
 0x2a8   : > { %4186 = vrot.lane.b32.xlu0 %v18455_v29, %s11897_s22  ;;  %v5872_v29 = vmax.f32 %v5870_v21, %v5871_v55  ;;  %v3853_v21 = vadd.f32 %v3852_v1, %v3851_v35  ;;  %v4912_v15 = vrot.slane %v4911_v42, 2  ;;  %v5879_v39 = vmax.f32 %v5877_v63, %v5878_v11 }
 0x2a9   : > { %v14794_v56 = vpop.f32.mrb[118].mxu1  ;;  %v4901_v55 = vadd.f32 %v4900_v23, %v4899_v4  ;;  %v5898_v38 = vsel %vm729_vm7, %v14788_v43, -inf  ;;  %v5891_v35 = vsel %vm729_vm7, %v14798_v27, -inf  ;;  %11733 = vrcp.f32 %v4908_v48 }
 0x2aa   : > { %v14791_v62 = vpop.permute.xlu0 %3177  ;;  %18457 = vst [vmem:[#allocation81_spill] sm:$0xff] %v14794_v56  ;;  %v14800_v28 = vpop.f32.mrb[119].mxu1  ;;  %5244 = vrot.lane.b32.xlu1 %v18461_v20, %s11912_s30  ;;  %v3843_v4 = vadd.f32 %v3842_v0, %v3841_v49  ;;  %v5862_v11 = vmax.f32 %v5860_v44, %v5861_v22  ;;  %11735 = vpow2.f32 %v5913_v19  ;;  %v5887_v1 = vrot.slane %v5886_v34, 2 }
 0x2ab   : > { %18460 = vst [vmem:[#allocation83_spill] sm:$0xff] %v14800_v28  ;;  %v14819_v23 = vpop.permute.xlu1 %3179  ;;  %v3875_v63 = vmul.f32 %v11730_v33, %v14583_v7  ;;  %v5907_v20 = vsub.f32 %v14651_v8, %v5869_v9  ;;  %v5899_v28 = vrot.slane %v5898_v38, 4  ;;  %11737 = vrcp.f32 %v4901_v55 }
 0x2ac   : > { %5041 = vrot.lane.b32.xlu0 %v4933_v51, %s11912_s30  ;;  %v5873_v51 = vrot.slane %v5872_v29, 2  ;;  %18465 = vst [vmem:[#allocation99_spill] sm:$0xff] %v14819_v23  ;;  %v3854_v48 = vrot.slane %v3853_v21, 2  ;;  %v5880_v49 = vrot.slane %v5879_v39, 2  ;;  %v5892_v0 = vrot.slane %v5891_v35, 4 }
 0x2ad   : > { %v14813_v36 = vpop.f32.mrb[120].mxu1  ;;  %v3878_v22 = vmul.f32 %v11732_v24, %v14589_v17  ;;  %v4920_v19 = vadd.f32 %v4919_v53, %v4918_v10  ;;  %11739 = vrcp.f32 %v3843_v4  ;;  %v5906_v8 = vsub.f32 %v14672_v45, %v5862_v11  ;;  %v18469_v45 = vld [vmem:[#allocation84_spill] sm:$0xff] }
 0x2ae   : > { %v14811_v12 = vpop.permute.xlu0 %2118  ;;  %18463 = vst [vmem:[#allocation106_spill] sm:$0xff] %v14813_v36  ;;  %v14817_v2 = vpop.f32.mrb[121].mxu1  ;;  %v3864_v36 = vadd.f32 %v3863_v52, %v3862_v61  ;;  %3983 = vrot.lane.b32.xlu1 %v3875_v63, %s11897_s22  ;;  %v5874_v9 = vmax.f32 %v5872_v29, %v5873_v51  ;;  %v5917_v55 = vmul.f32 1.442695, %v5907_v20  ;;  %v5888_v63 = vmax.f32 %v5886_v34, %v5887_v1  ;;  %v18475_v1 = vld [vmem:[#allocation102_spill] sm:$0xff] }
 0x2af   : > { %18462 = vst [vmem:[#allocation71_spill] sm:$0xff] %v14811_v12  ;;  %18464 = vst [vmem:[#allocation68_spill] sm:$0xff] %v14817_v2  ;;  %v11880_v2 = vld [vmem:[%s11996_s10] sm:$0xff]  ;;  %v14834_v52 = vpop.permute.xlu1 %2120  ;;  %v5900_v17 = vmax.f32 %v5898_v38, %v5899_v28  ;;  %v3855_v10 = vadd.f32 %v3854_v48, %v3853_v21  ;;  %v5881_v24 = vmax.f32 %v5879_v39, %v5880_v49  ;;  %v5915_v28 = vmul.f32 1.442695, %v5906_v8  ;;  %v18471_v21 = vld [vmem:[#allocation115_spill] sm:$0xff] }
 0x2b0   : > { %5242 = vrot.lane.b32.xlu0 %v18466_v47, %s11912_s30  ;;  %v1763_v7 = vrot.slane %v11880_v2, %v18426_v6  ;;  %v1756_v33 = vcombine.high %v11880_v2, %v11880_v2  ;;  %v4913_v47 = vadd.f32 %v4912_v15, %v4911_v42  ;;  %18468 = vst [vmem:[#allocation130_spill] sm:$0xff] %v14834_v52  ;;  %11741 = vrcp.f32 %v3864_v36  ;;  %v18472_v39 = vld [vmem:[#allocation79_spill] sm:$0xff] }
 0x2b1   : > { %v5893_v53 = vmax.f32 %v5891_v35, %v5892_v0  ;;  %v2867_v42 = vcombine.high %v14770_v30, %v14770_v30  ;;  %v4921_v15 = vrot.slane %v4920_v19, 1  ;;  %v5875_v38 = vrot.slane %v5874_v9, 1 }
 0x2b2   : > { %v14826_v44 = vpop.permute.xlu0 %3181  ;;  %4184 = vrot.lane.b32.xlu1 %v18469_v45, %s11897_s22  ;;  %v1771_v51 = vcombine.high %v1763_v7, %v1763_v7  ;;  %v14844_v4 = vrot.slane %v1763_v7, %v18426_v6  ;;  %v1770_v34 = vrot.slane %v1756_v33, %v18426_v6  ;;  %v14849_v36 = vadd.f32 %v18472_v39, %v18471_v21  ;;  %v18478_v39 = vld [vmem:[#allocation87_spill] sm:$0xff] }
 0x2b3   : > { %18467 = vst [vmem:[#allocation16_spill] sm:$0xff] %v14826_v44  ;;  %v18473_v35 = vcombine.high %v14726_v60, %v14726_v60  ;;  %v14857_v11 = vpop.permute.xlu1 %3183  ;;  %v11734_v20 = vpop.eup %11733  ;;  %v4914_v48 = vrot.slane %v4913_v47, 1  ;;  %11743 = vpow2.f32 %v5917_v55  ;;  %v5889_v49 = vrot.slane %v5888_v63, 1 }
 0x2b4   : > { %3989 = vrot.lane.b32.xlu0 %v3878_v22, %s11897_s22  ;;  %18474 = vst [vmem:[#allocation115_spill] sm:$0xff] %v14857_v11  ;;  %v5901_v0 = vrot.slane %v5900_v17, 2  ;;  %v14861_v22 = vpop.f32.mrb[122].mxu1  ;;  %v14863_v7 = vpop.eup %11735  ;;  %v3856_v33 = vrot.slane %v3855_v10, 1  ;;  %v5882_v8 = vrot.slane %v5881_v24, 1  ;;  %v5894_v45 = vrot.slane %v5893_v53, 2 }
 0x2b5   : > { %v14855_v2 = vrot.slane %v18473_v35, %v18441_v40  ;;  %18476 = vst [vmem:[#allocation79_spill] sm:$0xff] %v14861_v22  ;;  %18477 = vst [vmem:[#allocation102_spill] sm:$0xff] %v14863_v7  ;;  %v14866_v21 = vrot.slane %v2867_v42, %v18441_v40  ;;  %v11738_v55 = vpop.eup %11737  ;;  %v1793_v61 = vrot.slane %v1771_v51, %v18426_v6  ;;  %11745 = vpow2.f32 %v5915_v28 }
 0x2b6   : > { %v14841_v29 = vpop.permute.xlu0 %4054  ;;  %4234 = vrot.lane.b32.xlu1 %v18478_v39, %s11897_s22  ;;  %v1772_v22 = vcombine.high %v1770_v34, %v1770_v34  ;;  %v4922_v56 = vadd.f32 %v4921_v15, %v4920_v19  ;;  %v5876_v11 = vmax.f32 %v5874_v9, %v5875_v38  ;;  %v6911_v42 = vsel %vm729_vm7, %v14849_v36, -inf }
 0x2b7   : > { %18470 = vst [vmem:[#allocation84_spill] sm:$0xff] %v14841_v29  ;;  %v14877_v29 = vrot.slane %v14844_v4, %v18441_v40  ;;  %v14881_v44 = vpop.permute.xlu1 %5112  ;;  %v4936_v39 = vmul.f32 %v11734_v20, %v14642_v46  ;;  %v5929_v51 = vsel %vm729_vm7, %v14863_v7, 0.0  ;;  %v5890_v52 = vmax.f32 %v5888_v63, %v5889_v49  ;;  %v18558_v7 = vld [vmem:[#allocation7_spill] sm:$0xff] }
 0x2b8   : > { %5292 = vrot.lane.b32.xlu0 %v18475_v1, %s11912_s30  ;;  %v14872_v1 = vpop.f32.mrb[123].mxu1  ;;  %18482 = vst [vmem:[#allocation133_spill] sm:$0xff] %v14881_v44  ;;  %v5902_v23 = vmax.f32 %v5900_v17, %v5901_v0  ;;  %v4915_v12 = vadd.f32 %v4914_v48, %v4913_v47  ;;  %v5883_v9 = vmax.f32 %v5881_v24, %v5882_v8  ;;  %v6912_v44 = vrot.slane %v6911_v42, 4 }
 0x2b9   : > { %18480 = vst [vmem:[#allocation131_spill] sm:$0xff] %v14872_v1  ;;  %18481 = vst [vmem:[#allocation132_spill] sm:$0xff] %v14877_v29  ;;  %v11740_v1 = vpop.eup %11739  ;;  %v14888_v19 = vpop.f32.mrb[124].mxu1  ;;  %v5895_v15 = vmax.f32 %v5893_v53, %v5894_v45  ;;  %v4935_v46 = vmul.f32 %v11738_v55, %v14658_v32  ;;  %v3857_v38 = vadd.f32 %v3856_v33, %v3855_v10  ;;  %11747 = vrcp.f32 %v4922_v56  ;;  %v18494_v45 = vld [vmem:[#allocation30_spill] sm:$0xff] }
 0x2ba   : > { %v14870_v35 = vpop.permute.xlu0 %5110  ;;  %5047 = vrot.lane.b32.xlu1 %v4936_v39, %s11912_s30  ;;  %v14894_v20 = vpop.f32.mrb[125].mxu1  ;;  %v1801_v63 = vcombine.high %v14844_v4, %v14844_v4  ;;  %v14899_v47 = vrot.slane %v1770_v34, %v18426_v6  ;;  %v5930_v17 = vrot.slane %v5929_v51, 4  ;;  %v5908_v24 = vsub.f32 %v14741_v59, %v5876_v11 }
 0x2bb   : > { %18479 = vst [vmem:[#allocation87_spill] sm:$0xff] %v14870_v35  ;;  %v18483_v35 = vld [vmem:[#allocation88_spill] sm:$0xff]  ;;  %18486 = vst [vmem:[#allocation135_spill] sm:$0xff] %v14894_v20  ;;  %v1803_v53 = vcombine.high %v1793_v61, %v1793_v61  ;;  %v14902_v48 = vpop.permute.xlu1 %4052  ;;  %v3877_v32 = vmul.f32 %v11740_v1, %v14647_v58  ;;  %v5910_v10 = vsub.f32 %v14748_v31, %v5890_v52  ;;  %v5903_v49 = vrot.slane %v5902_v23, 1  ;;  %v18495_v1 = vld [vmem:[#allocation85_spill] sm:$0xff] }
 0x2bc   : > { %4232 = vrot.lane.b32.xlu0 %v18483_v35, %s11897_s22  ;;  %18484 = vst [vmem:[#allocation88_spill] sm:$0xff] %v14888_v19  ;;  %v11742_v35 = vpop.eup %11741  ;;  %18487 = vst [vmem:[#allocation136_spill] sm:$0xff] %v14902_v48  ;;  %v14908_v0 = vrot.slane %v1772_v22, %v18426_v6  ;;  %11749 = vrcp.f32 %v4915_v12  ;;  %v5909_v56 = vsub.f32 %v14762_v41, %v5883_v9  ;;  %v5896_v34 = vrot.slane %v5895_v15, 1  ;;  %v18514_v48 = vld [vmem:[#allocation6_spill] sm:$0xff] }
 0x2bd   : > { %v14910_v4 = vpop.f32.mrb[126].mxu1  ;;  %v3880_v58 = vmul.f32 %v11742_v35, %v14665_v26  ;;  %11751 = vrcp.f32 %v3857_v38  ;;  %v14919_v31 = vpop.eup %11743  ;;  %v6913_v52 = vmax.f32 %v6911_v42, %v6912_v44  ;;  %v14922_v22 = vrot.slane %v1793_v61, %v18441_v40  ;;  %v18498_v61 = vld [vmem:[#allocation86_spill] sm:$0xff] }
 0x2be   : > { %v14891_v28 = vpop.permute.xlu0 %4058  ;;  %18488 = vst [vmem:[#allocation137_spill] sm:$0xff] %v14910_v4  ;;  %3987 = vrot.lane.b32.xlu1 %v3877_v32, %s11897_s22  ;;  %v14917_v11 = vpop.f32.mrb[127].mxu1  ;;  %18491 = vst [vmem:[#allocation140_spill] sm:$0xff] %v14919_v31  ;;  %v14925_v12 = vrot.slane %v1801_v63, %v18441_v40  ;;  %v5931_v33 = vadd.f32 %v5930_v17, %v5929_v51  ;;  %v5919_v8 = vmul.f32 1.442695, %v5908_v24  ;;  %v18499_v42 = vld [vmem:[#allocation114_spill] sm:$0xff] }
 0x2bf   : > { %18485 = vst [vmem:[#allocation134_spill] sm:$0xff] %v14891_v28  ;;  %18490 = vst [vmem:[#allocation139_spill] sm:$0xff] %v14917_v11  ;;  %v14931_v26 = vadd.f32 %v18495_v1, %v18494_v45  ;;  %v1804_v55 = vcombine.high %v14908_v0, %v14908_v0  ;;  %v14935_v39 = vpop.permute.xlu1 %5116  ;;  %v5923_v44 = vmul.f32 1.442695, %v5910_v10  ;;  %v14940_v9 = vadd.f32 %v18499_v42, %v18498_v61  ;;  %v14949_v35 = vpop.eup %11745  ;;  %v18504_v10 = vld [vmem:[#allocation103_spill] sm:$0xff]  ;;  %v10129_v45 = vld [vmem:[%s18118_s2 + $0x7c0] sm:$0xff] }
 0x2c0   : > { %5045 = vrot.lane.b32.xlu0 %v4935_v46, %s11912_s30  ;;  %18492 = vst [vmem:[#allocation141_spill] sm:$0xff] %v14922_v22  ;;  %18493 = vst [vmem:[#allocation142_spill] sm:$0xff] %v14925_v12  ;;  %v14943_v46 = vrot.slane %v1803_v53, %v18441_v40  ;;  %v1802_v51 = vcombine.high %v14899_v47, %v14899_v47  ;;  %v5943_v63 = vsel %vm729_vm7, %v14919_v31, 0.0  ;;  %v5921_v17 = vmul.f32 1.442695, %v5909_v56  ;;  %v10130_v1 = vld [vmem:[%s18118_s2 + $0x7c8] sm:$0xff] }
 0x2c1   : > { %18496 = vst [vmem:[#allocation30_spill] sm:$0xff] %v14931_v26  ;;  %18497 = vst [vmem:[#allocation85_spill] sm:$0xff] %v14935_v39  ;;  %v14947_v38 = vpop.f32.mrb[128].mxu1  ;;  %v14953_v24 = vmax.f32 %v5902_v23, %v5903_v49  ;;  %v14955_v32 = vmax.f32 %v5895_v15, %v5896_v34  ;;  %v6914_v56 = vrot.slane %v6913_v52, 2  ;;  %v14971_v23 = vmul.f32 %v14447_v13, %v14922_v22  ;;  %v18508_v13 = vld [vmem:[#allocation15_spill] sm:$0xff] }
 0x2c2   : > { %v14914_v59 = vpop.permute.xlu0 %5114  ;;  %18500 = vst [vmem:[#allocation86_spill] sm:$0xff] %v14940_v9  ;;  %18501 = vst [vmem:[#allocation114_spill] sm:$0xff] %v14943_v46  ;;  %5290 = vrot.lane.b32.xlu1 %v18504_v10, %s11912_s30  ;;  %v14975_v15 = vmul.f32 %v14453_v54, %v14877_v29  ;;  %11188 = vmatprep.mubr.msk.f32.mxu0 %vm287_vm0, %v10129_v45  ;;  %v5932_v34 = vrot.slane %v5931_v33, 2  ;;  %11753 = vpow2.f32 %v5919_v8  ;;  %v6925_v61 = vsel %vm729_vm7, %v14931_v26, -inf  ;;  %v18513_v28 = vld [vmem:[#allocation91_spill] sm:$0xff] }
 0x2c3   : > { %18489 = vst [vmem:[#allocation138_spill] sm:$0xff] %v14914_v59  ;;  %18502 = vst [vmem:[#allocation143_spill] sm:$0xff] %v14947_v38  ;;  %v14983_v42 = vrot.slane %v1804_v55, %v18441_v40  ;;  %v14985_v10 = vpop.permute.xlu1 %4056  ;;  %11189 = vmatmul.mubr.msk.f32.gmra.mrb[108].mxu0 %vm287_vm0, %v10130_v1  ;;  %v11748_v54 = vpop.eup %11747  ;;  %v5944_v41 = vrot.slane %v5943_v63, 4  ;;  %11755 = vpow2.f32 %v5923_v44  ;;  %v14992_v45 = vsel %vm729_vm7, %v14940_v9, -inf }
 0x2c4   : > { %3993 = vrot.lane.b32.xlu0 %v3880_v58, %s11897_s22  ;;  %18503 = vst [vmem:[#allocation144_spill] sm:$0xff] %v14949_v35  ;;  %v14961_v58 = vpop.f32.mrb[129].mxu1  ;;  %18507 = vst [vmem:[#allocation146_spill] sm:$0xff] %v14985_v10  ;;  %v14995_v8 = vrot.slane %v1802_v51, %v18441_v40  ;;  %v15001_v55 = vsel %vm729_vm7, %v14949_v35, 0.0  ;;  %11757 = vpow2.f32 %v5921_v17  ;;  %v5911_v44 = vsub.f32 %v14798_v27, %v14955_v32 }
 0x2c5   : > { %18506 = vst [vmem:[#allocation145_spill] sm:$0xff] %v14961_v58  ;;  %v14997_v49 = vpop.f32.mrb[130].mxu1  ;;  %v15013_v59 = vmax.f32 %v6913_v52, %v6914_v56  ;;  %v6926_v39 = vrot.slane %v6925_v61, 4  ;;  %v1951_v17 = vmul.f32 %v18513_v28, %v14971_v23  ;;  %v1950_v1 = vmul.f32 %v18514_v48, %v14975_v15  ;;  %v18517_v56 = vld [vmem:[#allocation28_spill] sm:$0xff]  ;;  %v18519_v48 = vld [vmem:[#allocation90_spill] sm:$0xff] }
 0x2c6   : > { %v14959_v53 = vpop.permute.xlu0 %4062  ;;  %18509 = vst [vmem:[#allocation15_spill] sm:$0xff] %v14997_v49  ;;  %v15011_v51 = vpop.f32.mrb[131].mxu1  ;;  %v15019_v22 = vadd.f32 %v5932_v34, %v5931_v33  ;;  %v18515_v27 = vrot.slane %v14675_v25, %v18441_v40  ;;  %v18516_v52 = vrot.slane %v14661_v57, %v18441_v40  ;;  %v4938_v28 = vmul.f32 %v11748_v54, %v14706_v50  ;;  %v10131_v25 = vld [vmem:[%s18118_s2 + $0x7d0] sm:$0xff]  ;;  %v18520_v57 = vld [vmem:[#allocation17_spill] sm:$0xff]  ;;  %v18522_v50 = vld [vmem:[#allocation23_spill] sm:$0xff] }
 0x2c7   : > { %18505 = vst [vmem:[#allocation103_spill] sm:$0xff] %v14959_v53  ;;  %18512 = vst [vmem:[#allocation147_spill] sm:$0xff] %v15011_v51  ;;  %v11750_v10 = vpop.eup %11749  ;;  %v15044_v33 = vadd.f32 %v5944_v41, %v5943_v63  ;;  %v2011_v34 = vmul.f32 %v18520_v57, %v14971_v23  ;;  %v2010_v54 = vmul.f32 %v18522_v50, %v14975_v15  ;;  %11191 = vmatprep.mubr.msk.f32.mxu0 %vm287_vm0, %v10131_v25  ;;  %v18524_v63 = vld [vmem:[#allocation26_spill] sm:$0xff] }
 0x2c8   : > { %5296 = vrot.lane.b32.xlu0 %v18508_v13, %s11912_s30  ;;  %v18510_v13 = vld [vmem:[#allocation49_spill] sm:$0xff]  ;;  %v11752_v29 = vpop.eup %11751  ;;  %v15025_v32 = vmul.f32 %v14483_v3, %v18515_v27  ;;  %v1886_v41 = vsel %vm1885_vm1, %v14975_v15, 0.0  ;;  %v15068_v25 = vmax.f32 %v6925_v61, %v6926_v39  ;;  %v1959_v6 = vsel %vm1885_vm1, %v1951_v17, 0.0  ;;  %v18528_v61 = vld [vmem:[#allocation95_spill] sm:$0xff] }
 0x2c9   : > { %4238 = vrot.lane.b32.xlu1 %v18510_v13, %s11897_s22  ;;  %v15031_v13 = vmul.f32 %v18517_v56, %v18516_v52  ;;  %v10132_v3 = vld [vmem:[%s18118_s2 + $0x7d8] sm:$0xff]  ;;  %v15052_v56 = vpop.f32.mrb[132].mxu1  ;;  %v1958_v49 = vsel %vm1885_vm1, %v1950_v1, 0.0  ;;  %v3879_v38 = vmul.f32 %v11752_v29, %v14720_v16  ;;  %v18529_v1 = vld [vmem:[#allocation62_spill] sm:$0xff]  ;;  %v2019_v29 = vsel %vm1885_vm1, %v2011_v34, 0.0 }
 0x2ca   : > { %v15009_v53 = vpop.permute.xlu0 %5118  ;;  %v18521_v27 = vld [vmem:[#allocation25_spill] sm:$0xff]  ;;  %18523 = vst [vmem:[#allocation6_spill] sm:$0xff] %v15052_v56  ;;  %v15065_v50 = vpop.f32.mrb[133].mxu1  ;;  %11192 = vmatmul.mubr.msk.f32.gmra.mrb[110].mxu0 %vm287_vm0, %v10132_v3  ;;  %v18527_v3 = vld [vmem:[#allocation52_spill] sm:$0xff]  ;;  %v15100_v56 = vadd.f32 %v1959_v6, %v1958_v49  ;;  %v2950_v6 = vsel %vm2948_vm5, %v15025_v32, 0.0 }
 0x2cb   : > { %18511 = vst [vmem:[#allocation49_spill] sm:$0xff] %v15009_v53  ;;  %v15033_v53 = vpop.permute.xlu1 %5120  ;;  %v2071_v52 = vmul.f32 %v18521_v27, %v14971_v23  ;;  %v4937_v27 = vmul.f32 %v11750_v10, %v14737_v5  ;;  %18526 = vst [vmem:[#allocation90_spill] sm:$0xff] %v15065_v50  ;;  %v10134_v5 = vld [vmem:[%s18118_s2 + $0x7e8] sm:$0xff]  ;;  %v15079_v10 = vmul.f32 1.442695, %v5911_v44  ;;  %v3014_v39 = vmul.f32 %v18527_v3, %v15025_v32  ;;  %v18536_v49 = vld [vmem:[#allocation8_spill] sm:$0xff] }
 0x2cc   : > { %18518 = vst [vmem:[#allocation91_spill] sm:$0xff] %v15033_v53  ;;  %4236 = vrot.lane.b32.xlu0 %v18519_v48, %s11897_s22  ;;  %v1887_v48 = vsel %vm1885_vm1, %v14971_v23, 0.0  ;;  %v2070_v53 = vmul.f32 %v18524_v63, %v14975_v15  ;;  %v3013_v17 = vmul.f32 %v18528_v61, %v15031_v13  ;;  %v15087_v63 = vmul.f32 %v18529_v1, %v14925_v12  ;;  %v15098_v61 = vpop.eup %11753 }
 0x2cd   : > { %5051 = vrot.lane.b32.xlu1 %v4938_v28, %s11912_s30  ;;  %v10133_v28 = vld [vmem:[%s18118_s2 + $0x7e0] sm:$0xff]  ;;  %v2079_v44 = vsel %vm1885_vm1, %v2071_v52, 0.0  ;;  %v2018_v3 = vsel %vm1885_vm1, %v2010_v54, 0.0  ;;  %v15096_v50 = vpop.f32.mrb[134].mxu1  ;;  %v15113_v54 = vpop.eup %11755  ;;  %11759 = vpow2.f32 %v15079_v10 }
 0x2ce   : > { %v15062_v57 = vpop.permute.xlu0 %4066  ;;  %11194 = vmatprep.mubr.msk.f32.mxu0 %vm287_vm0, %v10133_v28  ;;  %18531 = vst [vmem:[#allocation25_spill] sm:$0xff] %v15096_v50  ;;  %v2078_v1 = vsel %vm1885_vm1, %v2070_v53, 0.0  ;;  %v18533_v28 = vld [vmem:[#allocation50_spill] sm:$0xff]  ;;  %v15110_v52 = vpop.f32.mrb[135].mxu1  ;;  %v2949_v53 = vsel %vm2948_vm5, %v15031_v13, 0.0  ;;  %v1889_v58 = vsel %vm1885_vm1, %v15087_v63, 0.0 }
 0x2cf   : > { %18525 = vst [vmem:[#allocation28_spill] sm:$0xff] %v15062_v57  ;;  %v15089_v16 = vpop.permute.xlu1 %4060  ;;  %v1888_v57 = vadd.f32 %v1887_v48, %v1886_v41  ;;  %v3134_v12 = vmul.f32 %v18533_v28, %v15025_v32  ;;  %18535 = vst [vmem:[#allocation26_spill] sm:$0xff] %v15110_v52  ;;  %11195 = vmatmul.mubr.msk.f32.gmra.mrb[112].mxu0 %vm287_vm0, %v10134_v5  ;;  %v3073_v48 = vmul.f32 %v18536_v49, %v15031_v13  ;;  %v18537_v41 = vld [vmem:[#allocation58_spill] sm:$0xff] }
 0x2d0   : > { %18530 = vst [vmem:[#allocation17_spill] sm:$0xff] %v15089_v16  ;;  %5049 = vrot.lane.b32.xlu0 %v4937_v27, %s11912_s30  ;;  %v18532_v16 = vld [vmem:[#allocation116_spill] sm:$0xff]  ;;  %v3022_v28 = vsel %vm2948_vm5, %v3014_v39, 0.0  ;;  %v3021_v5 = vsel %vm2948_vm5, %v3013_v17, 0.0  ;;  %v18539_v50 = vld [vmem:[#allocation10_spill] sm:$0xff]  ;;  %v10136_v39 = vld [vmem:[%s18118_s2 + $0x7f8] sm:$0xff]  ;;  %v2020_v17 = vadd.f32 %v2019_v29, %v2018_v3  ;;  %v2080_v4 = vadd.f32 %v2079_v44, %v2078_v1 }
 0x2d1   : > { %v3074_v27 = vmul.f32 %v18532_v16, %v15025_v32  ;;  %3991 = vrot.lane.b32.xlu1 %v3879_v38, %s11897_s22  ;;  %v3133_v38 = vmul.f32 %v18537_v41, %v15031_v13  ;;  %v15123_v16 = vpop.eup %11757  ;;  %v2012_v51 = vmul.f32 %v18539_v50, %v15087_v63  ;;  %v18541_v49 = vld [vmem:[#allocation110_spill] sm:$0xff]  ;;  %v10135_v41 = vld [vmem:[%s18118_s2 + $0x7f0] sm:$0xff]  ;;  %v18543_v50 = vld [vmem:[#allocation119_spill] sm:$0xff]  ;;  %v3142_v19 = vsel %vm2948_vm5, %v3134_v12, 0.0 }
 0x2d2   : > { %v15108_v34 = vpop.permute.xlu0 %5122  ;;  %v2072_v31 = vmul.f32 %v18543_v50, %v15087_v63  ;;  %11197 = vmatprep.mubr.msk.f32.mxu0 %vm287_vm0, %v10135_v41  ;;  %v18545_v29 = vld [vmem:[#allocation34_spill] sm:$0xff]  ;;  %v18546_v3 = vld [vmem:[#allocation107_spill] sm:$0xff]  ;;  %v2951_v41 = vadd.f32 %v2950_v6, %v2949_v53  ;;  %v3081_v12 = vsel %vm2948_vm5, %v3073_v48, 0.0  ;;  %v18553_v48 = vld [vmem:[#allocation93_spill] sm:$0xff] }
 0x2d3   : > { %18534 = vst [vmem:[#allocation23_spill] sm:$0xff] %v15108_v34  ;;  %v18538_v34 = vld [vmem:[#allocation29_spill] sm:$0xff]  ;;  %v15133_v35 = vpop.permute.xlu1 %5124  ;;  %v15156_v44 = vmul.f32 %v18545_v29, %v14711_v14  ;;  %11198 = vmatmul.mubr.msk.f32.gmra.mrb[114].mxu0 %vm287_vm0, %v10136_v39  ;;  %v3141_v50 = vsel %vm2948_vm5, %v3133_v38, 0.0  ;;  %v10137_v14 = vld [vmem:[%s18118_s2 + $0x800] sm:$0xff]  ;;  %v2021_v6 = vsel %vm1885_vm1, %v2012_v51, 0.0  ;;  %v10138_v38 = vld [vmem:[%s18118_s2 + $0x808] sm:$0xff] }
 0x2d4   : > { %v15129_v52 = vmul.f32 %v18538_v34, %v14943_v46  ;;  %18540 = vst [vmem:[#allocation52_spill] sm:$0xff] %v15133_v35  ;;  %5300 = vrot.lane.b32.xlu0 %v18541_v49, %s11912_s30  ;;  %v18542_v34 = vld [vmem:[#allocation97_spill] sm:$0xff]  ;;  %v15147_v35 = vpop.f32.mrb[136].mxu1  ;;  %v3082_v49 = vsel %vm2948_vm5, %v3074_v27, 0.0  ;;  %v3023_v27 = vadd.f32 %v3022_v28, %v3021_v5  ;;  %11200 = vmatprep.mubr.msk.f32.mxu0 %vm287_vm0, %v10137_v14  ;;  %v2081_v39 = vsel %vm1885_vm1, %v2072_v31, 0.0  ;;  %v18557_v14 = vld [vmem:[#allocation98_spill] sm:$0xff] }
 0x2d5   : > { %v1952_v46 = vmul.f32 %v18542_v34, %v15087_v63  ;;  %18544 = vst [vmem:[#allocation95_spill] sm:$0xff] %v15147_v35  ;;  %5294 = vrot.lane.b32.xlu1 %v18546_v3, %s11912_s30  ;;  %v15162_v34 = vpop.f32.mrb[137].mxu1  ;;  %v18549_v29 = vld [vmem:[#allocation5_spill] sm:$0xff]  ;;  %v18550_v3 = vld [vmem:[#allocation31_spill] sm:$0xff]  ;;  %v1890_v28 = vadd.f32 %v1889_v58, %v1888_v57  ;;  %v3075_v11 = vmul.f32 %v18558_v7, %v15156_v44  ;;  %v18559_v58 = vld [vmem:[#allocation92_spill] sm:$0xff] }
 0x2d6   : > { %v15160_v1 = vpop.permute.xlu0 %5172  ;;  %18548 = vst [vmem:[#allocation116_spill] sm:$0xff] %v15162_v34  ;;  %v1953_v35 = vmul.f32 %v18549_v29, %v15129_v52  ;;  %v18551_v34 = vld [vmem:[#allocation59_spill] sm:$0xff]  ;;  %v18554_v29 = vld [vmem:[#allocation129_spill] sm:$0xff]  ;;  %v15191_v51 = vpop.f32.mrb[138].mxu1  ;;  %v3143_v57 = vadd.f32 %v3142_v19, %v3141_v50  ;;  %v1891_v10 = vsel %vm1885_vm1, %v15129_v52, 0.0 }
 0x2d7   : > { %18547 = vst [vmem:[#allocation62_spill] sm:$0xff] %v15160_v1  ;;  %v2013_v1 = vmul.f32 %v18550_v3, %v15129_v52  ;;  %v2073_v9 = vmul.f32 %v18551_v34, %v15129_v52  ;;  %v15177_v53 = vpop.permute.xlu1 %4064  ;;  %v1961_v5 = vsel %vm1885_vm1, %v1952_v46, 0.0  ;;  %v18555_v34 = vld [vmem:[#allocation67_spill] sm:$0xff]  ;;  %18556 = vst [vmem:[#allocation8_spill] sm:$0xff] %v15191_v51  ;;  %v15202_v31 = vpop.f32.mrb[139].mxu1  ;;  %11201 = vmatmul.mubr.msk.f32.gmra.mrb[116].mxu0 %vm287_vm0, %v10138_v38  ;;  %v18564_v38 = vld [vmem:[#allocation113_spill] sm:$0xff] }
 0x2d8   : > { %18552 = vst [vmem:[#allocation50_spill] sm:$0xff] %v15177_v53  ;;  %4240 = vrot.lane.b32.xlu0 %v18553_v48, %s11897_s22  ;;  %v15189_v3 = vmul.f32 %v18555_v34, %v18554_v29  ;;  %v3083_v48 = vadd.f32 %v3082_v49, %v3081_v12  ;;  %v3015_v53 = vmul.f32 %v18557_v14, %v15156_v44  ;;  %18561 = vst [vmem:[#allocation29_spill] sm:$0xff] %v15202_v31  ;;  %v18562_v12 = vld [vmem:[#allocation51_spill] sm:$0xff] }
 0x2d9   : > { %4242 = vrot.lane.b32.xlu1 %v18559_v58, %s11897_s22  ;;  %v2022_v49 = vadd.f32 %v2021_v6, %v2020_v17  ;;  %v3135_v29 = vmul.f32 %v18562_v12, %v15156_v44  ;;  %v1963_v34 = vsel %vm1885_vm1, %v1953_v35, 0.0  ;;  %v1962_v7 = vadd.f32 %v1961_v5, %v15100_v56  ;;  %v18565_v50 = vld [vmem:[#allocation19_spill] sm:$0xff]  ;;  %v18566_v35 = vld [vmem:[#allocation118_spill] sm:$0xff] }
 0x2da   : > { %v15200_v46 = vpop.permute.xlu0 %4112  ;;  %v2082_v14 = vadd.f32 %v2081_v39, %v2080_v4  ;;  %v2952_v58 = vsel %vm2948_vm5, %v15156_v44, 0.0  ;;  %v2023_v19 = vsel %vm1885_vm1, %v2013_v1, 0.0  ;;  %v2083_v17 = vsel %vm1885_vm1, %v2073_v9, 0.0  ;;  %v18569_v9 = vld [vmem:[#allocation55_spill] sm:$0xff] }
 0x2db   : > { %18560 = vst [vmem:[#allocation58_spill] sm:$0xff] %v15200_v46  ;;  %v15213_v46 = vpop.permute.xlu1 %4114  ;;  %v3016_v6 = vmul.f32 %v18565_v50, %v15189_v3  ;;  %v15221_v12 = vadd.f32 %v1891_v10, %v1890_v28  ;;  %v3076_v4 = vmul.f32 %v18566_v35, %v15189_v3  ;;  %v3024_v56 = vsel %vm2948_vm5, %v3015_v53, 0.0  ;;  %v10139_v28 = vld [vmem:[%s18118_s2 + $0x810] sm:$0xff]  ;;  %v10140_v53 = vld [vmem:[%s18118_s2 + $0x818] sm:$0xff]  ;;  %v18572_v50 = vld [vmem:[#allocation123_spill] sm:$0xff] }
 0x2dc   : > { %18563 = vst [vmem:[#allocation10_spill] sm:$0xff] %v15213_v46  ;;  %5304 = vrot.lane.b32.xlu0 %v18564_v38, %s11912_s30  ;;  %v3084_v5 = vsel %vm2948_vm5, %v3075_v11, 0.0  ;;  %v18567_v39 = vrot.slane %v14908_v0, %v18441_v40  ;;  %v18568_v38 = vld [vmem:[#allocation72_spill] sm:$0xff]  ;;  %v2953_v11 = vadd.f32 %v2952_v58, %v2951_v41  ;;  %v3144_v10 = vsel %vm2948_vm5, %v3135_v29, 0.0  ;;  %11203 = vmatprep.mubr.msk.f32.mxu0 %vm287_vm0, %v10139_v28 }
 0x2dd   : > { %5298 = vrot.lane.b32.xlu1 %v18569_v9, %s11912_s30  ;;  %v18571_v0 = vrot.slane %v14899_v47, %v18441_v40  ;;  %v18573_v41 = vld [vmem:[#allocation36_spill] sm:$0xff]  ;;  %11204 = vmatmul.mubr.msk.f32.gmra.mrb[118].mxu0 %vm287_vm0, %v10140_v53  ;;  %v3026_v28 = vsel %vm2948_vm5, %v3016_v6, 0.0  ;;  %v3085_v9 = vadd.f32 %v3084_v5, %v3083_v48  ;;  %v18577_v53 = vld [vmem:[#allocation74_spill] sm:$0xff] }
 0x2de   : > { %v15231_v46 = vmul.f32 %v18568_v38, %v18567_v39  ;;  %v15235_v1 = vpop.permute.xlu0 %5176  ;;  %v15250_v39 = vadd.f32 %v2023_v19, %v2022_v49  ;;  %v10141_v38 = vld [vmem:[%s18118_s2 + $0x820] sm:$0xff]  ;;  %v3136_v58 = vmul.f32 %v18573_v41, %v15189_v3  ;;  %v18575_v47 = vld [vmem:[#allocation96_spill] sm:$0xff]  ;;  %v15265_v49 = vadd.f32 %v2083_v17, %v2082_v14  ;;  %v10142_v41 = vld [vmem:[%s18118_s2 + $0x828] sm:$0xff] }
 0x2df   : > { %18570 = vst [vmem:[#allocation110_spill] sm:$0xff] %v15235_v1  ;;  %v15248_v35 = vmul.f32 %v18572_v50, %v18571_v0  ;;  %v15259_v29 = vpop.permute.xlu1 %5170  ;;  %v15263_v0 = vadd.f32 %v1963_v34, %v1962_v7  ;;  %v2954_v19 = vsel %vm2948_vm5, %v15189_v3, 0.0  ;;  %v3025_v50 = vadd.f32 %v3024_v56, %v3023_v27  ;;  %11206 = vmatprep.mubr.msk.f32.mxu0 %vm287_vm0, %v10141_v38  ;;  %v18576_v14 = vld [vmem:[#allocation22_spill] sm:$0xff]  ;;  %v10143_v48 = vld [vmem:[%s18118_s2 + $0x830] sm:$0xff]  ;;  %v18580_v56 = vld [vmem:[#allocation75_spill] sm:$0xff] }
 0x2e0   : > { %18574 = vst [vmem:[#allocation97_spill] sm:$0xff] %v15259_v29  ;;  %4244 = vrot.lane.b32.xlu0 %v18575_v47, %s11897_s22  ;;  %v3086_v34 = vsel %vm2948_vm5, %v3076_v4, 0.0  ;;  %v15276_v7 = vadd.f32 %v3144_v10, %v3143_v57  ;;  %v2015_v17 = vmul.f32 %v18576_v14, %v15231_v46  ;;  %v2131_v47 = vmul.f32 %v18577_v53, %v14971_v23  ;;  %v18578_v6 = vld [vmem:[#allocation94_spill] sm:$0xff]  ;;  %v18581_v57 = vld [vmem:[#allocation20_spill] sm:$0xff]  ;;  %v15301_v53 = vpop.eup %11759 }
 0x2e1   : > { %4246 = vrot.lane.b32.xlu1 %v18578_v6, %s11897_s22  ;;  %v2130_v4 = vmul.f32 %v18580_v56, %v14975_v15  ;;  %v2014_v5 = vmul.f32 %v18581_v57, %v15248_v35  ;;  %v18582_v10 = vrot.slane %v14726_v60, %v18441_v40  ;;  %v18583_v38 = vld [vmem:[#allocation124_spill] sm:$0xff]  ;;  %v15299_v14 = vadd.f32 %v2954_v19, %v2953_v11  ;;  %v18585_v15 = vld [vmem:[#allocation27_spill] sm:$0xff]  ;;  %v18587_v60 = vld [vmem:[#allocation121_spill] sm:$0xff] }
 0x2e2   : > { %v15284_v27 = vpop.permute.xlu0 %4116  ;;  %v15304_v6 = vsel %vm2948_vm5, %v3136_v58, 0.0  ;;  %v2075_v56 = vmul.f32 %v18585_v15, %v15231_v46  ;;  %v18586_v57 = vrot.slane %v14770_v30, %v18441_v40  ;;  %v18589_v11 = vld [vmem:[#allocation64_spill] sm:$0xff]  ;;  %11207 = vmatmul.mubr.msk.f32.gmra.mrb[120].mxu0 %vm287_vm0, %v10142_v41  ;;  %v18590_v58 = vld [vmem:[#allocation101_spill] sm:$0xff]  ;;  %v15325_v15 = vadd.f32 %v3026_v28, %v3025_v50  ;;  %v10145_v50 = vld [vmem:[%s18118_s2 + $0x840] sm:$0xff] }
 0x2e3   : > { %18579 = vst [vmem:[#allocation119_spill] sm:$0xff] %v15284_v27  ;;  %v15297_v23 = vmul.f32 %v18583_v38, %v18582_v10  ;;  %v18584_v27 = vld [vmem:[#allocation100_spill] sm:$0xff]  ;;  %v15316_v10 = vpop.permute.xlu1 %4118  ;;  %v1954_v19 = vmul.f32 %v18590_v58, %v15248_v35  ;;  %v3087_v38 = vadd.f32 %v3086_v34, %v3085_v9  ;;  %11209 = vmatprep.mubr.msk.f32.mxu0 %vm287_vm0, %v10143_v48  ;;  %v10144_v30 = vld [vmem:[%s18118_s2 + $0x838] sm:$0xff]  ;;  %v1893_v41 = vsel %vm1885_vm1, %v15248_v35, 0.0  ;;  %v18592_v58 = vld [vmem:[#allocation18_spill] sm:$0xff] }
 0x2e4   : > { %v1955_v1 = vmul.f32 %v18584_v27, %v15231_v46  ;;  %v15314_v29 = vmul.f32 %v18587_v60, %v18586_v57  ;;  %18588 = vst [vmem:[#allocation34_spill] sm:$0xff] %v15316_v10  ;;  %6172 = vrot.lane.b32.xlu0 %v18589_v11, %s11904_s27  ;;  %v1895_v27 = vsel %vm1885_vm1, %v15231_v46, 0.0  ;;  %v2139_v57 = vsel %vm1885_vm1, %v2131_v47, 0.0  ;;  %v18591_v60 = vld [vmem:[#allocation4_spill] sm:$0xff]  ;;  %v18595_v10 = vld [vmem:[#allocation13_spill] sm:$0xff] }
 0x2e5   : > { %v3193_v11 = vmul.f32 %v18591_v60, %v15031_v13  ;;  %5302 = vrot.lane.b32.xlu1 %v18592_v58, %s11912_s30  ;;  %v2027_v28 = vsel %vm1885_vm1, %v2015_v17, 0.0  ;;  %v2138_v34 = vsel %vm1885_vm1, %v2130_v4, 0.0  ;;  %v18594_v47 = vld [vmem:[#allocation24_spill] sm:$0xff]  ;;  %v15349_v40 = vmul.f32 %v18595_v10, %v14995_v8  ;;  %v18597_v17 = vld [vmem:[#allocation122_spill] sm:$0xff]  ;;  %v18599_v4 = vld [vmem:[#allocation73_spill] sm:$0xff] }
 0x2e6   : > { %v15338_v9 = vpop.permute.xlu0 %5180  ;;  %v3077_v48 = vmul.f32 %v18594_v47, %v15297_v23  ;;  %v2025_v13 = vsel %vm1885_vm1, %v2014_v5, 0.0  ;;  %v18596_v60 = vld [vmem:[#allocation104_spill] sm:$0xff]  ;;  %v1967_v47 = vsel %vm1885_vm1, %v1955_v1, 0.0  ;;  %v15364_v51 = vsel %vm1885_vm1, %v2075_v56, 0.0  ;;  %11210 = vmatmul.mubr.msk.f32.gmra.mrb[122].mxu0 %vm287_vm0, %v10144_v30  ;;  %v18600_v8 = vld [vmem:[#allocation9_spill] sm:$0xff]  ;;  %v10146_v1 = vld [vmem:[%s18118_s2 + $0x848] sm:$0xff] }
 0x2e7   : > { %18593 = vst [vmem:[#allocation107_spill] sm:$0xff] %v15338_v9  ;;  %v15354_v58 = vmul.f32 %v18596_v60, %v15314_v29  ;;  %v3194_v9 = vmul.f32 %v18597_v17, %v15025_v32  ;;  %v15358_v31 = vpop.permute.xlu1 %5174  ;;  %v3078_v5 = vmul.f32 %v18600_v8, %v15314_v29  ;;  %v1894_v10 = vadd.f32 %v1893_v41, %v15221_v12 }
 0x2e8   : > { %18598 = vst [vmem:[#allocation5_spill] sm:$0xff] %v15358_v31  ;;  %6176 = vrot.lane.b32.xlu0 %v18599_v4, %s11904_s27  ;;  %v2958_v32 = vsel %vm2948_vm5, %v15314_v29, 0.0  ;;  %v1965_v60 = vsel %vm1885_vm1, %v1954_v19, 0.0  ;;  %11212 = vmatprep.mubr.msk.f32.mxu0 %vm287_vm0, %v10145_v50  ;;  %v2140_v56 = vadd.f32 %v2139_v57, %v2138_v34  ;;  %v3201_v17 = vsel %vm2948_vm5, %v3193_v11, 0.0  ;;  %v18601_v4 = vld [vmem:[#allocation66_spill] sm:$0xff]  ;;  %v10147_v19 = vld [vmem:[%s18118_s2 + $0x850] sm:$0xff] }
 0x2e9   : > { %v2956_v30 = vsel %vm2948_vm5, %v15297_v23, 0.0  ;;  %6174 = vrot.lane.b32.xlu1 %v18601_v4, %s11904_s27  ;;  %v2026_v41 = vadd.f32 %v2025_v13, %v15250_v39  ;;  %v18603_v50 = vld [vmem:[#allocation128_spill] sm:$0xff]  ;;  %v15392_v57 = vmul.f32 %v14781_v37, %v14855_v2  ;;  %v18604_v11 = vld [vmem:[#allocation35_spill] sm:$0xff]  ;;  %v3088_v4 = vsel %vm2948_vm5, %v3077_v48, 0.0  ;;  %v18606_v31 = vld [vmem:[#allocation57_spill] sm:$0xff] }
 0x2ea   : > { %v15382_v12 = vpop.permute.xlu0 %4120  ;;  %v2132_v8 = vmul.f32 %v18603_v50, %v15087_v63  ;;  %v2016_v34 = vmul.f32 %v18604_v11, %v15349_v40  ;;  %v18605_v39 = vld [vmem:[#allocation32_spill] sm:$0xff]  ;;  %v15402_v20 = vmul.f32 %v18606_v31, %v14983_v42  ;;  %v18607_v63 = vld [vmem:[#allocation3_spill] sm:$0xff]  ;;  %v1966_v37 = vadd.f32 %v1965_v60, %v15263_v0  ;;  %11213 = vmatmul.mubr.msk.f32.gmra.mrb[124].mxu0 %vm287_vm0, %v10146_v1  ;;  %v18608_v48 = vld [vmem:[#allocation105_spill] sm:$0xff] }
 0x2eb   : > { %18602 = vst [vmem:[#allocation31_spill] sm:$0xff] %v15382_v12  ;;  %v3202_v12 = vsel %vm2948_vm5, %v3194_v9, 0.0  ;;  %v2074_v13 = vmul.f32 %v18605_v39, %v15248_v35  ;;  %v15404_v26 = vpop.permute.xlu1 %4122  ;;  %v15412_v9 = vmul.f32 %v18608_v48, %v15297_v23  ;;  %v18609_v50 = vld [vmem:[#allocation54_spill] sm:$0xff]  ;;  %v1896_v42 = vadd.f32 %v1895_v27, %v1894_v10  ;;  %11215 = vmatprep.mubr.msk.f32.mxu0 %vm287_vm0, %v10147_v19  ;;  %v10148_v31 = vld [vmem:[%s18118_s2 + $0x858] sm:$0xff] }
 0x2ec   : > { %6180 = vrot.lane.b32.xlu0 %v18607_v63, %s11904_s27  ;;  %v3203_v2 = vadd.f32 %v3202_v12, %v3201_v17  ;;  %v15416_v11 = vmul.f32 %v18609_v50, %v15297_v23  ;;  %v18610_v0 = vld [vmem:[#allocation78_spill] sm:$0xff]  ;;  %v18611_v1 = vld [vmem:[#allocation89_spill] sm:$0xff]  ;;  %v2028_v12 = vadd.f32 %v2027_v28, %v2026_v41  ;;  %v2957_v39 = vadd.f32 %v2956_v30, %v15299_v14  ;;  %v18614_v50 = vld [vmem:[#allocation56_spill] sm:$0xff] }
 0x2ed   : > { %v2133_v60 = vmul.f32 %v18610_v0, %v15129_v52  ;;  %6178 = vrot.lane.b32.xlu1 %v18611_v1, %s11904_s27  ;;  %v3089_v63 = vadd.f32 %v3088_v4, %v3087_v38  ;;  %v10149_v27 = vld [vmem:[%s18118_s2 + $0x860] sm:$0xff]  ;;  %v2141_v10 = vsel %vm1885_vm1, %v2132_v8, 0.0  ;;  %v2029_v52 = vsel %vm1885_vm1, %v2016_v34, 0.0  ;;  %v18615_v1 = vld [vmem:[#allocation80_spill] sm:$0xff]  ;;  %v18617_v38 = vld [vmem:[#allocation77_spill] sm:$0xff] }
 0x2ee   : > { %v15426_v17 = vpop.permute.xlu0 %5184  ;;  %v18613_v19 = vld [vmem:[#allocation14_spill] sm:$0xff]  ;;  %v3079_v0 = vmul.f32 %v18614_v50, %v15392_v57  ;;  %v15440_v28 = vmul.f32 %v18615_v1, %v14866_v21  ;;  %v18618_v30 = vld [vmem:[#allocation33_spill] sm:$0xff]  ;;  %v3090_v8 = vsel %vm2948_vm5, %v3078_v5, 0.0  ;;  %11216 = vmatmul.mubr.msk.f32.gmra.mrb[126].mxu0 %vm287_vm0, %v10148_v31  ;;  %v18619_v34 = vld [vmem:[#allocation60_spill] sm:$0xff]  ;;  %v1897_v21 = vsel %vm1885_vm1, %v15349_v40, 0.0 }
 0x2ef   : > { %18612 = vst [vmem:[#allocation59_spill] sm:$0xff] %v15426_v17  ;;  %v3195_v48 = vmul.f32 %v18613_v19, %v15156_v44  ;;  %v15442_v14 = vpop.permute.xlu1 %5178  ;;  %v2017_v41 = vmul.f32 %v18618_v30, %v15402_v20  ;;  %v15449_v44 = vadd.f32 %v1967_v47, %v1966_v37  ;;  %v2134_v4 = vmul.f32 %v18619_v34, %v15248_v35  ;;  %v10150_v47 = vld [vmem:[%s18118_s2 + $0x868] sm:$0xff]  ;;  %v18620_v31 = vld [vmem:[#allocation120_spill] sm:$0xff] }
 0x2f0   : > { %18616 = vst [vmem:[#allocation93_spill] sm:$0xff] %v15442_v14  ;;  %6184 = vrot.lane.b32.xlu0 %v18617_v38, %s11904_s27  ;;  %v1899_v19 = vsel %vm1885_vm1, %v15402_v20, 0.0  ;;  %v2085_v50 = vsel %vm1885_vm1, %v2074_v13, 0.0  ;;  %11218 = vmatprep.mubr.msk.f32.mxu0 %vm287_vm0, %v10149_v27  ;;  %v2143_v5 = vsel %vm1885_vm1, %v2133_v60, 0.0  ;;  %v2142_v37 = vadd.f32 %v2141_v10, %v2140_v56  ;;  %v10151_v13 = vld [vmem:[%s18118_s2 + $0x870] sm:$0xff]  ;;  %v18622_v27 = vld [vmem:[#allocation125_spill] sm:$0xff] }
 0x2f1   : > { %6182 = vrot.lane.b32.xlu1 %v18620_v31, %s11904_s27  ;;  %v2030_v1 = vadd.f32 %v2029_v52, %v2028_v12  ;;  %v2959_v38 = vadd.f32 %v2958_v32, %v2957_v39  ;;  %v3196_v30 = vmul.f32 %v18622_v27, %v15189_v3  ;;  %v3204_v34 = vsel %vm2948_vm5, %v3195_v48, 0.0  ;;  %v18624_v10 = vld [vmem:[#allocation126_spill] sm:$0xff]  ;;  %v18625_v12 = vld [vmem:[#allocation48_spill] sm:$0xff]  ;;  %v18626_v52 = vld [vmem:[#allocation109_spill] sm:$0xff] }
 0x2f2   : > { %v15466_v35 = vpop.permute.xlu0 %4124  ;;  %v3091_v17 = vadd.f32 %v3090_v8, %v3089_v63  ;;  %v3092_v60 = vsel %vm2948_vm5, %v3079_v0, 0.0  ;;  %v1898_v31 = vadd.f32 %v1897_v21, %v1896_v42  ;;  %v2031_v32 = vsel %vm1885_vm1, %v2017_v41, 0.0  ;;  %11219 = vmatmul.mubr.msk.f32.gmra.mrb[128].mxu0 %vm287_vm0, %v10150_v47  ;;  %v10152_v0 = vld [vmem:[%s18118_s2 + $0x878] sm:$0xff]  ;;  %v18627_v21 = vld [vmem:[#allocation11_spill] sm:$0xff] }
 0x2f3   : > { %18621 = vst [vmem:[#allocation129_spill] sm:$0xff] %v15466_v35  ;;  %v15475_v56 = vpop.permute.xlu1 %4126  ;;  %v3080_v39 = vmul.f32 %v18625_v12, %v15440_v28  ;;  %v1956_v35 = vmul.f32 %v18626_v52, %v15349_v40  ;;  %v2145_v3 = vsel %vm1885_vm1, %v2134_v4, 0.0  ;;  %v2135_v63 = vmul.f32 %v14804_v18, %v15231_v46  ;;  %11221 = vmatprep.mubr.msk.f32.mxu0 %vm287_vm0, %v10151_v13  ;;  %v18629_v13 = vld [vmem:[#allocation108_spill] sm:$0xff] }
 0x2f4   : > { %18623 = vst [vmem:[#allocation67_spill] sm:$0xff] %v15475_v56  ;;  %6234 = vrot.lane.b32.xlu0 %v18624_v10, %s11904_s27  ;;  %v3197_v48 = vmul.f32 %v14791_v62, %v15297_v23  ;;  %v2960_v42 = vsel %vm2948_vm5, %v15392_v57, 0.0  ;;  %v3205_v41 = vadd.f32 %v3204_v34, %v3203_v2  ;;  %v2144_v8 = vadd.f32 %v2143_v5, %v2142_v37  ;;  %v18628_v23 = vld [vmem:[#allocation71_spill] sm:$0xff]  ;;  %v18630_v10 = vld [vmem:[#allocation65_spill] sm:$0xff] }
 0x2f5   : > { %6186 = vrot.lane.b32.xlu1 %v18627_v21, %s11904_s27  ;;  %v2032_v18 = vadd.f32 %v2031_v32, %v2030_v1  ;;  %v3093_v46 = vadd.f32 %v3092_v60, %v3091_v17  ;;  %v3206_v62 = vsel %vm2948_vm5, %v3196_v30, 0.0  ;;  %v2136_v47 = vmul.f32 %v18628_v23, %v15349_v40  ;;  %v18632_v60 = vld [vmem:[#allocation99_spill] sm:$0xff]  ;;  %v18636_v23 = vld [vmem:[#allocation112_spill] sm:$0xff] }
 0x2f6   : > { %v15498_v4 = vpop.permute.xlu0 %4174  ;;  %v1957_v27 = vmul.f32 %v18629_v13, %v15402_v20  ;;  %v2076_v12 = vmul.f32 %v18630_v10, %v15349_v40  ;;  %v2146_v2 = vadd.f32 %v2145_v3, %v2144_v8  ;;  %v1900_v37 = vadd.f32 %v1899_v19, %v1898_v31  ;;  %11222 = vmatmul.mubr.msk.f32.gmra.mrb[130].mxu0 %vm287_vm0, %v10152_v0  ;;  %v18720_v56 = vld [vmem:[#allocation43_spill] sm:$0xff] }
 0x2f7   : > { %v15507_v5 = vpop.permute.xlu1 %5182  ;;  %v2961_v34 = vadd.f32 %v2960_v42, %v2959_v38  ;;  %v3094_v17 = vsel %vm2948_vm5, %v3080_v39, 0.0  ;;  %v2147_v1 = vsel %vm1885_vm1, %v2135_v63, 0.0  ;;  %v3208_v30 = vsel %vm2948_vm5, %v3197_v48, 0.0  ;;  %v18633_v63 = vld [vmem:[#allocation130_spill] sm:$0xff]  ;;  %v18634_v42 = vld [vmem:[#allocation16_spill] sm:$0xff] }
 0x2f8   : > { %18631 = vst [vmem:[#allocation98_spill] sm:$0xff] %v15507_v5  ;;  %2034 = vrot.lane.b32.xlu0 %v2032_v18, %s11891_s25  ;;  %v3198_v32 = vmul.f32 %v18632_v60, %v15314_v29  ;;  %v1969_v40 = vsel %vm1885_vm1, %v1956_v35, 0.0  ;;  %v3207_v52 = vadd.f32 %v3206_v62, %v3205_v41  ;;  %v3095_v31 = vadd.f32 %v3094_v17, %v3093_v46 }
 0x2f9   : > { %1902 = vrot.lane.b32.xlu1 %v1900_v37, %s11891_s25  ;;  %v2086_v38 = vadd.f32 %v2085_v50, %v15265_v49  ;;  %v3028_v39 = vsel %vm2948_vm5, %v15412_v9, 0.0  ;;  %v2149_v3 = vsel %vm1885_vm1, %v2136_v47, 0.0  ;;  %v2137_v48 = vmul.f32 %v18633_v63, %v15402_v20  ;;  %v18635_v50 = vld [vmem:[#allocation38_spill] sm:$0xff] }
 0x2fa   : > { %v15518_v19 = vpop.permute.xlu0 %5230  ;;  %v3199_v0 = vmul.f32 %v18634_v42, %v15392_v57  ;;  %v2962_v35 = vsel %vm2948_vm5, %v15440_v28, 0.0  ;;  %v2148_v41 = vadd.f32 %v2147_v1, %v2146_v2  ;;  %v3209_v8 = vadd.f32 %v3208_v30, %v3207_v52 }
 0x2fb   : > { %v15530_v21 = vpop.permute.xlu1 %5232  ;;  %v2963_v18 = vadd.f32 %v2962_v35, %v2961_v34  ;;  %v1970_v49 = vadd.f32 %v1969_v40, %v15449_v44  ;;  %v3210_v9 = vsel %vm2948_vm5, %v3198_v32, 0.0  ;;  %v2077_v46 = vmul.f32 %v18635_v50, %v15402_v20  ;;  %v18638_v32 = vld [vmem:[#allocation81_spill] sm:$0xff] }
 0x2fc   : > { %3097 = vrot.lane.b32.xlu0 %v3095_v31, %s11896_s6  ;;  %v2089_v62 = vsel %vm1885_vm1, %v2076_v12, 0.0  ;;  %v3019_v47 = vmul.f32 %v18636_v23, %v15392_v57  ;;  %v2150_v13 = vadd.f32 %v2149_v3, %v2148_v41  ;;  %v1971_v10 = vsel %vm1885_vm1, %v1957_v27, 0.0  ;;  %v18637_v12 = vld [vmem:[#allocation115_spill] sm:$0xff]  ;;  %v18639_v40 = vld [vmem:[#allocation53_spill] sm:$0xff] }
 0x2fd   : > { %2965 = vrot.lane.b32.xlu1 %v2963_v18, %s11896_s6  ;;  %v2088_v37 = vadd.f32 %v15364_v51, %v2086_v38  ;;  %v3029_v44 = vadd.f32 %v3028_v39, %v15325_v15  ;;  %v2151_v34 = vsel %vm1885_vm1, %v2137_v48, 0.0  ;;  %v3212_v20 = vsel %vm2948_vm5, %v3199_v0, 0.0 }
 0x2fe   : > { %v15542_v2 = vpop.permute.xlu0 %4178  ;;  %v3200_v17 = vmul.f32 %v18637_v12, %v15440_v28  ;;  %v3148_v1 = vsel %vm2948_vm5, %v15416_v11, 0.0  ;;  %v3211_v30 = vadd.f32 %v3210_v9, %v3209_v8  ;;  %v1972_v27 = vadd.f32 %v1971_v10, %v1970_v49  ;;  %v18640_v11 = vld [vmem:[#allocation69_spill] sm:$0xff] }
 0x2ff   : > { %v15552_v60 = vpop.permute.xlu1 %4172  ;;  %v2090_v51 = vadd.f32 %v2089_v62, %v2088_v37  ;;  %v3147_v15 = vadd.f32 %v15304_v6, %v15276_v7  ;;  %v3138_v52 = vmul.f32 %v18639_v40, %v15314_v29  ;;  %v3030_v31 = vsel %vm2948_vm5, %v15354_v58, 0.0  ;;  %v18641_v58 = vld [vmem:[#allocation111_spill] sm:$0xff] }
 0x300   : > { %6238 = vrot.lane.b32.xlu0 %v18638_v32, %s11904_s27  ;;  %v3032_v38 = vsel %vm2948_vm5, %v3019_v47, 0.0  ;;  %v3139_v39 = vmul.f32 %v18640_v11, %v15392_v57  ;;  %v2152_v3 = vadd.f32 %v2151_v34, %v2150_v13  ;;  %v3213_v63 = vadd.f32 %v3212_v20, %v3211_v30 }
 0x301   : > { %1974 = vrot.lane.b32.xlu1 %v1972_v27, %s11891_s25  ;;  %v3031_v42 = vadd.f32 %v3030_v31, %v3029_v44  ;;  %v3149_v0 = vadd.f32 %v3148_v1, %v3147_v15  ;;  %v5937_v7 = vrot.slane %v15001_v55, 4  ;;  %v3214_v29 = vsel %vm2948_vm5, %v3200_v17, 0.0  ;;  %v18644_v17 = vld [vmem:[#allocation70_spill] sm:$0xff] }
 0x302   : > { %v15566_v48 = vpop.permute.xlu0 %5234  ;;  %v2091_v6 = vsel %vm1885_vm1, %v2077_v46, 0.0  ;;  %v3020_v35 = vmul.f32 %v18641_v58, %v15440_v28  ;;  %v5934_v41 = vrot.slane %v15019_v22, 1  ;;  %v6916_v57 = vrot.slane %v15013_v59, 1 }
 0x303   : > { %v15575_v8 = vpop.permute.xlu1 %5236  ;;  %v2092_v18 = vadd.f32 %v2091_v6, %v2090_v51  ;;  %v3033_v49 = vadd.f32 %v3032_v38, %v3031_v42  ;;  %v5946_v9 = vrot.slane %v15044_v33, 2  ;;  %v18642_v50 = vrot.slane %v15068_v25, 2 }
 0x304   : > { %2154 = vrot.lane.b32.xlu0 %v2152_v3, %s11891_s25  ;;  %v3150_v46 = vsel %vm2948_vm5, %v3138_v52, 0.0  ;;  %v3152_v23 = vsel %vm2948_vm5, %v3139_v39, 0.0  ;;  %v5957_v47 = vsel %vm729_vm7, %v15123_v16, 0.0  ;;  %v6919_v13 = vrot.slane %v14992_v45, 4  ;;  %v18645_v3 = vld [vmem:[#allocation106_spill] sm:$0xff] }
 0x305   : > { %v6929_v62 = vmax.f32 %v15068_v25, %v18642_v50  ;;  %v3215_v10 = vadd.f32 %v3214_v29, %v3213_v63  ;;  %2094 = vrot.lane.b32.xlu1 %v2092_v18, %s11891_s25  ;;  %v3151_v44 = vadd.f32 %v3150_v46, %v3149_v0  ;;  %v5938_v34 = vadd.f32 %v5937_v7, %v15001_v55  ;;  %v18649_v46 = vld [vmem:[#allocation127_spill] sm:$0xff] }
 0x306   : > { %v15588_v37 = vpop.permute.xlu0 %3981  ;;  %v18643_v25 = vsub.f32 %v14788_v43, %v14953_v24  ;;  %v3034_v12 = vsel %vm2948_vm5, %v3020_v35, 0.0  ;;  %v3140_v1 = vmul.f32 %v18644_v17, %v15440_v28  ;;  %v5950_v30 = vsel %vm729_vm7, %v15098_v61, 0.0 }
 0x307   : > { %v6917_v27 = vmax.f32 %v15013_v59, %v6916_v57  ;;  %v15600_v32 = vpop.permute.xlu1 %4176  ;;  %v3035_v51 = vadd.f32 %v3034_v12, %v3033_v49  ;;  %v3153_v55 = vadd.f32 %v3152_v23, %v3151_v44  ;;  %v5947_v15 = vadd.f32 %v5946_v9, %v15044_v33  ;;  %v18648_v49 = vld [vmem:[#allocation30_spill] sm:$0xff] }
 0x308   : > { %v5927_v20 = vmul.f32 1.442695, %v18643_v25  ;;  %3217 = vrot.lane.b32.xlu0 %v3215_v10, %s11896_s6  ;;  %v5958_v43 = vrot.slane %v5957_v47, 4  ;;  %v6930_v24 = vrot.slane %v6929_v62, 1  ;;  %v5935_v40 = vadd.f32 %v5934_v41, %v15019_v22  ;;  %v18647_v41 = vld [vmem:[#allocation79_spill] sm:$0xff] }
 0x309   : > { %v6920_v52 = vmax.f32 %v14992_v45, %v6919_v13  ;;  %3037 = vrot.lane.b32.xlu1 %v3035_v51, %s11896_s6  ;;  %v5939_v31 = vrot.slane %v5938_v34, 2  ;;  %v5951_v59 = vrot.slane %v5950_v30, 4  ;;  %v3154_v38 = vsel %vm2948_vm5, %v3140_v1, 0.0 }
 0x30a   : > { %v15607_v28 = vpop.permute.xlu0 %4182  ;;  %11761 = vpow2.f32 %v5927_v20  ;;  %v6967_v11 = vsub.f32 %v14849_v36, %v6917_v27  ;;  %v3155_v33 = vadd.f32 %v3154_v38, %v3153_v55  ;;  %v5948_v22 = vrot.slane %v5947_v15, 1 }
 0x30b   : > { %v15611_v39 = vpop.permute.xlu1 %5039  ;;  %v5959_v63 = vadd.f32 %v5958_v43, %v5957_v47  ;;  %v6931_v45 = vmax.f32 %v6929_v62, %v6930_v24  ;;  %11763 = vrcp.f32 %v5935_v40  ;;  %v5971_v42 = vsel %vm729_vm7, %v15301_v53, 0.0 }
 0x30c   : > { %6242 = vrot.lane.b32.xlu0 %v18645_v3, %s11904_s27  ;;  %v6921_v0 = vrot.slane %v6920_v52, 2  ;;  %v5940_v29 = vadd.f32 %v5939_v31, %v5938_v34  ;;  %v5952_v36 = vadd.f32 %v5951_v59, %v5950_v30  ;;  %v5964_v6 = vsel %vm729_vm7, %v15113_v54, 0.0  ;;  %v18651_v34 = vld [vmem:[#allocation135_spill] sm:$0xff]  ;;  %v18657_v3 = vld [vmem:[#allocation102_spill] sm:$0xff] }
 0x30d   : > { %3157 = vrot.lane.b32.xlu1 %v3155_v33, %s11896_s6  ;;  %v6975_v58 = vmul.f32 1.442695, %v6967_v11  ;;  %v5960_v57 = vrot.slane %v5959_v63, 2  ;;  %v5972_v18 = vrot.slane %v5971_v42, 4  ;;  %v6969_v9 = vsub.f32 %v18648_v49, %v6931_v45  ;;  %v18652_v30 = vld [vmem:[#allocation83_spill] sm:$0xff]  ;;  %v18655_v11 = vld [vmem:[#allocation68_spill] sm:$0xff] }
 0x30e   : > { %v15618_v7 = vpop.permute.xlu0 %5037  ;;  %v5949_v50 = vadd.f32 %v5948_v22, %v5947_v15  ;;  %v6922_v62 = vmax.f32 %v6920_v52, %v6921_v0  ;;  %v5941_v47 = vrot.slane %v5940_v29, 1  ;;  %v5953_v13 = vrot.slane %v5952_v36, 2  ;;  %v18654_v52 = vld [vmem:[#allocation139_spill] sm:$0xff] }
 0x30f   : > { %v15622_v35 = vpop.permute.xlu1 %5240  ;;  %v5965_v10 = vrot.slane %v5964_v6, 4  ;;  %11765 = vpow2.f32 %v6975_v58  ;;  %v5961_v20 = vadd.f32 %v5960_v57, %v5959_v63  ;;  %v5973_v12 = vadd.f32 %v5972_v18, %v5971_v42  ;;  %v18658_v58 = vld [vmem:[#allocation131_spill] sm:$0xff] }
 0x310   : > { %18646 = vst [vmem:[#allocation7_spill] sm:$0xff] %v15622_v35  ;;  %6246 = vrot.lane.b32.xlu0 %v18647_v41, %s11904_s27  ;;  %v6979_v17 = vmul.f32 1.442695, %v6969_v9  ;;  %11767 = vrcp.f32 %v5949_v50  ;;  %v6923_v1 = vrot.slane %v6922_v62, 1  ;;  %v5954_v55 = vadd.f32 %v5953_v13, %v5952_v36  ;;  %v18659_v9 = vld [vmem:[#allocation86_spill] sm:$0xff] }
 0x311   : > { %6232 = vrot.lane.b32.xlu1 %v18649_v46, %s11904_s27  ;;  %v5966_v15 = vadd.f32 %v5965_v10, %v5964_v6  ;;  %v5942_v43 = vadd.f32 %v5941_v47, %v5940_v29  ;;  %v5962_v31 = vrot.slane %v5961_v20, 1  ;;  %v5974_v59 = vrot.slane %v5973_v12, 2  ;;  %v18661_v47 = vld [vmem:[#allocation145_spill] sm:$0xff] }
 0x312   : > { %v15629_v23 = vpop.permute.xlu0 %5238  ;;  %11769 = vpow2.f32 %v6979_v17  ;;  %v6924_v38 = vmax.f32 %v6922_v62, %v6923_v1  ;;  %v5955_v63 = vrot.slane %v5954_v55, 1 }
 0x313   : > { %18650 = vst [vmem:[#allocation92_spill] sm:$0xff] %v15629_v23  ;;  %v15631_v44 = vpop.permute.xlu1 %3979  ;;  %v5967_v45 = vrot.slane %v5966_v15, 2  ;;  %11771 = vrcp.f32 %v5942_v43  ;;  %v5975_v29 = vadd.f32 %v5974_v59, %v5973_v12  ;;  %v5963_v36 = vadd.f32 %v5962_v31, %v5961_v20  ;;  %v18664_v12 = vld [vmem:[#allocation140_spill] sm:$0xff]  ;;  %v18665_v59 = vld [vmem:[#allocation137_spill] sm:$0xff] }
 0x314   : > { %6292 = vrot.lane.b32.xlu0 %v18651_v34, %s11904_s27  ;;  %v15635_v25 = vpop.eup %11761  ;;  %v6968_v50 = vsub.f32 %v18659_v9, %v6924_v38  ;;  %v5956_v62 = vadd.f32 %v5955_v63, %v5954_v55  ;;  %v18662_v34 = vld [vmem:[#allocation88_spill] sm:$0xff] }
 0x315   : > { %6236 = vrot.lane.b32.xlu1 %v18652_v30, %s11904_s27  ;;  %v11764_v51 = vpop.eup %11763  ;;  %v5978_v24 = vsel %vm729_vm7, %v15635_v25, 0.0  ;;  %v5968_v18 = vadd.f32 %v5967_v45, %v5966_v15  ;;  %v5976_v13 = vrot.slane %v5975_v29, 1  ;;  %11773 = vrcp.f32 %v5963_v36  ;;  %v18667_v63 = vld [vmem:[#allocation144_spill] sm:$0xff] }
 0x316   : > { %v15639_v27 = vpop.permute.xlu0 %3985  ;;  %v5993_v22 = vmul.f32 %v11764_v51, %v18657_v3  ;;  %v5979_v42 = vrot.slane %v5978_v24, 4  ;;  %v6977_v55 = vmul.f32 1.442695, %v6968_v50  ;;  %11775 = vrcp.f32 %v5956_v62 }
 0x317   : > { %v15643_v40 = vpop.permute.xlu1 %4180  ;;  %v5969_v30 = vrot.slane %v5968_v18, 1 }
 0x318   : > { %18653 = vst [vmem:[#allocation51_spill] sm:$0xff] %v15643_v40  ;;  %6296 = vrot.lane.b32.xlu0 %v18654_v52, %s11904_s27  ;;  %v5980_v49 = vadd.f32 %v5979_v42, %v5978_v24  ;;  %v5977_v52 = vadd.f32 %v5976_v13, %v5975_v29  ;;  %11777 = vpow2.f32 %v6977_v55  ;;  %v18668_v42 = vld [vmem:[#allocation147_spill] sm:$0xff] }
 0x319   : > { %6240 = vrot.lane.b32.xlu1 %v18655_v11, %s11904_s27  ;;  %v15655_v6 = vpop.eup %11765  ;;  %v5970_v3 = vadd.f32 %v5969_v30, %v5968_v18  ;;  %v18670_v18 = vld [vmem:[#allocation6_spill] sm:$0xff]  ;;  %v18671_v13 = vld [vmem:[#allocation143_spill] sm:$0xff] }
 0x31a   : > { %v15649_v33 = vpop.permute.xlu0 %4186  ;;  %v11768_v57 = vpop.eup %11767  ;;  %v6991_v10 = vsel %vm729_vm7, %v15655_v6, 0.0  ;;  %v5981_v51 = vrot.slane %v5980_v49, 2  ;;  %11779 = vrcp.f32 %v5977_v52 }
 0x31b   : > { %18656 = vst [vmem:[#allocation113_spill] sm:$0xff] %v15649_v33  ;;  %v15652_v0 = vpop.permute.xlu1 %5043  ;;  %v5995_v17 = vmul.f32 %v11768_v57, %v18664_v12  ;;  %v6992_v24 = vrot.slane %v6991_v10, 4  ;;  %11781 = vrcp.f32 %v5970_v3 }
 0x31c   : > { %6099 = vrot.lane.b32.xlu0 %v5993_v22, %s11904_s27  ;;  %v15673_v1 = vpop.eup %11769  ;;  %v5982_v11 = vadd.f32 %v5981_v51, %v5980_v49 }
 0x31d   : > { %6244 = vrot.lane.b32.xlu1 %v18658_v58, %s11904_s27  ;;  %v11772_v43 = vpop.eup %11771  ;;  %v7005_v31 = vsel %vm729_vm7, %v15673_v1, 0.0  ;;  %v6993_v36 = vadd.f32 %v6992_v24, %v6991_v10 }
 0x31e   : > { %v15659_v41 = vpop.permute.xlu0 %5041  ;;  %v5994_v45 = vmul.f32 %v11772_v43, %v18667_v63  ;;  %v7006_v29 = vrot.slane %v7005_v31, 4  ;;  %v5983_v9 = vrot.slane %v5982_v11, 1  ;;  %v18676_v63 = vld [vmem:[#allocation15_spill] sm:$0xff] }
 0x31f   : > { %v15662_v46 = vpop.permute.xlu1 %5244  ;;  %v11774_v57 = vpop.eup %11773  ;;  %v6994_v62 = vrot.slane %v6993_v36, 2 }
 0x320   : > { %18660 = vst [vmem:[#allocation19_spill] sm:$0xff] %v15662_v46  ;;  %6300 = vrot.lane.b32.xlu0 %v18661_v47, %s11904_s27  ;;  %v11776_v50 = vpop.eup %11775  ;;  %v7007_v47 = vadd.f32 %v7006_v29, %v7005_v31  ;;  %v5984_v12 = vadd.f32 %v5983_v9, %v5982_v11 }
 0x321   : > { %6294 = vrot.lane.b32.xlu1 %v18662_v34, %s11904_s27  ;;  %v5997_v34 = vmul.f32 %v11774_v57, %v15123_v16  ;;  %v5996_v30 = vmul.f32 %v11776_v50, %v15098_v61  ;;  %v6995_v55 = vadd.f32 %v6994_v62, %v6993_v36 }
 0x322   : > { %v15670_v20 = vpop.permute.xlu0 %5242  ;;  %v15705_v51 = vpop.eup %11777  ;;  %v7008_v43 = vrot.slane %v7007_v47, 2  ;;  %11783 = vrcp.f32 %v5984_v12  ;;  %v18682_v12 = vld [vmem:[#allocation90_spill] sm:$0xff] }
 0x323   : > { %18663 = vst [vmem:[#allocation118_spill] sm:$0xff] %v15670_v20  ;;  %v15675_v15 = vpop.permute.xlu1 %3983  ;;  %v6998_v16 = vsel %vm729_vm7, %v15705_v51, 0.0  ;;  %v6996_v11 = vrot.slane %v6995_v55, 1 }
 0x324   : > { %6103 = vrot.lane.b32.xlu0 %v5995_v17, %s11904_s27  ;;  %v11780_v52 = vpop.eup %11779  ;;  %v7009_v3 = vadd.f32 %v7008_v43, %v7007_v47  ;;  %v6999_v36 = vrot.slane %v6998_v16, 4 }
 0x325   : > { %6298 = vrot.lane.b32.xlu1 %v18665_v59, %s11904_s27  ;;  %v18675_v59 = vld [vmem:[#allocation25_spill] sm:$0xff]  ;;  %v11782_v61 = vpop.eup %11781 }
 0x326   : > { %v15682_v38 = vpop.permute.xlu0 %3989  ;;  %v5998_v57 = vmul.f32 %v11782_v61, %v15113_v54  ;;  %v7010_v9 = vrot.slane %v7009_v3, 1  ;;  %v7000_v62 = vadd.f32 %v6999_v36, %v6998_v16  ;;  %v6859_v16 = vld [vmem:[%s18119_s3 + $0x20] sm:$0xff] }
 0x327   : > { %v15684_v22 = vpop.permute.xlu1 %4184 }
 0x328   : > { %18666 = vst [vmem:[#allocation72_spill] sm:$0xff] %v15684_v22  ;;  %6304 = vrot.lane.b32.xlu0 %v18668_v42, %s11904_s27  ;;  %v5999_v42 = vmul.f32 %v11780_v52, %v15301_v53  ;;  %v18685_v52 = vld [vmem:[#allocation8_spill] sm:$0xff] }
 0x329   : > { %6101 = vrot.lane.b32.xlu1 %v5994_v45, %s11904_s27 }
 0x32a   : > { %v15690_v58 = vpop.permute.xlu0 %5292 }
 0x32b   : > { %v15692_v49 = vpop.permute.xlu1 %4234 }
 0x32c   : > { %18669 = vst [vmem:[#allocation55_spill] sm:$0xff] %v15692_v49  ;;  %6354 = vrot.lane.b32.xlu0 %v18670_v18, %s11904_s27  ;;  %v6997_v18 = vadd.f32 %v6996_v11, %v6995_v55  ;;  %v11784_v53 = vpop.eup %11783 }
 0x32d   : > { %6302 = vrot.lane.b32.xlu1 %v18671_v13, %s11904_s27  ;;  %v18681_v13 = vld [vmem:[#allocation95_spill] sm:$0xff]  ;;  %v6000_v43 = vmul.f32 %v11784_v53, %v15635_v25  ;;  %v6861_v25 = vld [vmem:[%s18119_s3 + $0x30] sm:$0xff] }
 0x32e   : > { %v15698_v10 = vpop.permute.xlu0 %4232  ;;  %11785 = vrcp.f32 %v6997_v18 }
 0x32f   : > { %v15701_v17 = vpop.permute.xlu1 %5047 }
 0x330   : > { %18672 = vst [vmem:[#allocation123_spill] sm:$0xff] %v15701_v17  ;;  %6107 = vrot.lane.b32.xlu0 %v5997_v34, %s11904_s27  ;;  %v7011_v34 = vadd.f32 %v7010_v9, %v7009_v3  ;;  %v18688_v3 = vld [vmem:[#allocation26_spill] sm:$0xff] }
 0x331   : > { %6105 = vrot.lane.b32.xlu1 %v5996_v30, %s11904_s27  ;;  %v7001_v30 = vrot.slane %v7000_v62, 2 }
 0x332   : > { %v15708_v24 = vpop.permute.xlu0 %5045  ;;  %11787 = vrcp.f32 %v7011_v34 }
 0x333   : > { %18673 = vst [vmem:[#allocation36_spill] sm:$0xff] %v15708_v24  ;;  %v15712_v31 = vpop.permute.xlu1 %3987  ;;  %v7002_v61 = vadd.f32 %v7001_v30, %v7000_v62  ;;  %v18691_v62 = vld [vmem:[#allocation116_spill] sm:$0xff] }
 0x334   : > { %18674 = vst [vmem:[#allocation96_spill] sm:$0xff] %v15712_v31  ;;  %6358 = vrot.lane.b32.xlu0 %v18675_v59, %s11904_s27 }
 0x335   : > { %6306 = vrot.lane.b32.xlu1 %v18676_v63, %s11904_s27  ;;  %v7003_v36 = vrot.slane %v7002_v61, 1 }
 0x336   : > { %v15718_v45 = vpop.permute.xlu0 %3993 }
 0x337   : > { %18677 = vst [vmem:[#allocation22_spill] sm:$0xff] %v15718_v45  ;;  %v15721_v29 = vpop.permute.xlu1 %5290 }
 0x338   : > { %18678 = vst [vmem:[#allocation74_spill] sm:$0xff] %v15721_v29  ;;  %6111 = vrot.lane.b32.xlu0 %v5999_v42, %s11904_s27  ;;  %v11786_v42 = vpop.eup %11785 }
 0x339   : > { %6109 = vrot.lane.b32.xlu1 %v5998_v57, %s11904_s27  ;;  %v7055_v53 = vmul.f32 %v11786_v42, %v15655_v6 }
 0x33a   : > { %v15726_v50 = vpop.permute.xlu0 %5296 }
 0x33b   : > { %18679 = vst [vmem:[#allocation94_spill] sm:$0xff] %v15726_v50  ;;  %v15728_v47 = vpop.permute.xlu1 %4238  ;;  %v10157_v50 = vld [vmem:[%s18118_s2 + $0x8a0] sm:$0xff] }
 0x33c   : > { %18680 = vst [vmem:[#allocation75_spill] sm:$0xff] %v15728_v47  ;;  %6362 = vrot.lane.b32.xlu0 %v18681_v13, %s11904_s27  ;;  %v11788_v34 = vpop.eup %11787 }
 0x33d   : > { %6352 = vrot.lane.b32.xlu1 %v18682_v12, %s11904_s27  ;;  %v7004_v12 = vadd.f32 %v7003_v36, %v7002_v61  ;;  %v6860_v61 = vld [vmem:[%s18119_s3 + $0x28] sm:$0xff]  ;;  %v6862_v36 = vld [vmem:[%s18119_s3 + $0x38] sm:$0xff] }
 0x33e   : > { %v15734_v54 = vpop.permute.xlu0 %4236 }
 0x33f   : > { %18683 = vst [vmem:[#allocation20_spill] sm:$0xff] %v15734_v54  ;;  %v15736_v55 = vpop.permute.xlu1 %5051  ;;  %11789 = vrcp.f32 %v7004_v12 }
 0x340   : > { %18684 = vst [vmem:[#allocation124_spill] sm:$0xff] %v15736_v55  ;;  %6366 = vrot.lane.b32.xlu0 %v18685_v52, %s11904_s27  ;;  %v10158_v55 = vld [vmem:[%s18118_s2 + $0x8a8] sm:$0xff] }
 0x341   : > { %6113 = vrot.lane.b32.xlu1 %v6000_v43, %s11904_s27  ;;  %v15756_v57 = vpop.f32.mrb[104].mxu0  ;;  %v18694_v43 = vld [vmem:[#allocation29_spill] sm:$0xff] }
 0x342   : > { %v15745_v59 = vpop.permute.xlu0 %5049  ;;  %v15760_v18 = vpop.f32.mrb[105].mxu0 }
 0x343   : > { %18686 = vst [vmem:[#allocation100_spill] sm:$0xff] %v15745_v59  ;;  %v15747_v11 = vpop.permute.xlu1 %3991  ;;  %v10159_v59 = vld [vmem:[%s18118_s2 + $0x8b0] sm:$0xff] }
 0x344   : > { %18687 = vst [vmem:[#allocation27_spill] sm:$0xff] %v15747_v11  ;;  %6885 = vperm.xlu0 %11577, %v6859_v16   ;;  %v7057_v16 = vmul.f32 %v11788_v34, %v15673_v1 }
 0x345   : > { %6356 = vrot.lane.b32.xlu1 %v18688_v3, %s11904_s27 }
 0x346   : > { %v15754_v63 = vpop.permute.xlu0 %5300 }
 0x347   : > { %18689 = vst [vmem:[#allocation121_spill] sm:$0xff] %v15754_v63  ;;  %v15758_v9 = vpop.permute.xlu1 %5294 }
 0x348   : > { %18690 = vst [vmem:[#allocation64_spill] sm:$0xff] %v15758_v9  ;;  %6895 = vperm.xlu0 %11577, %v6861_v25   ;;  %v6858_v25 = vld [vmem:[%s18119_s3 + $0x18] sm:$0xff] }
 0x349   : > { %6360 = vrot.lane.b32.xlu1 %v18691_v62, %s11904_s27  ;;  %v15815_v33 = vpop.f32.mrb[106].mxu0 }
 0x34a   : > { %v15764_v13 = vpop.permute.xlu0 %4240 }
 0x34b   : > { %18692 = vst [vmem:[#allocation101_spill] sm:$0xff] %v15764_v13  ;;  %v15767_v30 = vpop.permute.xlu1 %4242 }
 0x34c   : > { %18693 = vst [vmem:[#allocation4_spill] sm:$0xff] %v15767_v30  ;;  %7161 = vrot.lane.b32.xlu0 %v7055_v53, %s11910_s13  ;;  %v11790_v53 = vpop.eup %11789 }
 0x34d   : > { %6364 = vrot.lane.b32.xlu1 %v18694_v43, %s11904_s27  ;;  %v7056_v43 = vmul.f32 %v11790_v53, %v15705_v51  ;;  %v15819_v51 = vpop.f32.mrb[107].mxu0  ;;  %s11915_s27 = smov 17  }
 0x34e   : > { %v15772_v52 = vpop.permute.xlu0 %5304 }
 0x34f   : > { %18695 = vst [vmem:[#allocation18_spill] sm:$0xff] %v15772_v52  ;;  %v15778_v3 = vpop.permute.xlu1 %5298 }
 0x350   : > { %18696 = vst [vmem:[#allocation24_spill] sm:$0xff] %v15778_v3  ;;  %7165 = vrot.lane.b32.xlu0 %v7057_v16, %s11910_s13 }
 0x351   : > { %6880 = vperm.xlu1 %11576, %v6858_v25  }
 0x352   : > { %v15781_v6 = vpop.permute.xlu0 %4244 }
 0x353   : > { %18697 = vst [vmem:[#allocation13_spill] sm:$0xff] %v15781_v6  ;;  %v15786_v42 = vpop.permute.xlu1 %4246 }
 0x354   : > { %18698 = vst [vmem:[#allocation104_spill] sm:$0xff] %v15786_v42 }
 0x355   : > { %6890 = vperm.xlu1 %11576, %v6860_v61  }
 0x356   : > { %v15788_v1 = vpop.permute.xlu0 %6172 }
 0x357   : > { %v15793_v62 = vpop.permute.xlu1 %5302 }
 0x358   : > { %18699 = vst [vmem:[#allocation122_spill] sm:$0xff] %v15793_v62 }
 0x359   : > { %6900 = vperm.xlu1 %11576, %v6862_v36  }
 0x35a   : > { %v15795_v34 = vpop.permute.xlu0 %6176 }
 0x35b   : > { %v15797_v12 = vpop.permute.xlu1 %6174 }
 0x35d   : > { %7163 = vrot.lane.b32.xlu1 %v7056_v43, %s11910_s13 }
 0x35e   : > { %v15801_v16 = vpop.permute.xlu0 %6180 }
 0x35f   : > { %v15803_v25 = vpop.permute.xlu1 %6178 }
 0x362   : > { %v15805_v61 = vpop.permute.xlu0 %6184 }
 0x363   : > { %v15807_v52 = vpop.permute.xlu1 %6182 }
 0x366   : > { %v15809_v63 = vpop.permute.xlu0 %6234 }
 0x367   : > { %18700 = vst [vmem:[#allocation73_spill] sm:$0xff] %v15809_v63  ;;  %v15811_v62 = vpop.permute.xlu1 %6186 }
 0x36a   : > { %v15813_v36 = vpop.permute.xlu0 %2034 }
 0x36b   : > { %18701 = vst [vmem:[#allocation9_spill] sm:$0xff] %v15813_v36  ;;  %v15817_v5 = vpop.permute.xlu1 %1902 }
 0x36c   : > { %18702 = vst [vmem:[#allocation66_spill] sm:$0xff] %v15817_v5 }
 0x36e   : > { %v15821_v53 = vpop.permute.xlu0 %3097 }
 0x36f   : > { %18703 = vst [vmem:[#allocation128_spill] sm:$0xff] %v15821_v53  ;;  %v15823_v43 = vpop.permute.xlu1 %2965 }
 0x370   : > { %18704 = vst [vmem:[#allocation35_spill] sm:$0xff] %v15823_v43 }
 0x372   : > { %v15825_v3 = vpop.permute.xlu0 %6238 }
 0x373   : > { %18705 = vst [vmem:[#allocation32_spill] sm:$0xff] %v15825_v3  ;;  %v15827_v22 = vpop.permute.xlu1 %1974 }
 0x374   : > { %18706 = vst [vmem:[#allocation57_spill] sm:$0xff] %v15827_v22 }
 0x376   : > { %v15829_v42 = vpop.permute.xlu0 %2154 }
 0x377   : > { %18707 = vst [vmem:[#allocation3_spill] sm:$0xff] %v15829_v42  ;;  %v15831_v63 = vpop.permute.xlu1 %2094  ;;  %v18717_v42 = vld [vmem:[#allocation40_spill] sm:$0xff] }
 0x378   : > { %18708 = vst [vmem:[#allocation105_spill] sm:$0xff] %v15831_v63  ;;  %v18718_v63 = vld [vmem:[#allocation37_spill] sm:$0xff] }
 0x379   : > { %v6009_v20 = vrot.slane %v18718_v63, %v18717_v42 }
 0x37a   : > { %v15833_v9 = vpop.permute.xlu0 %3217 }
 0x37b   : > { %18709 = vst [vmem:[#allocation54_spill] sm:$0xff] %v15833_v9  ;;  %v15835_v36 = vpop.permute.xlu1 %3037  ;;  %v6017_v13 = vcombine.high %v6009_v20, %v6009_v20 }
 0x37c   : > { %18710 = vst [vmem:[#allocation78_spill] sm:$0xff] %v15835_v36  ;;  %v10153_v36 = vld [vmem:[%s18118_s2 + $0x880] sm:$0xff] }
 0x37d   : > { %11224 = vmatprep.mubr.msk.f32.mxu0 %vm287_vm0, %v10153_v36  ;;  %v6002_v36 = vcombine.high %v18718_v63, %v18718_v63 }
 0x37e   : > { %v15837_v46 = vpop.permute.xlu0 %6242 }
 0x37f   : > { %18711 = vst [vmem:[#allocation89_spill] sm:$0xff] %v15837_v46  ;;  %v15839_v5 = vpop.permute.xlu1 %3157  ;;  %v6025_v46 = vrot.slane %v6009_v20, %v18717_v42  ;;  %v6016_v54 = vrot.slane %v6002_v36, %v18717_v42 }
 0x380   : > { %18712 = vst [vmem:[#allocation14_spill] sm:$0xff] %v15839_v5  ;;  %v10154_v5 = vld [vmem:[%s18118_s2 + $0x888] sm:$0xff] }
 0x381   : > { %11225 = vmatmul.mubr.msk.f32.gmra.mrb[132].mxu0 %vm287_vm0, %v10154_v5  ;;  %v6047_v5 = vcombine.high %v6025_v46, %v6025_v46  ;;  %v6054_v20 = vrot.slane %v6025_v46, %v18720_v56  ;;  %v10160_v46 = vld [vmem:[%s18118_s2 + $0x8b8] sm:$0xff]  ;;  %v6018_v31 = vcombine.high %v6016_v54, %v6016_v54 }
 0x382   : > { %v15841_v6 = vpop.permute.xlu0 %6246 }
 0x383   : > { %18713 = vst [vmem:[#allocation56_spill] sm:$0xff] %v15841_v6  ;;  %v15843_v53 = vpop.permute.xlu1 %6232  ;;  %v6062_v29 = vrot.slane %v6047_v5, %v18720_v56 }
 0x384   : > { %18714 = vst [vmem:[#allocation80_spill] sm:$0xff] %v15843_v53  ;;  %v10156_v53 = vld [vmem:[%s18118_s2 + $0x898] sm:$0xff] }
 0x386   : > { %v6293_v43 = vpop.permute.xlu0 %6292 }
 0x387   : > { %v15845_v3 = vpop.permute.xlu1 %6236 }
 0x388   : > { %18715 = vst [vmem:[#allocation77_spill] sm:$0xff] %v15845_v3  ;;  %v10155_v3 = vld [vmem:[%s18118_s2 + $0x890] sm:$0xff] }
 0x389   : > { %11227 = vmatprep.mubr.msk.f32.mxu0 %vm287_vm0, %v10155_v3  ;;  %v6039_v3 = vrot.slane %v6017_v13, %v18717_v42 }
 0x38a   : > { %v6297_v22 = vpop.permute.xlu0 %6296  ;;  %11228 = vmatmul.mubr.msk.f32.gmra.mrb[134].mxu0 %vm287_vm0, %v10156_v53 }
 0x38b   : > { %v15847_v30 = vpop.permute.xlu1 %6240  ;;  %11230 = vmatprep.mubr.msk.f32.mxu0 %vm287_vm0, %v10157_v50  ;;  %v6058_v13 = vrot.slane %v6039_v3, %v18720_v56  ;;  %v6049_v45 = vcombine.high %v6039_v3, %v6039_v3 }
 0x38c   : > { %18716 = vst [vmem:[#allocation33_spill] sm:$0xff] %v15847_v30 }
 0x38e   : > { %v6100_v9 = vpop.permute.xlu0 %6099  ;;  %11231 = vmatmul.mubr.msk.f32.gmra.mrb[136].mxu0 %vm287_vm0, %v10158_v55 }
 0x38f   : > { %v15858_v6 = vpop.permute.xlu1 %6244  ;;  %v15885_v53 = vmul.f32 %v6100_v9, %v6054_v20  ;;  %11233 = vmatprep.mubr.msk.f32.mxu0 %vm287_vm0, %v10159_v59  ;;  %v6032_v9 = vrot.slane %v6016_v54, %v18717_v42 }
 0x390   : > { %18719 = vst [vmem:[#allocation60_spill] sm:$0xff] %v15858_v6 }
 0x391   : > { %18721 = vst [vmem:[#allocation120_spill] sm:$0xff] %v15885_v53  ;;  %v6196_v20 = vmul.f32 %v15788_v1, %v15885_v53  ;;  %v6316_v11 = vmul.f32 %v6293_v43, %v15885_v53  ;;  %v6070_v14 = vrot.slane %v6032_v9, %v18720_v56 }
 0x392   : > { %v15862_v30 = vpop.permute.xlu0 %6300  ;;  %11234 = vmatmul.mubr.msk.f32.gmra.mrb[138].mxu0 %vm287_vm0, %v10160_v46 }
 0x393   : > { %v6295_v6 = vpop.permute.xlu1 %6294  ;;  %v6204_v1 = vsel %vm6131_vm8, %v6196_v20, 0.0  ;;  %v6324_v43 = vsel %vm6131_vm8, %v6316_v11, 0.0  ;;  %v6066_v20 = vrot.slane %v6049_v45, %v18720_v56 }
 0x396   : > { %v6104_v47 = vpop.permute.xlu0 %6103  ;;  %v15899_v36 = vpop.f32.mrb[108].mxu0 }
 0x397   : > { %v6299_v63 = vpop.permute.xlu1 %6298  ;;  %v15896_v50 = vmul.f32 %v6104_v47, %v6062_v29  ;;  %18723 = vst [vmem:[#allocation126_spill] sm:$0xff] %v15899_v36  ;;  %v15903_v5 = vpop.f32.mrb[109].mxu0 }
 0x398   : > { %18724 = vst [vmem:[#allocation48_spill] sm:$0xff] %v15903_v5 }
 0x399   : > { %18722 = vst [vmem:[#allocation125_spill] sm:$0xff] %v15896_v50  ;;  %v6198_v36 = vmul.f32 %v15795_v34, %v15896_v50  ;;  %v6318_v59 = vmul.f32 %v6297_v22, %v15896_v50 }
 0x39a   : > { %v15888_v40 = vpop.permute.xlu0 %6304 }
 0x39b   : > { %v6102_v55 = vpop.permute.xlu1 %6101  ;;  %v6327_v24 = vsel %vm6131_vm8, %v6318_v59, 0.0  ;;  %v18732_v59 = vld [vmem:[#allocation21_spill] sm:$0xff] }
 0x39c   : > { %v15909_v29 = vmul.f32 %v6102_v55, %v6058_v13 }
 0x39d   : > { %v15922_v55 = vpop.f32.mrb[110].mxu0 }
 0x39e   : > { %18725 = vst [vmem:[#allocation109_spill] sm:$0xff] %v15909_v29  ;;  %v6355_v47 = vpop.permute.xlu0 %6354  ;;  %v6197_v23 = vmul.f32 %v15797_v12, %v15909_v29  ;;  %v6317_v5 = vmul.f32 %v6295_v6, %v15909_v29  ;;  %18726 = vst [vmem:[#allocation11_spill] sm:$0xff] %v15922_v55  ;;  %v15924_v12 = vpop.f32.mrb[111].mxu0  ;;  %v6207_v6 = vsel %vm6131_vm8, %v6198_v36, 0.0 }
 0x39f   : > { %v6303_v46 = vpop.permute.xlu1 %6302  ;;  %18727 = vst [vmem:[#allocation71_spill] sm:$0xff] %v15924_v12 }
 0x3a0   : > { %v6205_v13 = vsel %vm6131_vm8, %v6197_v23, 0.0  ;;  %v6325_v3 = vsel %vm6131_vm8, %v6317_v5, 0.0 }
 0x3a1   : > { %v6206_v34 = vadd.f32 %v6205_v13, %v6204_v1  ;;  %v6326_v22 = vadd.f32 %v6325_v3, %v6324_v43  ;;  %v6048_v43 = vcombine.high %v6032_v9, %v6032_v9  ;;  %v3889_v9 = vrot.slane %v18732_v59, %v18717_v42 }
 0x3a2   : > { %v6108_v35 = vpop.permute.xlu0 %6107  ;;  %v15935_v54 = vpop.f32.mrb[112].mxu0 }
 0x3a3   : > { %v15929_v17 = vmul.f32 %v6108_v35, %v6070_v14  ;;  %v6106_v11 = vpop.permute.xlu1 %6105  ;;  %v6208_v23 = vadd.f32 %v6207_v6, %v6206_v34  ;;  %v6328_v49 = vadd.f32 %v6327_v24, %v6326_v22  ;;  %18730 = vst [vmem:[#allocation99_spill] sm:$0xff] %v15935_v54  ;;  %v15939_v36 = vpop.f32.mrb[113].mxu0  ;;  %v6046_v24 = vrot.slane %v6018_v31, %v18717_v42 }
 0x3a4   : > { %v15931_v5 = vmul.f32 %v6106_v11, %v6066_v20  ;;  %18731 = vst [vmem:[#allocation130_spill] sm:$0xff] %v15939_v36 }
 0x3a5   : > { %18728 = vst [vmem:[#allocation108_spill] sm:$0xff] %v15929_v17  ;;  %v6200_v1 = vmul.f32 %v15801_v16, %v15929_v17  ;;  %v6320_v35 = vmul.f32 %v15862_v30, %v15929_v17  ;;  %v3882_v16 = vcombine.high %v18732_v59, %v18732_v59  ;;  %v6074_v11 = vrot.slane %v6046_v24, %v18720_v56 }
 0x3a6   : > { %18729 = vst [vmem:[#allocation65_spill] sm:$0xff] %v15931_v5  ;;  %v15937_v13 = vpop.permute.xlu0 %6358  ;;  %v6199_v45 = vmul.f32 %v15803_v25, %v15931_v5  ;;  %v6319_v14 = vmul.f32 %v6299_v63, %v15931_v5  ;;  %v6078_v25 = vrot.slane %v6048_v43, %v18720_v56  ;;  %v15954_v6 = vpop.f32.mrb[114].mxu0 }
 0x3a7   : > { %v6307_v3 = vpop.permute.xlu1 %6306  ;;  %18733 = vst [vmem:[#allocation16_spill] sm:$0xff] %v15954_v6  ;;  %v6211_v63 = vsel %vm6131_vm8, %v6200_v1, 0.0  ;;  %v15957_v20 = vpop.f32.mrb[115].mxu0  ;;  %v6331_v55 = vsel %vm6131_vm8, %v6320_v35, 0.0  ;;  %v3896_v43 = vrot.slane %v3882_v16, %v18717_v42  ;;  %v6050_v1 = vcombine.high %v6046_v24, %v6046_v24 }
 0x3a8   : > { %v6209_v34 = vsel %vm6131_vm8, %v6199_v45, 0.0  ;;  %v6329_v22 = vsel %vm6131_vm8, %v6319_v14, 0.0  ;;  %18734 = vst [vmem:[#allocation38_spill] sm:$0xff] %v15957_v20  ;;  %v3897_v45 = vcombine.high %v3889_v9, %v3889_v9  ;;  %v15982_v16 = vrot.slane %v3889_v9, %v18717_v42 }
 0x3a9   : > { %v6210_v31 = vadd.f32 %v6209_v34, %v6208_v23  ;;  %v6330_v59 = vadd.f32 %v6329_v22, %v6328_v49  ;;  %v6377_v34 = vmul.f32 %v6355_v47, %v15909_v29 }
 0x3aa   : > { %v6112_v30 = vpop.permute.xlu0 %6111  ;;  %v15966_v12 = vpop.f32.mrb[116].mxu0  ;;  %v15979_v24 = vrot.slane %v3897_v45, %v18717_v42 }
 0x3ab   : > { %v15960_v54 = vmul.f32 %v6112_v30, %v6078_v25  ;;  %v6110_v36 = vpop.permute.xlu1 %6109  ;;  %v6212_v14 = vadd.f32 %v6211_v63, %v6210_v31  ;;  %18737 = vst [vmem:[#allocation81_spill] sm:$0xff] %v15966_v12  ;;  %v15968_v20 = vpop.f32.mrb[117].mxu0  ;;  %v6332_v35 = vadd.f32 %v6331_v55, %v6330_v59  ;;  %v3898_v63 = vcombine.high %v3896_v43, %v3896_v43 }
 0x3ac   : > { %v15964_v6 = vmul.f32 %v6110_v36, %v6074_v11  ;;  %18738 = vst [vmem:[#allocation53_spill] sm:$0xff] %v15968_v20  ;;  %v6082_v55 = vrot.slane %v6050_v1, %v18720_v56  ;;  %v6385_v11 = vsel %vm6131_vm8, %v6377_v34, 0.0 }
 0x3ad   : > { %18735 = vst [vmem:[#allocation112_spill] sm:$0xff] %v15960_v54  ;;  %v6202_v23 = vmul.f32 %v15805_v61, %v15960_v54  ;;  %v6322_v49 = vmul.f32 %v15888_v40, %v15960_v54  ;;  %v11881_v61 = vld [vmem:[%s11996_s10] sm:$0xff]  ;;  %v15998_v1 = vrot.slane %v3898_v63, %v18717_v42  ;;  %v3938_v63 = vrot.slane %v15979_v24, %v18720_v56 }
 0x3ae   : > { %18736 = vst [vmem:[#allocation115_spill] sm:$0xff] %v15964_v6  ;;  %v6201_v22 = vmul.f32 %v15807_v52, %v15964_v6  ;;  %v6321_v36 = vmul.f32 %v6303_v46, %v15964_v6  ;;  %v4940_v30 = vcombine.high %v11881_v61, %v11881_v61 }
 0x3af   : > { %v6353_v25 = vpop.permute.xlu1 %6352  ;;  %v6215_v52 = vsel %vm6131_vm8, %v6202_v23, 0.0  ;;  %v6335_v31 = vsel %vm6131_vm8, %v6322_v49, 0.0  ;;  %v3927_v49 = vcombine.high %v15982_v16, %v15982_v16 }
 0x3b0   : > { %v6376_v40 = vmul.f32 %v6353_v25, %v15885_v53  ;;  %v6213_v47 = vsel %vm6131_vm8, %v6201_v22, 0.0  ;;  %v6333_v46 = vsel %vm6131_vm8, %v6321_v36, 0.0  ;;  %v15993_v59 = vpop.f32.mrb[118].mxu0  ;;  %v4954_v34 = vrot.slane %v4940_v30, %v18717_v42 }
 0x3b1   : > { %18739 = vst [vmem:[#allocation69_spill] sm:$0xff] %v15993_v59  ;;  %v6214_v45 = vadd.f32 %v6213_v47, %v6212_v14  ;;  %v6334_v61 = vadd.f32 %v6333_v46, %v6332_v35  ;;  %v15995_v53 = vpop.f32.mrb[119].mxu0  ;;  %v3929_v14 = vcombine.high %v15979_v24, %v15979_v24  ;;  %v6363_v35 = vpop.permute.xlu0 %6362 }
 0x3b2   : > { %v6384_v9 = vsel %vm6131_vm8, %v6376_v40, 0.0  ;;  %18740 = vst [vmem:[#allocation111_spill] sm:$0xff] %v15995_v53 }
 0x3b3   : > { %v6386_v20 = vadd.f32 %v6385_v11, %v6384_v9  ;;  %v6114_v25 = vpop.permute.xlu1 %6113  ;;  %v6216_v22 = vadd.f32 %v6215_v52, %v6214_v45  ;;  %v6336_v36 = vadd.f32 %v6335_v31, %v6334_v61  ;;  %v16016_v52 = vrot.slane %v3896_v43, %v18717_v42 }
 0x3b4   : > { %v16000_v23 = vmul.f32 %v6114_v25, %v6082_v55  ;;  %v3930_v11 = vcombine.high %v15998_v1, %v15998_v1  ;;  %v16028_v45 = vrot.slane %v3927_v49, %v18720_v56  ;;  %v4956_v43 = vcombine.high %v4954_v34, %v4954_v34 }
 0x3b5   : > { %v16007_v40 = vpop.f32.mrb[120].mxu0  ;;  %v6367_v49 = vpop.permute.xlu0 %6366 }
 0x3b6   : > { %18741 = vst [vmem:[#allocation70_spill] sm:$0xff] %v16000_v23  ;;  %18742 = vst [vmem:[#allocation106_spill] sm:$0xff] %v16007_v40  ;;  %v6203_v47 = vmul.f32 %v15811_v62, %v16000_v23  ;;  %v16018_v30 = vpop.f32.mrb[121].mxu0  ;;  %v6323_v31 = vmul.f32 %v6307_v3, %v16000_v23  ;;  %v6379_v62 = vmul.f32 %v15937_v13, %v15931_v5 }
 0x3b7   : > { %v6357_v46 = vpop.permute.xlu1 %6356  ;;  %18743 = vst [vmem:[#allocation79_spill] sm:$0xff] %v16018_v30  ;;  %v16034_v3 = vrot.slane %v3929_v14, %v18720_v56  ;;  %v6408_v14 = vld [vmem:[%s11996_s10] sm:$0xff] }
 0x3b8   : > { %v6378_v9 = vmul.f32 %v6357_v46, %v15896_v50  ;;  %v6217_v24 = vsel %vm6131_vm8, %v6203_v47, 0.0  ;;  %v6337_v25 = vsel %vm6131_vm8, %v6323_v31, 0.0 }
 0x3b9   : > { %v16030_v61 = vadd.f32 %v6217_v24, %v6216_v22  ;;  %v16037_v30 = vpop.f32.mrb[122].mxu0  ;;  %v16039_v13 = vadd.f32 %v6337_v25, %v6336_v36  ;;  %v3928_v22 = vcombine.high %v16016_v52, %v16016_v52  ;;  %v6389_v36 = vsel %vm6131_vm8, %v6379_v62, 0.0  ;;  %v18749_v62 = vld [vmem:[#allocation82_spill] sm:$0xff] }
 0x3ba   : > { %v6387_v55 = vsel %vm6131_vm8, %v6378_v9, 0.0  ;;  %18745 = vst [vmem:[#allocation127_spill] sm:$0xff] %v16037_v30  ;;  %v16047_v24 = vpop.f32.mrb[123].mxu0  ;;  %v16051_v9 = vrot.slane %v3930_v11, %v18720_v56  ;;  %v6381_v25 = vmul.f32 %v6363_v35, %v15964_v6  ;;  %v16069_v53 = vmul.f32 %v18749_v62, %v6408_v14 }
 0x3bb   : > { %18744 = vst [vmem:[#allocation30_spill] sm:$0xff] %v16030_v61  ;;  %18746 = vst [vmem:[#allocation135_spill] sm:$0xff] %v16039_v13  ;;  %v6388_v46 = vadd.f32 %v6387_v55, %v6386_v20  ;;  %v6361_v31 = vpop.permute.xlu1 %6360  ;;  %v16057_v13 = vrot.slane %v4956_v43, %v18717_v42  ;;  %v16060_v20 = vmul.f32 %v15588_v37, %v3938_v63 }
 0x3bc   : > { %18747 = vst [vmem:[#allocation83_spill] sm:$0xff] %v16047_v24  ;;  %v6380_v47 = vmul.f32 %v6361_v31, %v15929_v17  ;;  %v16063_v55 = vrot.slane %v4954_v34, %v18717_v42  ;;  %18750 = vst [vmem:[#allocation68_spill] sm:$0xff] %v16069_v53  ;;  %v16074_v43 = vrot.slane %v3928_v22, %v18720_v56  ;;  %v6393_v63 = vsel %vm6131_vm8, %v6381_v25, 0.0  ;;  %v18753_v22 = vld [vmem:[#allocation84_spill] sm:$0xff] }
 0x3bd   : > { %v6390_v61 = vadd.f32 %v6389_v36, %v6388_v46  ;;  %v16066_v24 = vpop.f32.mrb[124].mxu0  ;;  %v4988_v35 = vcombine.high %v16057_v13, %v16057_v13  ;;  %v18752_v36 = vld [vmem:[#allocation141_spill] sm:$0xff]  ;;  %v16168_v50 = vmul.f32 %v15639_v27, %v16034_v3 }
 0x3be   : > { %v6391_v11 = vsel %vm6131_vm8, %v6380_v47, 0.0  ;;  %18748 = vst [vmem:[#allocation139_spill] sm:$0xff] %v16066_v24  ;;  %v16076_v37 = vpop.f32.mrb[125].mxu0  ;;  %v4986_v34 = vcombine.high %v16063_v55, %v16063_v55  ;;  %v6383_v47 = vmul.f32 %v6367_v49, %v16000_v23  ;;  %v16085_v62 = vmul.f32 %v15611_v39, %v18752_v36 }
 0x3bf   : > { %v6392_v46 = vadd.f32 %v6391_v11, %v6390_v61  ;;  %v6365_v31 = vpop.permute.xlu1 %6364  ;;  %18751 = vst [vmem:[#allocation102_spill] sm:$0xff] %v16076_v37  ;;  %v4077_v61 = vmul.f32 %v18753_v22, %v16060_v20  ;;  %v18754_v11 = vld [vmem:[#allocation132_spill] sm:$0xff]  ;;  %v4197_v22 = vmul.f32 %v15498_v4, %v16060_v20 }
 0x3c0   : > { %v6382_v14 = vmul.f32 %v6365_v31, %v15960_v54  ;;  %v16091_v24 = vmul.f32 %v15618_v7, %v18754_v11  ;;  %v18756_v31 = vld [vmem:[#allocation10_spill] sm:$0xff]  ;;  %v16113_v11 = vrot.slane %v4986_v34, %v18720_v56  ;;  %v18761_v34 = vld [vmem:[#allocation97_spill] sm:$0xff] }
 0x3c1   : > { %v6394_v42 = vadd.f32 %v6393_v63, %v6392_v46  ;;  %v16096_v23 = vpop.f32.mrb[126].mxu0  ;;  %v4137_v39 = vmul.f32 %v18756_v31, %v16060_v20  ;;  %v6397_v31 = vsel %vm6131_vm8, %v6383_v47, 0.0  ;;  %v4013_v46 = vsel %vm4011_vm6, %v16060_v20, 0.0 }
 0x3c2   : > { %v6395_v25 = vsel %vm6131_vm8, %v6382_v14, 0.0  ;;  %18755 = vst [vmem:[#allocation131_spill] sm:$0xff] %v16096_v23  ;;  %v16105_v7 = vpop.f32.mrb[127].mxu0  ;;  %v16110_v14 = vrot.slane %v4988_v35, %v18720_v56  ;;  %v4085_v4 = vsel %vm4011_vm6, %v4077_v61, 0.0  ;;  %v18760_v35 = vld [vmem:[#allocation87_spill] sm:$0xff]  ;;  %v5194_v23 = vmul.f32 %v18761_v34, %v16091_v24 }
 0x3c3   : > { %v6886_v49 = vpop.permute.xlu0 %6885  ;;  %v6396_v63 = vadd.f32 %v6395_v25, %v6394_v42  ;;  %18757 = vst [vmem:[#allocation86_spill] sm:$0xff] %v16105_v7  ;;  %v18758_v42 = vld [vmem:[#allocation133_spill] sm:$0xff]  ;;  %v5134_v6 = vmul.f32 %v18760_v35, %v16091_v24  ;;  %v4145_v17 = vsel %vm4011_vm6, %v4137_v39, 0.0  ;;  %v4205_v34 = vsel %vm4011_vm6, %v4197_v22, 0.0  ;;  %v18765_v39 = vld [vmem:[#allocation62_spill] sm:$0xff] }
 0x3c4   : > { %v16103_v36 = vadd.f32 %v6886_v49, %v15760_v18  ;;  %v5135_v18 = vmul.f32 %v18758_v42, %v16085_v62  ;;  %v5202_v22 = vsel %vm5069_vm4, %v5194_v23, 0.0 }
 0x3c5   : > { %v16120_v25 = vadd.f32 %v6397_v31, %v6396_v63  ;;  %v16129_v7 = vpop.f32.mrb[128].mxu0  ;;  %v5254_v63 = vmul.f32 %v15518_v19, %v16091_v24  ;;  %v18763_v31 = vrot.slane %v15982_v16, %v18720_v56  ;;  %v5142_v16 = vsel %vm5069_vm4, %v5134_v6, 0.0 }
 0x3c6   : > { %v6939_v49 = vsel %vm729_vm7, %v16103_v36, -inf  ;;  %18762 = vst [vmem:[#allocation88_spill] sm:$0xff] %v16129_v7  ;;  %v16143_v35 = vpop.f32.mrb[129].mxu0  ;;  %v5195_v7 = vmul.f32 %v18765_v39, %v16085_v62  ;;  %v5143_v37 = vsel %vm5069_vm4, %v5135_v18, 0.0  ;;  %v18767_v18 = vld [vmem:[#allocation136_spill] sm:$0xff] }
 0x3c7   : > { %18759 = vst [vmem:[#allocation145_spill] sm:$0xff] %v16120_v25  ;;  %v6940_v47 = vrot.slane %v6939_v49, 4  ;;  %v6896_v54 = vpop.permute.xlu0 %6895  ;;  %v16138_v61 = vmul.f32 %v15631_v44, %v18763_v31  ;;  %18764 = vst [vmem:[#allocation140_spill] sm:$0xff] %v16143_v35  ;;  %v5071_v25 = vsel %vm5069_vm4, %v16085_v62, 0.0  ;;  %v5255_v44 = vmul.f32 %v15530_v21, %v16085_v62  ;;  %v18768_v21 = vld [vmem:[#allocation58_spill] sm:$0xff] }
 0x3c8   : > { %v16141_v42 = vadd.f32 %v6896_v54, %v15819_v51  ;;  %v5070_v51 = vsel %vm5069_vm4, %v16091_v24, 0.0  ;;  %v5203_v29 = vsel %vm5069_vm4, %v5195_v7, 0.0 }
 0x3c9   : > { %v6941_v19 = vmax.f32 %v6939_v49, %v6940_v47  ;;  %v16159_v5 = vpop.f32.mrb[130].mxu0  ;;  %v5262_v49 = vsel %vm5069_vm4, %v5254_v63, 0.0  ;;  %v4076_v47 = vmul.f32 %v18767_v18, %v16138_v61  ;;  %v4136_v39 = vmul.f32 %v18768_v21, %v16138_v61 }
 0x3ca   : > { %v6953_v54 = vsel %vm729_vm7, %v16141_v42, -inf  ;;  %18766 = vst [vmem:[#allocation137_spill] sm:$0xff] %v16159_v5  ;;  %v16170_v30 = vpop.f32.mrb[131].mxu0  ;;  %v4012_v6 = vsel %vm4011_vm6, %v16138_v61, 0.0  ;;  %v4196_v23 = vmul.f32 %v15552_v60, %v16138_v61  ;;  %v5263_v18 = vsel %vm5069_vm4, %v5255_v44, 0.0 }
 0x3cb   : > { %v6942_v31 = vrot.slane %v6941_v19, 2  ;;  %v6954_v35 = vrot.slane %v6953_v54, 4  ;;  %18769 = vst [vmem:[#allocation144_spill] sm:$0xff] %v16170_v30  ;;  %v5072_v40 = vadd.f32 %v5071_v25, %v5070_v51  ;;  %v16178_v21 = vadd.f32 %v5143_v37, %v5142_v16  ;;  %v18771_v37 = vld [vmem:[#allocation34_spill] sm:$0xff] }
 0x3cc   : > { %v16180_v59 = vadd.f32 %v5203_v29, %v5202_v22  ;;  %v16182_v27 = vadd.f32 %v5263_v18, %v5262_v49  ;;  %v16184_v12 = vadd.f32 %v4013_v46, %v4012_v6  ;;  %v4084_v53 = vsel %vm4011_vm6, %v4076_v47, 0.0  ;;  %v18772_v46 = vld [vmem:[#allocation114_spill] sm:$0xff]  ;;  %v18774_v49 = vld [vmem:[#allocation117_spill] sm:$0xff] }
 0x3cd   : > { %v6943_v5 = vmax.f32 %v6941_v19, %v6942_v31  ;;  %v6955_v63 = vmax.f32 %v6953_v54, %v6954_v35  ;;  %v4144_v60 = vsel %vm4011_vm6, %v4136_v39, 0.0  ;;  %v18770_v35 = vld [vmem:[#allocation134_spill] sm:$0xff]  ;;  %v4204_v19 = vsel %vm4011_vm6, %v4196_v23, 0.0  ;;  %v18775_v18 = vld [vmem:[#allocation85_spill] sm:$0xff] }
 0x3ce   : > { %v4079_v7 = vmul.f32 %v18770_v35, %v16168_v50  ;;  %v4139_v25 = vmul.f32 %v18771_v37, %v16168_v50  ;;  %v4199_v54 = vmul.f32 %v15542_v2, %v16168_v50  ;;  %v16197_v16 = vmul.f32 %v15652_v0, %v18772_v46  ;;  %v18773_v22 = vld [vmem:[#allocation142_spill] sm:$0xff] }
 0x3cf   : > { %v6944_v3 = vrot.slane %v6943_v5, 1  ;;  %v6956_v30 = vrot.slane %v6955_v63, 2  ;;  %v16201_v31 = vmul.f32 %v15659_v41, %v18773_v22  ;;  %v16206_v39 = vadd.f32 %v4085_v4, %v4084_v53 }
 0x3d0   : > { %v6881_v51 = vpop.permute.xlu1 %6880  ;;  %v16208_v6 = vadd.f32 %v4145_v17, %v4144_v60  ;;  %v16211_v23 = vadd.f32 %v4205_v34, %v4204_v19  ;;  %v16215_v2 = vsel %vm4011_vm6, %v16168_v50, 0.0  ;;  %v16218_v0 = vsel %vm4011_vm6, %v4079_v7, 0.0  ;;  %v18776_v7 = vld [vmem:[#allocation138_spill] sm:$0xff] }
 0x3d1   : > { %v6945_v29 = vmax.f32 %v6943_v5, %v6944_v3  ;;  %v6957_v44 = vmax.f32 %v6955_v63, %v6956_v30  ;;  %v16204_v47 = vadd.f32 %v18774_v49, %v6881_v51  ;;  %v16223_v53 = vsel %vm4011_vm6, %v4139_v25, 0.0 }
 0x3d2   : > { %v16226_v34 = vsel %vm4011_vm6, %v4199_v54, 0.0  ;;  %v5137_v3 = vmul.f32 %v18775_v18, %v16197_v16  ;;  %v5073_v60 = vsel %vm5069_vm4, %v16201_v31, 0.0  ;;  %v5136_v19 = vmul.f32 %v18776_v7, %v16201_v31 }
 0x3d3   : > { %v6971_v5 = vsub.f32 %v16103_v36, %v6945_v29  ;;  %v6958_v30 = vrot.slane %v6957_v44, 1  ;;  %v6932_v41 = vsel %vm729_vm7, %v16204_v47, -inf  ;;  %v18777_v29 = vld [vmem:[#allocation5_spill] sm:$0xff]  ;;  %v5256_v51 = vmul.f32 %v15566_v48, %v16201_v31 }
 0x3d4   : > { %v6933_v63 = vrot.slane %v6932_v41, 4  ;;  %v6891_v36 = vpop.permute.xlu1 %6890  ;;  %v16244_v54 = vmul.f32 %v15675_v15, %v16028_v45  ;;  %v5075_v46 = vsel %vm5069_vm4, %v16197_v16, 0.0  ;;  %v5257_v48 = vmul.f32 %v15575_v8, %v16197_v16  ;;  %v10201_v45 = vld [vmem:[%s18118_s2 + $0x8c0] sm:$0xff]  ;;  %v18779_v8 = vld [vmem:[#allocation119_spill] sm:$0xff] }
 0x3d5   : > { %v6983_v17 = vmul.f32 1.442695, %v6971_v5  ;;  %v6959_v4 = vmax.f32 %v6957_v44, %v6958_v30  ;;  %v16233_v35 = vadd.f32 %v15756_v57, %v6891_v36  ;;  %v5196_v44 = vmul.f32 %v18777_v29, %v16201_v31  ;;  %11244 = vmatprep.mubr.msk.f32.mxu1 %vm287_vm0, %v10201_v45 }
 0x3d6   : > { %v6934_v25 = vmax.f32 %v6932_v41, %v6933_v63  ;;  %v5147_v30 = vsel %vm5069_vm4, %v5137_v3, 0.0  ;;  %v18778_v41 = vld [vmem:[#allocation110_spill] sm:$0xff]  ;;  %v5145_v63 = vsel %vm5069_vm4, %v5136_v19, 0.0  ;;  %v5265_v7 = vsel %vm5069_vm4, %v5256_v51, 0.0  ;;  %v10202_v51 = vld [vmem:[%s18118_s2 + $0x8c8] sm:$0xff] }
 0x3d7   : > { %11791 = vpow2.f32 %v6983_v17  ;;  %v6973_v37 = vsub.f32 %v16141_v42, %v6959_v4  ;;  %v6946_v57 = vsel %vm729_vm7, %v16233_v35, -inf  ;;  %v5197_v17 = vmul.f32 %v18778_v41, %v16197_v16  ;;  %11245 = vmatmul.mubr.msk.f32.vlgmr.msra.gmra.mrb[140].mxu1 %vm287_vm0, %v10202_v51 }
 0x3d8   : > { %v6935_v49 = vrot.slane %v6934_v25, 2  ;;  %v6947_v42 = vrot.slane %v6946_v57, 4  ;;  %v6901_v5 = vpop.permute.xlu1 %6900  ;;  %v5074_v4 = vadd.f32 %v5073_v60, %v5072_v40  ;;  %v5205_v3 = vsel %vm5069_vm4, %v5196_v44, 0.0 }
 0x3d9   : > { %v6987_v22 = vmul.f32 1.442695, %v6973_v37  ;;  %v16256_v15 = vadd.f32 %v15815_v33, %v6901_v5  ;;  %v4138_v37 = vmul.f32 %v18779_v8, %v16244_v54  ;;  %v5207_v60 = vsel %vm5069_vm4, %v5197_v17, 0.0 }
 0x3da   : > { %v6936_v36 = vmax.f32 %v6934_v25, %v6935_v49  ;;  %v6948_v18 = vmax.f32 %v6946_v57, %v6947_v42  ;;  %v5267_v19 = vsel %vm5069_vm4, %v5257_v48, 0.0  ;;  %v18780_v25 = vld [vmem:[#allocation146_spill] sm:$0xff]  ;;  %v4198_v44 = vmul.f32 %v15600_v32, %v16244_v54 }
 0x3db   : > { %v6960_v33 = vsel %vm729_vm7, %v16256_v15, -inf  ;;  %11793 = vpow2.f32 %v6987_v22  ;;  %v4078_v57 = vmul.f32 %v18780_v25, %v16244_v54  ;;  %v10203_v22 = vld [vmem:[%s18118_s2 + $0x8d0] sm:$0xff]  ;;  %v5146_v49 = vadd.f32 %v5145_v63, %v16178_v21  ;;  %v10204_v21 = vld [vmem:[%s18118_s2 + $0x8d8] sm:$0xff] }
 0x3dc   : > { %v6937_v29 = vrot.slane %v6936_v36, 1  ;;  %v6949_v5 = vrot.slane %v6948_v18, 2  ;;  %v6961_v40 = vrot.slane %v6960_v33, 4  ;;  %v5206_v48 = vadd.f32 %v5205_v3, %v16180_v59  ;;  %11247 = vmatprep.mubr.msk.f32.mxu1 %vm287_vm0, %v10203_v22 }
 0x3dd   : > { %v5266_v45 = vadd.f32 %v5265_v7, %v16182_v27  ;;  %v4015_v32 = vsel %vm4011_vm6, %v16244_v54, 0.0  ;;  %v16287_v8 = vadd.f32 %v5075_v46, %v5074_v4  ;;  %v4087_v27 = vsel %vm4011_vm6, %v4078_v57, 0.0  ;;  %11248 = vmatmul.mubr.msk.f32.gmra.mrb[142].mxu1 %vm287_vm0, %v10204_v21 }
 0x3de   : > { %v6938_v42 = vmax.f32 %v6936_v36, %v6937_v29  ;;  %v6950_v41 = vmax.f32 %v6948_v18, %v6949_v5  ;;  %v6962_v17 = vmax.f32 %v6960_v33, %v6961_v40  ;;  %v4147_v36 = vsel %vm4011_vm6, %v4138_v37, 0.0 }
 0x3df   : > { %v4207_v7 = vsel %vm4011_vm6, %v4198_v44, 0.0  ;;  %v18781_v46 = vrot.slane %v15998_v1, %v18720_v56  ;;  %v4148_v25 = vadd.f32 %v4147_v36, %v16208_v6  ;;  %v16310_v57 = vadd.f32 %v5147_v30, %v5146_v49 }
 0x3e0   : > { %v6970_v18 = vsub.f32 %v16204_v47, %v6938_v42  ;;  %v6951_v59 = vrot.slane %v6950_v41, 1  ;;  %v6963_v3 = vrot.slane %v6962_v17, 2  ;;  %v4016_v47 = vadd.f32 %v4015_v32, %v16184_v12 }
 0x3e1   : > { %v16293_v63 = vpop.eup %11791  ;;  %v16303_v4 = vmul.f32 %v15682_v38, %v18781_v46  ;;  %v16312_v44 = vadd.f32 %v5267_v19, %v5266_v45  ;;  %v4088_v22 = vadd.f32 %v4087_v27, %v16206_v39  ;;  %v4208_v42 = vadd.f32 %v4207_v7, %v16211_v23  ;;  %v18789_v7 = vld [vmem:[#allocation96_spill] sm:$0xff] }
 0x3e2   : > { %v7019_v33 = vsel %vm729_vm7, %v16293_v63, 0.0  ;;  %v6981_v5 = vmul.f32 1.442695, %v6970_v18  ;;  %v6952_v37 = vmax.f32 %v6950_v41, %v6951_v59  ;;  %v6964_v40 = vmax.f32 %v6962_v17, %v6963_v3  ;;  %v18782_v41 = vld [vmem:[#allocation103_spill] sm:$0xff] }
 0x3e3   : > { %v7020_v29 = vrot.slane %v7019_v33, 4  ;;  %v4081_v17 = vmul.f32 %v18782_v41, %v16303_v4  ;;  %v16319_v21 = vadd.f32 %v5207_v60, %v5206_v48  ;;  %v4141_v6 = vmul.f32 %v15404_v26, %v16303_v4  ;;  %v18793_v41 = vld [vmem:[#allocation93_spill] sm:$0xff] }
 0x3e4   : > { %11795 = vpow2.f32 %v6981_v5  ;;  %v6972_v38 = vsub.f32 %v16233_v35, %v6952_v37  ;;  %v6965_v51 = vrot.slane %v6964_v40, 1  ;;  %v4201_v35 = vmul.f32 %v15607_v28, %v16303_v4  ;;  %v18783_v28 = vld [vmem:[#allocation55_spill] sm:$0xff] }
 0x3e5   : > { %v7021_v1 = vadd.f32 %v7020_v29, %v7019_v33  ;;  %v16321_v12 = vpop.eup %11793  ;;  %v5315_v39 = vmul.f32 %v15690_v58, %v16085_v62  ;;  %v4256_v23 = vmul.f32 %v15698_v10, %v16138_v61  ;;  %v4018_v60 = vadd.f32 %v16215_v2, %v4016_v47  ;;  %v18785_v62 = vld [vmem:[#allocation123_spill] sm:$0xff] }
 0x3e6   : > { %v6985_v19 = vmul.f32 1.442695, %v6972_v38  ;;  %v6966_v49 = vmax.f32 %v6964_v40, %v6965_v51  ;;  %v16334_v32 = vadd.f32 %v16223_v53, %v4148_v25  ;;  %v16338_v26 = vsel %vm4011_vm6, %v16303_v4, 0.0  ;;  %v18790_v40 = vld [vmem:[#allocation91_spill] sm:$0xff]  ;;  %v18791_v51 = vld [vmem:[#allocation49_spill] sm:$0xff] }
 0x3e7   : > { %v7022_v30 = vrot.slane %v7021_v1, 2  ;;  %v4257_v36 = vmul.f32 %v18783_v28, %v16060_v20  ;;  %v18784_v58 = vrot.slane %v16057_v13, %v18720_v56  ;;  %v7033_v61 = vsel %vm729_vm7, %v16321_v12, 0.0  ;;  %v18795_v28 = vld [vmem:[#allocation92_spill] sm:$0xff] }
 0x3e8   : > { %v6974_v45 = vsub.f32 %v16256_v15, %v6966_v49  ;;  %v16351_v2 = vadd.f32 %v16218_v0, %v4088_v22  ;;  %v18786_v53 = vrot.slane %v16063_v55, %v18720_v56  ;;  %v18787_v15 = vld [vmem:[#allocation36_spill] sm:$0xff]  ;;  %11797 = vpow2.f32 %v6985_v19  ;;  %v18792_v22 = vld [vmem:[#allocation7_spill] sm:$0xff] }
 0x3e9   : > { %v7023_v48 = vadd.f32 %v7022_v30, %v7021_v1  ;;  %v16346_v10 = vmul.f32 %v18785_v62, %v18784_v58  ;;  %v16360_v13 = vsel %vm5069_vm4, %v5315_v39, 0.0  ;;  %v4264_v3 = vsel %vm4011_vm6, %v4256_v23, 0.0  ;;  %v18794_v49 = vld [vmem:[#allocation31_spill] sm:$0xff]  ;;  %v18796_v58 = vld [vmem:[#allocation22_spill] sm:$0xff] }
 0x3ea   : > { %v16357_v18 = vmul.f32 %v18787_v15, %v18786_v53  ;;  %v6989_v20 = vmul.f32 1.442695, %v6974_v45  ;;  %v16364_v27 = vsel %vm4011_vm6, %v4141_v6, 0.0  ;;  %v16367_v0 = vsel %vm4011_vm6, %v4081_v17, 0.0  ;;  %v10282_v45 = vld [vmem:[%s18118_s2 + $0xa08] sm:$0xff]  ;;  %v10283_v15 = vld [vmem:[%s18118_s2 + $0xa10] sm:$0xff] }
 0x3eb   : > { %v7024_v59 = vrot.slane %v7023_v48, 1  ;;  %v18788_v55 = vrot.slane %v16016_v52, %v18720_v56  ;;  %v7034_v33 = vrot.slane %v7033_v61, 4  ;;  %v16376_v5 = vadd.f32 %v16226_v34, %v4208_v42 }
 0x3ec   : > { %v4265_v37 = vsel %vm4011_vm6, %v4257_v36, 0.0  ;;  %v5139_v47 = vmul.f32 %v18790_v40, %v16346_v10  ;;  %11799 = vpow2.f32 %v6989_v20  ;;  %v16382_v25 = vsel %vm4011_vm6, %v4201_v35, 0.0 }
 0x3ed   : > { %v16373_v46 = vmul.f32 %v18789_v7, %v18788_v55  ;;  %v7025_v29 = vadd.f32 %v7024_v59, %v7023_v48  ;;  %v16386_v52 = vadd.f32 %v4265_v37, %v4264_v3  ;;  %v5077_v38 = vsel %vm5069_vm4, %v16357_v18, 0.0  ;;  %v10281_v48 = vld [vmem:[%s18118_s2 + $0xa00] sm:$0xff]  ;;  %v18797_v59 = vld [vmem:[#allocation27_spill] sm:$0xff]  ;;  %v18798_v3 = vld [vmem:[#allocation100_spill] sm:$0xff] }
 0x3ee   : > { %v16384_v1 = vpop.eup %11795  ;;  %v5138_v34 = vmul.f32 %v18791_v51, %v16357_v18  ;;  %v5259_v42 = vmul.f32 %v18792_v22, %v16346_v10  ;;  %v16396_v17 = vmul.f32 %v18793_v41, %v16357_v18  ;;  %v5079_v30 = vsel %vm5069_vm4, %v16346_v10, 0.0  ;;  %11312 = vmatprep.mubr.msk.f32.mxu0 %vm287_vm0, %v10281_v48 }
 0x3ef   : > { %11801 = vrcp.f32 %v7025_v29  ;;  %v7012_v6 = vsel %vm729_vm7, %v16384_v1, 0.0  ;;  %v4019_v19 = vsel %vm4011_vm6, %v16373_v46, 0.0  ;;  %v4140_v35 = vmul.f32 %v18794_v49, %v16373_v46  ;;  %11313 = vmatmul.mubr.msk.f32.vlgmr.msra.gmra.mrb[140].mxu0 %vm287_vm0, %v10282_v45  ;;  %v18800_v29 = vld [vmem:[#allocation51_spill] sm:$0xff]  ;;  %v18803_v45 = vld [vmem:[#allocation129_spill] sm:$0xff] }
 0x3f0   : > { %v7035_v39 = vadd.f32 %v7034_v33, %v7033_v61  ;;  %v7013_v23 = vrot.slane %v7012_v6, 4  ;;  %v5258_v36 = vmul.f32 %v18795_v28, %v16357_v18  ;;  %v16416_v62 = vmul.f32 %v18796_v58, %v16051_v9  ;;  %11315 = vmatprep.mubr.msk.f32.mxu0 %vm287_vm0, %v10283_v15 }
 0x3f1   : > { %v5078_v53 = vadd.f32 %v5077_v38, %v16287_v8  ;;  %v5151_v61 = vsel %vm5069_vm4, %v5139_v47, 0.0  ;;  %v16426_v20 = vmul.f32 %v18797_v59, %v16074_v43  ;;  %v16430_v55 = vmul.f32 %v18798_v3, %v16113_v11  ;;  %v18799_v8 = vld [vmem:[#allocation17_spill] sm:$0xff]  ;;  %v18801_v38 = vld [vmem:[#allocation74_spill] sm:$0xff]  ;;  %v18805_v59 = vld [vmem:[#allocation124_spill] sm:$0xff] }
 0x3f2   : > { %v7014_v9 = vadd.f32 %v7013_v23, %v7012_v6  ;;  %v5149_v7 = vsel %vm5069_vm4, %v5138_v34, 0.0  ;;  %v16436_v33 = vmul.f32 %v18799_v8, %v16373_v46  ;;  %v16440_v37 = vmul.f32 %v18800_v29, %v16373_v46  ;;  %v10284_v11 = vld [vmem:[%s18118_s2 + $0xa18] sm:$0xff]  ;;  %v16449_v47 = vpop.eup %11797  ;;  %v18806_v8 = vld [vmem:[#allocation94_spill] sm:$0xff] }
 0x3f3   : > { %v4020_v40 = vadd.f32 %v4019_v19, %v4018_v60  ;;  %v16443_v43 = vsel %vm5069_vm4, %v5259_v42, 0.0  ;;  %v5314_v51 = vmul.f32 %v18801_v38, %v16091_v24  ;;  %v7036_v34 = vrot.slane %v7035_v39, 2  ;;  %v18802_v60 = vld [vmem:[#allocation20_spill] sm:$0xff]  ;;  %v18804_v24 = vld [vmem:[#allocation67_spill] sm:$0xff]  ;;  %11316 = vmatmul.mubr.msk.f32.gmra.mrb[142].mxu0 %vm287_vm0, %v10284_v11 }
 0x3f4   : > { %v7015_v22 = vrot.slane %v7014_v9, 2  ;;  %v4151_v41 = vsel %vm4011_vm6, %v4140_v35, 0.0  ;;  %v4258_v6 = vmul.f32 %v18802_v60, %v16244_v54  ;;  %v5080_v42 = vadd.f32 %v5079_v30, %v5078_v53 }
 0x3f5   : > { %v5150_v19 = vadd.f32 %v5149_v7, %v16310_v57  ;;  %v5269_v49 = vsel %vm5069_vm4, %v5258_v36, 0.0  ;;  %v5081_v48 = vsel %vm5069_vm4, %v16430_v55, 0.0  ;;  %v4142_v28 = vmul.f32 %v18803_v45, %v16426_v20 }
 0x3f6   : > { %v7016_v23 = vadd.f32 %v7015_v22, %v7014_v9  ;;  %v4143_v58 = vmul.f32 %v18804_v24, %v16416_v62  ;;  %v16465_v35 = vpop.eup %11799  ;;  %v7026_v54 = vsel %vm729_vm7, %v16449_v47, 0.0  ;;  %v4152_v57 = vadd.f32 %v4151_v41, %v16334_v32 }
 0x3f7   : > { %v16471_v30 = vadd.f32 %v16338_v26, %v4020_v40  ;;  %v16475_v36 = vsel %vm4011_vm6, %v16416_v62, 0.0  ;;  %v5322_v15 = vsel %vm5069_vm4, %v5314_v51, 0.0  ;;  %v16480_v3 = vmul.f32 %v18805_v59, %v16110_v14  ;;  %v18807_v51 = vld [vmem:[#allocation23_spill] sm:$0xff] }
 0x3f8   : > { %v7037_v9 = vadd.f32 %v7036_v34, %v7035_v39  ;;  %v7017_v7 = vrot.slane %v7016_v23, 1  ;;  %v16484_v29 = vmul.f32 %v18806_v8, %v16197_v16  ;;  %v4267_v32 = vsel %vm4011_vm6, %v4258_v6, 0.0  ;;  %v18808_v14 = vld [vmem:[#allocation75_spill] sm:$0xff] }
 0x3f9   : > { %v11802_v53 = vpop.eup %11801  ;;  %v5082_v40 = vadd.f32 %v5081_v48, %v5080_v42  ;;  %v7027_v11 = vrot.slane %v7026_v54, 4  ;;  %v4155_v38 = vsel %vm4011_vm6, %v4142_v28, 0.0  ;;  %v5140_v41 = vmul.f32 %v18807_v51, %v16430_v55  ;;  %v18810_v28 = vld [vmem:[#allocation118_spill] sm:$0xff] }
 0x3fa   : > { %v7059_v26 = vmul.f32 %v11802_v53, %v16293_v63  ;;  %v7018_v22 = vadd.f32 %v7017_v7, %v7016_v23  ;;  %v4259_v39 = vmul.f32 %v18808_v14, %v16168_v50  ;;  %v7040_v34 = vsel %vm729_vm7, %v16465_v35, 0.0  ;;  %v18809_v63 = vld [vmem:[#allocation101_spill] sm:$0xff]  ;;  %v18812_v7 = vld [vmem:[#allocation28_spill] sm:$0xff] }
 0x3fb   : > { %v4154_v16 = vadd.f32 %v16364_v27, %v4152_v57  ;;  %v5152_v60 = vadd.f32 %v5151_v61, %v5150_v19  ;;  %v4260_v6 = vmul.f32 %v18809_v63, %v16373_v46  ;;  %v7038_v42 = vrot.slane %v7037_v9, 1 }
 0x3fc   : > { %7169 = vrot.lane.b32.xlu0 %v7059_v26, %s11910_s13  ;;  %v5083_v23 = vsel %vm5069_vm4, %v16480_v3, 0.0  ;;  %11803 = vrcp.f32 %v7018_v22  ;;  %v4268_v48 = vadd.f32 %v4267_v32, %v16386_v52  ;;  %v5260_v24 = vmul.f32 %v18810_v28, %v16430_v55  ;;  %v18811_v52 = vld [vmem:[#allocation52_spill] sm:$0xff]  ;;  %v10206_v26 = vld [vmem:[%s18118_s2 + $0x8e8] sm:$0xff] }
 0x3fd   : > { %v5084_v45 = vadd.f32 %v5083_v23, %v5082_v40  ;;  %v4156_v50 = vadd.f32 %v4155_v38, %v4154_v16  ;;  %v7028_v53 = vadd.f32 %v7027_v11, %v7026_v54  ;;  %v7041_v59 = vrot.slane %v7040_v34, 4  ;;  %v10285_v54 = vld [vmem:[%s18118_s2 + $0xa20] sm:$0xff]  ;;  %v10287_v40 = vld [vmem:[%s18118_s2 + $0xa30] sm:$0xff] }
 0x3fe   : > { %v5153_v27 = vsel %vm5069_vm4, %v5140_v41, 0.0  ;;  %v5270_v61 = vadd.f32 %v5269_v49, %v16312_v44  ;;  %v16507_v46 = vadd.f32 %v16360_v13, %v5322_v15  ;;  %v4157_v19 = vsel %vm4011_vm6, %v4143_v58, 0.0  ;;  %v10205_v44 = vld [vmem:[%s18118_s2 + $0x8e0] sm:$0xff]  ;;  %v10286_v13 = vld [vmem:[%s18118_s2 + $0xa28] sm:$0xff]  ;;  %11318 = vmatprep.mubr.msk.f32.mxu0 %vm287_vm0, %v10285_v54  ;;  %v18814_v41 = vld [vmem:[#allocation13_spill] sm:$0xff] }
 0x3ff   : > { %v5141_v57 = vmul.f32 %v18811_v52, %v16480_v3  ;;  %v16515_v8 = vmul.f32 %v18812_v7, %v16416_v62  ;;  %v4269_v49 = vsel %vm4011_vm6, %v4259_v39, 0.0  ;;  %v4271_v58 = vsel %vm4011_vm6, %v4260_v6, 0.0  ;;  %11250 = vmatprep.mubr.msk.f32.mxu1 %vm287_vm0, %v10205_v44  ;;  %11319 = vmatmul.mubr.msk.f32.gmra.mrb[144].mxu0 %vm287_vm0, %v10286_v13 }
 0x400   : > { %5086 = vrot.lane.b32.xlu0 %v5084_v45, %s11900_s24  ;;  %v4091_v15 = vsel %vm4011_vm6, %v16436_v33, 0.0  ;;  %v7039_v32 = vadd.f32 %v7038_v42, %v7037_v9  ;;  %v4270_v11 = vadd.f32 %v4269_v49, %v4268_v48  ;;  %v4158_v38 = vadd.f32 %v4157_v19, %v4156_v50  ;;  %11251 = vmatmul.mubr.msk.f32.gmra.mrb[144].mxu1 %vm287_vm0, %v10206_v26  ;;  %v18813_v33 = vld [vmem:[#allocation4_spill] sm:$0xff]  ;;  %v18815_v42 = vld [vmem:[#allocation19_spill] sm:$0xff]  ;;  %v18817_v50 = vld [vmem:[#allocation50_spill] sm:$0xff] }
 0x401   : > { %v5154_v22 = vadd.f32 %v5153_v27, %v5152_v60  ;;  %v5273_v51 = vsel %vm5069_vm4, %v5260_v24, 0.0  ;;  %v4261_v9 = vmul.f32 %v18813_v33, %v16303_v4  ;;  %v4262_v14 = vmul.f32 %v18814_v41, %v16426_v20  ;;  %11321 = vmatprep.mubr.msk.f32.mxu0 %vm287_vm0, %v10287_v40  ;;  %v10288_v60 = vld [vmem:[%s18118_s2 + $0xa38] sm:$0xff]  ;;  %v18816_v48 = vld [vmem:[#allocation64_spill] sm:$0xff]  ;;  %v18821_v41 = vld [vmem:[#allocation107_spill] sm:$0xff] }
 0x402   : > { %v7029_v39 = vrot.slane %v7028_v53, 2  ;;  %v7042_v16 = vadd.f32 %v7041_v59, %v7040_v34  ;;  %v4272_v63 = vadd.f32 %v4271_v58, %v4270_v11  ;;  %v5155_v6 = vsel %vm5069_vm4, %v5141_v57, 0.0  ;;  %v10207_v24 = vld [vmem:[%s18118_s2 + $0x8f0] sm:$0xff]  ;;  %v10208_v59 = vld [vmem:[%s18118_s2 + $0x8f8] sm:$0xff] }
 0x403   : > { %v5261_v23 = vmul.f32 %v18815_v42, %v16480_v3  ;;  %v5272_v4 = vadd.f32 %v16443_v43, %v5270_v61  ;;  %v5316_v34 = vmul.f32 %v18816_v48, %v16201_v31  ;;  %v4023_v45 = vsel %vm4011_vm6, %v16426_v20, 0.0  ;;  %11322 = vmatmul.mubr.msk.f32.gmra.mrb[146].mxu0 %vm287_vm0, %v10288_v60  ;;  %11253 = vmatprep.mubr.msk.f32.mxu1 %vm287_vm0, %v10207_v24  ;;  %v18818_v58 = vld [vmem:[#allocation104_spill] sm:$0xff]  ;;  %v18822_v60 = vld [vmem:[#allocation98_spill] sm:$0xff] }
 0x404   : > { %4160 = vrot.lane.b32.xlu0 %v4158_v38, %s11898_s23  ;;  %v4082_v28 = vmul.f32 %v18817_v50, %v16426_v20  ;;  %11805 = vrcp.f32 %v7039_v32  ;;  %v5156_v43 = vadd.f32 %v5155_v6, %v5154_v22  ;;  %v4092_v61 = vadd.f32 %v4091_v15, %v16351_v2  ;;  %11254 = vmatmul.mubr.msk.f32.gmra.mrb[146].mxu1 %vm287_vm0, %v10208_v59  ;;  %v18820_v38 = vld [vmem:[#allocation24_spill] sm:$0xff] }
 0x405   : > { %v5274_v27 = vadd.f32 %v5273_v51, %v5272_v4  ;;  %v4211_v31 = vsel %vm4011_vm6, %v16440_v37, 0.0  ;;  %v4273_v52 = vsel %vm4011_vm6, %v4261_v9, 0.0  ;;  %v4275_v57 = vsel %vm4011_vm6, %v4262_v14, 0.0  ;;  %v18823_v4 = vld [vmem:[#allocation113_spill] sm:$0xff] }
 0x406   : > { %v11804_v19 = vpop.eup %11803  ;;  %v7030_v7 = vadd.f32 %v7029_v39, %v7028_v53  ;;  %v7043_v54 = vrot.slane %v7042_v16, 2  ;;  %v4274_v44 = vadd.f32 %v4273_v52, %v4272_v63  ;;  %v4024_v2 = vadd.f32 %v4023_v45, %v16471_v30  ;;  %v18819_v53 = vld [vmem:[#allocation72_spill] sm:$0xff] }
 0x407   : > { %v7058_v13 = vmul.f32 %v11804_v19, %v16384_v1  ;;  %v5275_v37 = vsel %vm5069_vm4, %v5261_v23, 0.0  ;;  %v5325_v49 = vsel %vm5069_vm4, %v5316_v34, 0.0  ;;  %v4263_v15 = vmul.f32 %v18818_v58, %v16416_v62  ;;  %v18824_v45 = vld [vmem:[#allocation68_spill] sm:$0xff] }
 0x408   : > { %5158 = vrot.lane.b32.xlu0 %v5156_v43, %s11900_s24  ;;  %v4095_v32 = vsel %vm4011_vm6, %v4082_v28, 0.0  ;;  %v4202_v26 = vmul.f32 %v18819_v53, %v16426_v20  ;;  %v4276_v40 = vadd.f32 %v4275_v57, %v4274_v44  ;;  %v5276_v1 = vadd.f32 %v5275_v37, %v5274_v27  ;;  %v18827_v57 = vld [vmem:[#allocation59_spill] sm:$0xff] }
 0x409   : > { %7167 = vrot.lane.b32.xlu1 %v7058_v13, %s11910_s13  ;;  %v4094_v11 = vadd.f32 %v16367_v0, %v4092_v61  ;;  %v4212_v30 = vadd.f32 %v4211_v31, %v16376_v5  ;;  %v5318_v22 = vmul.f32 %v18820_v38, %v16357_v18  ;;  %v7031_v51 = vrot.slane %v7030_v7, 1 }
 0x40a   : > { %v7044_v33 = vadd.f32 %v7043_v54, %v7042_v16  ;;  %v5209_v9 = vsel %vm5069_vm4, %v16396_v17, 0.0  ;;  %v5199_v14 = vmul.f32 %v18821_v41, %v16346_v10  ;;  %v5326_v20 = vadd.f32 %v5325_v49, %v16507_v46  ;;  %v18832_v41 = vld [vmem:[#allocation38_spill] sm:$0xff] }
 0x40b   : > { %v4026_v39 = vadd.f32 %v16475_v36, %v4024_v2  ;;  %v4096_v0 = vadd.f32 %v4095_v32, %v4094_v11  ;;  %v5327_v5 = vsel %vm5069_vm4, %v16484_v29, 0.0  ;;  %v4277_v18 = vsel %vm4011_vm6, %v4263_v15, 0.0 }
 0x40c   : > { %5278 = vrot.lane.b32.xlu0 %v5276_v1, %s11900_s24  ;;  %v4215_v16 = vsel %vm4011_vm6, %v4202_v26, 0.0  ;;  %v5200_v17 = vmul.f32 %v18822_v60, %v16430_v55  ;;  %v4278_v63 = vadd.f32 %v4277_v18, %v4276_v40  ;;  %v4097_v46 = vsel %vm4011_vm6, %v16515_v8, 0.0  ;;  %v18829_v26 = vld [vmem:[#allocation48_spill] sm:$0xff]  ;;  %v18838_v60 = vld [vmem:[#allocation11_spill] sm:$0xff] }
 0x40d   : > { %4028 = vrot.lane.b32.xlu1 %v4026_v39, %s11898_s23  ;;  %v4214_v36 = vadd.f32 %v16382_v25, %v4212_v30  ;;  %v5210_v6 = vadd.f32 %v5209_v9, %v16319_v21  ;;  %v5329_v29 = vsel %vm5069_vm4, %v5318_v22, 0.0  ;;  %v7045_v23 = vrot.slane %v7044_v33, 1  ;;  %v18825_v25 = vld [vmem:[#allocation121_spill] sm:$0xff]  ;;  %v18826_v21 = vld [vmem:[#allocation122_spill] sm:$0xff]  ;;  %v18830_v30 = vld [vmem:[#allocation71_spill] sm:$0xff] }
 0x40e   : > { %v11806_v42 = vpop.eup %11805  ;;  %v4203_v48 = vmul.f32 %v18823_v4, %v16416_v62  ;;  %v7032_v34 = vadd.f32 %v7031_v51, %v7030_v7  ;;  %v7214_v50 = vsel %vm7193_vm9, %v18824_v45, 0.0  ;;  %v5328_v28 = vadd.f32 %v5327_v5, %v5326_v20  ;;  %v18831_v51 = vld [vmem:[#allocation130_spill] sm:$0xff]  ;;  %v18833_v39 = vld [vmem:[#allocation81_spill] sm:$0xff] }
 0x40f   : > { %v4098_v24 = vadd.f32 %v4097_v46, %v4096_v0  ;;  %v4216_v8 = vadd.f32 %v4215_v16, %v4214_v36  ;;  %v5319_v59 = vmul.f32 %v18825_v25, %v16346_v10  ;;  %v5320_v43 = vmul.f32 %v18826_v21, %v16430_v55  ;;  %v18835_v0 = vld [vmem:[#allocation126_spill] sm:$0xff]  ;;  %v18837_v5 = vld [vmem:[#allocation109_spill] sm:$0xff]  ;;  %v18840_v36 = vld [vmem:[#allocation127_spill] sm:$0xff] }
 0x410   : > { %4280 = vrot.lane.b32.xlu0 %v4278_v63, %s11898_s23  ;;  %v5211_v27 = vsel %vm5069_vm4, %v5199_v14, 0.0  ;;  %v5213_v61 = vsel %vm5069_vm4, %v5200_v17, 0.0  ;;  %v5330_v62 = vadd.f32 %v5329_v29, %v5328_v28  ;;  %v7061_v31 = vmul.f32 %v11806_v42, %v16321_v12  ;;  %v18828_v12 = vld [vmem:[#allocation18_spill] sm:$0xff]  ;;  %v18839_v17 = vld [vmem:[#allocation120_spill] sm:$0xff]  ;;  %v18842_v42 = vld [vmem:[#allocation125_spill] sm:$0xff] }
 0x411   : > { %4100 = vrot.lane.b32.xlu1 %v4098_v24, %s11898_s23  ;;  %v5212_v19 = vadd.f32 %v5211_v27, %v5210_v6  ;;  %v4217_v52 = vsel %vm4011_vm6, %v4203_v48, 0.0  ;;  %v5201_v7 = vmul.f32 %v18827_v57, %v16480_v3  ;;  %11807 = vrcp.f32 %v7032_v34  ;;  %v18841_v6 = vld [vmem:[#allocation99_spill] sm:$0xff]  ;;  %v18844_v34 = vld [vmem:[#allocation102_spill] sm:$0xff]  ;;  %v18845_v28 = vld [vmem:[#allocation16_spill] sm:$0xff] }
 0x412   : > { %v7046_v10 = vadd.f32 %v7045_v23, %v7044_v33  ;;  %v7215_v54 = vrot.slane %v7214_v50, 4  ;;  %v4218_v44 = vadd.f32 %v4217_v52, %v4216_v8  ;;  %v5331_v13 = vsel %vm5069_vm4, %v5319_v59, 0.0  ;;  %v18843_v23 = vld [vmem:[#allocation65_spill] sm:$0xff]  ;;  %v18846_v24 = vld [vmem:[#allocation108_spill] sm:$0xff]  ;;  %v18847_v25 = vld [vmem:[#allocation86_spill] sm:$0xff] }
 0x413   : > { %v5214_v55 = vadd.f32 %v5213_v61, %v5212_v19  ;;  %v5333_v2 = vsel %vm5069_vm4, %v5320_v43, 0.0  ;;  %v5332_v37 = vadd.f32 %v5331_v13, %v5330_v62  ;;  %v5321_v49 = vmul.f32 %v18828_v12, %v16480_v3  ;;  %v18848_v59 = vld [vmem:[#allocation115_spill] sm:$0xff]  ;;  %v18849_v43 = vld [vmem:[#allocation53_spill] sm:$0xff]  ;;  %v18850_v61 = vld [vmem:[#allocation140_spill] sm:$0xff] }
 0x414   : > { %7173 = vrot.lane.b32.xlu0 %v7061_v31, %s11910_s13  ;;  %v5215_v58 = vsel %vm5069_vm4, %v5201_v7, 0.0  ;;  %11809 = vrcp.f32 %v7046_v10  ;;  %v7216_v15 = vadd.f32 %v7215_v54, %v7214_v50  ;;  %v6133_v18 = vsel %vm6131_vm8, %v18837_v5, 0.0  ;;  %v18851_v31 = vld [vmem:[#allocation112_spill] sm:$0xff]  ;;  %v18852_v52 = vld [vmem:[#allocation111_spill] sm:$0xff]  ;;  %v10209_v57 = vld [vmem:[%s18118_s2 + $0x900] sm:$0xff] }
 0x415   : > { %4220 = vrot.lane.b32.xlu1 %v4218_v44, %s11898_s23  ;;  %v5334_v32 = vadd.f32 %v5333_v2, %v5332_v37  ;;  %v5216_v53 = vadd.f32 %v5215_v58, %v5214_v55  ;;  %v5335_v40 = vsel %vm5069_vm4, %v5321_v49, 0.0  ;;  %v11913_v16 = vmov 7   ;;  %v10210_v7 = vld [vmem:[%s18118_s2 + $0x908] sm:$0xff]  ;;  %v18853_v10 = vld [vmem:[#allocation73_spill] sm:$0xff]  ;;  %v18854_v44 = vld [vmem:[#allocation70_spill] sm:$0xff]  ;;  %11256 = vmatprep.mubr.msk.f32.mxu1 %vm287_vm0, %v10209_v57 }
 0x416   : > { %v7217_v1 = vrot.slane %v7216_v15, 2  ;;  %11579 = vset.pattern.permute.xlu1 %v11913_v16  ;;  %11578 = vset.pattern.permute.xlu0 %v11913_v16  ;;  %v6132_v63 = vsel %vm6131_vm8, %v18839_v17, 0.0  ;;  %v6135_v29 = vsel %vm6131_vm8, %v18842_v42, 0.0  ;;  %v6137_v4 = vsel %vm6131_vm8, %v18843_v23, 0.0  ;;  %v18855_v13 = vld [vmem:[#allocation144_spill] sm:$0xff]  ;;  %v10212_v58 = vld [vmem:[%s18118_s2 + $0x918] sm:$0xff] }
 0x417   : > { %v5336_v11 = vadd.f32 %v5335_v40, %v5334_v32  ;;  %v6134_v46 = vadd.f32 %v6133_v18, %v6132_v63  ;;  %v6139_v8 = vsel %vm6131_vm8, %v18846_v24, 0.0  ;;  %v6141_v21 = vsel %vm6131_vm8, %v18848_v59, 0.0  ;;  %11257 = vmatmul.mubr.msk.f32.gmra.mrb[148].mxu1 %vm287_vm0, %v10210_v7  ;;  %v10211_v37 = vld [vmem:[%s18118_s2 + $0x910] sm:$0xff]  ;;  %v10218_v63 = vld [vmem:[%s18118_s2 + $0x948] sm:$0xff]  ;;  %v10224_v57 = vld [vmem:[%s18118_s2 + $0x978] sm:$0xff] }
 0x418   : > { %7234 = vrot.lane.b32.xlu0 %v18829_v26, %s11910_s13  ;;  %v7218_v3 = vadd.f32 %v7217_v1, %v7216_v15  ;;  %v6143_v19 = vsel %vm6131_vm8, %v18851_v31, 0.0  ;;  %v6257_v54 = vmul.f32 %v18853_v10, %v18837_v5  ;;  %v6145_v55 = vsel %vm6131_vm8, %v18854_v44, 0.0  ;;  %v18856_v12 = vld [vmem:[#allocation80_spill] sm:$0xff]  ;;  %11259 = vmatprep.mubr.msk.f32.mxu1 %vm287_vm0, %v10211_v37  ;;  %v18857_v15 = vld [vmem:[#allocation79_spill] sm:$0xff]  ;;  %v10213_v26 = vld [vmem:[%s18118_s2 + $0x920] sm:$0xff] }
 0x419   : > { %5218 = vrot.lane.b32.xlu1 %v5216_v53, %s11900_s24  ;;  %v6136_v48 = vadd.f32 %v6135_v29, %v6134_v46  ;;  %v6256_v49 = vmul.f32 %v18856_v12, %v18839_v17  ;;  %v18858_v1 = vld [vmem:[#allocation77_spill] sm:$0xff]  ;;  %v18864_v46 = vld [vmem:[#allocation131_spill] sm:$0xff]  ;;  %v10293_v7 = vld [vmem:[%s18118_s2 + $0xa60] sm:$0xff] }
 0x41a   : > { %v7219_v14 = vrot.slane %v7218_v3, 1  ;;  %v6265_v53 = vsel %vm6131_vm8, %v6257_v54, 0.0  ;;  %v10225_v10 = vld [vmem:[%s18118_s2 + $0x980] sm:$0xff]  ;;  %v10294_v54 = vld [vmem:[%s18118_s2 + $0xa68] sm:$0xff]  ;;  %v10296_v37 = vld [vmem:[%s18118_s2 + $0xa78] sm:$0xff] }
 0x41b   : > { %v11808_v38 = vpop.eup %11807  ;;  %v6138_v50 = vadd.f32 %v6137_v4, %v6136_v48  ;;  %11260 = vmatmul.mubr.msk.f32.gmra.mrb[150].mxu1 %vm287_vm0, %v10212_v58  ;;  %v6264_v40 = vsel %vm6131_vm8, %v6256_v49, 0.0  ;;  %v18866_v4 = vld [vmem:[#allocation56_spill] sm:$0xff]  ;;  %v16850_v58 = vpop.permute.xlu0 %7161 }
 0x41c   : > { %7238 = vrot.lane.b32.xlu0 %v18830_v30, %s11910_s13  ;;  %v7060_v22 = vmul.f32 %v11808_v38, %v16449_v47  ;;  %v7220_v20 = vadd.f32 %v7219_v14, %v7218_v3  ;;  %v18834_v47 = vld [vmem:[#allocation69_spill] sm:$0xff]  ;;  %v18859_v30 = vld [vmem:[#allocation32_spill] sm:$0xff]  ;;  %11262 = vmatprep.mubr.msk.f32.mxu1 %vm287_vm0, %v10213_v26  ;;  %v10214_v3 = vld [vmem:[%s18118_s2 + $0x928] sm:$0xff]  ;;  %v6263_v48 = vmul.f32 %v18866_v4, %v18854_v44  ;;  %v7164_v4 = vpop.permute.xlu1 %7163 }
 0x41d   : > { %5338 = vrot.lane.b32.xlu1 %v5336_v11, %s11900_s24  ;;  %v6140_v27 = vadd.f32 %v6139_v8, %v6138_v50  ;;  %v6258_v11 = vmul.f32 %v18858_v1, %v18842_v42  ;;  %v6259_v38 = vmul.f32 %v18859_v30, %v18843_v23  ;;  %v18861_v14 = vld [vmem:[#allocation33_spill] sm:$0xff]  ;;  %v10289_v50 = vld [vmem:[%s18118_s2 + $0xa40] sm:$0xff]  ;;  %v16823_v44 = vld [vmem:[%s18119_s3 + $0x8] sm:$0xff] }
 0x41e   : > { %v11810_v33 = vpop.eup %11809  ;;  %v10221_v8 = vld [vmem:[%s18118_s2 + $0x960] sm:$0xff]  ;;  %11324 = vmatprep.mubr.msk.f32.mxu0 %vm287_vm0, %v10289_v50  ;;  %v16845_v12 = vld [vmem:[%s18119_s3 + $0x10] sm:$0xff]  ;;  %v10298_v1 = vld [vmem:[%s18118_s2 + $0xa88] sm:$0xff] }
 0x41f   : > { %v7062_v9 = vmul.f32 %v11810_v33, %v16465_v35  ;;  %v18836_v35 = vld [vmem:[#allocation106_spill] sm:$0xff]  ;;  %v6142_v62 = vadd.f32 %v6141_v21, %v6140_v27  ;;  %11263 = vmatmul.mubr.msk.f32.gmra.mrb[152].mxu1 %vm287_vm0, %v10214_v3  ;;  %v10215_v33 = vld [vmem:[%s18118_s2 + $0x930] sm:$0xff]  ;;  %v6277_v21 = vsel %vm6131_vm8, %v6263_v48, 0.0  ;;  %v10300_v3 = vld [vmem:[%s18118_s2 + $0xa98] sm:$0xff] }
 0x420   : > { %7242 = vrot.lane.b32.xlu0 %v18831_v51, %s11910_s13  ;;  %v18860_v51 = vld [vmem:[#allocation83_spill] sm:$0xff]  ;;  %11265 = vmatprep.mubr.msk.f32.mxu1 %vm287_vm0, %v10215_v33  ;;  %v10291_v27 = vld [vmem:[%s18118_s2 + $0xa50] sm:$0xff]  ;;  %v10297_v26 = vld [vmem:[%s18118_s2 + $0xa80] sm:$0xff] }
 0x421   : > { %7171 = vrot.lane.b32.xlu1 %v7060_v22, %s11910_s13  ;;  %v6144_v2 = vadd.f32 %v6143_v19, %v6142_v62  ;;  %v6266_v22 = vadd.f32 %v6265_v53, %v6264_v40  ;;  %v10292_v19 = vld [vmem:[%s18118_s2 + $0xa58] sm:$0xff]  ;;  %v10229_v53 = vld [vmem:[%s18118_s2 + $0x9a0] sm:$0xff]  ;;  %v10231_v33 = vld [vmem:[%s18118_s2 + $0x9b0] sm:$0xff] }
 0x422   : > { %v10308_v48 = vld [vmem:[%s18118_s2 + $0xad8] sm:$0xff]  ;;  %v10309_v50 = vld [vmem:[%s18118_s2 + $0xae0] sm:$0xff] }
 0x423   : > { %v6146_v32 = vadd.f32 %v6145_v55, %v6144_v2  ;;  %v10226_v55 = vld [vmem:[%s18118_s2 + $0x988] sm:$0xff]  ;;  %v10227_v2 = vld [vmem:[%s18118_s2 + $0x990] sm:$0xff] }
 0x424   : > { %7246 = vrot.lane.b32.xlu0 %v18832_v41, %s11910_s13  ;;  %v6269_v41 = vsel %vm6131_vm8, %v6259_v38, 0.0  ;;  %v10230_v38 = vld [vmem:[%s18118_s2 + $0x9a8] sm:$0xff] }
 0x425   : > { %7175 = vrot.lane.b32.xlu1 %v7062_v9, %s11910_s13  ;;  %v6267_v9 = vsel %vm6131_vm8, %v6258_v11, 0.0  ;;  %v10299_v11 = vld [vmem:[%s18118_s2 + $0xa90] sm:$0xff] }
 0x428   : > { %7296 = vrot.lane.b32.xlu0 %v18833_v39, %s11910_s13  ;;  %v10216_v39 = vld [vmem:[%s18118_s2 + $0x938] sm:$0xff] }
 0x429   : > { %7222 = vrot.lane.b32.xlu1 %v7220_v20, %s11902_s26  ;;  %v6260_v20 = vmul.f32 %v18861_v14, %v18846_v24  ;;  %11266 = vmatmul.mubr.msk.f32.gmra.mrb[154].mxu1 %vm287_vm0, %v10216_v39  ;;  %v10302_v39 = vld [vmem:[%s18118_s2 + $0xaa8] sm:$0xff] }
 0x42b   : > { %v6271_v17 = vsel %vm6131_vm8, %v6260_v20, 0.0  ;;  %v10232_v20 = vld [vmem:[%s18118_s2 + $0x9b8] sm:$0xff] }
 0x42c   : > { %7300 = vrot.lane.b32.xlu0 %v18834_v47, %s11910_s13  ;;  %v18862_v47 = vld [vmem:[#allocation139_spill] sm:$0xff] }
 0x42d   : > { %7236 = vrot.lane.b32.xlu1 %v18835_v0, %s11910_s13  ;;  %v6268_v0 = vadd.f32 %v6267_v9, %v6266_v22  ;;  %v16887_v22 = vpop.permute.xlu0 %7165  ;;  %v10301_v9 = vld [vmem:[%s18118_s2 + $0xaa0] sm:$0xff] }
 0x42f   : > { %v6270_v18 = vadd.f32 %v6269_v41, %v6268_v0  ;;  %v10233_v0 = vld [vmem:[%s18118_s2 + $0x9c0] sm:$0xff] }
 0x430   : > { %7304 = vrot.lane.b32.xlu0 %v18836_v35, %s11910_s13  ;;  %v18863_v35 = vld [vmem:[#allocation89_spill] sm:$0xff] }
 0x431   : > { %7240 = vrot.lane.b32.xlu1 %v18838_v60, %s11910_s13  ;;  %v6261_v5 = vmul.f32 %v18863_v35, %v18848_v59  ;;  %v10217_v60 = vld [vmem:[%s18118_s2 + $0x940] sm:$0xff]  ;;  %v6272_v23 = vadd.f32 %v6271_v17, %v6270_v18  ;;  %v10303_v35 = vld [vmem:[%s18118_s2 + $0xab0] sm:$0xff]  ;;  %v10234_v18 = vld [vmem:[%s18118_s2 + $0x9c8] sm:$0xff] }
 0x432   : > { %11268 = vmatprep.mubr.msk.f32.mxu1 %vm287_vm0, %v10217_v60  ;;  %v10304_v60 = vld [vmem:[%s18118_s2 + $0xab8] sm:$0xff] }
 0x433   : > { %v6273_v29 = vsel %vm6131_vm8, %v6261_v5, 0.0  ;;  %11269 = vmatmul.mubr.msk.f32.gmra.mrb[156].mxu1 %vm287_vm0, %v10218_v63  ;;  %v10305_v63 = vld [vmem:[%s18118_s2 + $0xac0] sm:$0xff] }
 0x434   : > { %7308 = vrot.lane.b32.xlu0 %v18840_v36, %s11910_s13  ;;  %v10219_v36 = vld [vmem:[%s18118_s2 + $0x950] sm:$0xff]  ;;  %v6274_v24 = vadd.f32 %v6273_v29, %v6272_v23 }
 0x435   : > { %7244 = vrot.lane.b32.xlu1 %v18841_v6, %s11910_s13  ;;  %v18865_v6 = vld [vmem:[#allocation60_spill] sm:$0xff]  ;;  %11271 = vmatprep.mubr.msk.f32.mxu1 %vm287_vm0, %v10219_v36  ;;  %v10306_v36 = vld [vmem:[%s18118_s2 + $0xac8] sm:$0xff] }
 0x436   : > { %v6262_v42 = vmul.f32 %v18865_v6, %v18851_v31  ;;  %v10223_v31 = vld [vmem:[%s18118_s2 + $0x970] sm:$0xff] }
 0x437   : > { %v18871_v29 = vld [vmem:[#allocation40_spill] sm:$0xff] }
 0x438   : > { %7354 = vrot.lane.b32.xlu0 %v18844_v34, %s11910_s13  ;;  %v10220_v34 = vld [vmem:[%s18118_s2 + $0x958] sm:$0xff]  ;;  %v6275_v59 = vsel %vm6131_vm8, %v6262_v42, 0.0  ;;  %v10307_v42 = vld [vmem:[%s18118_s2 + $0xad0] sm:$0xff]  ;;  %v7071_v23 = vrot.slane %v18824_v45, %v18871_v29 }
 0x439   : > { %7248 = vrot.lane.b32.xlu1 %v18845_v28, %s11910_s13  ;;  %v18867_v28 = vld [vmem:[#allocation88_spill] sm:$0xff]  ;;  %11272 = vmatmul.mubr.msk.f32.gmra.mrb[158].mxu1 %vm287_vm0, %v10220_v34  ;;  %v6276_v62 = vadd.f32 %v6275_v59, %v6274_v24 }
 0x43a   : > { %11274 = vmatprep.mubr.msk.f32.mxu1 %vm287_vm0, %v10221_v8  ;;  %v10310_v8 = vld [vmem:[%s18118_s2 + $0xae8] sm:$0xff]  ;;  %v10311_v59 = vld [vmem:[%s18118_s2 + $0xaf0] sm:$0xff] }
 0x43c   : > { %7358 = vrot.lane.b32.xlu0 %v18847_v25, %s11910_s13  ;;  %v10290_v25 = vld [vmem:[%s18118_s2 + $0xa48] sm:$0xff] }
 0x43d   : > { %7294 = vrot.lane.b32.xlu1 %v18849_v43, %s11910_s13  ;;  %11325 = vmatmul.mubr.msk.f32.gmra.mrb[148].mxu0 %vm287_vm0, %v10290_v25  ;;  %v10222_v43 = vld [vmem:[%s18118_s2 + $0x968] sm:$0xff] }
 0x43e   : > { %11327 = vmatprep.mubr.msk.f32.mxu0 %vm287_vm0, %v10291_v27  ;;  %11275 = vmatmul.mubr.msk.f32.gmra.mrb[160].mxu1 %vm287_vm0, %v10222_v43  ;;  %v7087_v27 = vrot.slane %v7071_v23, %v18871_v29 }
 0x43f   : > { %11277 = vmatprep.mubr.msk.f32.mxu1 %vm287_vm0, %v10223_v31 }
 0x440   : > { %7362 = vrot.lane.b32.xlu0 %v18850_v61, %s11910_s13  ;;  %v18868_v61 = vld [vmem:[#allocation137_spill] sm:$0xff] }
 0x441   : > { %7298 = vrot.lane.b32.xlu1 %v18852_v52, %s11910_s13  ;;  %11328 = vmatmul.mubr.msk.f32.gmra.mrb[150].mxu0 %vm287_vm0, %v10292_v19  ;;  %v6278_v52 = vadd.f32 %v6277_v21, %v6276_v62  ;;  %v7064_v62 = vcombine.high %v18824_v45, %v18824_v45  ;;  %v10313_v19 = vld [vmem:[%s18118_s2 + $0xb00] sm:$0xff]  ;;  %v10314_v45 = vld [vmem:[%s18118_s2 + $0xb08] sm:$0xff] }
 0x442   : > { %11330 = vmatprep.mubr.msk.f32.mxu0 %vm287_vm0, %v10293_v7  ;;  %11278 = vmatmul.mubr.msk.f32.gmra.mrb[162].mxu1 %vm287_vm0, %v10224_v57  ;;  %v7116_v7 = vrot.slane %v7087_v27, %v18720_v56 }
 0x443   : > { %11280 = vmatprep.mubr.msk.f32.mxu1 %vm287_vm0, %v10225_v10  ;;  %v7109_v10 = vcombine.high %v7087_v27, %v7087_v27 }
 0x444   : > { %7366 = vrot.lane.b32.xlu0 %v18855_v13, %s11910_s13  ;;  %v10295_v13 = vld [vmem:[%s18118_s2 + $0xa70] sm:$0xff] }
 0x445   : > { %7302 = vrot.lane.b32.xlu1 %v18857_v15, %s11910_s13  ;;  %11331 = vmatmul.mubr.msk.f32.gmra.mrb[152].mxu0 %vm287_vm0, %v10294_v54  ;;  %v10228_v15 = vld [vmem:[%s18118_s2 + $0x998] sm:$0xff] }
 0x446   : > { %11333 = vmatprep.mubr.msk.f32.mxu0 %vm287_vm0, %v10295_v13  ;;  %11281 = vmatmul.mubr.msk.f32.gmra.mrb[164].mxu1 %vm287_vm0, %v10226_v55  ;;  %v7078_v13 = vrot.slane %v7064_v62, %v18871_v29 }
 0x447   : > { %11283 = vmatprep.mubr.msk.f32.mxu1 %vm287_vm0, %v10227_v2 }
 0x448   : > { %6148 = vrot.lane.b32.xlu0 %v6146_v32, %s11905_s28 }
 0x449   : > { %7306 = vrot.lane.b32.xlu1 %v18860_v51, %s11910_s13  ;;  %11334 = vmatmul.mubr.msk.f32.gmra.mrb[154].mxu0 %vm287_vm0, %v10296_v37  ;;  %v11914_v51 = vmov 8   ;;  %v16999_v37 = vmul.f32 %v16850_v58, %v7116_v7 }
 0x44a   : > { %11336 = vmatprep.mubr.msk.f32.mxu0 %vm287_vm0, %v10297_v26  ;;  %11284 = vmatmul.mubr.msk.f32.gmra.mrb[166].mxu1 %vm287_vm0, %v10228_v15 }
 0x44b   : > { %11286 = vmatprep.mubr.msk.f32.mxu1 %vm287_vm0, %v10229_v53  ;;  %v7124_v53 = vrot.slane %v7109_v10, %v18720_v56 }
 0x44d   : > { %7356 = vrot.lane.b32.xlu1 %v18862_v47, %s11910_s13  ;;  %11337 = vmatmul.mubr.msk.f32.gmra.mrb[156].mxu0 %vm287_vm0, %v10298_v1  ;;  %v17012_v58 = vmul.f32 %v16887_v22, %v7124_v53 }
 0x44e   : > { %11339 = vmatprep.mubr.msk.f32.mxu0 %vm287_vm0, %v10299_v11  ;;  %11287 = vmatmul.mubr.msk.f32.gmra.mrb[168].mxu1 %vm287_vm0, %v10230_v38  ;;  %v7094_v11 = vrot.slane %v7078_v13, %v18871_v29 }
 0x44f   : > { %11289 = vmatprep.mubr.msk.f32.mxu1 %vm287_vm0, %v10231_v33 }
 0x451   : > { %7360 = vrot.lane.b32.xlu1 %v18864_v46, %s11910_s13  ;;  %11340 = vmatmul.mubr.msk.f32.gmra.mrb[158].mxu0 %vm287_vm0, %v10300_v3  ;;  %v7194_v3 = vsel %vm7193_vm9, %v16999_v37, 0.0 }
 0x452   : > { %11342 = vmatprep.mubr.msk.f32.mxu0 %vm287_vm0, %v10301_v9  ;;  %11290 = vmatmul.mubr.msk.f32.gmra.mrb[170].mxu1 %vm287_vm0, %v10232_v20  ;;  %v7080_v9 = vcombine.high %v7078_v13, %v7078_v13  ;;  %v10236_v13 = vld [vmem:[%s18118_s2 + $0x9d8] sm:$0xff] }
 0x453   : > { %11292 = vmatprep.mubr.msk.f32.mxu1 %vm287_vm0, %v10233_v0  ;;  %v7132_v0 = vrot.slane %v7094_v11, %v18720_v56 }
 0x454   : > { %v16847_v49 = vpop.f32.mrb[132].mxu0 }
 0x455   : > { %7364 = vrot.lane.b32.xlu1 %v18867_v28, %s11910_s13  ;;  %v16857_v32 = vpop.f32.mrb[133].mxu0  ;;  %11343 = vmatmul.mubr.msk.f32.gmra.mrb[160].mxu0 %vm287_vm0, %v10302_v39  ;;  %v7079_v28 = vcombine.high %v7071_v23, %v7071_v23 }
 0x456   : > { %11345 = vmatprep.mubr.msk.f32.mxu0 %vm287_vm0, %v10303_v35  ;;  %11293 = vmatmul.mubr.msk.f32.gmra.mrb[172].mxu1 %vm287_vm0, %v10234_v18  ;;  %v7197_v18 = vsel %vm7193_vm9, %v17012_v58, 0.0 }
 0x457   : > { %v7101_v21 = vrot.slane %v7079_v28, %v18871_v29 }
 0x459   : > { %7368 = vrot.lane.b32.xlu1 %v18868_v61, %s11910_s13  ;;  %11346 = vmatmul.mubr.msk.f32.gmra.mrb[162].mxu0 %vm287_vm0, %v10304_v60  ;;  %v10312_v61 = vld [vmem:[%s18118_s2 + $0xaf8] sm:$0xff]  ;;  %v7111_v55 = vcombine.high %v7101_v21, %v7101_v21 }
 0x45a   : > { %11348 = vmatprep.mubr.msk.f32.mxu0 %vm287_vm0, %v10305_v63  ;;  %v7110_v63 = vcombine.high %v7094_v11, %v7094_v11 }
 0x45b   : > { %v7128_v1 = vrot.slane %v7111_v55, %v18720_v56 }
 0x45d   : > { %6280 = vrot.lane.b32.xlu1 %v6278_v52, %s11905_s28  ;;  %v16866_v40 = vpop.f32.mrb[134].mxu0  ;;  %11349 = vmatmul.mubr.msk.f32.gmra.mrb[164].mxu0 %vm287_vm0, %v10306_v36  ;;  %v7120_v52 = vrot.slane %v7101_v21, %v18720_v56  ;;  %v7108_v36 = vrot.slane %v7080_v9, %v18871_v29  ;;  %v10238_v9 = vld [vmem:[%s18118_s2 + $0x9e8] sm:$0xff] }
 0x45e   : > { %v16877_v30 = vpop.f32.mrb[135].mxu0  ;;  %11351 = vmatprep.mubr.msk.f32.mxu0 %vm287_vm0, %v10307_v42 }
 0x45f   : > { %v16991_v54 = vmul.f32 %v7164_v4, %v7120_v52  ;;  %v7136_v28 = vrot.slane %v7108_v36, %v18720_v56 }
 0x461   : > { %7928 = vperm.xlu1 %11579, %v16823_v44   ;;  %v16896_v41 = vpop.f32.mrb[136].mxu0  ;;  %11352 = vmatmul.mubr.msk.f32.gmra.mrb[166].mxu0 %vm287_vm0, %v10308_v48  ;;  %v7195_v26 = vsel %vm7193_vm9, %v16991_v54, 0.0 }
 0x462   : > { %v16900_v14 = vpop.f32.mrb[137].mxu0  ;;  %11354 = vmatprep.mubr.msk.f32.mxu0 %vm287_vm0, %v10309_v50  ;;  %v7196_v20 = vadd.f32 %v7195_v26, %v7194_v3  ;;  %v7140_v50 = vrot.slane %v7110_v63, %v18720_v56  ;;  %v18881_v63 = vld [vmem:[#allocation30_spill] sm:$0xff] }
 0x464   : > { %v7198_v22 = vadd.f32 %v7197_v18, %v7196_v20 }
 0x465   : > { %7933 = vperm.xlu1 %11579, %v16845_v12   ;;  %v16918_v5 = vpop.f32.mrb[138].mxu0  ;;  %11355 = vmatmul.mubr.msk.f32.gmra.mrb[168].mxu0 %vm287_vm0, %v10310_v8 }
 0x466   : > { %v16935_v46 = vpop.f32.mrb[139].mxu0  ;;  %11357 = vmatprep.mubr.msk.f32.mxu0 %vm287_vm0, %v10311_v59 }
 0x469   : > { %11581 = vset.pattern.permute.xlu1 %v11914_v51  ;;  %11358 = vmatmul.mubr.msk.f32.gmra.mrb[170].mxu0 %vm287_vm0, %v10312_v61 }
 0x46a   : > { %11360 = vmatprep.mubr.msk.f32.mxu0 %vm287_vm0, %v10313_v19 }
 0x46d   : > { %11361 = vmatmul.mubr.msk.f32.gmra.mrb[172].mxu0 %vm287_vm0, %v10314_v45  ;;  %v10235_v45 = vld [vmem:[%s18118_s2 + $0x9d0] sm:$0xff] }
 0x46e   : > { %v16910_v47 = vpop.permute.xlu0 %7169  ;;  %11295 = vmatprep.mubr.msk.f32.mxu1 %vm287_vm0, %v10235_v45 }
 0x46f   : > { %v17027_v23 = vmul.f32 %v16910_v47, %v7132_v0  ;;  %11296 = vmatmul.mubr.msk.f32.gmra.mrb[174].mxu1 %vm287_vm0, %v10236_v13 }
 0x471   : > { %v7201_v59 = vsel %vm7193_vm9, %v17027_v23, 0.0 }
 0x472   : > { %v16930_v17 = vpop.permute.xlu0 %5086 }
 0x473   : > { %18869 = vst [vmem:[#allocation147_spill] sm:$0xff] %v16930_v17 }
 0x476   : > { %v16943_v6 = vpop.permute.xlu0 %4160 }
 0x477   : > { %18870 = vst [vmem:[#allocation6_spill] sm:$0xff] %v16943_v6 }
 0x47a   : > { %v16955_v34 = vpop.permute.xlu0 %5158 }
 0x47b   : > { %18872 = vst [vmem:[#allocation143_spill] sm:$0xff] %v16955_v34  ;;  %v7168_v24 = vpop.permute.xlu1 %7167 }
 0x47c   : > { %v17014_v33 = vmul.f32 %v7168_v24, %v7128_v1  ;;  %v7112_v24 = vcombine.high %v7108_v36, %v7108_v36 }
 0x47e   : > { %v16965_v25 = vpop.permute.xlu0 %5278  ;;  %v7199_v60 = vsel %vm7193_vm9, %v17014_v33, 0.0  ;;  %v7144_v47 = vrot.slane %v7112_v24, %v18720_v56 }
 0x47f   : > { %18873 = vst [vmem:[#allocation25_spill] sm:$0xff] %v16965_v25  ;;  %v16971_v43 = vpop.permute.xlu1 %4028  ;;  %v7200_v4 = vadd.f32 %v7199_v60, %v7198_v22 }
 0x480   : > { %18874 = vst [vmem:[#allocation15_spill] sm:$0xff] %v16971_v43 }
 0x481   : > { %v7202_v62 = vadd.f32 %v7201_v59, %v7200_v4  ;;  %v10316_v59 = vld [vmem:[%s18118_s2 + $0xb18] sm:$0xff] }
 0x482   : > { %v16981_v31 = vpop.permute.xlu0 %4280 }
 0x483   : > { %18875 = vst [vmem:[#allocation95_spill] sm:$0xff] %v16981_v31  ;;  %v16987_v57 = vpop.permute.xlu1 %4100 }
 0x484   : > { %18876 = vst [vmem:[#allocation90_spill] sm:$0xff] %v16987_v57 }
 0x486   : > { %v7174_v2 = vpop.permute.xlu0 %7173 }
 0x487   : > { %v17001_v15 = vpop.permute.xlu1 %4220  ;;  %v17033_v21 = vmul.f32 %v7174_v2, %v7140_v50  ;;  %v10237_v2 = vld [vmem:[%s18118_s2 + $0x9e0] sm:$0xff] }
 0x488   : > { %18877 = vst [vmem:[#allocation8_spill] sm:$0xff] %v17001_v15  ;;  %11298 = vmatprep.mubr.msk.f32.mxu1 %vm287_vm0, %v10237_v2 }
 0x489   : > { %v7205_v55 = vsel %vm7193_vm9, %v17033_v21, 0.0  ;;  %11299 = vmatmul.mubr.msk.f32.gmra.mrb[176].mxu1 %vm287_vm0, %v10238_v9 }
 0x48a   : > { %v7235_v38 = vpop.permute.xlu0 %7234 }
 0x48b   : > { %v17016_v39 = vpop.permute.xlu1 %5218  ;;  %v7258_v20 = vmul.f32 %v7235_v38, %v16999_v37 }
 0x48c   : > { %18878 = vst [vmem:[#allocation26_spill] sm:$0xff] %v17016_v39 }
 0x48d   : > { %v7266_v22 = vsel %vm7193_vm9, %v7258_v20, 0.0 }
 0x48e   : > { %v7239_v35 = vpop.permute.xlu0 %7238 }
 0x48f   : > { %v17024_v42 = vpop.permute.xlu1 %5338  ;;  %v7260_v18 = vmul.f32 %v7239_v35, %v17012_v58  ;;  %v10315_v35 = vld [vmem:[%s18118_s2 + $0xb10] sm:$0xff] }
 0x490   : > { %18879 = vst [vmem:[#allocation116_spill] sm:$0xff] %v17024_v42  ;;  %11363 = vmatprep.mubr.msk.f32.mxu0 %vm287_vm0, %v10315_v35 }
 0x491   : > { %v7269_v24 = vsel %vm7193_vm9, %v7260_v18, 0.0  ;;  %11364 = vmatmul.mubr.msk.f32.gmra.mrb[174].mxu0 %vm287_vm0, %v10316_v59 }
 0x492   : > { %v7243_v48 = vpop.permute.xlu0 %7242 }
 0x493   : > { %v7172_v8 = vpop.permute.xlu1 %7171  ;;  %v7262_v38 = vmul.f32 %v7243_v48, %v17027_v23 }
 0x494   : > { %v17035_v27 = vmul.f32 %v7172_v8, %v7136_v28 }
 0x496   : > { %v7247_v61 = vpop.permute.xlu0 %7246  ;;  %v7203_v19 = vsel %vm7193_vm9, %v17035_v27, 0.0 }
 0x497   : > { %v7176_v52 = vpop.permute.xlu1 %7175  ;;  %v7204_v7 = vadd.f32 %v7203_v19, %v7202_v62  ;;  %v7264_v45 = vmul.f32 %v7247_v61, %v17033_v21 }
 0x498   : > { %v17040_v10 = vmul.f32 %v7176_v52, %v7144_v47  ;;  %v18882_v47 = vld [vmem:[#allocation135_spill] sm:$0xff] }
 0x499   : > { %v7206_v53 = vadd.f32 %v7205_v55, %v7204_v7  ;;  %v7273_v55 = vsel %vm7193_vm9, %v7262_v38, 0.0  ;;  %v7277_v9 = vsel %vm7193_vm9, %v7264_v45, 0.0 }
 0x49a   : > { %v7207_v26 = vsel %vm7193_vm9, %v17040_v10, 0.0  ;;  %v7297_v3 = vpop.permute.xlu0 %7296 }
 0x49b   : > { %v17057_v1 = vpop.permute.xlu1 %7222  ;;  %v7208_v11 = vadd.f32 %v7207_v26, %v7206_v53 }
 0x49c   : > { %18880 = vst [vmem:[#allocation29_spill] sm:$0xff] %v17057_v1 }
 0x49d   : > { %7210 = vrot.lane.b32.xlu0 %v7208_v11, %s11902_s26 }
 0x49e   : > { %v7301_v36 = vpop.permute.xlu0 %7300 }
 0x49f   : > { %v7237_v0 = vpop.permute.xlu1 %7236 }
 0x4a0   : > { %v7259_v60 = vmul.f32 %v7237_v0, %v16991_v54 }
 0x4a1   : > { %6220 = vrot.lane.b32.xlu0 %v18881_v63, %s11905_s28 }
 0x4a2   : > { %v7267_v4 = vsel %vm7193_vm9, %v7259_v60, 0.0  ;;  %v7305_v52 = vpop.permute.xlu0 %7304 }
 0x4a3   : > { %v7268_v50 = vadd.f32 %v7267_v4, %v7266_v22  ;;  %v7241_v28 = vpop.permute.xlu1 %7240  ;;  %v7319_v4 = vmul.f32 %v7297_v3, %v16991_v54  ;;  %v7321_v3 = vmul.f32 %v7301_v36, %v17014_v33  ;;  %v7323_v45 = vmul.f32 %v7305_v52, %v17035_v27 }
 0x4a4   : > { %v7261_v8 = vmul.f32 %v7241_v28, %v17014_v33 }
 0x4a5   : > { %v7270_v62 = vadd.f32 %v7269_v24, %v7268_v50  ;;  %6340 = vrot.lane.b32.xlu0 %v18882_v47, %s11905_s28  ;;  %v7913_v24 = vld [vmem:[%s18119_s3] sm:$0xff]  ;;  %v7327_v59 = vsel %vm7193_vm9, %v7319_v4, 0.0 }
 0x4a6   : > { %v7271_v19 = vsel %vm7193_vm9, %v7261_v8, 0.0  ;;  %v7309_v0 = vpop.permute.xlu0 %7308 }
 0x4a7   : > { %v7272_v48 = vadd.f32 %v7271_v19, %v7270_v62  ;;  %v7245_v7 = vpop.permute.xlu1 %7244 }
 0x4a8   : > { %v7263_v13 = vmul.f32 %v7245_v7, %v17035_v27 }
 0x4a9   : > { %v7274_v2 = vadd.f32 %v7273_v55, %v7272_v48  ;;  %v7331_v55 = vsel %vm7193_vm9, %v7321_v3, 0.0 }
 0x4aa   : > { %v7275_v53 = vsel %vm7193_vm9, %v7263_v13, 0.0  ;;  %v17096_v50 = vpop.f32.mrb[140].mxu1  ;;  %v7355_v8 = vpop.permute.xlu0 %7354 }
 0x4ab   : > { %v7276_v26 = vadd.f32 %v7275_v53, %v7274_v2  ;;  %v7249_v11 = vpop.permute.xlu1 %7248  ;;  %v17102_v38 = vpop.f32.mrb[141].mxu1  ;;  %v7378_v52 = vmul.f32 %v7355_v8, %v16999_v37 }
 0x4ac   : > { %v7265_v20 = vmul.f32 %v7249_v11, %v17040_v10 }
 0x4ad   : > { %v7278_v18 = vadd.f32 %v7277_v9, %v7276_v26  ;;  %v7335_v9 = vsel %vm7193_vm9, %v7323_v45, 0.0  ;;  %v7386_v8 = vsel %vm7193_vm9, %v7378_v52, 0.0 }
 0x4ae   : > { %v7279_v60 = vsel %vm7193_vm9, %v7265_v20, 0.0  ;;  %v7359_v2 = vpop.permute.xlu0 %7358  ;;  %v7325_v20 = vmul.f32 %v7309_v0, %v17040_v10 }
 0x4af   : > { %v7280_v63 = vadd.f32 %v7279_v60, %v7278_v18  ;;  %v7295_v22 = vpop.permute.xlu1 %7294  ;;  %v7380_v0 = vmul.f32 %v7359_v2, %v17012_v58 }
 0x4b0   : > { %v7318_v61 = vmul.f32 %v7295_v22, %v16999_v37 }
 0x4b1   : > { %7282 = vrot.lane.b32.xlu0 %v7280_v63, %s11902_s26 }
 0x4b2   : > { %v7326_v28 = vsel %vm7193_vm9, %v7318_v61, 0.0  ;;  %v7363_v22 = vpop.permute.xlu0 %7362 }
 0x4b3   : > { %v7299_v35 = vpop.permute.xlu1 %7298  ;;  %v7328_v47 = vadd.f32 %v7327_v59, %v7326_v28  ;;  %v8978_v28 = vld [vmem:[%s18119_s3 + $0x18] sm:$0xff] }
 0x4b4   : > { %v7320_v62 = vmul.f32 %v7299_v35, %v17012_v58 }
 0x4b5   : > { %7923 = vperm.xlu0 %11578, %v7913_v24  }
 0x4b6   : > { %v7329_v19 = vsel %vm7193_vm9, %v7320_v62, 0.0 }
 0x4b7   : > { %v7330_v48 = vadd.f32 %v7329_v19, %v7328_v47  ;;  %v7303_v7 = vpop.permute.xlu1 %7302  ;;  %v8979_v47 = vld [vmem:[%s18119_s3 + $0x20] sm:$0xff]  ;;  %v7389_v19 = vsel %vm7193_vm9, %v7380_v0, 0.0 }
 0x4b8   : > { %v7322_v13 = vmul.f32 %v7303_v7, %v17027_v23 }
 0x4b9   : > { %v7332_v53 = vadd.f32 %v7331_v55, %v7330_v48  ;;  %11580 = vset.pattern.permute.xlu0 %v11914_v51  ;;  %v7382_v48 = vmul.f32 %v7363_v22, %v17027_v23  ;;  %v7367_v55 = vpop.permute.xlu0 %7366  ;;  %v8981_v22 = vld [vmem:[%s18119_s3 + $0x30] sm:$0xff] }
 0x4ba   : > { %v7333_v36 = vsel %vm7193_vm9, %v7322_v13, 0.0  ;;  %8985 = vperm.xlu0 %11580, %v7913_v24   ;;  %v7339_v24 = vsel %vm7193_vm9, %v7325_v20, 0.0 }
 0x4bb   : > { %v7334_v26 = vadd.f32 %v7333_v36, %v7332_v53  ;;  %v7307_v11 = vpop.permute.xlu1 %7306  ;;  %v18883_v53 = vld [vmem:[#allocation145_spill] sm:$0xff] }
 0x4bc   : > { %v7324_v18 = vmul.f32 %v7307_v11, %v17033_v21  ;;  %v7393_v11 = vsel %vm7193_vm9, %v7382_v48, 0.0 }
 0x4bd   : > { %v7336_v60 = vadd.f32 %v7335_v9, %v7334_v26  ;;  %v8980_v26 = vld [vmem:[%s18119_s3 + $0x28] sm:$0xff]  ;;  %v7384_v9 = vmul.f32 %v7367_v55, %v17033_v21 }
 0x4be   : > { %v7337_v63 = vsel %vm7193_vm9, %v7324_v18, 0.0  ;;  %8995 = vperm.xlu0 %11580, %v16845_v12  }
 0x4bf   : > { %v7338_v4 = vadd.f32 %v7337_v63, %v7336_v60  ;;  %v7357_v61 = vpop.permute.xlu1 %7356 }
 0x4c0   : > { %v7379_v35 = vmul.f32 %v7357_v61, %v16991_v54 }
 0x4c1   : > { %v7340_v59 = vadd.f32 %v7339_v24, %v7338_v4  ;;  %v7397_v4 = vsel %vm7193_vm9, %v7384_v9, 0.0 }
 0x4c2   : > { %v7387_v3 = vsel %vm7193_vm9, %v7379_v35, 0.0  ;;  %9000 = vperm.xlu0 %11580, %v8978_v28  }
 0x4c3   : > { %v7388_v12 = vadd.f32 %v7387_v3, %v7386_v8  ;;  %7342 = vrot.lane.b32.xlu1 %v7340_v59, %s11902_s26  ;;  %v7361_v62 = vpop.permute.xlu1 %7360  ;;  %v10239_v59 = vld [vmem:[%s18118_s2 + $0x9f0] sm:$0xff]  ;;  %v10318_v3 = vld [vmem:[%s18118_s2 + $0xb28] sm:$0xff] }
 0x4c4   : > { %v7381_v7 = vmul.f32 %v7361_v62, %v17014_v33  ;;  %11301 = vmatprep.mubr.msk.f32.mxu1 %vm287_vm0, %v10239_v59 }
 0x4c5   : > { %v7390_v45 = vadd.f32 %v7389_v19, %v7388_v12 }
 0x4c6   : > { %v7391_v13 = vsel %vm7193_vm9, %v7381_v7, 0.0  ;;  %9005 = vperm.xlu0 %11580, %v8979_v47  }
 0x4c7   : > { %v7392_v2 = vadd.f32 %v7391_v13, %v7390_v45  ;;  %6400 = vrot.lane.b32.xlu1 %v18883_v53, %s11905_s28  ;;  %v7365_v36 = vpop.permute.xlu1 %7364  ;;  %v17217_v45 = vpop.permute.xlu0 %6148 }
 0x4c8   : > { %v7383_v20 = vmul.f32 %v7365_v36, %v17035_v27  ;;  %18887 = vst [vmem:[#allocation141_spill] sm:$0xff] %v17217_v45 }
 0x4c9   : > { %v7394_v18 = vadd.f32 %v7393_v11, %v7392_v2 }
 0x4ca   : > { %v7395_v60 = vsel %vm7193_vm9, %v7383_v20, 0.0  ;;  %9010 = vperm.xlu0 %11580, %v8980_v26  }
 0x4cb   : > { %v7396_v52 = vadd.f32 %v7395_v60, %v7394_v18  ;;  %8990 = vperm.xlu1 %11581, %v16823_v44   ;;  %v7369_v63 = vpop.permute.xlu1 %7368  ;;  %v17157_v44 = vpop.f32.mrb[142].mxu1 }
 0x4cc   : > { %v7385_v61 = vmul.f32 %v7369_v63, %v17040_v10  ;;  %v7724_v8 = vpop.f32.mrb[143].mxu1 }
 0x4cd   : > { %v7398_v24 = vadd.f32 %v7397_v4, %v7396_v52 }
 0x4ce   : > { %v7399_v0 = vsel %vm7193_vm9, %v7385_v61, 0.0  ;;  %9015 = vperm.xlu0 %11580, %v8981_v22  }
 0x4cf   : > { %v7400_v35 = vadd.f32 %v7399_v0, %v7398_v24  ;;  %11582 = vset.pattern.permute.xlu1 %v11913_v16  ;;  %v10240_v16 = vld [vmem:[%s18118_s2 + $0x9f8] sm:$0xff]  ;;  %v17215_v48 = vpop.permute.xlu1 %6280 }
 0x4d0   : > { %7938 = vperm.xlu1 %11582, %v8978_v28   ;;  %v10317_v28 = vld [vmem:[%s18118_s2 + $0xb20] sm:$0xff]  ;;  %11302 = vmatmul.mubr.msk.f32.gmra.mrb[178].mxu1 %vm287_vm0, %v10240_v16  ;;  %18886 = vst [vmem:[#allocation82_spill] sm:$0xff] %v17215_v48 }
 0x4d1   : > { %11366 = vmatprep.mubr.msk.f32.mxu0 %vm287_vm0, %v10317_v28 }
 0x4d2   : > { %7402 = vrot.lane.b32.xlu0 %v7400_v35, %s11902_s26  ;;  %11367 = vmatmul.mubr.msk.f32.gmra.mrb[176].mxu0 %vm287_vm0, %v10318_v3 }
 0x4d3   : > { %v17195_v12 = vpop.f32.mrb[144].mxu1 }
 0x4d4   : > { %7943 = vperm.xlu1 %11582, %v8979_v47  }
 0x4d6   : > { %7416 = vrot.lane.b32.xlu0 %v16847_v49, %s11910_s13  ;;  %v17168_v49 = vpop.f32.mrb[140].mxu0 }
 0x4d8   : > { %7948 = vperm.xlu1 %11582, %v8980_v26  }
 0x4da   : > { %7420 = vrot.lane.b32.xlu0 %v16866_v40, %s11910_s13  ;;  %v7920_v40 = vld [vmem:[%s18119_s3 + $0x38] sm:$0xff] }
 0x4dc   : > { %7953 = vperm.xlu1 %11582, %v8981_v22  }
 0x4de   : > { %7424 = vrot.lane.b32.xlu0 %v16896_v41, %s11910_s13  ;;  %v17193_v41 = vpop.f32.mrb[141].mxu0 }
 0x4e0   : > { %7958 = vperm.xlu1 %11582, %v7920_v40   ;;  %v7929_v7 = vpop.permute.xlu1 %7928 }
 0x4e1   : > { %v7962_v26 = vadd.f32 %v17096_v50, %v7929_v7 }
 0x4e2   : > { %7428 = vrot.lane.b32.xlu0 %v16918_v5, %s11910_s13  ;;  %v17197_v5 = vpop.f32.mrb[142].mxu0 }
 0x4e3   : > { %18884 = vst [vmem:[#allocation37_spill] sm:$0xff] %v17197_v5  ;;  %v17201_v62 = vpop.f32.mrb[143].mxu0  ;;  %v7976_v9 = vsel %vm729_vm7, %v7962_v26, -inf }
 0x4e4   : > { %11583 = vset.pattern.permute.xlu1 %v11914_v51  ;;  %v17199_v51 = vpop.f32.mrb[145].mxu1  ;;  %v7934_v55 = vpop.permute.xlu1 %7933  ;;  %v7977_v60 = vrot.slane %v7976_v9, 4 }
 0x4e5   : > { %9020 = vperm.xlu1 %11583, %v7920_v40   ;;  %v17211_v19 = vpop.f32.mrb[146].mxu1  ;;  %v7963_v53 = vadd.f32 %v7934_v55, %v7724_v8 }
 0x4e6   : > { %v7978_v22 = vmax.f32 %v7976_v9, %v7977_v60 }
 0x4e7   : > { %v7983_v11 = vsel %vm729_vm7, %v7963_v53, -inf }
 0x4e8   : > { %v7984_v20 = vrot.slane %v7983_v11, 4  ;;  %v7979_v50 = vrot.slane %v7978_v22, 2 }
 0x4e9   : > { %7414 = vrot.lane.b32.xlu1 %v16857_v32, %s11910_s13  ;;  %v17203_v32 = vpop.f32.mrb[144].mxu0 }
 0x4ea   : > { %18885 = vst [vmem:[#allocation21_spill] sm:$0xff] %v17203_v32  ;;  %v17205_v47 = vpop.f32.mrb[145].mxu0  ;;  %v7985_v52 = vmax.f32 %v7983_v11, %v7984_v20  ;;  %v7980_v8 = vmax.f32 %v7978_v22, %v7979_v50 }
 0x4ec   : > { %v7986_v61 = vrot.slane %v7985_v52, 2  ;;  %v7981_v11 = vrot.slane %v7980_v8, 1 }
 0x4ed   : > { %7418 = vrot.lane.b32.xlu1 %v16877_v30, %s11910_s13  ;;  %v17207_v30 = vpop.f32.mrb[146].mxu0 }
 0x4ee   : > { %v7987_v16 = vmax.f32 %v7985_v52, %v7986_v61  ;;  %v7982_v6 = vmax.f32 %v7980_v8, %v7981_v11 }
 0x4f0   : > { %v7988_v55 = vrot.slane %v7987_v16, 1  ;;  %v8026_v25 = vsub.f32 %v7962_v26, %v7982_v6 }
 0x4f1   : > { %7422 = vrot.lane.b32.xlu1 %v16900_v14, %s11910_s13  ;;  %v17209_v14 = vpop.f32.mrb[147].mxu0 }
 0x4f2   : > { %v7989_v60 = vmax.f32 %v7987_v16, %v7988_v55 }
 0x4f5   : > { %7426 = vrot.lane.b32.xlu1 %v16935_v46, %s11910_s13  ;;  %v17213_v46 = vpop.f32.mrb[147].mxu1 }
 0x4f6   : > { %v17219_v13 = vpop.f32.mrb[148].mxu1 }
 0x4f7   : > { %v17221_v2 = vpop.f32.mrb[149].mxu1 }
 0x4f8   : > { %v17230_v63 = vpop.f32.mrb[150].mxu1 }
 0x4f9   : > { %v17234_v24 = vpop.f32.mrb[151].mxu1 }
 0x4fa   : > { %18891 = vst [vmem:[#allocation133_spill] sm:$0xff] %v17234_v24  ;;  %v17236_v0 = vpop.f32.mrb[152].mxu1 }
 0x4fb   : > { %18892 = vst [vmem:[#allocation87_spill] sm:$0xff] %v17236_v0  ;;  %v17238_v35 = vpop.f32.mrb[153].mxu1 }
 0x4fc   : > { %v17242_v28 = vpop.f32.mrb[154].mxu1 }
 0x4fd   : > { %18894 = vst [vmem:[#allocation62_spill] sm:$0xff] %v17242_v28  ;;  %v17244_v40 = vpop.f32.mrb[155].mxu1 }
 0x506   : > { %v17248_v39 = vpop.f32.mrb[156].mxu1 }
 0x507   : > { %18895 = vst [vmem:[#allocation136_spill] sm:$0xff] %v17248_v39 }
 0x50f   : > { %v17223_v36 = vpop.permute.xlu0 %7210 }
 0x510   : > { %18888 = vst [vmem:[#allocation84_spill] sm:$0xff] %v17223_v36 }
 0x513   : > { %v17228_v18 = vpop.permute.xlu0 %6220 }
 0x514   : > { %18889 = vst [vmem:[#allocation132_spill] sm:$0xff] %v17228_v18 }
 0x517   : > { %v17232_v4 = vpop.permute.xlu0 %6340 }
 0x518   : > { %18890 = vst [vmem:[#allocation10_spill] sm:$0xff] %v17232_v4  ;;  %v17250_v4 = vpop.f32.mrb[157].mxu1 }
 0x519   : > { %v17252_v61 = vpop.f32.mrb[158].mxu1 }
 0x51a   : > { %18896 = vst [vmem:[#allocation58_spill] sm:$0xff] %v17252_v61  ;;  %v17254_v50 = vpop.f32.mrb[159].mxu1 }
 0x51b   : > { %18897 = vst [vmem:[#allocation134_spill] sm:$0xff] %v17254_v50 }
 0x523   : > { %v17240_v59 = vpop.permute.xlu0 %7282 }
 0x524   : > { %18893 = vst [vmem:[#allocation97_spill] sm:$0xff] %v17240_v59  ;;  %v8027_v59 = vsub.f32 %v7963_v53, %v7989_v60  ;;  %v8035_v53 = vmul.f32 1.442695, %v8026_v25 }
 0x526   : > { %v8037_v8 = vmul.f32 1.442695, %v8027_v59 }
 0x528   : > { %11811 = vpow2.f32 %v8037_v8  ;;  %v10319_v8 = vld [vmem:[%s18118_s2 + $0xb30] sm:$0xff] }
 0x529   : > { %11813 = vpow2.f32 %v8035_v53  ;;  %11369 = vmatprep.mubr.msk.f32.mxu0 %vm287_vm0, %v10319_v8 }
 0x532   : > { %v17311_v43 = vpop.eup %11811 }
 0x534   : > { %v7924_v3 = vpop.permute.xlu0 %7923 }
 0x535   : > { %v7961_v7 = vadd.f32 %v7924_v3, %v17102_v38  ;;  %v17256_v3 = vpop.f32.mrb[160].mxu1  ;;  %v17260_v16 = vpop.permute.xlu1 %7342 }
 0x536   : > { %18898 = vst [vmem:[#allocation34_spill] sm:$0xff] %v17256_v3  ;;  %v17258_v18 = vpop.f32.mrb[161].mxu1  ;;  %18900 = vst [vmem:[#allocation142_spill] sm:$0xff] %v17260_v16 }
 0x537   : > { %v7969_v9 = vsel %vm729_vm7, %v7961_v7, -inf  ;;  %18899 = vst [vmem:[#allocation114_spill] sm:$0xff] %v17258_v18  ;;  %v17262_v55 = vpop.f32.mrb[162].mxu1 }
 0x538   : > { %v7970_v20 = vrot.slane %v7969_v9, 4  ;;  %18901 = vst [vmem:[#allocation117_spill] sm:$0xff] %v17262_v55  ;;  %v17264_v11 = vpop.f32.mrb[163].mxu1  ;;  %v17297_v55 = vpop.f32.mrb[148].mxu0 }
 0x539   : > { %v8986_v22 = vpop.permute.xlu0 %8985  ;;  %18902 = vst [vmem:[#allocation85_spill] sm:$0xff] %v17264_v11  ;;  %18912 = vst [vmem:[#allocation96_spill] sm:$0xff] %v17297_v55 }
 0x53a   : > { %v7971_v48 = vmax.f32 %v7969_v9, %v7970_v20  ;;  %v17266_v20 = vpop.f32.mrb[164].mxu1  ;;  %v17305_v45 = vadd.f32 %v8986_v22, %v17193_v41 }
 0x53b   : > { %18903 = vst [vmem:[#allocation138_spill] sm:$0xff] %v17266_v20  ;;  %v17268_v34 = vpop.f32.mrb[165].mxu1 }
 0x53c   : > { %v7972_v52 = vrot.slane %v7971_v48, 2  ;;  %v9031_v41 = vsel %vm729_vm7, %v17305_v45, -inf }
 0x53d   : > { %v8996_v60 = vpop.permute.xlu0 %8995  ;;  %v9032_v20 = vrot.slane %v9031_v41, 4 }
 0x53e   : > { %v7973_v38 = vmax.f32 %v7971_v48, %v7972_v52  ;;  %v17270_v48 = vpop.f32.mrb[166].mxu1  ;;  %v17274_v52 = vpop.permute.xlu1 %6400 }
 0x53f   : > { %18904 = vst [vmem:[#allocation5_spill] sm:$0xff] %v17270_v48  ;;  %v17272_v6 = vpop.f32.mrb[167].mxu1  ;;  %18906 = vst [vmem:[#allocation119_spill] sm:$0xff] %v17274_v52  ;;  %v9033_v56 = vmax.f32 %v9031_v41, %v9032_v20 }
 0x540   : > { %v7974_v9 = vrot.slane %v7973_v38, 1  ;;  %18905 = vst [vmem:[#allocation110_spill] sm:$0xff] %v17272_v6  ;;  %v17276_v16 = vpop.f32.mrb[168].mxu1 }
 0x541   : > { %18907 = vst [vmem:[#allocation146_spill] sm:$0xff] %v17276_v16  ;;  %v17278_v59 = vpop.f32.mrb[169].mxu1  ;;  %v17282_v57 = vpop.permute.xlu0 %9000  ;;  %v9034_v20 = vrot.slane %v9033_v56, 2 }
 0x542   : > { %v7975_v26 = vmax.f32 %v7973_v38, %v7974_v9  ;;  %18908 = vst [vmem:[#allocation103_spill] sm:$0xff] %v17278_v59  ;;  %v17280_v15 = vpop.f32.mrb[170].mxu1  ;;  %v10320_v38 = vld [vmem:[%s18118_s2 + $0xb38] sm:$0xff] }
 0x543   : > { %18909 = vst [vmem:[#allocation55_spill] sm:$0xff] %v17280_v15  ;;  %v17284_v25 = vpop.f32.mrb[171].mxu1  ;;  %11370 = vmatmul.mubr.msk.f32.gmra.mrb[178].mxu0 %vm287_vm0, %v10320_v38  ;;  %v17318_v38 = vpop.eup %11813  ;;  %v9035_v48 = vmax.f32 %v9033_v56, %v9034_v20 }
 0x544   : > { %18910 = vst [vmem:[#allocation123_spill] sm:$0xff] %v17284_v25  ;;  %v8025_v9 = vsub.f32 %v7961_v7, %v7975_v26  ;;  %v17294_v53 = vpop.f32.mrb[172].mxu1  ;;  %v17302_v25 = vpop.f32.mrb[149].mxu0 }
 0x545   : > { %18911 = vst [vmem:[#allocation36_spill] sm:$0xff] %v17294_v53  ;;  %v17299_v36 = vpop.f32.mrb[173].mxu1  ;;  %18913 = vst [vmem:[#allocation91_spill] sm:$0xff] %v17302_v25  ;;  %v17307_v17 = vpop.f32.mrb[150].mxu0 }
 0x546   : > { %18914 = vst [vmem:[#allocation49_spill] sm:$0xff] %v17307_v17  ;;  %v8033_v7 = vmul.f32 1.442695, %v8025_v9  ;;  %v17309_v26 = vpop.f32.mrb[151].mxu0  ;;  %v9006_v59 = vpop.permute.xlu0 %9005  ;;  %v8063_v9 = vsel %vm729_vm7, %v17311_v43, 0.0 }
 0x547   : > { %18915 = vst [vmem:[#allocation7_spill] sm:$0xff] %v17309_v26  ;;  %v17313_v8 = vpop.f32.mrb[152].mxu0 }
 0x548   : > { %18916 = vst [vmem:[#allocation93_spill] sm:$0xff] %v17313_v8  ;;  %v17316_v55 = vpop.f32.mrb[153].mxu0  ;;  %11815 = vpow2.f32 %v8033_v7  ;;  %v8064_v7 = vrot.slane %v8063_v9, 4 }
 0x549   : > { %18917 = vst [vmem:[#allocation31_spill] sm:$0xff] %v17316_v55  ;;  %v17322_v22 = vpop.f32.mrb[154].mxu0  ;;  %v17347_v55 = vadd.f32 %v8996_v60, %v17201_v62 }
 0x54a   : > { %v17292_v1 = vpop.permute.xlu1 %8990  ;;  %18918 = vst [vmem:[#allocation92_spill] sm:$0xff] %v17322_v22  ;;  %v17327_v50 = vpop.f32.mrb[155].mxu0 }
 0x54b   : > { %18919 = vst [vmem:[#allocation22_spill] sm:$0xff] %v17327_v50  ;;  %v17340_v15 = vpop.permute.xlu0 %9010  ;;  %v9045_v62 = vsel %vm729_vm7, %v17347_v55, -inf }
 0x54c   : > { %18923 = vst [vmem:[#allocation51_spill] sm:$0xff] %v17340_v15 }
 0x54f   : > { %v7939_v3 = vpop.permute.xlu1 %7938 }
 0x550   : > { %v7964_v61 = vadd.f32 %v17157_v44, %v7939_v3  ;;  %v17329_v44 = vpop.f32.mrb[156].mxu0  ;;  %v8056_v3 = vsel %vm729_vm7, %v17318_v38, 0.0 }
 0x551   : > { %18920 = vst [vmem:[#allocation27_spill] sm:$0xff] %v17329_v44  ;;  %v17336_v22 = vpop.f32.mrb[157].mxu0  ;;  %v8057_v44 = vrot.slane %v8056_v3, 4 }
 0x552   : > { %v7990_v17 = vsel %vm729_vm7, %v7964_v61, -inf  ;;  %18921 = vst [vmem:[#allocation100_spill] sm:$0xff] %v17336_v22  ;;  %v17338_v0 = vpop.f32.mrb[158].mxu0 }
 0x553   : > { %v7991_v8 = vrot.slane %v7990_v17, 4  ;;  %v7944_v53 = vpop.permute.xlu1 %7943  ;;  %18922 = vst [vmem:[#allocation17_spill] sm:$0xff] %v17338_v0  ;;  %v17344_v24 = vpop.f32.mrb[159].mxu0 }
 0x554   : > { %v17334_v39 = vadd.f32 %v7944_v53, %v17199_v51  ;;  %18924 = vst [vmem:[#allocation74_spill] sm:$0xff] %v17344_v24  ;;  %v17349_v16 = vpop.f32.mrb[160].mxu0  ;;  %v8058_v24 = vadd.f32 %v8057_v44, %v8056_v3 }
 0x555   : > { %v7992_v28 = vmax.f32 %v7990_v17, %v7991_v8  ;;  %18925 = vst [vmem:[#allocation20_spill] sm:$0xff] %v17349_v16  ;;  %v17351_v17 = vpop.f32.mrb[161].mxu0  ;;  %v8065_v8 = vadd.f32 %v8064_v7, %v8063_v9  ;;  %v17361_v16 = vpop.eup %11815  ;;  %v9046_v7 = vrot.slane %v9045_v62, 4 }
 0x556   : > { %v7997_v50 = vsel %vm729_vm7, %v17334_v39, -inf  ;;  %18926 = vst [vmem:[#allocation129_spill] sm:$0xff] %v17351_v17  ;;  %v17353_v52 = vpop.f32.mrb[162].mxu0  ;;  %v17363_v9 = vpop.permute.xlu0 %9015 }
 0x557   : > { %v7993_v11 = vrot.slane %v7992_v28, 2  ;;  %v7998_v51 = vrot.slane %v7997_v50, 4  ;;  %v7949_v53 = vpop.permute.xlu1 %7948  ;;  %18927 = vst [vmem:[#allocation67_spill] sm:$0xff] %v17353_v52  ;;  %v17355_v29 = vpop.f32.mrb[163].mxu0  ;;  %v8066_v41 = vrot.slane %v8065_v8, 2  ;;  %v8049_v52 = vsel %vm729_vm7, %v17361_v16, 0.0 }
 0x558   : > { %18928 = vst [vmem:[#allocation124_spill] sm:$0xff] %v17355_v29  ;;  %v17359_v31 = vpop.f32.mrb[164].mxu0  ;;  %v17368_v44 = vadd.f32 %v17195_v12, %v7949_v53 }
 0x559   : > { %v7994_v0 = vmax.f32 %v7992_v28, %v7993_v11  ;;  %v7999_v18 = vmax.f32 %v7997_v50, %v7998_v51  ;;  %18929 = vst [vmem:[#allocation94_spill] sm:$0xff] %v17359_v31  ;;  %v17365_v11 = vpop.f32.mrb[165].mxu0  ;;  %v8059_v51 = vrot.slane %v8058_v24, 2 }
 0x55a   : > { %18930 = vst [vmem:[#allocation23_spill] sm:$0xff] %v17365_v11  ;;  %v17370_v3 = vpop.f32.mrb[166].mxu0  ;;  %v9047_v11 = vmax.f32 %v9045_v62, %v9046_v7  ;;  %v17387_v20 = vpop.permute.xlu0 %7402 }
 0x55b   : > { %v7995_v42 = vrot.slane %v7994_v0, 1  ;;  %v8000_v60 = vrot.slane %v7999_v18, 2  ;;  %v7954_v26 = vpop.permute.xlu1 %7953  ;;  %18931 = vst [vmem:[#allocation75_spill] sm:$0xff] %v17370_v3  ;;  %v17374_v31 = vpop.f32.mrb[167].mxu0  ;;  %v8050_v3 = vrot.slane %v8049_v52, 4  ;;  %v8060_v56 = vadd.f32 %v8059_v51, %v8058_v24  ;;  %18936 = vst [vmem:[#allocation4_spill] sm:$0xff] %v17387_v20 }
 0x55c   : > { %18932 = vst [vmem:[#allocation101_spill] sm:$0xff] %v17374_v31  ;;  %v17381_v12 = vpop.f32.mrb[168].mxu0  ;;  %v9048_v51 = vrot.slane %v9047_v11, 2 }
 0x55d   : > { %v7996_v28 = vmax.f32 %v7994_v0, %v7995_v42  ;;  %v8001_v50 = vmax.f32 %v7999_v18, %v8000_v60  ;;  %v17377_v42 = vadd.f32 %v9006_v59, %v17205_v47  ;;  %v8004_v18 = vsel %vm729_vm7, %v17368_v44, -inf  ;;  %18933 = vst [vmem:[#allocation118_spill] sm:$0xff] %v17381_v12  ;;  %v17383_v60 = vpop.f32.mrb[169].mxu0 }
 0x55e   : > { %v8067_v0 = vadd.f32 %v8066_v41, %v8065_v8  ;;  %18934 = vst [vmem:[#allocation52_spill] sm:$0xff] %v17383_v60  ;;  %v17385_v25 = vpop.f32.mrb[170].mxu0  ;;  %v17390_v47 = vadd.f32 %v7954_v26, %v17213_v46  ;;  %v9036_v12 = vrot.slane %v9035_v48, 1  ;;  %v8051_v7 = vadd.f32 %v8050_v3, %v8049_v52  ;;  %v7417_v60 = vpop.permute.xlu0 %7416 }
 0x55f   : > { %v8028_v29 = vsub.f32 %v7964_v61, %v7996_v28  ;;  %v7959_v17 = vpop.permute.xlu1 %7958  ;;  %v8002_v22 = vrot.slane %v8001_v50, 1  ;;  %v8005_v28 = vrot.slane %v8004_v18, 4  ;;  %18935 = vst [vmem:[#allocation28_spill] sm:$0xff] %v17385_v25  ;;  %v17392_v59 = vpop.f32.mrb[171].mxu0  ;;  %v9059_v8 = vsel %vm729_vm7, %v17377_v42, -inf }
 0x560   : > { %18937 = vst [vmem:[#allocation13_spill] sm:$0xff] %v17392_v59  ;;  %v17399_v41 = vpop.f32.mrb[172].mxu0  ;;  %v8068_v24 = vrot.slane %v8067_v0, 1  ;;  %v17404_v46 = vadd.f32 %v17211_v19, %v7959_v17  ;;  %v9060_v20 = vrot.slane %v9059_v8, 4  ;;  %v8052_v17 = vrot.slane %v8051_v7, 2 }
 0x561   : > { %v8039_v53 = vmul.f32 1.442695, %v8028_v29  ;;  %v8003_v61 = vmax.f32 %v8001_v50, %v8002_v22  ;;  %v8006_v62 = vmax.f32 %v8004_v18, %v8005_v28  ;;  %18938 = vst [vmem:[#allocation19_spill] sm:$0xff] %v17399_v41  ;;  %v8011_v50 = vsel %vm729_vm7, %v17390_v47, -inf  ;;  %v17406_v26 = vpop.f32.mrb[173].mxu0 }
 0x562   : > { %18939 = vst [vmem:[#allocation64_spill] sm:$0xff] %v17406_v26  ;;  %v8012_v18 = vrot.slane %v8011_v50, 4  ;;  %v9037_v28 = vmax.f32 %v9035_v48, %v9036_v12  ;;  %v8018_v41 = vsel %vm729_vm7, %v17404_v46, -inf  ;;  %v8069_v19 = vadd.f32 %v8068_v24, %v8067_v0 }
 0x563   : > { %11817 = vpow2.f32 %v8039_v53  ;;  %v8029_v29 = vsub.f32 %v17334_v39, %v8003_v61  ;;  %v8007_v53 = vrot.slane %v8006_v62, 2  ;;  %v8061_v61 = vrot.slane %v8060_v56, 1 }
 0x564   : > { %v17397_v22 = vpop.permute.xlu1 %9020  ;;  %v8013_v31 = vmax.f32 %v8011_v50, %v8012_v18  ;;  %v9049_v32 = vmax.f32 %v9047_v11, %v9048_v51  ;;  %v9061_v52 = vmax.f32 %v9059_v8, %v9060_v20  ;;  %v9087_v6 = vsub.f32 %v17305_v45, %v9037_v28  ;;  %v7421_v50 = vpop.permute.xlu0 %7420 }
 0x565   : > { %v8041_v39 = vmul.f32 1.442695, %v8029_v29  ;;  %v8008_v25 = vmax.f32 %v8006_v62, %v8007_v53  ;;  %v8019_v29 = vrot.slane %v8018_v41, 4  ;;  %v8062_v15 = vadd.f32 %v8061_v61, %v8060_v56 }
 0x566   : > { %v8014_v3 = vrot.slane %v8013_v31, 2  ;;  %v8053_v53 = vadd.f32 %v8052_v17, %v8051_v7  ;;  %v9050_v24 = vrot.slane %v9049_v32, 1  ;;  %v9062_v8 = vrot.slane %v9061_v52, 2 }
 0x567   : > { %11819 = vpow2.f32 %v8041_v39  ;;  %v8009_v26 = vrot.slane %v8008_v25, 1  ;;  %v8020_v39 = vmax.f32 %v8018_v41, %v8019_v29  ;;  %v17416_v45 = vmul.f32 1.442695, %v9087_v6 }
 0x568   : > { %v7415_v59 = vpop.permute.xlu1 %7414  ;;  %v8015_v62 = vmax.f32 %v8013_v31, %v8014_v3  ;;  %11821 = vrcp.f32 %v8069_v19  ;;  %v7439_v7 = vmul.f32 %v7417_v60, %v16991_v54  ;;  %v8054_v18 = vrot.slane %v8053_v53, 1  ;;  %v7425_v29 = vpop.permute.xlu0 %7424 }
 0x569   : > { %v8010_v5 = vmax.f32 %v8008_v25, %v8009_v26  ;;  %11823 = vrcp.f32 %v8062_v15  ;;  %v17420_v25 = vadd.f32 %v17363_v9, %v17209_v14  ;;  %v8021_v41 = vrot.slane %v8020_v39, 2 }
 0x56a   : > { %v8016_v56 = vrot.slane %v8015_v62, 1  ;;  %v7438_v61 = vmul.f32 %v7415_v59, %v16999_v37  ;;  %v17426_v28 = vmax.f32 %v9049_v32, %v9050_v24  ;;  %v9063_v9 = vmax.f32 %v9061_v52, %v9062_v8 }
 0x56b   : > { %v8030_v11 = vsub.f32 %v17368_v44, %v8010_v5  ;;  %v8022_v15 = vmax.f32 %v8020_v39, %v8021_v41  ;;  %v9073_v54 = vsel %vm729_vm7, %v17420_v25, -inf  ;;  %v7447_v32 = vsel %vm7193_vm9, %v7439_v7, 0.0 }
 0x56c   : > { %v7419_v48 = vpop.permute.xlu1 %7418  ;;  %v8017_v51 = vmax.f32 %v8015_v62, %v8016_v56  ;;  %v7446_v60 = vsel %vm7193_vm9, %v7438_v61, 0.0  ;;  %v8055_v24 = vadd.f32 %v8054_v18, %v8053_v53  ;;  %v9064_v41 = vrot.slane %v9063_v9, 1 }
 0x56d   : > { %v17411_v12 = vpop.eup %11817  ;;  %v8043_v31 = vmul.f32 1.442695, %v8030_v11  ;;  %v8023_v37 = vrot.slane %v8022_v15, 1  ;;  %v7440_v62 = vmul.f32 %v7419_v48, %v17012_v58  ;;  %v7443_v58 = vmul.f32 %v7425_v29, %v17035_v27  ;;  %v17455_v29 = vpop.f32.mrb[174].mxu1 }
 0x56e   : > { %v8070_v0 = vsel %vm729_vm7, %v17411_v12, 0.0  ;;  %v8031_v19 = vsub.f32 %v17390_v47, %v8017_v51 }
 0x56f   : > { %v8071_v20 = vrot.slane %v8070_v0, 4  ;;  %11825 = vpow2.f32 %v8043_v31  ;;  %v8024_v52 = vmax.f32 %v8022_v15, %v8023_v37  ;;  %v7449_v8 = vsel %vm7193_vm9, %v7440_v62, 0.0 }
 0x570   : > { %v7423_v5 = vpop.permute.xlu1 %7422  ;;  %v8045_v3 = vmul.f32 1.442695, %v8031_v19  ;;  %v9089_v15 = vsub.f32 %v17347_v55, %v17426_v28  ;;  %v9065_v37 = vmax.f32 %v9063_v9, %v9064_v41  ;;  %v17457_v9 = vpop.f32.mrb[175].mxu1 }
 0x571   : > { %v8072_v26 = vadd.f32 %v8071_v20, %v8070_v0  ;;  %v17424_v44 = vpop.eup %11819  ;;  %v7441_v0 = vmul.f32 %v7421_v50, %v17014_v33  ;;  %v7448_v20 = vadd.f32 %v7447_v32, %v7446_v60  ;;  %v8032_v7 = vsub.f32 %v17404_v46, %v8024_v52 }
 0x572   : > { %v8077_v14 = vsel %vm729_vm7, %v17424_v44, 0.0  ;;  %v17437_v47 = vpop.eup %11821  ;;  %11827 = vpow2.f32 %v8045_v3  ;;  %v7442_v33 = vmul.f32 %v7423_v5, %v17027_v23  ;;  %v7455_v5 = vsel %vm7193_vm9, %v7443_v58, 0.0 }
 0x573   : > { %v8073_v6 = vrot.slane %v8072_v26, 2  ;;  %v8078_v17 = vrot.slane %v8077_v14, 4  ;;  %v11824_v51 = vpop.eup %11823  ;;  %v7450_v48 = vadd.f32 %v7449_v8, %v7448_v20  ;;  %11829 = vrcp.f32 %v8055_v24  ;;  %v17463_v24 = vpop.f32.mrb[176].mxu1 }
 0x574   : > { %v7427_v56 = vpop.permute.xlu1 %7426  ;;  %v7451_v50 = vsel %vm7193_vm9, %v7441_v0, 0.0  ;;  %v8047_v61 = vmul.f32 1.442695, %v8032_v7  ;;  %v7453_v46 = vsel %vm7193_vm9, %v7442_v33, 0.0  ;;  %v9091_v0 = vsub.f32 %v17377_v42, %v9065_v37  ;;  %v17470_v7 = vpop.f32.mrb[174].mxu0 }
 0x575   : > { %v8074_v59 = vadd.f32 %v8073_v6, %v8072_v26  ;;  %v8079_v39 = vadd.f32 %v8078_v17, %v8077_v14  ;;  %v9074_v26 = vrot.slane %v9073_v54, 4  ;;  %v7444_v18 = vmul.f32 %v7427_v56, %v17033_v21  ;;  %v7429_v6 = vpop.permute.xlu0 %7428  ;;  %v17468_v56 = vpop.f32.mrb[177].mxu1 }
 0x576   : > { %v7452_v14 = vadd.f32 %v7451_v50, %v7450_v48  ;;  %11831 = vpow2.f32 %v8047_v61  ;;  %v7445_v55 = vmul.f32 %v7429_v6, %v17040_v10  ;;  %v9103_v58 = vmul.f32 1.442695, %v9091_v0 }
 0x577   : > { %v8075_v11 = vrot.slane %v8074_v59, 1  ;;  %v8080_v31 = vrot.slane %v8079_v39, 2  ;;  %v9075_v60 = vmax.f32 %v9073_v54, %v9074_v26  ;;  %v7457_v28 = vsel %vm7193_vm9, %v7444_v18, 0.0 }
 0x578   : > { %v7454_v21 = vadd.f32 %v7453_v46, %v7452_v14  ;;  %v7459_v8 = vsel %vm7193_vm9, %v7445_v55, 0.0  ;;  %v8114_v6 = vmul.f32 %v11824_v51, %v17318_v38  ;;  %v8115_v46 = vmul.f32 %v17437_v47, %v17311_v43 }
 0x579   : > { %v8081_v53 = vadd.f32 %v8080_v31, %v8079_v39  ;;  %v8076_v19 = vadd.f32 %v8075_v11, %v8074_v59  ;;  %v17448_v17 = vpop.eup %11825  ;;  %v9099_v39 = vmul.f32 1.442695, %v9089_v15  ;;  %v9076_v10 = vrot.slane %v9075_v60, 2 }
 0x57a   : > { %v8084_v23 = vsel %vm729_vm7, %v17448_v17, 0.0  ;;  %v7456_v59 = vadd.f32 %v7455_v5, %v7454_v21  ;;  %v17494_v43 = vadd.f32 %v17207_v30, %v17397_v22 }
 0x57b   : > { %v8082_v27 = vrot.slane %v8081_v53, 1  ;;  %11833 = vrcp.f32 %v8076_v19  ;;  %v8085_v32 = vrot.slane %v8084_v23, 4 }
 0x57c   : > { %v17459_v54 = vpop.eup %11827  ;;  %v7458_v52 = vadd.f32 %v7457_v28, %v7456_v59 }
 0x57d   : > { %v8083_v3 = vadd.f32 %v8082_v27, %v8081_v53  ;;  %v8086_v62 = vadd.f32 %v8085_v32, %v8084_v23  ;;  %v8091_v20 = vsel %vm729_vm7, %v17459_v54, 0.0  ;;  %v11830_v31 = vpop.eup %11829  ;;  %v9077_v53 = vmax.f32 %v9075_v60, %v9076_v10 }
 0x57e   : > { %v8092_v41 = vrot.slane %v8091_v20, 4  ;;  %v7460_v26 = vadd.f32 %v7459_v8, %v7458_v52  ;;  %v8113_v42 = vmul.f32 %v11830_v31, %v17361_v16  ;;  %v17481_v16 = vld [vmem:[%s11996_s10] sm:$0xff]  ;;  %s11916_s10 = smov 18  }
 0x57f   : > { %11835 = vrcp.f32 %v8083_v3  ;;  %v8087_v11 = vrot.slane %v8086_v62, 2  ;;  %v9078_v23 = vrot.slane %v9077_v53, 1  ;;  %v8272_v38 = vsel %vm8251_vm10, %v17481_v16, 0.0 }
 0x580   : > { %11837 = vpow2.f32 %v17416_v45  ;;  %v8093_v48 = vadd.f32 %v8092_v41, %v8091_v20  ;;  %7462 = vrot.lane.b32.xlu1 %v7460_v26, %s11902_s26  ;;  %v17474_v33 = vpop.eup %11831  ;;  %8219 = vrot.lane.b32.xlu0 %v8113_v42, %s11915_s27  ;;  %v8273_v55 = vrot.slane %v8272_v38, 4  ;;  %s11448_s26 = smul.u32 40, %s19032_s16 }
 0x581   : > { %v8088_v45 = vadd.f32 %v8087_v11, %v8086_v62  ;;  %11839 = vpow2.f32 %v9099_v39  ;;  %v8098_v15 = vsel %vm729_vm7, %v17474_v33, 0.0  ;;  %v9079_v3 = vmax.f32 %v9077_v53, %v9078_v23  ;;  %v17517_v23 = vpop.f32.mrb[175].mxu0 }
 0x582   : > { %v8094_v18 = vrot.slane %v8093_v48, 2  ;;  %v8099_v14 = vrot.slane %v8098_v15, 4  ;;  %11841 = vpow2.f32 %v9103_v58  ;;  %v9080_v62 = vsel %vm729_vm7, %v17494_v43, -inf  ;;  %s18079_s23 = scalar_lea.vmem %s18120_s4, %s11448_s26 }
 0x583   : > { %v8089_v50 = vrot.slane %v8088_v45, 1  ;;  %v8274_v39 = vadd.f32 %v8273_v55, %v8272_v38  ;;  %v9093_v0 = vsub.f32 %v17420_v25, %v9079_v3  ;;  %v9081_v52 = vrot.slane %v9080_v62, 4 }
 0x584   : > { %v8095_v27 = vadd.f32 %v8094_v18, %v8093_v48  ;;  %8221 = vrot.lane.b32.xlu1 %v8114_v6, %s11915_s27  ;;  %v8100_v5 = vadd.f32 %v8099_v14, %v8098_v15  ;;  %8223 = vrot.lane.b32.xlu0 %v8115_v46, %s11915_s27 }
 0x585   : > { %v11834_v61 = vpop.eup %11833  ;;  %v8090_v19 = vadd.f32 %v8089_v50, %v8088_v45  ;;  %v8275_v26 = vrot.slane %v8274_v39, 2  ;;  %v9107_v58 = vmul.f32 1.442695, %v9093_v0  ;;  %v9082_v48 = vmax.f32 %v9080_v62, %v9081_v52 }
 0x586   : > { %v8116_v37 = vmul.f32 %v11834_v61, %v17411_v12  ;;  %v8096_v21 = vrot.slane %v8095_v27, 1  ;;  %v8101_v32 = vrot.slane %v8100_v5, 2 }
 0x587   : > { %11843 = vrcp.f32 %v8090_v19  ;;  %v8276_v61 = vadd.f32 %v8275_v26, %v8274_v39  ;;  %v9083_v15 = vrot.slane %v9082_v48, 2 }
 0x588   : > { %8225 = vrot.lane.b32.xlu1 %v8116_v37, %s11915_s27  ;;  %v8097_v12 = vadd.f32 %v8096_v21, %v8095_v27  ;;  %v8102_v59 = vadd.f32 %v8101_v32, %v8100_v5 }
 0x589   : > { %v11836_v60 = vpop.eup %11835  ;;  %v8277_v14 = vrot.slane %v8276_v61, 1  ;;  %v9084_v37 = vmax.f32 %v9082_v48, %v9083_v15 }
 0x58a   : > { %v17490_v51 = vpop.eup %11837  ;;  %v8117_v47 = vmul.f32 %v11836_v60, %v17424_v44  ;;  %11845 = vrcp.f32 %v8097_v12  ;;  %v8103_v22 = vrot.slane %v8102_v59, 1 }
 0x58b   : > { %v9111_v28 = vsel %vm729_vm7, %v17490_v51, 0.0  ;;  %v17503_v30 = vpop.eup %11839  ;;  %v8278_v38 = vadd.f32 %v8277_v14, %v8276_v61  ;;  %v18942_v14 = vld [vmem:[#allocation51_spill] sm:$0xff] }
 0x58c   : > { %8227 = vrot.lane.b32.xlu0 %v8117_v47, %s11915_s27  ;;  %v9112_v44 = vrot.slane %v9111_v28, 4  ;;  %v8104_v10 = vadd.f32 %v8103_v22, %v8102_v59  ;;  %v17506_v11 = vpop.eup %11841  ;;  %v9125_v20 = vsel %vm729_vm7, %v17503_v30, 0.0  ;;  %v9085_v47 = vrot.slane %v9084_v37, 1 }
 0x58d   : > { %v9126_v45 = vrot.slane %v9125_v20, 4  ;;  %v9139_v42 = vsel %vm729_vm7, %v17506_v11, 0.0 }
 0x58e   : > { %11847 = vrcp.f32 %v8104_v10  ;;  %v9113_v31 = vadd.f32 %v9112_v44, %v9111_v28  ;;  %v9140_v50 = vrot.slane %v9139_v42, 4  ;;  %v9086_v28 = vmax.f32 %v9084_v37, %v9085_v47 }
 0x58f   : > { %v9127_v18 = vadd.f32 %v9126_v45, %v9125_v20  ;;  %11849 = vpow2.f32 %v9107_v58 }
 0x590   : > { %v9114_v53 = vrot.slane %v9113_v31, 2  ;;  %v9094_v62 = vsub.f32 %v17494_v43, %v9086_v28 }
 0x591   : > { %v11844_v8 = vpop.eup %11843  ;;  %v9128_v27 = vrot.slane %v9127_v18, 2 }
 0x592   : > { %v8118_v41 = vmul.f32 %v11844_v8, %v17448_v17  ;;  %v9141_v17 = vadd.f32 %v9140_v50, %v9139_v42  ;;  %v9115_v19 = vadd.f32 %v9114_v53, %v9113_v31  ;;  %v9109_v0 = vmul.f32 1.442695, %v9094_v62 }
 0x593   : > { %v9129_v21 = vadd.f32 %v9128_v27, %v9127_v18 }
 0x594   : > { %8229 = vrot.lane.b32.xlu1 %v8118_v41, %s11915_s27  ;;  %v11846_v25 = vpop.eup %11845  ;;  %v9142_v5 = vrot.slane %v9141_v17, 2 }
 0x595   : > { %v8119_v6 = vmul.f32 %v11846_v25, %v17459_v54  ;;  %v9116_v54 = vrot.slane %v9115_v19, 1  ;;  %v9130_v55 = vrot.slane %v9129_v21, 1 }
 0x596   : > { %v9143_v12 = vadd.f32 %v9142_v5, %v9141_v17 }
 0x597   : > { %8231 = vrot.lane.b32.xlu0 %v8119_v6, %s11915_s27  ;;  %v9117_v3 = vadd.f32 %v9116_v54, %v9115_v19  ;;  %v9131_v22 = vadd.f32 %v9130_v55, %v9129_v21  ;;  %v18946_v54 = vld [vmem:[#allocation23_spill] sm:$0xff]  ;;  %v18947_v55 = vld [vmem:[#allocation64_spill] sm:$0xff] }
 0x598   : > { %v11848_v46 = vpop.eup %11847  ;;  %v9144_v59 = vrot.slane %v9143_v12, 1 }
 0x599   : > { %v8120_v60 = vmul.f32 %v11848_v46, %v17474_v33  ;;  %v11850_v32 = vpop.eup %11849  ;;  %11851 = vrcp.f32 %v9117_v3  ;;  %v18943_v46 = vld [vmem:[#allocation21_spill] sm:$0xff] }
 0x59a   : > { %v9153_v33 = vsel %vm729_vm7, %v11850_v32, 0.0  ;;  %v9145_v44 = vadd.f32 %v9144_v59, %v9143_v12  ;;  %11853 = vrcp.f32 %v9131_v22  ;;  %v9028_v19 = vadd.f32 %v18943_v46, %v18942_v14 }
 0x59b   : > { %8292 = vrot.lane.b32.xlu0 %v17221_v2, %s11915_s27  ;;  %8233 = vrot.lane.b32.xlu1 %v8120_v60, %s11915_s27  ;;  %v9154_v2 = vrot.slane %v9153_v33, 4  ;;  %v8122_v14 = vcombine.high %v17481_v16, %v17481_v16 }
 0x59c   : > { %11855 = vrcp.f32 %v9145_v44  ;;  %v9066_v37 = vsel %vm729_vm7, %v9028_v19, -inf  ;;  %v18948_v44 = vld [vmem:[#allocation46_spill] sm:$0xff] }
 0x59d   : > { %v9155_v39 = vadd.f32 %v9154_v2, %v9153_v33  ;;  %11857 = vpow2.f32 %v9109_v0 }
 0x59f   : > { %8280 = vrot.lane.b32.xlu1 %v8278_v38, %s11906_s29  ;;  %v9156_v10 = vrot.slane %v9155_v39, 2  ;;  %v9067_v38 = vrot.slane %v9066_v37, 4 }
 0x5a3   : > { %8294 = vrot.lane.b32.xlu1 %v17219_v13, %s11915_s27  ;;  %v17531_v52 = vpop.f32.mrb[178].mxu1  ;;  %v11852_v20 = vpop.eup %11851 }
 0x5a4   : > { %v17533_v13 = vpop.f32.mrb[179].mxu1  ;;  %v9175_v8 = vmul.f32 %v11852_v20, %v17490_v51  ;;  %v11854_v31 = vpop.eup %11853 }
 0x5a5   : > { %v17535_v43 = vpop.f32.mrb[176].mxu0  ;;  %v9177_v26 = vmul.f32 %v11854_v31, %v17503_v30  ;;  %v18951_v31 = vld [vmem:[#allocation54_spill] sm:$0xff] }
 0x5a6   : > { %v11856_v41 = vpop.eup %11855 }
 0x5a7   : > { %8298 = vrot.lane.b32.xlu1 %v17230_v63, %s11915_s27  ;;  %v9157_v63 = vadd.f32 %v9156_v10, %v9155_v39  ;;  %v11858_v45 = vpop.eup %11857  ;;  %v9179_v48 = vmul.f32 %v11856_v41, %v17506_v11  ;;  %v9024_v11 = vadd.f32 %v17168_v49, %v17292_v1  ;;  %v18944_v1 = vld [vmem:[#allocation91_spill] sm:$0xff]  ;;  %v18950_v10 = vld [vmem:[#allocation5_spill] sm:$0xff] }
 0x5a8   : > { %v9160_v58 = vsel %vm729_vm7, %v11858_v45, 0.0  ;;  %v18949_v39 = vld [vmem:[#allocation3_spill] sm:$0xff] }
 0x5a9   : > { %v9038_v18 = vsel %vm729_vm7, %v9024_v11, -inf  ;;  %v2157_v0 = vadd.f32 %v18949_v39, %v18948_v44  ;;  %v18952_v41 = vld [vmem:[#allocation95_spill] sm:$0xff] }
 0x5aa   : > { %v9039_v6 = vrot.slane %v9038_v18, 4 }
 0x5ab   : > { %8300 = vrot.lane.b32.xlu1 %v17238_v35, %s11915_s27  ;;  %v9158_v35 = vrot.slane %v9157_v63, 1 }
 0x5ac   : > { %v9040_v49 = vmax.f32 %v9038_v18, %v9039_v6 }
 0x5ad   : > { %v9159_v42 = vadd.f32 %v9158_v35, %v9157_v63  ;;  %v3220_v35 = vadd.f32 %v18951_v31, %v2157_v0 }
 0x5ae   : > { %v9041_v60 = vrot.slane %v9040_v49, 2 }
 0x5af   : > { %8304 = vrot.lane.b32.xlu1 %v17244_v40, %s11915_s27  ;;  %v9161_v40 = vrot.slane %v9160_v58, 4  ;;  %11859 = vrcp.f32 %v9159_v42 }
 0x5b0   : > { %v9042_v21 = vmax.f32 %v9040_v49, %v9041_v60 }
 0x5b1   : > { %v9162_v51 = vadd.f32 %v9161_v40, %v9160_v58  ;;  %v18954_v40 = vld [vmem:[#allocation116_spill] sm:$0xff] }
 0x5b2   : > { %v9043_v28 = vrot.slane %v9042_v21, 1 }
 0x5b3   : > { %9281 = vrot.lane.b32.xlu1 %v9175_v8, %s11916_s10  ;;  %v9163_v30 = vrot.slane %v9162_v51, 2 }
 0x5b4   : > { %v9044_v2 = vmax.f32 %v9042_v21, %v9043_v28  ;;  %v18960_v21 = vld [vmem:[#allocation17_spill] sm:$0xff] }
 0x5b5   : > { %v9164_v53 = vadd.f32 %v9163_v30, %v9162_v51  ;;  %v18955_v30 = vld [vmem:[#allocation40_spill] sm:$0xff] }
 0x5b6   : > { %v9088_v20 = vsub.f32 %v9024_v11, %v9044_v2  ;;  %v18957_v11 = vld [vmem:[#allocation101_spill] sm:$0xff] }
 0x5b7   : > { %9285 = vrot.lane.b32.xlu1 %v9177_v26, %s11916_s10  ;;  %v9165_v61 = vrot.slane %v9164_v53, 1  ;;  %v4283_v26 = vadd.f32 %v18952_v41, %v3220_v35 }
 0x5b8   : > { %v9097_v42 = vmul.f32 1.442695, %v9088_v20 }
 0x5b9   : > { %v11860_v25 = vpop.eup %11859  ;;  %v9166_v17 = vadd.f32 %v9165_v61, %v9164_v53  ;;  %v5341_v51 = vadd.f32 %v18954_v40, %v4283_v26  ;;  %v18956_v53 = vld [vmem:[#allocation119_spill] sm:$0xff]  ;;  %v18961_v26 = vld [vmem:[#allocation146_spill] sm:$0xff] }
 0x5ba   : > { %v9181_v50 = vmul.f32 %v11860_v25, %v11850_v32  ;;  %v9068_v32 = vmax.f32 %v9066_v37, %v9067_v38  ;;  %v8129_v25 = vrot.slane %v17481_v16, %v18955_v30 }
 0x5bb   : > { %9289 = vrot.lane.b32.xlu1 %v9179_v48, %s11916_s10  ;;  %11861 = vrcp.f32 %v9166_v17 }
 0x5bc   : > { %v9069_v33 = vrot.slane %v9068_v32, 2  ;;  %11863 = vpow2.f32 %v9097_v42  ;;  %v8145_v46 = vrot.slane %v8129_v25, %v18955_v30 }
 0x5be   : > { %v9070_v22 = vmax.f32 %v9068_v32, %v9069_v33 }
 0x5bf   : > { %8352 = vrot.lane.b32.xlu1 %v17250_v4, %s11915_s27  ;;  %v18940_v4 = vld [vmem:[#allocation37_spill] sm:$0xff] }
 0x5c0   : > { %v9026_v15 = vadd.f32 %v18940_v4, %v17282_v57  ;;  %v18945_v57 = vld [vmem:[#allocation100_spill] sm:$0xff]  ;;  %v9071_v8 = vrot.slane %v9070_v22, 1  ;;  %v8137_v4 = vcombine.high %v8129_v25, %v8129_v25 }
 0x5c2   : > { %v9072_v48 = vmax.f32 %v9070_v22, %v9071_v8 }
 0x5c3   : > { %8412 = vrot.lane.b32.xlu1 %v17268_v34, %s11915_s27  ;;  %v18941_v34 = vld [vmem:[#allocation110_spill] sm:$0xff] }
 0x5c4   : > { %v9092_v18 = vsub.f32 %v9028_v19, %v9072_v48  ;;  %v18959_v19 = vld [vmem:[#allocation43_spill] sm:$0xff] }
 0x5c5   : > { %v11862_v12 = vpop.eup %11861  ;;  %v8174_v60 = vrot.slane %v8145_v46, %v18959_v19 }
 0x5c6   : > { %v9182_v59 = vmul.f32 %v11862_v12, %v11858_v45  ;;  %v18953_v45 = vld [vmem:[#allocation7_spill] sm:$0xff]  ;;  %v9105_v17 = vmul.f32 1.442695, %v9092_v18 }
 0x5c7   : > { %8472 = vrot.lane.b32.xlu1 %v17299_v36, %s11915_s27  ;;  %v9052_v36 = vsel %vm729_vm7, %v9026_v15, -inf  ;;  %v18962_v18 = vld [vmem:[#allocation31_spill] sm:$0xff] }
 0x5c8   : > { %v9053_v27 = vrot.slane %v9052_v36, 4 }
 0x5ca   : > { %v9054_v5 = vmax.f32 %v9052_v36, %v9053_v27  ;;  %v8159_v36 = vrot.slane %v8137_v4, %v18955_v30  ;;  %v8136_v27 = vrot.slane %v8122_v14, %v18955_v30 }
 0x5cb   : > { %9293 = vrot.lane.b32.xlu1 %v9181_v50, %s11916_s10  ;;  %v6403_v50 = vadd.f32 %v18956_v53, %v5341_v51 }
 0x5cc   : > { %v9055_v47 = vrot.slane %v9054_v5, 2  ;;  %v8178_v49 = vrot.slane %v8159_v36, %v18959_v19  ;;  %v8169_v38 = vcombine.high %v8159_v36, %v8159_v36 }
 0x5ce   : > { %v9056_v3 = vmax.f32 %v9054_v5, %v9055_v47  ;;  %v8167_v5 = vcombine.high %v8145_v46, %v8145_v46 }
 0x5cf   : > { %8416 = vrot.lane.b32.xlu1 %v18941_v34, %s11915_s27 }
 0x5d0   : > { %v9057_v62 = vrot.slane %v9056_v3, 1  ;;  %v8182_v33 = vrot.slane %v8167_v5, %v18959_v19 }
 0x5d2   : > { %v9058_v63 = vmax.f32 %v9056_v3, %v9057_v62 }
 0x5d3   : > { %9354 = vrot.lane.b32.xlu1 %v18944_v1, %s11916_s10 }
 0x5d4   : > { %v9090_v58 = vsub.f32 %v9026_v15, %v9058_v63  ;;  %v18958_v15 = vld [vmem:[#allocation114_spill] sm:$0xff] }
 0x5d6   : > { %v9101_v61 = vmul.f32 1.442695, %v9090_v58 }
 0x5d7   : > { %9414 = vrot.lane.b32.xlu1 %v18945_v57, %s11916_s10  ;;  %v17599_v57 = vpop.eup %11863 }
 0x5d8   : > { %11865 = vpow2.f32 %v9101_v61  ;;  %v9118_v32 = vsel %vm729_vm7, %v17599_v57, 0.0 }
 0x5d9   : > { %11867 = vpow2.f32 %v9105_v17  ;;  %v9119_v22 = vrot.slane %v9118_v32, 4 }
 0x5db   : > { %9474 = vrot.lane.b32.xlu1 %v18946_v54, %s11916_s10  ;;  %v8138_v54 = vcombine.high %v8136_v27, %v8136_v27  ;;  %v9120_v42 = vadd.f32 %v9119_v22, %v9118_v32 }
 0x5dd   : > { %v8166_v2 = vrot.slane %v8138_v54, %v18955_v30  ;;  %v9121_v4 = vrot.slane %v9120_v42, 2 }
 0x5df   : > { %9534 = vrot.lane.b32.xlu1 %v18947_v55, %s11916_s10  ;;  %v17609_v55 = vpop.f32.mrb[177].mxu0 }
 0x5e2   : > { %v17611_v28 = vpop.eup %11865 }
 0x5e3   : > { %9295 = vrot.lane.b32.xlu1 %v9182_v59, %s11916_s10  ;;  %v8186_v59 = vrot.slane %v8169_v38, %v18959_v19  ;;  %v9132_v0 = vsel %vm729_vm7, %v17611_v28, 0.0  ;;  %v17625_v63 = vpop.eup %11867 }
 0x5e4   : > { %v9133_v58 = vrot.slane %v9132_v0, 4  ;;  %v9146_v40 = vsel %vm729_vm7, %v17625_v63, 0.0 }
 0x5e7   : > { %8418 = vrot.lane.b32.xlu1 %v18950_v10, %s11915_s27 }
 0x5eb   : > { %9358 = vrot.lane.b32.xlu1 %v18953_v45, %s11916_s10 }
 0x5ef   : > { %9478 = vrot.lane.b32.xlu1 %v18957_v11, %s11916_s10  ;;  %v8170_v11 = vcombine.high %v8166_v2, %v8166_v2 }
 0x5f2   : > { %v7463_v34 = vpop.permute.xlu1 %7462  ;;  %v8220_v1 = vpop.permute.xlu0 %8219 }
 0x5f3   : > { %v17587_v6 = vadd.f32 %v7463_v34, %v6403_v50  ;;  %8360 = vrot.lane.b32.xlu1 %v18958_v15, %s11915_s27  ;;  %v17613_v3 = vmul.f32 %v8220_v1, %v8174_v60  ;;  %v9134_v34 = vadd.f32 %v9133_v58, %v9132_v0  ;;  %v9147_v15 = vrot.slane %v9146_v40, 4  ;;  %v18969_v58 = vld [vmem:[#allocation87_spill] sm:$0xff] }
 0x5f4   : > { %v8202_v1 = vrot.slane %v8170_v11, %v18959_v19  ;;  %v9122_v60 = vadd.f32 %v9121_v4, %v9120_v42  ;;  %v18968_v42 = vld [vmem:[#allocation55_spill] sm:$0xff] }
 0x5f5   : > { %v8252_v8 = vsel %vm8251_vm10, %v17613_v3, 0.0  ;;  %v9135_v5 = vrot.slane %v9134_v34, 2  ;;  %v9148_v38 = vadd.f32 %v9147_v15, %v9146_v40 }
 0x5f6   : > { %v8222_v37 = vpop.permute.xlu1 %8221  ;;  %v8224_v12 = vpop.permute.xlu0 %8223 }
 0x5f7   : > { %8480 = vrot.lane.b32.xlu1 %v17468_v56, %s11915_s27  ;;  %v17604_v47 = vmul.f32 %v8222_v37, %v8178_v49  ;;  %v8152_v56 = vrot.slane %v8136_v27, %v18955_v30  ;;  %v17629_v31 = vmul.f32 %v8224_v12, %v8182_v33  ;;  %v18963_v27 = vld [vmem:[#allocation52_spill] sm:$0xff]  ;;  %v18964_v12 = vld [vmem:[#allocation85_spill] sm:$0xff] }
 0x5f9   : > { %v8253_v44 = vsel %vm8251_vm10, %v17604_v47, 0.0  ;;  %v8190_v39 = vrot.slane %v8152_v56, %v18959_v19  ;;  %v8168_v20 = vcombine.high %v8152_v56, %v8152_v56  ;;  %v8255_v25 = vsel %vm8251_vm10, %v17629_v31, 0.0 }
 0x5fa   : > { %v8226_v62 = vpop.permute.xlu1 %8225  ;;  %v8254_v41 = vadd.f32 %v8253_v44, %v8252_v8  ;;  %v18966_v8 = vld [vmem:[#allocation133_spill] sm:$0xff] }
 0x5fb   : > { %9420 = vrot.lane.b32.xlu1 %v18960_v21, %s11916_s10  ;;  %v17631_v35 = vmul.f32 %v8226_v62, %v8186_v59  ;;  %v8198_v51 = vrot.slane %v8168_v20, %v18959_v19  ;;  %v9123_v59 = vrot.slane %v9122_v60, 1  ;;  %v9149_v62 = vrot.slane %v9148_v38, 2  ;;  %v18965_v20 = vld [vmem:[#allocation20_spill] sm:$0xff] }
 0x5fc   : > { %v8256_v61 = vadd.f32 %v8255_v25, %v8254_v41  ;;  %v18970_v25 = vld [vmem:[#allocation22_spill] sm:$0xff] }
 0x5fd   : > { %v8257_v53 = vsel %vm8251_vm10, %v17631_v35, 0.0  ;;  %v9150_v0 = vadd.f32 %v9149_v62, %v9148_v38 }
 0x5fe   : > { %v8228_v10 = vpop.permute.xlu0 %8227  ;;  %v8258_v14 = vadd.f32 %v8257_v53, %v8256_v61 }
 0x5ff   : > { %9540 = vrot.lane.b32.xlu1 %v17470_v7, %s11916_s10  ;;  %v8194_v7 = vrot.slane %v8166_v2, %v18959_v19  ;;  %v17636_v48 = vmul.f32 %v8228_v10, %v8190_v39  ;;  %v9136_v2 = vadd.f32 %v9135_v5, %v9134_v34  ;;  %v9124_v10 = vadd.f32 %v9123_v59, %v9122_v60  ;;  %v18979_v5 = vld [vmem:[#allocation96_spill] sm:$0xff] }
 0x601   : > { %v8259_v17 = vsel %vm8251_vm10, %v17636_v48, 0.0  ;;  %v9137_v39 = vrot.slane %v9136_v2, 1  ;;  %11869 = vrcp.f32 %v9124_v10 }
 0x602   : > { %v8260_v37 = vadd.f32 %v8259_v17, %v8258_v14  ;;  %v18973_v17 = vld [vmem:[#allocation92_spill] sm:$0xff] }
 0x603   : > { %8422 = vrot.lane.b32.xlu1 %v18961_v26, %s11915_s27  ;;  %v9138_v41 = vadd.f32 %v9137_v39, %v9136_v2  ;;  %v18967_v26 = vld [vmem:[#allocation2_spill] sm:$0xff]  ;;  %v18974_v14 = vld [vmem:[#allocation28_spill] sm:$0xff]  ;;  %v18986_v39 = vld [vmem:[#allocation49_spill] sm:$0xff] }
 0x604   : > { %v18984_v2 = vld [vmem:[#allocation74_spill] sm:$0xff] }
 0x605   : > { %11871 = vrcp.f32 %v9138_v41 }
 0x606   : > { %v8230_v45 = vpop.permute.xlu1 %8229 }
 0x607   : > { %v17645_v50 = vmul.f32 %v8230_v45, %v8194_v7  ;;  %9362 = vrot.lane.b32.xlu1 %v18962_v18, %s11916_s10  ;;  %v9151_v7 = vrot.slane %v9150_v0, 1  ;;  %v18972_v18 = vld [vmem:[#allocation13_spill] sm:$0xff] }
 0x609   : > { %v8232_v36 = vpop.permute.xlu0 %8231  ;;  %v8261_v49 = vsel %vm8251_vm10, %v17645_v50, 0.0 }
 0x60a   : > { %v17651_v46 = vmul.f32 %v8232_v36, %v8198_v51  ;;  %v8262_v56 = vadd.f32 %v8261_v49, %v8260_v37 }
 0x60b   : > { %9482 = vrot.lane.b32.xlu1 %v18963_v27, %s11916_s10  ;;  %v11870_v51 = vpop.eup %11869  ;;  %v18977_v27 = vld [vmem:[#allocation36_spill] sm:$0xff] }
 0x60c   : > { %v8263_v54 = vsel %vm8251_vm10, %v17651_v46, 0.0  ;;  %v9176_v11 = vmul.f32 %v11870_v51, %v17599_v57 }
 0x60d   : > { %v8234_v21 = vpop.permute.xlu1 %8233  ;;  %v8264_v33 = vadd.f32 %v8263_v54, %v8262_v56  ;;  %v18980_v54 = vld [vmem:[#allocation27_spill] sm:$0xff]  ;;  %v18981_v56 = vld [vmem:[#allocation94_spill] sm:$0xff] }
 0x60e   : > { %v17660_v32 = vmul.f32 %v8234_v21, %v8202_v1  ;;  %v18975_v1 = vld [vmem:[#allocation136_spill] sm:$0xff] }
 0x60f   : > { %8364 = vrot.lane.b32.xlu1 %v18964_v12, %s11915_s27  ;;  %v11872_v61 = vpop.eup %11871  ;;  %v18982_v12 = vld [vmem:[#allocation19_spill] sm:$0xff] }
 0x610   : > { %v8265_v22 = vsel %vm8251_vm10, %v17660_v32, 0.0  ;;  %v9178_v4 = vmul.f32 %v11872_v61, %v17611_v28  ;;  %v18976_v28 = vld [vmem:[#allocation138_spill] sm:$0xff]  ;;  %v18995_v61 = vld [vmem:[#allocation141_spill] sm:$0xff] }
 0x611   : > { %v8266_v44 = vadd.f32 %v8265_v22, %v8264_v33  ;;  %v17689_v53 = vpop.permute.xlu1 %8280 }
 0x613   : > { %8484 = vrot.lane.b32.xlu1 %v17533_v13, %s11915_s27  ;;  %8268 = vrot.lane.b32.xlu0 %v8266_v44, %s11906_s29  ;;  %v9152_v13 = vadd.f32 %v9151_v7, %v9150_v0  ;;  %v18985_v44 = vld [vmem:[#allocation103_spill] sm:$0xff] }
 0x615   : > { %11873 = vrcp.f32 %v9152_v13  ;;  %v8295_v15 = vpop.permute.xlu1 %8294 }
 0x616   : > { %v17677_v45 = vpop.f32.mrb[178].mxu0 }
 0x617   : > { %9424 = vrot.lane.b32.xlu1 %v18965_v20, %s11916_s10  ;;  %8296 = vrot.lane.b32.xlu0 %v18966_v8, %s11915_s27  ;;  %v17683_v40 = vpop.f32.mrb[179].mxu0  ;;  %v18988_v20 = vld [vmem:[#allocation34_spill] sm:$0xff] }
 0x618   : > { %v18990_v8 = vld [vmem:[#allocation66_spill] sm:$0xff] }
 0x619   : > { %v8299_v57 = vpop.permute.xlu1 %8298 }
 0x61b   : > { %9544 = vrot.lane.b32.xlu1 %v17535_v43, %s11916_s10  ;;  %8529 = vrot.lane.b32.xlu0 %v18967_v26, %s11916_s10  ;;  %v18971_v43 = vld [vmem:[#allocation62_spill] sm:$0xff]  ;;  %v18991_v26 = vld [vmem:[#allocation35_spill] sm:$0xff] }
 0x61d   : > { %v8301_v49 = vpop.permute.xlu1 %8300 }
 0x61f   : > { %8426 = vrot.lane.b32.xlu1 %v18968_v42, %s11915_s27  ;;  %8302 = vrot.lane.b32.xlu0 %v18969_v58, %s11915_s27  ;;  %v11874_v34 = vpop.eup %11873  ;;  %v18992_v42 = vld [vmem:[#allocation129_spill] sm:$0xff]  ;;  %v18993_v58 = vld [vmem:[#allocation15_spill] sm:$0xff] }
 0x620   : > { %v9180_v36 = vmul.f32 %v11874_v34, %v17625_v63  ;;  %v18978_v63 = vld [vmem:[#allocation134_spill] sm:$0xff]  ;;  %v18997_v34 = vld [vmem:[#allocation84_spill] sm:$0xff] }
 0x621   : > { %v17709_v37 = vpop.permute.xlu1 %8304 }
 0x623   : > { %9366 = vrot.lane.b32.xlu1 %v18970_v25, %s11916_s10  ;;  %8306 = vrot.lane.b32.xlu0 %v18971_v43, %s11915_s27  ;;  %v18994_v43 = vld [vmem:[#allocation147_spill] sm:$0xff] }
 0x625   : > { %v17713_v60 = vpop.permute.xlu1 %9281 }
 0x627   : > { %9486 = vrot.lane.b32.xlu1 %v18972_v18, %s11916_s10  ;;  %9283 = vrot.lane.b32.xlu0 %v9176_v11, %s11916_s10 }
 0x629   : > { %v17719_v38 = vpop.permute.xlu1 %9285 }
 0x62b   : > { %9368 = vrot.lane.b32.xlu1 %v18973_v17, %s11916_s10  ;;  %9287 = vrot.lane.b32.xlu0 %v9178_v4, %s11916_s10  ;;  %v18996_v4 = vld [vmem:[#allocation123_spill] sm:$0xff] }
 0x62d   : > { %v17723_v21 = vpop.permute.xlu1 %9289 }
 0x62f   : > { %9488 = vrot.lane.b32.xlu1 %v18974_v14, %s11916_s10  ;;  %9291 = vrot.lane.b32.xlu0 %v9180_v36, %s11916_s10  ;;  %v8317_v36 = vmul.f32 %v8295_v15, %v17604_v47  ;;  %v18999_v15 = vld [vmem:[#allocation118_spill] sm:$0xff] }
 0x631   : > { %v17729_v33 = vpop.permute.xlu1 %8352 }
 0x633   : > { %8354 = vrot.lane.b32.xlu0 %v18975_v1, %s11915_s27 }
 0x635   : > { %v17733_v59 = vpop.permute.xlu1 %8412 }
 0x637   : > { %8414 = vrot.lane.b32.xlu0 %v18976_v28, %s11915_s27 }
 0x639   : > { %v17739_v62 = vpop.permute.xlu1 %8472 }
 0x63b   : > { %8474 = vrot.lane.b32.xlu0 %v18977_v27, %s11915_s27 }
 0x63d   : > { %v17743_v22 = vpop.permute.xlu1 %9293 }
 0x63f   : > { %8356 = vrot.lane.b32.xlu0 %v18978_v63, %s11915_s27  ;;  %v8325_v63 = vsel %vm8251_vm10, %v8317_v36, 0.0 }
 0x641   : > { %v17749_v0 = vpop.permute.xlu1 %8416 }
 0x643   : > { %8476 = vrot.lane.b32.xlu0 %v17457_v9, %s11915_s27  ;;  %v18983_v9 = vld [vmem:[#allocation58_spill] sm:$0xff] }
 0x645   : > { %v17753_v10 = vpop.permute.xlu1 %9354 }
 0x647   : > { %9356 = vrot.lane.b32.xlu0 %v18979_v5, %s11916_s10 }
 0x649   : > { %v17761_v41 = vpop.permute.xlu1 %9414 }
 0x64b   : > { %9416 = vrot.lane.b32.xlu0 %v18980_v54, %s11916_s10 }
 0x64d   : > { %v17767_v25 = vpop.permute.xlu1 %9474 }
 0x64f   : > { %9476 = vrot.lane.b32.xlu0 %v18981_v56, %s11916_s10 }
 0x651   : > { %v17777_v14 = vpop.permute.xlu1 %9534 }
 0x653   : > { %9536 = vrot.lane.b32.xlu0 %v18982_v12, %s11916_s10 }
 0x655   : > { %v17787_v12 = vpop.permute.xlu1 %9295 }
 0x657   : > { %8358 = vrot.lane.b32.xlu0 %v18983_v9, %s11915_s27 }
 0x65b   : > { %8478 = vrot.lane.b32.xlu0 %v17455_v29, %s11915_s27  ;;  %v18987_v29 = vld [vmem:[#allocation75_spill] sm:$0xff] }
 0x65f   : > { %9418 = vrot.lane.b32.xlu0 %v18984_v2, %s11916_s10 }
 0x663   : > { %9538 = vrot.lane.b32.xlu0 %v17517_v23, %s11916_s10  ;;  %v18989_v23 = vld [vmem:[#allocation47_spill] sm:$0xff] }
 0x664   : > { %v1905_v7 = vadd.f32 %v18990_v8, %v18989_v23  ;;  %v19000_v23 = vld [vmem:[#allocation117_spill] sm:$0xff]  ;;  %v8320_v8 = vmul.f32 %v8301_v49, %v17636_v48 }
 0x666   : > { %v2968_v13 = vadd.f32 %v18991_v26, %v1905_v7 }
 0x667   : > { %8420 = vrot.lane.b32.xlu0 %v18985_v44, %s11915_s27  ;;  %v8319_v44 = vmul.f32 %v8299_v57, %v17631_v35 }
 0x668   : > { %v4031_v51 = vadd.f32 %v18993_v58, %v2968_v13  ;;  %v17800_v58 = vpop.permute.xlu1 %8418 }
 0x66a   : > { %v5089_v11 = vadd.f32 %v18994_v43, %v4031_v51 }
 0x66b   : > { %9360 = vrot.lane.b32.xlu0 %v18986_v39, %s11916_s10 }
 0x66c   : > { %v6151_v18 = vadd.f32 %v18995_v61, %v5089_v11 }
 0x66e   : > { %v7213_v17 = vadd.f32 %v18997_v34, %v6151_v18  ;;  %v8331_v18 = vsel %vm8251_vm10, %v8320_v8, 0.0 }
 0x66f   : > { %9480 = vrot.lane.b32.xlu0 %v18987_v29, %s11916_s10 }
 0x673   : > { %8362 = vrot.lane.b32.xlu0 %v18988_v20, %s11915_s27 }
 0x677   : > { %8482 = vrot.lane.b32.xlu0 %v17463_v24, %s11915_s27  ;;  %v8293_v24 = vpop.permute.xlu0 %8292 }
 0x678   : > { %v8316_v27 = vmul.f32 %v8293_v24, %v17613_v3 }
 0x67a   : > { %v8324_v56 = vsel %vm8251_vm10, %v8316_v27, 0.0 }
 0x67b   : > { %9422 = vrot.lane.b32.xlu0 %v18992_v42, %s11916_s10  ;;  %v8326_v9 = vadd.f32 %v8325_v63, %v8324_v56  ;;  %v8329_v42 = vsel %vm8251_vm10, %v8319_v44, 0.0  ;;  %v8322_v63 = vmul.f32 %v17709_v37, %v17651_v46 }
 0x67f   : > { %9542 = vrot.lane.b32.xlu0 %v17609_v55, %s11916_s10  ;;  %v18998_v55 = vld [vmem:[#allocation93_spill] sm:$0xff] }
 0x683   : > { %8424 = vrot.lane.b32.xlu0 %v18996_v4, %s11915_s27 }
 0x685   : > { %v8269_v1 = vpop.permute.xlu0 %8268 }
 0x686   : > { %v17779_v28 = vadd.f32 %v8269_v1, %v7213_v17 }
 0x687   : > { %9364 = vrot.lane.b32.xlu0 %v18998_v55, %s11916_s10 }
 0x689   : > { %v8297_v5 = vpop.permute.xlu0 %8296 }
 0x68a   : > { %v8318_v54 = vmul.f32 %v8297_v5, %v17629_v31 }
 0x68b   : > { %9484 = vrot.lane.b32.xlu0 %v18999_v15, %s11916_s10 }
 0x68c   : > { %v8327_v2 = vsel %vm8251_vm10, %v8318_v54, 0.0  ;;  %v17813_v54 = vpop.permute.xlu1 %9358 }
 0x68d   : > { %v8530_v39 = vpop.permute.xlu0 %8529  ;;  %v8328_v29 = vadd.f32 %v8327_v2, %v8326_v9  ;;  %v19001_v9 = vld [vmem:[#allocation124_spill] sm:$0xff] }
 0x68e   : > { %v8532_v20 = vmul.f32 %v8530_v39, %v17481_v16 }
 0x68f   : > { %8366 = vrot.lane.b32.xlu0 %v19000_v23, %s11915_s27  ;;  %v8330_v43 = vadd.f32 %v8329_v42, %v8328_v29  ;;  %v8335_v23 = vsel %vm8251_vm10, %v8322_v63, 0.0 }
 0x690   : > { %v9184_v7 = vcombine.high %v8532_v20, %v8532_v20  ;;  %v9191_v26 = vrot.slane %v8532_v20, %v18955_v30  ;;  %v9334_v13 = vsel %vm9313_vm11, %v8532_v20, 0.0 }
 0x691   : > { %v9335_v57 = vrot.slane %v9334_v13, 4  ;;  %v8303_v51 = vpop.permute.xlu0 %8302  ;;  %v8332_v5 = vadd.f32 %v8331_v18, %v8330_v43  ;;  %v17835_v43 = vpop.permute.xlu1 %9478 }
 0x692   : > { %v9198_v11 = vrot.slane %v9184_v7, %v18955_v30  ;;  %v9207_v16 = vrot.slane %v9191_v26, %v18955_v30  ;;  %v8321_v24 = vmul.f32 %v8303_v51, %v17645_v50  ;;  %v9199_v49 = vcombine.high %v9191_v26, %v9191_v26 }
 0x693   : > { %v9336_v61 = vadd.f32 %v9335_v57, %v9334_v13  ;;  %8486 = vrot.lane.b32.xlu0 %v17531_v52, %s11915_s27 }
 0x694   : > { %v9200_v4 = vcombine.high %v9198_v11, %v9198_v11  ;;  %v9229_v34 = vcombine.high %v9207_v16, %v9207_v16  ;;  %v9236_v17 = vrot.slane %v9207_v16, %v18959_v19  ;;  %v8333_v1 = vsel %vm8251_vm10, %v8321_v24, 0.0 }
 0x695   : > { %v9337_v36 = vrot.slane %v9336_v61, 2  ;;  %v8307_v27 = vpop.permute.xlu0 %8306  ;;  %v9221_v55 = vrot.slane %v9199_v49, %v18955_v30  ;;  %v9214_v52 = vrot.slane %v9198_v11, %v18955_v30  ;;  %v8334_v2 = vadd.f32 %v8333_v1, %v8332_v5 }
 0x696   : > { %v9244_v56 = vrot.slane %v9229_v34, %v18959_v19  ;;  %v9228_v44 = vrot.slane %v9200_v4, %v18955_v30  ;;  %v17821_v39 = vmul.f32 %v17713_v60, %v9236_v17  ;;  %v8323_v29 = vmul.f32 %v8307_v27, %v17660_v32  ;;  %v19002_v17 = vld [vmem:[#allocation67_spill] sm:$0xff] }
 0x697   : > { %v9338_v15 = vadd.f32 %v9337_v36, %v9336_v61  ;;  %9426 = vrot.lane.b32.xlu0 %v19001_v9, %s11916_s10  ;;  %v9240_v37 = vrot.slane %v9221_v55, %v18959_v19  ;;  %v9231_v7 = vcombine.high %v9221_v55, %v9221_v55  ;;  %v9230_v26 = vcombine.high %v9214_v52, %v9214_v52 }
 0x698   : > { %v9252_v13 = vrot.slane %v9214_v52, %v18959_v19  ;;  %v17828_v42 = vmul.f32 %v17719_v38, %v9244_v56  ;;  %v8336_v30 = vadd.f32 %v8335_v23, %v8334_v2  ;;  %v9232_v11 = vcombine.high %v9228_v44, %v9228_v44 }
 0x699   : > { %v9284_v20 = vpop.permute.xlu0 %9283  ;;  %v9339_v8 = vrot.slane %v9338_v15, 1  ;;  %v9248_v51 = vrot.slane %v9231_v7, %v18959_v19  ;;  %v8337_v16 = vsel %vm8251_vm10, %v8323_v29, 0.0  ;;  %v9314_v24 = vsel %vm9313_vm11, %v17821_v39, 0.0 }
 0x69a   : > { %v17830_v57 = vmul.f32 %v9284_v20, %v9240_v37  ;;  %v9260_v18 = vrot.slane %v9230_v26, %v18959_v19  ;;  %v17847_v4 = vmul.f32 %v17723_v21, %v9252_v13  ;;  %v9317_v34 = vsel %vm9313_vm11, %v17828_v42, 0.0  ;;  %v17860_v21 = vpop.permute.xlu1 %8360 }
 0x69b   : > { %9546 = vrot.lane.b32.xlu0 %v17683_v40, %s11916_s10  ;;  %v9340_v60 = vadd.f32 %v9339_v8, %v9338_v15  ;;  %v8338_v36 = vadd.f32 %v8337_v16, %v8336_v30  ;;  %v9256_v55 = vrot.slane %v9228_v44, %v18959_v19  ;;  %v9264_v63 = vrot.slane %v9232_v11, %v18959_v19 }
 0x69c   : > { %v9315_v38 = vsel %vm9313_vm11, %v17830_v57, 0.0  ;;  %v17863_v15 = vmul.f32 %v17743_v22, %v9260_v18  ;;  %v9321_v9 = vsel %vm9313_vm11, %v17847_v4, 0.0  ;;  %v8376_v2 = vmul.f32 %v17729_v33, %v17613_v3 }
 0x69d   : > { %v9288_v61 = vpop.permute.xlu0 %9287  ;;  %v9316_v49 = vadd.f32 %v9315_v38, %v9314_v24  ;;  %9342 = vrot.lane.b32.xlu1 %v9340_v60, %s11908_s5  ;;  %v17874_v37 = vmul.f32 %v17787_v12, %v9264_v63  ;;  %v8436_v7 = vmul.f32 %v17733_v59, %v17613_v3  ;;  %v8496_v59 = vmul.f32 %v17739_v62, %v17613_v3 }
 0x69e   : > { %v17843_v40 = vmul.f32 %v9288_v61, %v9248_v51  ;;  %v8384_v8 = vsel %vm8251_vm10, %v8376_v2, 0.0  ;;  %v17883_v13 = vpop.permute.xlu1 %8480  ;;  %v8438_v51 = vmul.f32 %v17749_v0, %v17629_v31  ;;  %v9378_v2 = vmul.f32 %v17753_v10, %v17821_v39 }
 0x69f   : > { %9428 = vrot.lane.b32.xlu0 %v19002_v17, %s11916_s10  ;;  %v9318_v1 = vadd.f32 %v9317_v34, %v9316_v49  ;;  %v9327_v60 = vsel %vm9313_vm11, %v17874_v37, 0.0  ;;  %v8444_v24 = vsel %vm8251_vm10, %v8436_v7, 0.0 }
 0x6a0   : > { %v9319_v27 = vsel %vm9313_vm11, %v17843_v40, 0.0  ;;  %v8447_v18 = vsel %vm8251_vm10, %v8438_v51, 0.0 }
 0x6a1   : > { %v9292_v5 = vpop.permute.xlu0 %9291  ;;  %v9320_v52 = vadd.f32 %v9319_v27, %v9318_v1  ;;  %8340 = vrot.lane.b32.xlu1 %v8338_v36, %s11906_s29  ;;  %v8504_v36 = vsel %vm8251_vm10, %v8496_v59, 0.0 }
 0x6a2   : > { %v17857_v56 = vmul.f32 %v9292_v5, %v9256_v55  ;;  %v17897_v17 = vpop.permute.xlu1 %9420 }
 0x6a3   : > { %9548 = vrot.lane.b32.xlu0 %v17677_v45, %s11916_s10  ;;  %v9322_v44 = vadd.f32 %v9321_v9, %v9320_v52  ;;  %v9325_v45 = vsel %vm9313_vm11, %v17863_v15, 0.0 }
 0x6a4   : > { %v9323_v29 = vsel %vm9313_vm11, %v17857_v56, 0.0 }
 0x6a5   : > { %v8355_v20 = vpop.permute.xlu0 %8354  ;;  %v9324_v23 = vadd.f32 %v9323_v29, %v9322_v44 }
 0x6a6   : > { %v8377_v22 = vmul.f32 %v8355_v20, %v17604_v47  ;;  %v17905_v63 = vpop.permute.xlu1 %9540 }
 0x6a7   : > { %v9326_v26 = vadd.f32 %v9325_v45, %v9324_v23  ;;  %v9386_v45 = vsel %vm9313_vm11, %v9378_v2, 0.0 }
 0x6a8   : > { %v8385_v33 = vsel %vm8251_vm10, %v8377_v22, 0.0  ;;  %v9380_v22 = vmul.f32 %v17813_v54, %v17828_v42 }
 0x6a9   : > { %v8386_v30 = vadd.f32 %v8385_v33, %v8384_v8  ;;  %v8415_v12 = vpop.permute.xlu0 %8414  ;;  %v9328_v16 = vadd.f32 %v9327_v60, %v9326_v26  ;;  %v9498_v60 = vmul.f32 %v17767_v25, %v17821_v39 }
 0x6aa   : > { %v8437_v11 = vmul.f32 %v8415_v12, %v17604_v47  ;;  %v8423_v23 = vpop.permute.xlu1 %8422  ;;  %v9389_v26 = vsel %vm9313_vm11, %v9380_v22, 0.0 }
 0x6ab   : > { %9330 = vrot.lane.b32.xlu0 %v9328_v16, %s11908_s5  ;;  %v9506_v59 = vsel %vm9313_vm11, %v9498_v60, 0.0 }
 0x6ac   : > { %v8445_v38 = vsel %vm8251_vm10, %v8437_v11, 0.0 }
 0x6ad   : > { %v8446_v61 = vadd.f32 %v8445_v38, %v8444_v24  ;;  %v8475_v49 = vpop.permute.xlu0 %8474  ;;  %v9500_v24 = vmul.f32 %v17835_v43, %v17828_v42 }
 0x6ae   : > { %v8497_v34 = vmul.f32 %v8475_v49, %v17604_v47  ;;  %v17930_v51 = vpop.permute.xlu1 %9362 }
 0x6af   : > { %v17899_v0 = vadd.f32 %v8447_v18, %v8446_v61  ;;  %v9558_v61 = vmul.f32 %v17777_v14, %v17821_v39 }
 0x6b0   : > { %v8505_v1 = vsel %vm8251_vm10, %v8497_v34, 0.0  ;;  %v9509_v34 = vsel %vm9313_vm11, %v9500_v24, 0.0  ;;  %v8439_v24 = vmul.f32 %v17800_v58, %v17631_v35 }
 0x6b1   : > { %v8506_v27 = vadd.f32 %v8505_v1, %v8504_v36  ;;  %v8357_v3 = vpop.permute.xlu0 %8356 }
 0x6b2   : > { %v8378_v62 = vmul.f32 %v8357_v3, %v17629_v31  ;;  %v17941_v36 = vpop.permute.xlu1 %9482 }
 0x6b4   : > { %v8387_v55 = vsel %vm8251_vm10, %v8378_v62, 0.0 }
 0x6b5   : > { %v17907_v5 = vadd.f32 %v8387_v55, %v8386_v30  ;;  %v8477_v52 = vpop.permute.xlu0 %8476 }
 0x6b6   : > { %v8498_v47 = vmul.f32 %v8477_v52, %v17629_v31  ;;  %v9438_v31 = vmul.f32 %v17761_v41, %v17821_v39  ;;  %v17947_v55 = vpop.permute.xlu1 %8364 }
 0x6b8   : > { %v8507_v9 = vsel %vm8251_vm10, %v8498_v47, 0.0  ;;  %v9446_v12 = vsel %vm9313_vm11, %v9438_v31, 0.0 }
 0x6b9   : > { %v17913_v44 = vadd.f32 %v8507_v9, %v8506_v27  ;;  %v9357_v29 = vpop.permute.xlu0 %9356  ;;  %v9566_v27 = vsel %vm9313_vm11, %v9558_v61, 0.0 }
 0x6ba   : > { %v9379_v20 = vmul.f32 %v9357_v29, %v17830_v57  ;;  %v17950_v47 = vpop.permute.xlu1 %8484 }
 0x6bc   : > { %v9387_v8 = vsel %vm9313_vm11, %v9379_v20, 0.0 }
 0x6bd   : > { %v9388_v7 = vadd.f32 %v9387_v8, %v9386_v45  ;;  %v9417_v33 = vpop.permute.xlu0 %9416 }
 0x6be   : > { %v9439_v10 = vmul.f32 %v9417_v33, %v17830_v57  ;;  %v17957_v22 = vpop.permute.xlu1 %9424  ;;  %v19003_v33 = vld [vmem:[#allocation41_spill] sm:$0xff] }
 0x6bf   : > { %v17924_v30 = vadd.f32 %v9389_v26, %v9388_v7 }
 0x6c0   : > { %v9447_v54 = vsel %vm9313_vm11, %v9439_v10, 0.0  ;;  %v996_v10 = vsel %vm729_vm7, %v19003_v33, 0.0  ;;  %v9382_v33 = vmul.f32 %v17930_v51, %v17847_v4 }
 0x6c1   : > { %v9448_v11 = vadd.f32 %v9447_v54, %v9446_v12  ;;  %v9477_v16 = vpop.permute.xlu0 %9476  ;;  %v997_v12 = vrot.slane %v996_v10, 4 }
 0x6c2   : > { %v9499_v41 = vmul.f32 %v9477_v16, %v17830_v57  ;;  %v17961_v7 = vpop.permute.xlu1 %9544 }
 0x6c4   : > { %v9507_v38 = vsel %vm9313_vm11, %v9499_v41, 0.0 }
 0x6c5   : > { %v9508_v49 = vadd.f32 %v9507_v38, %v9506_v59  ;;  %v9537_v18 = vpop.permute.xlu0 %9536 }
 0x6c6   : > { %v9559_v25 = vmul.f32 %v9537_v18, %v17830_v57  ;;  %v8427_v54 = vpop.permute.xlu1 %8426 }
 0x6c7   : > { %v17943_v1 = vadd.f32 %v9509_v34, %v9508_v49  ;;  %v8449_v49 = vsel %vm8251_vm10, %v8439_v24, 0.0  ;;  %v8441_v34 = vmul.f32 %v8423_v23, %v17645_v50  ;;  %v8443_v23 = vmul.f32 %v8427_v54, %v17660_v32 }
 0x6c8   : > { %v9567_v43 = vsel %vm9313_vm11, %v9559_v25, 0.0 }
 0x6c9   : > { %v9568_v3 = vadd.f32 %v9567_v43, %v9566_v27  ;;  %v8359_v62 = vpop.permute.xlu0 %8358  ;;  %v8450_v43 = vadd.f32 %v8449_v49, %v17899_v0 }
 0x6ca   : > { %v9367_v41 = vpop.permute.xlu1 %9366  ;;  %v8379_v58 = vmul.f32 %v8359_v62, %v17631_v35 }
 0x6cc   : > { %v8389_v0 = vsel %vm8251_vm10, %v8379_v58, 0.0 }
 0x6cd   : > { %v8479_v52 = vpop.permute.xlu0 %8478 }
 0x6ce   : > { %v9487_v27 = vpop.permute.xlu1 %9486 }
 0x6d1   : > { %v9419_v14 = vpop.permute.xlu0 %9418 }
 0x6d2   : > { %v9440_v39 = vmul.f32 %v9419_v14, %v17828_v42 }
 0x6d4   : > { %v9449_v57 = vsel %vm9313_vm11, %v9440_v39, 0.0 }
 0x6d5   : > { %v17953_v9 = vadd.f32 %v9449_v57, %v9448_v11  ;;  %v9539_v2 = vpop.permute.xlu0 %9538  ;;  %v998_v11 = vadd.f32 %v997_v12, %v996_v10  ;;  %v8380_v57 = vmul.f32 %v17860_v21, %v17636_v48  ;;  %v9369_v21 = vpop.permute.xlu1 %9368 }
 0x6d6   : > { %v9560_v29 = vmul.f32 %v9539_v2, %v17828_v42 }
 0x6d7   : > { %v999_v42 = vrot.slane %v998_v11, 2 }
 0x6d8   : > { %v9569_v20 = vsel %vm9313_vm11, %v9560_v29, 0.0 }
 0x6d9   : > { %v17959_v45 = vadd.f32 %v9569_v20, %v9568_v3  ;;  %v8421_v8 = vpop.permute.xlu0 %8420  ;;  %v1000_v61 = vadd.f32 %v999_v42, %v998_v11  ;;  %v8453_v20 = vsel %vm8251_vm10, %v8441_v34, 0.0 }
 0x6da   : > { %v8440_v59 = vmul.f32 %v8421_v8, %v17636_v48 }
 0x6db   : > { %v1001_v14 = vrot.slane %v1000_v61, 1 }
 0x6dc   : > { %v8451_v18 = vsel %vm8251_vm10, %v8440_v59, 0.0  ;;  %v8390_v59 = vadd.f32 %v8389_v0, %v17907_v5  ;;  %v9385_v5 = vmul.f32 %v9369_v21, %v17874_v37  ;;  %v19004_v21 = vld [vmem:[#allocation12_spill] sm:$0xff] }
 0x6dd   : > { %v9361_v31 = vpop.permute.xlu0 %9360  ;;  %v8452_v39 = vadd.f32 %v8451_v18, %v8450_v43  ;;  %v1002_v10 = vadd.f32 %v1001_v14, %v1000_v61  ;;  %v9393_v18 = vsel %vm9313_vm11, %v9382_v33, 0.0 }
 0x6de   : > { %v9381_v25 = vmul.f32 %v9361_v31, %v17843_v40  ;;  %v8499_v31 = vmul.f32 %v8479_v52, %v17631_v35  ;;  %v8457_v35 = vsel %vm8251_vm10, %v8443_v23, 0.0  ;;  %v9384_v52 = vmul.f32 %v9367_v41, %v17863_v15 }
 0x6df   : > { %v8454_v11 = vadd.f32 %v8453_v20, %v8452_v39  ;;  %v9504_v20 = vmul.f32 %v9487_v27, %v17863_v15 }
 0x6e0   : > { %v9391_v2 = vsel %vm9313_vm11, %v9381_v25, 0.0  ;;  %v8509_v49 = vsel %vm8251_vm10, %v8499_v31, 0.0  ;;  %v9502_v25 = vmul.f32 %v17941_v36, %v17847_v4 }
 0x6e1   : > { %v9481_v26 = vpop.permute.xlu0 %9480  ;;  %v9392_v12 = vadd.f32 %v9391_v2, %v17924_v30  ;;  %v9489_v2 = vpop.permute.xlu1 %9488  ;;  %v8510_v36 = vadd.f32 %v8509_v49, %v17913_v44  ;;  %v9399_v44 = vsel %vm9313_vm11, %v9385_v5, 0.0 }
 0x6e2   : > { %v9501_v29 = vmul.f32 %v9481_v26, %v17843_v40  ;;  %v8391_v26 = vsel %vm8251_vm10, %v8380_v57, 0.0  ;;  %v8382_v57 = vmul.f32 %v17947_v55, %v17651_v46  ;;  %v9505_v31 = vmul.f32 %v9489_v2, %v17874_v37 }
 0x6e3   : > { %v9394_v41 = vadd.f32 %v9393_v18, %v9392_v12  ;;  %v1917_v12 = vadd.f32 %v19004_v21, %v1002_v10 }
 0x6e4   : > { %v9511_v42 = vsel %vm9313_vm11, %v9501_v29, 0.0  ;;  %v8392_v29 = vadd.f32 %v8391_v26, %v8390_v59  ;;  %v19005_v59 = vld [vmem:[#allocation61_spill] sm:$0xff]  ;;  %v9519_v10 = vsel %vm9313_vm11, %v9505_v31, 0.0 }
 0x6e5   : > { %v8363_v60 = vpop.permute.xlu0 %8362  ;;  %v9512_v34 = vadd.f32 %v9511_v42, %v17943_v1  ;;  %v9397_v1 = vsel %vm9313_vm11, %v9384_v52, 0.0 }
 0x6e6   : > { %v8381_v54 = vmul.f32 %v8363_v60, %v17645_v50  ;;  %v8500_v60 = vmul.f32 %v17883_v13, %v17636_v48 }
 0x6e8   : > { %v8393_v58 = vsel %vm8251_vm10, %v8381_v54, 0.0  ;;  %v8395_v54 = vsel %vm8251_vm10, %v8382_v57, 0.0  ;;  %v19007_v57 = vld [vmem:[#allocation39_spill] sm:$0xff] }
 0x6e9   : > { %v8483_v16 = vpop.permute.xlu0 %8482 }
 0x6ea   : > { %v8501_v14 = vmul.f32 %v8483_v16, %v17645_v50  ;;  %v9513_v50 = vsel %vm9313_vm11, %v9502_v25, 0.0  ;;  %v8511_v16 = vsel %vm8251_vm10, %v8500_v60, 0.0  ;;  %v19006_v25 = vld [vmem:[#allocation63_spill] sm:$0xff] }
 0x6eb   : > { %v9514_v0 = vadd.f32 %v9513_v50, %v9512_v34  ;;  %v8512_v27 = vadd.f32 %v8511_v16, %v8510_v36  ;;  %v19009_v16 = vld [vmem:[#allocation29_spill] sm:$0xff] }
 0x6ed   : > { %v17968_v38 = vpop.permute.xlu0 %9422 }
 0x6ee   : > { %v9442_v5 = vmul.f32 %v17968_v38, %v17847_v4  ;;  %v9561_v38 = vmul.f32 %v17905_v63, %v17843_v40 }
 0x6f1   : > { %v17975_v3 = vpop.permute.xlu0 %9542 }
 0x6f5   : > { %v8425_v8 = vpop.permute.xlu0 %8424 }
 0x6f6   : > { %v8442_v62 = vmul.f32 %v8425_v8, %v17651_v46  ;;  %v8394_v8 = vadd.f32 %v8393_v58, %v8392_v29 }
 0x6f8   : > { %v8455_v24 = vsel %vm8251_vm10, %v8442_v62, 0.0  ;;  %v8513_v62 = vsel %vm8251_vm10, %v8501_v14, 0.0 }
 0x6f9   : > { %v8456_v51 = vadd.f32 %v8455_v24, %v8454_v11  ;;  %v9365_v61 = vpop.permute.xlu0 %9364  ;;  %v8502_v24 = vmul.f32 %v17950_v47, %v17651_v46 }
 0x6fa   : > { %v9383_v30 = vmul.f32 %v9365_v61, %v17857_v56  ;;  %v8514_v61 = vadd.f32 %v8513_v62, %v8512_v27 }
 0x6fb   : > { %v8458_v43 = vadd.f32 %v8457_v35, %v8456_v51  ;;  %v9517_v35 = vsel %vm9313_vm11, %v9504_v20, 0.0  ;;  %v2980_v51 = vadd.f32 %v19005_v59, %v1917_v12  ;;  %v8515_v47 = vsel %vm8251_vm10, %v8502_v24, 0.0 }
 0x6fc   : > { %v9395_v39 = vsel %vm9313_vm11, %v9383_v30, 0.0  ;;  %v8396_v30 = vadd.f32 %v8395_v54, %v8394_v8  ;;  %v8516_v14 = vadd.f32 %v8515_v47, %v8514_v61 }
 0x6fd   : > { %v9396_v48 = vadd.f32 %v9395_v39, %v9394_v41  ;;  %v9485_v13 = vpop.permute.xlu0 %9484  ;;  %8460 = vrot.lane.b32.xlu1 %v8458_v43, %s11906_s29  ;;  %v4043_v60 = vadd.f32 %v19006_v25, %v2980_v51  ;;  %v9441_v41 = vmul.f32 %v17897_v17, %v17843_v40  ;;  %v9453_v17 = vsel %vm9313_vm11, %v9442_v5, 0.0 }
 0x6fe   : > { %v9503_v23 = vmul.f32 %v9485_v13, %v17857_v56  ;;  %v19008_v13 = vld [vmem:[#allocation76_spill] sm:$0xff]  ;;  %v9571_v40 = vsel %vm9313_vm11, %v9561_v38, 0.0  ;;  %v19021_v38 = vld [vmem:[#allocation97_spill] sm:$0xff] }
 0x6ff   : > { %v9398_v55 = vadd.f32 %v9397_v1, %v9396_v48  ;;  %v5101_v2 = vadd.f32 %v19007_v57, %v4043_v60  ;;  %v9451_v48 = vsel %vm9313_vm11, %v9441_v41, 0.0  ;;  %v19013_v60 = vld [vmem:[#allocation44_spill] sm:$0xff] }
 0x700   : > { %v9515_v33 = vsel %vm9313_vm11, %v9503_v23, 0.0  ;;  %v9452_v20 = vadd.f32 %v9451_v48, %v17953_v9  ;;  %v9443_v23 = vmul.f32 %v17957_v22, %v17857_v56  ;;  %v9563_v22 = vmul.f32 %v17961_v7, %v17857_v56  ;;  %v19020_v48 = vld [vmem:[#allocation25_spill] sm:$0xff] }
 0x701   : > { %v9516_v11 = vadd.f32 %v9515_v33, %v9514_v0  ;;  %v8367_v26 = vpop.permute.xlu0 %8366  ;;  %v9400_v42 = vadd.f32 %v9399_v44, %v9398_v55  ;;  %v6163_v1 = vadd.f32 %v19008_v13, %v5101_v2  ;;  %v19019_v2 = vld [vmem:[#allocation132_spill] sm:$0xff]  ;;  %v19022_v13 = vld [vmem:[#allocation10_spill] sm:$0xff] }
 0x702   : > { %v8383_v52 = vmul.f32 %v8367_v26, %v17660_v32  ;;  %v9454_v55 = vadd.f32 %v9453_v17, %v9452_v20  ;;  %v9455_v9 = vsel %vm9313_vm11, %v9443_v23, 0.0  ;;  %v9575_v26 = vsel %vm9313_vm11, %v9563_v22, 0.0 }
 0x703   : > { %v9518_v49 = vadd.f32 %v9517_v35, %v9516_v11  ;;  %9402 = vrot.lane.b32.xlu1 %v9400_v42, %s11908_s5  ;;  %v7225_v8 = vadd.f32 %v19009_v16, %v6163_v1 }
 0x704   : > { %v8397_v18 = vsel %vm8251_vm10, %v8383_v52, 0.0  ;;  %v9456_v21 = vadd.f32 %v9455_v9, %v9454_v55  ;;  %v19025_v9 = vld [vmem:[#allocation9_spill] sm:$0xff] }
 0x705   : > { %v8398_v34 = vadd.f32 %v8397_v18, %v8396_v30  ;;  %v8487_v43 = vpop.permute.xlu0 %8486  ;;  %v9520_v46 = vadd.f32 %v9519_v10, %v9518_v49  ;;  %v19010_v49 = vld [vmem:[#allocation42_spill] sm:$0xff]  ;;  %v19011_v30 = vld [vmem:[#allocation57_spill] sm:$0xff] }
 0x706   : > { %v8503_v58 = vmul.f32 %v8487_v43, %v17660_v32  ;;  %v9562_v32 = vmul.f32 %v17975_v3, %v17847_v4  ;;  %v8283_v4 = vadd.f32 %v17689_v53, %v7225_v8  ;;  %v9572_v3 = vadd.f32 %v9571_v40, %v17959_v45  ;;  %v19012_v18 = vld [vmem:[#allocation78_spill] sm:$0xff] }
 0x707   : > { %8400 = vrot.lane.b32.xlu0 %v8398_v34, %s11906_s29  ;;  %9522 = vrot.lane.b32.xlu1 %v9520_v46, %s11908_s5  ;;  %v1977_v10 = vadd.f32 %v19011_v30, %v19010_v49  ;;  %v19014_v34 = vld [vmem:[#allocation105_spill] sm:$0xff]  ;;  %v19015_v46 = vld [vmem:[#allocation90_spill] sm:$0xff] }
 0x708   : > { %v8517_v39 = vsel %vm8251_vm10, %v8503_v58, 0.0  ;;  %v9573_v63 = vsel %vm9313_vm11, %v9562_v32, 0.0  ;;  %v2097_v43 = vadd.f32 %v19014_v34, %v19013_v60  ;;  %v19017_v58 = vld [vmem:[#allocation8_spill] sm:$0xff] }
 0x709   : > { %v8518_v36 = vadd.f32 %v8517_v39, %v8516_v14  ;;  %v9427_v29 = vpop.permute.xlu0 %9426  ;;  %v9574_v33 = vadd.f32 %v9573_v63, %v9572_v3  ;;  %v3040_v25 = vadd.f32 %v19012_v18, %v1977_v10  ;;  %v19018_v39 = vld [vmem:[#allocation143_spill] sm:$0xff]  ;;  %v19024_v3 = vld [vmem:[#allocation45_spill] sm:$0xff] }
 0x70a   : > { %v9444_v50 = vmul.f32 %v9427_v29, %v17863_v15 }
 0x70b   : > { %8520 = vrot.lane.b32.xlu0 %v8518_v36, %s11906_s29  ;;  %v9576_v56 = vadd.f32 %v9575_v26, %v9574_v33  ;;  %v4103_v47 = vadd.f32 %v19015_v46, %v3040_v25 }
 0x70c   : > { %v9457_v44 = vsel %vm9313_vm11, %v9444_v50, 0.0  ;;  %v19023_v50 = vld [vmem:[#allocation4_spill] sm:$0xff] }
 0x70d   : > { %v9547_v0 = vpop.permute.xlu0 %9546  ;;  %v9458_v53 = vadd.f32 %v9457_v44, %v9456_v21  ;;  %v5161_v57 = vadd.f32 %v19018_v39, %v4103_v47  ;;  %v2037_v44 = vadd.f32 %v19025_v9, %v19024_v3  ;;  %v19027_v21 = vld [vmem:[#allocation6_spill] sm:$0xff] }
 0x70e   : > { %v9564_v31 = vmul.f32 %v9547_v0, %v17863_v15 }
 0x70f   : > { %v9343_v62 = vpop.permute.xlu1 %9342  ;;  %v6223_v36 = vadd.f32 %v19019_v2, %v5161_v57 }
 0x710   : > { %v9345_v12 = vadd.f32 %v9343_v62, %v8283_v4  ;;  %v9577_v42 = vsel %vm9313_vm11, %v9564_v31, 0.0  ;;  %v19026_v31 = vld [vmem:[#allocation128_spill] sm:$0xff] }
 0x711   : > { %v9429_v27 = vpop.permute.xlu0 %9428  ;;  %v9578_v35 = vadd.f32 %v9577_v42, %v9576_v56  ;;  %v7285_v32 = vadd.f32 %v19021_v38, %v6223_v36  ;;  %v3100_v62 = vadd.f32 %v19026_v31, %v2037_v44  ;;  %v19030_v42 = vld [vmem:[#allocation142_spill] sm:$0xff] }
 0x712   : > { %v9445_v11 = vmul.f32 %v9429_v27, %v17874_v37  ;;  %v9589_v45 = vrot.slane %v9345_v12, %v18959_v19  ;;  %v19028_v27 = vld [vmem:[#allocation26_spill] sm:$0xff] }
 0x713   : > { %v8341_v5 = vpop.permute.xlu1 %8340  ;;  %v4163_v12 = vadd.f32 %v19027_v21, %v3100_v62 }
 0x714   : > { %v9459_v54 = vsel %vm9313_vm11, %v9445_v11, 0.0  ;;  %11875 = vrcp.f32 %v9589_v45  ;;  %v8343_v20 = vadd.f32 %v8341_v5, %v7285_v32 }
 0x715   : > { %v9460_v15 = vadd.f32 %v9459_v54, %v9458_v53  ;;  %v9549_v7 = vpop.permute.xlu0 %9548  ;;  %v5221_v11 = vadd.f32 %v19028_v27, %v4163_v12  ;;  %v19029_v53 = vld [vmem:[#allocation82_spill] sm:$0xff] }
 0x716   : > { %v9565_v24 = vmul.f32 %v9549_v7, %v17874_v37 }
 0x717   : > { %9462 = vrot.lane.b32.xlu0 %v9460_v15, %s11908_s5  ;;  %v6283_v45 = vadd.f32 %v19029_v53, %v5221_v11 }
 0x718   : > { %v9579_v52 = vsel %vm9313_vm11, %v9565_v24, 0.0 }
 0x719   : > { %v9580_v59 = vadd.f32 %v9579_v52, %v9578_v35  ;;  %v7345_v54 = vadd.f32 %v19030_v42, %v6283_v45 }
 0x71b   : > { %9582 = vrot.lane.b32.xlu0 %v9580_v59, %s11908_s5 }
 0x71d   : > { %v9331_v19 = vpop.permute.xlu0 %9330 }
 0x71e   : > { %v11876_v51 = vpop.eup %11875  ;;  %v9333_v61 = vadd.f32 %v9331_v19, %v17779_v28  ;;  %v19016_v28 = vld [vmem:[#allocation14_spill] sm:$0xff] }
 0x71f   : > { %v3160_v41 = vadd.f32 %v19016_v28, %v2097_v43 }
 0x720   : > { %v9591_v37 = vmul.f32 %v11876_v51, %v9333_v61  ;;  %11877 = vrcp.f32 %v9333_v61 }
 0x721   : > { %v4223_v14 = vadd.f32 %v19017_v58, %v3160_v41 }
 0x722   : > { %9592 = vst.msk [vmem:[%s18079_s23] sm:$0xff] %vm729_vm7, %v9591_v37 }
 0x723   : > { %v5281_v17 = vadd.f32 %v19020_v48, %v4223_v14 }
 0x725   : > { %v6343_v1 = vadd.f32 %v19022_v13, %v5281_v17 }
 0x727   : > { %v7405_v16 = vadd.f32 %v19023_v50, %v6343_v1 }
 0x72a   : > { %v11878_v55 = vpop.eup %11877 }
 0x76f   : > { %v8461_v29 = vpop.permute.xlu1 %8460 }
 0x770   : > { %v8463_v0 = vadd.f32 %v8461_v29, %v7405_v16 }
 0x775   : > { %v9403_v23 = vpop.permute.xlu1 %9402 }
 0x776   : > { %v9405_v8 = vadd.f32 %v9403_v23, %v8343_v20 }
 0x778   : > { %v9595_v40 = vmul.f32 %v11878_v55, %v9405_v8 }
 0x779   : > { %v9523_v63 = vpop.permute.xlu1 %9522  ;;  %v8401_v33 = vpop.permute.xlu0 %8400 }
 0x77a   : > { %9596 = vst.msk [vmem:[%s18079_s23 + $0x8] sm:$0xff] %vm729_vm7, %v9595_v40  ;;  %v9525_v4 = vadd.f32 %v9523_v63, %v8463_v0  ;;  %v8403_v56 = vadd.f32 %v8401_v33, %v7345_v54 }
 0x77c   : > { %v9599_v22 = vmul.f32 %v11878_v55, %v9525_v4 }
 0x77d   : > { %v8521_v26 = vpop.permute.xlu0 %8520 }
 0x77e   : > { %9600 = vst.msk [vmem:[%s18079_s23 + $0x18] sm:$0xff] %vm729_vm7, %v9599_v22  ;;  %v8523_v24 = vadd.f32 %v8521_v26, %v17587_v6 }
 0x789   : > { %v9463_v15 = vpop.permute.xlu0 %9462 }
 0x78a   : > { %v9465_v7 = vadd.f32 %v9463_v15, %v8403_v56 }
 0x78c   : > { %v9597_v35 = vmul.f32 %v11878_v55, %v9465_v7 }
 0x78d   : > { %v9583_v52 = vpop.permute.xlu0 %9582 }
 0x78e   : > { %9598 = vst.msk [vmem:[%s18079_s23 + $0x10] sm:$0xff] %vm729_vm7, %v9597_v35  ;;  %v9585_v59 = vadd.f32 %v9583_v52, %v8523_v24 }
 0x790   : > { %v9601_v19 = vmul.f32 %v11878_v55, %v9585_v59 }
 0x792   : > { %9602 = vst.msk [vmem:[%s18079_s23 + $0x20] sm:$0xff] %vm729_vm7, %v9601_v19 }
 0x793 PF: > { %s14_s15 = sadd.s32 1, %s11888_s15  }
 0x794   : > { %p11_p4 = scmp.ge.s32.totalorder %s14_s15, 4  }
 0x796   :  { %13 = sbr.rel (!%p11_p4) target bundleno = 1 (0x1), region = 77 }

</bundles_post_ra>
